<compile_context>
chip_gen: v6e
topology: v6e:2x2x1
jax: 0.10.0
libtpu: 0.0.40
codegen_flags: <defaults>
</compile_context>

<pallas_src>
import functools

import jax
import jax.numpy as jnp
from jax.experimental import pallas as pl
from jax.experimental.pallas import tpu as pltpu


def _round_up(x, m):
    return (x + m - 1) // m * m


def _pfn_kernel(x_ref, w_ref, scale_ref, shift_ref, out_ref, *, n_points,
                last_layer):
    # x_ref:     (TP*N, D)   flat pillar-point tile (io dtype)
    # w_ref:     (D, U)      linear weight, already transposed (io dtype)
    # scale_ref: (1, U)      folded BN scale = gamma / sqrt(var + eps)   (f32)
    # shift_ref: (1, U)      folded BN shift = beta - mean * scale       (f32)
    #                        (use_norm=False path: scale = 1, shift = bias)
    # out_ref:   (TP, N, 2U) or (TP, U) when last_layer
    x = x_ref[...]
    w = w_ref[...]
    u = w.shape[1]
    tp = x.shape[0] // n_points

    # Linear on the MXU with f32 accumulation (MXU utilization is irrelevant
    # here; the kernel is DMA bound).
    y = jnp.dot(x, w, preferred_element_type=jnp.float32)        # (TP*N, U) f32
    # Eval-mode BatchNorm folded into an affine, then ReLU, all in f32 on the
    # VPU (safe on v5e even with bf16 I/O).
    y = jnp.maximum(y * scale_ref[...] + shift_ref[...], 0.0)

    # torch.max(x, dim=1, keepdim=True)[0]
    y3 = y.reshape(tp, n_points, u)       # sublane regroup only (minor dim kept)
    y_max = jnp.max(y3, axis=1)           # (TP, U)

    if last_layer:
        out_ref[...] = y_max.astype(out_ref.dtype)
    else:
        rep = jnp.broadcast_to(y_max[:, None, :], (tp, n_points, u))
        # Single full-block store of the concatenation (no partial stores).
        out_ref[...] = jnp.concatenate([y3, rep], axis=-1).astype(out_ref.dtype)


def _pick_tile_p(n_points, d, u, in_itemsize, out_itemsize, last_layer,
                 max_tile_p=1024):
    """Largest pillar tile (multiple of 8) whose double-buffered in/out blocks
    plus f32 intermediates fit the per-generation VMEM budget."""
    try:
        vmem_cap = pltpu.get_tpu_info().vmem_capacity_bytes
    except Exception:
        vmem_cap = 64 * 1024 * 1024   # conservative fallback (v7x-sized)
    # Per-pillar VMEM bytes, lane-padded to 128 (this is what VMEM actually
    # holds; accounting with raw D=16 would under-count by 8x).
    in_bytes = n_points * _round_up(d, 128) * in_itemsize
    if last_layer:
        out_bytes = _round_up(u, 128) * out_itemsize
    else:
        out_bytes = n_points * _round_up(2 * u, 128) * out_itemsize
    interm_bytes = 3 * n_points * _round_up(u, 128) * 4       # y / y3 / concat (f32)
    per_pillar = 2 * in_bytes + 2 * out_bytes + interm_bytes  # x2 = double buffering
    budget = int(vmem_cap * 0.45)
    tile_p = max(8, min(max_tile_p, budget // per_pillar))
    tile_p = (tile_p // 8) * 8
    vmem_limit = int(vmem_cap * 0.8)
    return tile_p, vmem_limit


def pfn_layer(inputs, weight_t, scale, shift, *, last_layer=False,
              io_dtype=None, out_dtype=None, tile_p=None):
    """PFNLayer forward (eval-mode BN).

    inputs:   [P, N, D]  pillar points (N ideally a multiple of 8; pad if not)
    weight_t: [D, U]     linear weight transposed from torch's [U, D]
    scale:    [U]        folded BN scale (ones when use_norm=False)
    shift:    [U]        folded BN shift (linear bias when use_norm=False)
    Returns [P, N, 2U] (or [P, 1, U] when last_layer=True).
    """
    P, N, D = inputs.shape
    U = weight_t.shape[1]
    io_dtype = jnp.dtype(inputs.dtype if io_dtype is None else io_dtype)
    out_dtype = jnp.dtype(io_dtype if out_dtype is None else out_dtype)

    auto_tile_p, vmem_limit = _pick_tile_p(
        N, D, U, io_dtype.itemsize, out_dtype.itemsize, last_layer)
    if tile_p is None:
        tile_p = auto_tile_p
    tile_p = min(tile_p, _round_up(P, 8))
    tile_p = max(8, (tile_p // 8) * 8)
    P_pad = _round_up(P, tile_p)

    # Dense 2-D [P*N, D] presentation: contiguous HBM reads per tile and no
    # in-kernel reshape before the matmul.
    x = inputs.astype(io_dtype).reshape(P * N, D)
    if P_pad != P:
        x = jnp.pad(x, ((0, (P_pad - P) * N), (0, 0)))   # padded pillars sliced off
    w = weight_t.astype(io_dtype)
    scale2 = jnp.asarray(scale, jnp.float32).reshape(1, U)
    shift2 = jnp.asarray(shift, jnp.float32).reshape(1, U)

    if last_layer:
        out_shape = jax.ShapeDtypeStruct((P_pad, U), out_dtype)
        out_spec = pl.BlockSpec((tile_p, U), lambda i: (i, 0))
    else:
        out_shape = jax.ShapeDtypeStruct((P_pad, N, 2 * U), out_dtype)
        out_spec = pl.BlockSpec((tile_p, N, 2 * U), lambda i: (i, 0, 0))

    kernel = functools.partial(_pfn_kernel, n_points=N, last_layer=last_layer)
    out = pl.pallas_call(
        kernel,
        out_shape=out_shape,
        grid_spec=pl.GridSpec(
            grid=(P_pad // tile_p,),
            in_specs=[
                pl.BlockSpec((tile_p * N, D), lambda i: (i, 0)),
                pl.BlockSpec((D, U), lambda i: (0, 0)),
                pl.BlockSpec((1, U), lambda i: (0, 0)),
                pl.BlockSpec((1, U), lambda i: (0, 0)),
            ],
            out_specs=out_spec,
        ),
        compiler_params=pltpu.CompilerParams(
            dimension_semantics=("parallel",),
            vmem_limit_bytes=vmem_limit,
        ),
    )(x, w, scale2, shift2)

    if last_layer:
        return out[:P].reshape(P, 1, U)
    return out[:P]


if __name__ == "__main__":
    def make_params(key, in_channels, units, eps=0.001):
        # torch weight layout is [out, in]; BN in eval mode folded to affine.
        weight = 0.1 * jax.random.normal(key, (units, in_channels), jnp.float32)
        gamma = 1.0 + 0.01 * jnp.arange(units, dtype=jnp.float32)
        beta = 0.01 * jnp.arange(units, dtype=jnp.float32)
        running_mean = 0.05 * jnp.arange(units, dtype=jnp.float32)
        running_var = 1.0 + 0.02 * jnp.arange(units, dtype=jnp.float32)
        inv_std = 1.0 / jnp.sqrt(running_var + eps)
        scale = gamma * inv_std
        shift = beta - running_mean * scale
        return weight.T, scale, shift

    def reference(inputs, weight_t, scale, shift, last_layer):
        y = jnp.einsum("pnd,du->pnu",
                       inputs.astype(jnp.float32), weight_t.astype(jnp.float32),
                       precision=jax.lax.Precision.HIGHEST)
        y = jnp.maximum(y * scale[None, None, :] + shift[None, None, :], 0.0)
        y_max = jnp.max(y, axis=1, keepdims=True)
        if last_layer:
            return y_max
        return jnp.concatenate([y, jnp.broadcast_to(y_max, y.shape)], axis=-1)

    key = jax.random.PRNGKey(0)
    k_in, k_w1, k_w2 = jax.random.split(key, 3)

    # Small shapes consistent with the module; P deliberately NOT a multiple of
    # 8 to exercise the ragged-pillar padding path.
    P, N, D = 100, 32, 16
    out_channels = 64
    inputs = jax.random.normal(k_in, (P, N, D), dtype=jnp.float32)

    # --- Non-last layer (units = out_channels // 2), f32 I/O -----------------
    U1 = out_channels // 2
    w1_t, sc1, sh1 = make_params(k_w1, D, U1)
    out = jax.block_until_ready(pfn_layer(inputs, w1_t, sc1, sh1,
                                          last_layer=False))
    ref = reference(inputs, w1_t, sc1, sh1, last_layer=False)
    assert out.shape == (P, N, 2 * U1), (out.shape,)
    assert jnp.allclose(out, ref, atol=1e-4, rtol=1e-4), "f32 non-last mismatch"

    # --- Same layer with bf16 I/O (halves HBM traffic on v6e/v7x) ------------
    out_bf = jax.block_until_ready(
        pfn_layer(inputs, w1_t, sc1, sh1, last_layer=False,
                  io_dtype=jnp.bfloat16, out_dtype=jnp.float32))
    ref_bf = reference(inputs.astype(jnp.bfloat16), w1_t.astype(jnp.bfloat16),
                       sc1, sh1, last_layer=False)
    assert jnp.allclose(out_bf, ref_bf, atol=1e-2, rtol=1e-2), "bf16 mismatch"

    # --- Last layer (units = out_channels), f32 I/O --------------------------
    U2 = out_channels
    w2_t, sc2, sh2 = make_params(k_w2, D, U2)
    out_last = jax.block_until_ready(pfn_layer(inputs, w2_t, sc2, sh2,
                                               last_layer=True))
    ref_last = reference(inputs, w2_t, sc2, sh2, last_layer=True)
    assert out_last.shape == (P, 1, U2), (out_last.shape,)
    assert jnp.allclose(out_last, ref_last, atol=1e-4, rtol=1e-4), \
        "last-layer mismatch"

    print("KERNEL_OK")
</pallas_src>

<mosaic_0001>
module attributes {stable_mosaic.version = 11 : i64} {
  func.func @_pfn_kernel(%arg0: i32, %arg1: memref<3328x16xf32, #tpu.memory_space<vmem>>, %arg2: memref<16x32xf32, #tpu.memory_space<vmem>>, %arg3: memref<1x32xf32, #tpu.memory_space<vmem>>, %arg4: memref<1x32xf32, #tpu.memory_space<vmem>>, %arg5: memref<104x32x64xf32, #tpu.memory_space<vmem>>) attributes {dimension_semantics = [#tpu.dimension_semantics<parallel>], iteration_bounds = array<i64: 1>, scalar_prefetch = 0 : i64, scratch_operands = 0 : i64, tpu.core_type = #tpu.core_type<tc>, window_params = [{transform_indices = @transform_0, window_bounds = array<i64: 3328, 16>}, {pipeline_mode = #tpu.pipeline_mode<synchronous>, transform_indices = @transform_1, window_bounds = array<i64: 16, 32>}, {pipeline_mode = #tpu.pipeline_mode<synchronous>, transform_indices = @transform_2, window_bounds = array<i64: 1, 32>}, {pipeline_mode = #tpu.pipeline_mode<synchronous>, transform_indices = @transform_3, window_bounds = array<i64: 1, 32>}, {transform_indices = @transform_4, window_bounds = array<i64: 104, 32, 64>}]} {
    %c0 = arith.constant 0 : index
    %c0_0 = arith.constant 0 : index
    %0 = vector.load %arg1[%c0, %c0_0] : memref<3328x16xf32, #tpu.memory_space<vmem>>, vector<3328x16xf32>
    %c0_1 = arith.constant 0 : index
    %c0_2 = arith.constant 0 : index
    %1 = vector.load %arg2[%c0_1, %c0_2] : memref<16x32xf32, #tpu.memory_space<vmem>>, vector<16x32xf32>
    %cst = arith.constant dense<0.000000e+00> : vector<3328x32xf32>
    %2 = tpu.matmul %0, %1, %cst {dimension_numbers = #tpu.dot_dimension_numbers<[1], [0], [0], [1], [0, 0, 1, 1], [], []>} : vector<3328x16xf32>, vector<16x32xf32>, vector<3328x32xf32> -> vector<3328x32xf32>
    %c0_3 = arith.constant 0 : index
    %c0_4 = arith.constant 0 : index
    %3 = vector.load %arg3[%c0_3, %c0_4] : memref<1x32xf32, #tpu.memory_space<vmem>>, vector<1x32xf32>
    %4 = vector.broadcast %3 : vector<1x32xf32> to vector<3328x32xf32>
    %5 = arith.mulf %2, %4 : vector<3328x32xf32>
    %c0_5 = arith.constant 0 : index
    %c0_6 = arith.constant 0 : index
    %6 = vector.load %arg4[%c0_5, %c0_6] : memref<1x32xf32, #tpu.memory_space<vmem>>, vector<1x32xf32>
    %7 = vector.broadcast %6 : vector<1x32xf32> to vector<3328x32xf32>
    %8 = arith.addf %5, %7 : vector<3328x32xf32>
    %cst_7 = arith.constant 0.000000e+00 : f32
    %9 = vector.broadcast %cst_7 : f32 to vector<3328x32xf32>
    %10 = arith.maximumf %8, %9 : vector<3328x32xf32>
    %11 = vector.shape_cast %10 : vector<3328x32xf32> to vector<104x32x32xf32>
    %cst_8 = arith.constant dense<0xFF800000> : vector<104x32xf32>
    %12 = vector.multi_reduction <maximumf>, %11, %cst_8 [1] : vector<104x32x32xf32> to vector<104x32xf32>
    %13 = vector.shape_cast %12 : vector<104x32xf32> to vector<104x1x32xf32>
    %14 = vector.shape_cast %13 : vector<104x1x32xf32> to vector<104x1x32xf32>
    %15 = vector.broadcast %14 : vector<104x1x32xf32> to vector<104x32x32xf32>
    %16 = tpu.concatenate %11, %15 in 2 : vector<104x32x32xf32>, vector<104x32x32xf32> -> vector<104x32x64xf32>
    %c0_9 = arith.constant 0 : index
    %c0_10 = arith.constant 0 : index
    %c0_11 = arith.constant 0 : index
    %17 = vector.load %arg5[%c0_9, %c0_10, %c0_11] : memref<104x32x64xf32, #tpu.memory_space<vmem>>, vector<104x32x64xf32>
    tpu.vector_store %arg5[%c0_9, %c0_10, %c0_11], %16 {strides = array<i32>} : memref<104x32x64xf32, #tpu.memory_space<vmem>>, vector<104x32x64xf32>,
    return
  }
  func.func @transform_0(%arg0: i32) -> (i32, i32) {
    %c0_i32 = arith.constant 0 : i32
    %c0_i32_0 = arith.constant 0 : i32
    return %arg0, %c0_i32 : i32, i32
  }
  func.func @transform_1(%arg0: i32) -> (i32, i32) {
    %c0_i32 = arith.constant 0 : i32
    %c0_i32_0 = arith.constant 0 : i32
    %c0_i32_1 = arith.constant 0 : i32
    return %c0_i32, %c0_i32_0 : i32, i32
  }
  func.func @transform_2(%arg0: i32) -> (i32, i32) {
    %c0_i32 = arith.constant 0 : i32
    %c0_i32_0 = arith.constant 0 : i32
    %c0_i32_1 = arith.constant 0 : i32
    return %c0_i32, %c0_i32_0 : i32, i32
  }
  func.func @transform_3(%arg0: i32) -> (i32, i32) {
    %c0_i32 = arith.constant 0 : i32
    %c0_i32_0 = arith.constant 0 : i32
    %c0_i32_1 = arith.constant 0 : i32
    return %c0_i32, %c0_i32_0 : i32, i32
  }
  func.func @transform_4(%arg0: i32) -> (i32, i32, i32) {
    %c0_i32 = arith.constant 0 : i32
    %c0_i32_0 = arith.constant 0 : i32
    %c0_i32_1 = arith.constant 0 : i32
    return %arg0, %c0_i32, %c0_i32_0 : i32, i32, i32
  }
}

</mosaic_0001>

<bundles_post_ra>
// kernel: tpu_custom_call.1
= control target key start
LH: loop header
LB: loop body
LE: loop exit
PB: predicated region body
PF: predicated region fallthrough
CT: control target
= control target key end

     0   :  { %vm435_vm0 = vcmask 130048   ;;  %vm5091_vm1 = vcmask 261120   ;;  %s9180_s10 = smov 32   ;;  %vm7276_vm2 = vcmask 523264   ;;  %s18975_s1 = inlined_call_operand.vmem [shape: f32[16,32], index: 1, kind: input, shape index: {}]   ;;  %s18976_s0 = inlined_call_operand.vmem [shape: f32[3328,16], index: 0, kind: input, shape index: {}]   ;;  %s18977_s2 = inlined_call_operand.vmem [shape: f32[1,32], index: 2, kind: input, shape index: {}]   ;;  %s18978_s3 = inlined_call_operand.vmem [shape: f32[1,32], index: 3, kind: input, shape index: {}]   ;;  %s18979_s4 = inlined_call_operand.vmem [shape: f32[104,32,64], index: 4, kind: output, shape index: {}]  }
   0x1   :  { %v434_v0 = vld [vmem:[%s18975_s1 + $0x8] sm:$0xff]  ;;  %v433_v1 = vld [vmem:[%s18975_s1] sm:$0xff]  ;;  %v19_v6 = vld [vmem:[%s18976_s0 + $0x10] sm:$0xff] }
   0x2   :  { %8533 = vmatprep.subr.mxu0 %v434_v0  ;;  %9161 = vmatprep.subr.mxu1 %v434_v0  ;;  %v17_v2 = vld [vmem:[%s18976_s0] sm:$0xff]  ;;  %v18_v4 = vld [vmem:[%s18976_s0 + $0x8] sm:$0xff]  ;;  %v227_v7 = vld [vmem:[%s18976_s0 + $0x690] sm:$0xff] }
   0x3   :  { %8534 = vmatpush3.msra.mxu0 %v434_v0  ;;  %9163 = vmatpush3.msra.mxu1 %v434_v0  ;;  %v225_v3 = vld [vmem:[%s18976_s0 + $0x680] sm:$0xff]  ;;  %v226_v5 = vld [vmem:[%s18976_s0 + $0x688] sm:$0xff]  ;;  %v20_v8 = vld [vmem:[%s18976_s0 + $0x18] sm:$0xff] }
   0x4   :  { %8535 = vmatprep.subr.mxu0 %v433_v1  ;;  %9162 = vmatprep.subr.mxu1 %v433_v1  ;;  %v228_v9 = vld [vmem:[%s18976_s0 + $0x698] sm:$0xff]  ;;  %v21_v10 = vld [vmem:[%s18976_s0 + $0x20] sm:$0xff]  ;;  %v22_v12 = vld [vmem:[%s18976_s0 + $0x28] sm:$0xff] }
   0x5   :  { %8536 = vmatpush3.msra.mxu0 %v433_v1  ;;  %9164 = vmatpush3.msra.mxu1 %v433_v1  ;;  %v229_v11 = vld [vmem:[%s18976_s0 + $0x6a0] sm:$0xff]  ;;  %v230_v13 = vld [vmem:[%s18976_s0 + $0x6a8] sm:$0xff]  ;;  %v23_v14 = vld [vmem:[%s18976_s0 + $0x30] sm:$0xff] }
   0x6   :  { %8537 = vmatprep.mubr.msk.f32.mxu0 %vm435_vm0, %v17_v2  ;;  %8849 = vmatprep.mubr.msk.f32.mxu1 %vm435_vm0, %v225_v3  ;;  %v231_v15 = vld [vmem:[%s18976_s0 + $0x6b0] sm:$0xff]  ;;  %v24_v16 = vld [vmem:[%s18976_s0 + $0x38] sm:$0xff]  ;;  %v25_v18 = vld [vmem:[%s18976_s0 + $0x40] sm:$0xff] }
   0x7   :  { %8538 = vmatmul.mubr.msk.f32.vlgmr.msra.gmra.mxu0 %vm435_vm0, %v18_v4  ;;  %8850 = vmatmul.mubr.msk.f32.vlgmr.msra.gmra.mxu1 %vm435_vm0, %v226_v5  ;;  %v232_v17 = vld [vmem:[%s18976_s0 + $0x6b8] sm:$0xff]  ;;  %v233_v19 = vld [vmem:[%s18976_s0 + $0x6c0] sm:$0xff]  ;;  %v26_v20 = vld [vmem:[%s18976_s0 + $0x48] sm:$0xff] }
   0x8   :  { %8540 = vmatprep.mubr.msk.f32.mxu0 %vm435_vm0, %v19_v6  ;;  %8852 = vmatprep.mubr.msk.f32.mxu1 %vm435_vm0, %v227_v7  ;;  %v234_v21 = vld [vmem:[%s18976_s0 + $0x6c8] sm:$0xff]  ;;  %v27_v22 = vld [vmem:[%s18976_s0 + $0x50] sm:$0xff]  ;;  %v28_v24 = vld [vmem:[%s18976_s0 + $0x58] sm:$0xff] }
   0x9   :  { %v235_v23 = vld [vmem:[%s18976_s0 + $0x6d0] sm:$0xff]  ;;  %v236_v25 = vld [vmem:[%s18976_s0 + $0x6d8] sm:$0xff]  ;;  %v29_v26 = vld [vmem:[%s18976_s0 + $0x60] sm:$0xff] }
   0xa   :  { %v237_v27 = vld [vmem:[%s18976_s0 + $0x6e0] sm:$0xff]  ;;  %v30_v28 = vld [vmem:[%s18976_s0 + $0x68] sm:$0xff]  ;;  %v31_v30 = vld [vmem:[%s18976_s0 + $0x70] sm:$0xff] }
   0xb   :  { %8541 = vmatmul.mubr.msk.f32.gmra.mxu0 %vm435_vm0, %v20_v8  ;;  %8853 = vmatmul.mubr.msk.f32.gmra.mxu1 %vm435_vm0, %v228_v9  ;;  %v238_v29 = vld [vmem:[%s18976_s0 + $0x6e8] sm:$0xff]  ;;  %v239_v31 = vld [vmem:[%s18976_s0 + $0x6f0] sm:$0xff]  ;;  %v32_v32 = vld [vmem:[%s18976_s0 + $0x78] sm:$0xff] }
   0xc   :  { %8543 = vmatprep.mubr.msk.f32.mxu0 %vm435_vm0, %v21_v10  ;;  %8855 = vmatprep.mubr.msk.f32.mxu1 %vm435_vm0, %v229_v11  ;;  %v240_v33 = vld [vmem:[%s18976_s0 + $0x6f8] sm:$0xff]  ;;  %v33_v34 = vld [vmem:[%s18976_s0 + $0x80] sm:$0xff]  ;;  %v34_v36 = vld [vmem:[%s18976_s0 + $0x88] sm:$0xff] }
   0xd   :  { %v241_v35 = vld [vmem:[%s18976_s0 + $0x700] sm:$0xff]  ;;  %v242_v37 = vld [vmem:[%s18976_s0 + $0x708] sm:$0xff]  ;;  %v35_v38 = vld [vmem:[%s18976_s0 + $0x90] sm:$0xff] }
   0xe   :  { %v243_v39 = vld [vmem:[%s18976_s0 + $0x710] sm:$0xff]  ;;  %v36_v40 = vld [vmem:[%s18976_s0 + $0x98] sm:$0xff]  ;;  %v37_v42 = vld [vmem:[%s18976_s0 + $0xa0] sm:$0xff] }
   0xf   :  { %8544 = vmatmul.mubr.msk.f32.gmra.mxu0 %vm435_vm0, %v22_v12  ;;  %8856 = vmatmul.mubr.msk.f32.gmra.mxu1 %vm435_vm0, %v230_v13  ;;  %v244_v41 = vld [vmem:[%s18976_s0 + $0x718] sm:$0xff]  ;;  %v245_v43 = vld [vmem:[%s18976_s0 + $0x720] sm:$0xff]  ;;  %v38_v44 = vld [vmem:[%s18976_s0 + $0xa8] sm:$0xff] }
  0x10   :  { %8546 = vmatprep.mubr.msk.f32.mxu0 %vm435_vm0, %v23_v14  ;;  %8858 = vmatprep.mubr.msk.f32.mxu1 %vm435_vm0, %v231_v15  ;;  %v246_v45 = vld [vmem:[%s18976_s0 + $0x728] sm:$0xff]  ;;  %v39_v46 = vld [vmem:[%s18976_s0 + $0xb0] sm:$0xff]  ;;  %v40_v48 = vld [vmem:[%s18976_s0 + $0xb8] sm:$0xff] }
  0x11   :  { %v247_v47 = vld [vmem:[%s18976_s0 + $0x730] sm:$0xff]  ;;  %v248_v49 = vld [vmem:[%s18976_s0 + $0x738] sm:$0xff]  ;;  %v41_v50 = vld [vmem:[%s18976_s0 + $0xc0] sm:$0xff] }
  0x12   :  { %v249_v51 = vld [vmem:[%s18976_s0 + $0x740] sm:$0xff]  ;;  %v42_v52 = vld [vmem:[%s18976_s0 + $0xc8] sm:$0xff]  ;;  %v43_v54 = vld [vmem:[%s18976_s0 + $0xd0] sm:$0xff] }
  0x13   :  { %8547 = vmatmul.mubr.msk.f32.gmra.mxu0 %vm435_vm0, %v24_v16  ;;  %8859 = vmatmul.mubr.msk.f32.gmra.mxu1 %vm435_vm0, %v232_v17  ;;  %v250_v53 = vld [vmem:[%s18976_s0 + $0x748] sm:$0xff]  ;;  %v251_v55 = vld [vmem:[%s18976_s0 + $0x750] sm:$0xff]  ;;  %v44_v56 = vld [vmem:[%s18976_s0 + $0xd8] sm:$0xff] }
  0x14   :  { %8549 = vmatprep.mubr.msk.f32.mxu0 %vm435_vm0, %v25_v18  ;;  %8861 = vmatprep.mubr.msk.f32.mxu1 %vm435_vm0, %v233_v19  ;;  %v252_v57 = vld [vmem:[%s18976_s0 + $0x758] sm:$0xff]  ;;  %v45_v58 = vld [vmem:[%s18976_s0 + $0xe0] sm:$0xff]  ;;  %v46_v60 = vld [vmem:[%s18976_s0 + $0xe8] sm:$0xff] }
  0x15   :  { %v253_v59 = vld [vmem:[%s18976_s0 + $0x760] sm:$0xff]  ;;  %v254_v61 = vld [vmem:[%s18976_s0 + $0x768] sm:$0xff]  ;;  %v47_v62 = vld [vmem:[%s18976_s0 + $0xf0] sm:$0xff] }
  0x16   :  { %v255_v63 = vld [vmem:[%s18976_s0 + $0x770] sm:$0xff]  ;;  %v48_v0 = vld [vmem:[%s18976_s0 + $0xf8] sm:$0xff]  ;;  %v49_v2 = vld [vmem:[%s18976_s0 + $0x100] sm:$0xff] }
  0x17   :  { %8550 = vmatmul.mubr.msk.f32.gmra.mxu0 %vm435_vm0, %v26_v20  ;;  %8862 = vmatmul.mubr.msk.f32.gmra.mxu1 %vm435_vm0, %v234_v21  ;;  %v256_v1 = vld [vmem:[%s18976_s0 + $0x778] sm:$0xff]  ;;  %v257_v3 = vld [vmem:[%s18976_s0 + $0x780] sm:$0xff]  ;;  %v50_v4 = vld [vmem:[%s18976_s0 + $0x108] sm:$0xff] }
  0x18   :  { %8552 = vmatprep.mubr.msk.f32.mxu0 %vm435_vm0, %v27_v22  ;;  %8864 = vmatprep.mubr.msk.f32.mxu1 %vm435_vm0, %v235_v23  ;;  %v258_v5 = vld [vmem:[%s18976_s0 + $0x788] sm:$0xff]  ;;  %v51_v6 = vld [vmem:[%s18976_s0 + $0x110] sm:$0xff]  ;;  %v52_v8 = vld [vmem:[%s18976_s0 + $0x118] sm:$0xff] }
  0x19   :  { %v259_v7 = vld [vmem:[%s18976_s0 + $0x790] sm:$0xff]  ;;  %v260_v9 = vld [vmem:[%s18976_s0 + $0x798] sm:$0xff]  ;;  %v53_v10 = vld [vmem:[%s18976_s0 + $0x120] sm:$0xff] }
  0x1a   :  { %v261_v11 = vld [vmem:[%s18976_s0 + $0x7a0] sm:$0xff]  ;;  %v54_v12 = vld [vmem:[%s18976_s0 + $0x128] sm:$0xff]  ;;  %v55_v14 = vld [vmem:[%s18976_s0 + $0x130] sm:$0xff] }
  0x1b   :  { %8553 = vmatmul.mubr.msk.f32.gmra.mxu0 %vm435_vm0, %v28_v24  ;;  %8865 = vmatmul.mubr.msk.f32.gmra.mxu1 %vm435_vm0, %v236_v25  ;;  %v262_v13 = vld [vmem:[%s18976_s0 + $0x7a8] sm:$0xff]  ;;  %v263_v15 = vld [vmem:[%s18976_s0 + $0x7b0] sm:$0xff]  ;;  %v56_v16 = vld [vmem:[%s18976_s0 + $0x138] sm:$0xff] }
  0x1c   :  { %8555 = vmatprep.mubr.msk.f32.mxu0 %vm435_vm0, %v29_v26  ;;  %8867 = vmatprep.mubr.msk.f32.mxu1 %vm435_vm0, %v237_v27  ;;  %v264_v17 = vld [vmem:[%s18976_s0 + $0x7b8] sm:$0xff]  ;;  %v57_v18 = vld [vmem:[%s18976_s0 + $0x140] sm:$0xff]  ;;  %v58_v20 = vld [vmem:[%s18976_s0 + $0x148] sm:$0xff] }
  0x1d   :  { %v265_v19 = vld [vmem:[%s18976_s0 + $0x7c0] sm:$0xff]  ;;  %v266_v21 = vld [vmem:[%s18976_s0 + $0x7c8] sm:$0xff]  ;;  %v59_v22 = vld [vmem:[%s18976_s0 + $0x150] sm:$0xff] }
  0x1e   :  { %v267_v23 = vld [vmem:[%s18976_s0 + $0x7d0] sm:$0xff]  ;;  %v60_v24 = vld [vmem:[%s18976_s0 + $0x158] sm:$0xff]  ;;  %v61_v26 = vld [vmem:[%s18976_s0 + $0x160] sm:$0xff] }
  0x1f   :  { %8556 = vmatmul.mubr.msk.f32.gmra.mxu0 %vm435_vm0, %v30_v28  ;;  %8868 = vmatmul.mubr.msk.f32.gmra.mxu1 %vm435_vm0, %v238_v29  ;;  %v268_v25 = vld [vmem:[%s18976_s0 + $0x7d8] sm:$0xff]  ;;  %v269_v27 = vld [vmem:[%s18976_s0 + $0x7e0] sm:$0xff]  ;;  %v62_v28 = vld [vmem:[%s18976_s0 + $0x168] sm:$0xff] }
  0x20   :  { %8558 = vmatprep.mubr.msk.f32.mxu0 %vm435_vm0, %v31_v30  ;;  %8870 = vmatprep.mubr.msk.f32.mxu1 %vm435_vm0, %v239_v31  ;;  %v270_v29 = vld [vmem:[%s18976_s0 + $0x7e8] sm:$0xff]  ;;  %v63_v30 = vld [vmem:[%s18976_s0 + $0x170] sm:$0xff] }
  0x21   :  { %v271_v31 = vld [vmem:[%s18976_s0 + $0x7f0] sm:$0xff] }
  0x23   :  { %8559 = vmatmul.mubr.msk.f32.gmra.mxu0 %vm435_vm0, %v32_v32  ;;  %8871 = vmatmul.mubr.msk.f32.gmra.mxu1 %vm435_vm0, %v240_v33  ;;  %v64_v32 = vld [vmem:[%s18976_s0 + $0x178] sm:$0xff] }
  0x24   :  { %8561 = vmatprep.mubr.msk.f32.mxu0 %vm435_vm0, %v33_v34  ;;  %8873 = vmatprep.mubr.msk.f32.mxu1 %vm435_vm0, %v241_v35  ;;  %v272_v33 = vld [vmem:[%s18976_s0 + $0x7f8] sm:$0xff]  ;;  %v65_v34 = vld [vmem:[%s18976_s0 + $0x180] sm:$0xff] }
  0x25   :  { %v273_v35 = vld [vmem:[%s18976_s0 + $0x800] sm:$0xff] }
  0x27   :  { %8562 = vmatmul.mubr.msk.f32.gmra.mxu0 %vm435_vm0, %v34_v36  ;;  %8874 = vmatmul.mubr.msk.f32.gmra.mxu1 %vm435_vm0, %v242_v37  ;;  %v66_v36 = vld [vmem:[%s18976_s0 + $0x188] sm:$0xff] }
  0x28   :  { %8564 = vmatprep.mubr.msk.f32.mxu0 %vm435_vm0, %v35_v38  ;;  %8876 = vmatprep.mubr.msk.f32.mxu1 %vm435_vm0, %v243_v39  ;;  %v274_v37 = vld [vmem:[%s18976_s0 + $0x808] sm:$0xff]  ;;  %v67_v38 = vld [vmem:[%s18976_s0 + $0x190] sm:$0xff] }
  0x29   :  { %v275_v39 = vld [vmem:[%s18976_s0 + $0x810] sm:$0xff] }
  0x2b   :  { %8565 = vmatmul.mubr.msk.f32.gmra.mxu0 %vm435_vm0, %v36_v40  ;;  %8877 = vmatmul.mubr.msk.f32.gmra.mxu1 %vm435_vm0, %v244_v41  ;;  %v68_v40 = vld [vmem:[%s18976_s0 + $0x198] sm:$0xff] }
  0x2c   :  { %8567 = vmatprep.mubr.msk.f32.mxu0 %vm435_vm0, %v37_v42  ;;  %8879 = vmatprep.mubr.msk.f32.mxu1 %vm435_vm0, %v245_v43  ;;  %v276_v41 = vld [vmem:[%s18976_s0 + $0x818] sm:$0xff]  ;;  %v69_v42 = vld [vmem:[%s18976_s0 + $0x1a0] sm:$0xff] }
  0x2d   :  { %v277_v43 = vld [vmem:[%s18976_s0 + $0x820] sm:$0xff] }
  0x2f   :  { %8568 = vmatmul.mubr.msk.f32.gmra.mxu0 %vm435_vm0, %v38_v44  ;;  %8880 = vmatmul.mubr.msk.f32.gmra.mxu1 %vm435_vm0, %v246_v45  ;;  %v70_v44 = vld [vmem:[%s18976_s0 + $0x1a8] sm:$0xff] }
  0x30   :  { %8570 = vmatprep.mubr.msk.f32.mxu0 %vm435_vm0, %v39_v46  ;;  %8882 = vmatprep.mubr.msk.f32.mxu1 %vm435_vm0, %v247_v47  ;;  %v278_v45 = vld [vmem:[%s18976_s0 + $0x828] sm:$0xff]  ;;  %v71_v46 = vld [vmem:[%s18976_s0 + $0x1b0] sm:$0xff] }
  0x31   :  { %v279_v47 = vld [vmem:[%s18976_s0 + $0x830] sm:$0xff] }
  0x33   :  { %8571 = vmatmul.mubr.msk.f32.gmra.mxu0 %vm435_vm0, %v40_v48  ;;  %8883 = vmatmul.mubr.msk.f32.gmra.mxu1 %vm435_vm0, %v248_v49  ;;  %v72_v48 = vld [vmem:[%s18976_s0 + $0x1b8] sm:$0xff] }
  0x34   :  { %8573 = vmatprep.mubr.msk.f32.mxu0 %vm435_vm0, %v41_v50  ;;  %8885 = vmatprep.mubr.msk.f32.mxu1 %vm435_vm0, %v249_v51  ;;  %v280_v49 = vld [vmem:[%s18976_s0 + $0x838] sm:$0xff]  ;;  %v73_v50 = vld [vmem:[%s18976_s0 + $0x1c0] sm:$0xff] }
  0x35   :  { %v281_v51 = vld [vmem:[%s18976_s0 + $0x840] sm:$0xff] }
  0x37   :  { %8574 = vmatmul.mubr.msk.f32.gmra.mxu0 %vm435_vm0, %v42_v52  ;;  %8886 = vmatmul.mubr.msk.f32.gmra.mxu1 %vm435_vm0, %v250_v53  ;;  %v74_v52 = vld [vmem:[%s18976_s0 + $0x1c8] sm:$0xff] }
  0x38   :  { %8576 = vmatprep.mubr.msk.f32.mxu0 %vm435_vm0, %v43_v54  ;;  %8888 = vmatprep.mubr.msk.f32.mxu1 %vm435_vm0, %v251_v55  ;;  %v282_v53 = vld [vmem:[%s18976_s0 + $0x848] sm:$0xff]  ;;  %v75_v54 = vld [vmem:[%s18976_s0 + $0x1d0] sm:$0xff] }
  0x39   :  { %v283_v55 = vld [vmem:[%s18976_s0 + $0x850] sm:$0xff] }
  0x3b   :  { %8577 = vmatmul.mubr.msk.f32.gmra.mxu0 %vm435_vm0, %v44_v56  ;;  %8889 = vmatmul.mubr.msk.f32.gmra.mxu1 %vm435_vm0, %v252_v57  ;;  %v76_v56 = vld [vmem:[%s18976_s0 + $0x1d8] sm:$0xff] }
  0x3c   :  { %8579 = vmatprep.mubr.msk.f32.mxu0 %vm435_vm0, %v45_v58  ;;  %8891 = vmatprep.mubr.msk.f32.mxu1 %vm435_vm0, %v253_v59  ;;  %v284_v57 = vld [vmem:[%s18976_s0 + $0x858] sm:$0xff]  ;;  %v77_v58 = vld [vmem:[%s18976_s0 + $0x1e0] sm:$0xff] }
  0x3d   :  { %v285_v59 = vld [vmem:[%s18976_s0 + $0x860] sm:$0xff] }
  0x3f   :  { %8580 = vmatmul.mubr.msk.f32.gmra.mxu0 %vm435_vm0, %v46_v60  ;;  %8892 = vmatmul.mubr.msk.f32.gmra.mxu1 %vm435_vm0, %v254_v61  ;;  %v78_v60 = vld [vmem:[%s18976_s0 + $0x1e8] sm:$0xff] }
  0x40   :  { %8582 = vmatprep.mubr.msk.f32.mxu0 %vm435_vm0, %v47_v62  ;;  %8894 = vmatprep.mubr.msk.f32.mxu1 %vm435_vm0, %v255_v63  ;;  %v286_v61 = vld [vmem:[%s18976_s0 + $0x868] sm:$0xff]  ;;  %v79_v62 = vld [vmem:[%s18976_s0 + $0x1f0] sm:$0xff] }
  0x41   :  { %v287_v63 = vld [vmem:[%s18976_s0 + $0x870] sm:$0xff] }
  0x43   :  { %8583 = vmatmul.mubr.msk.f32.gmra.mxu0 %vm435_vm0, %v48_v0  ;;  %8895 = vmatmul.mubr.msk.f32.gmra.mxu1 %vm435_vm0, %v256_v1  ;;  %v80_v0 = vld [vmem:[%s18976_s0 + $0x1f8] sm:$0xff] }
  0x44   :  { %8585 = vmatprep.mubr.msk.f32.mxu0 %vm435_vm0, %v49_v2  ;;  %8897 = vmatprep.mubr.msk.f32.mxu1 %vm435_vm0, %v257_v3  ;;  %v288_v1 = vld [vmem:[%s18976_s0 + $0x878] sm:$0xff]  ;;  %v81_v2 = vld [vmem:[%s18976_s0 + $0x200] sm:$0xff] }
  0x45   :  { %v289_v3 = vld [vmem:[%s18976_s0 + $0x880] sm:$0xff] }
  0x47   :  { %8586 = vmatmul.mubr.msk.f32.gmra.mxu0 %vm435_vm0, %v50_v4  ;;  %8898 = vmatmul.mubr.msk.f32.gmra.mxu1 %vm435_vm0, %v258_v5  ;;  %v82_v4 = vld [vmem:[%s18976_s0 + $0x208] sm:$0xff] }
  0x48   :  { %8588 = vmatprep.mubr.msk.f32.mxu0 %vm435_vm0, %v51_v6  ;;  %8900 = vmatprep.mubr.msk.f32.mxu1 %vm435_vm0, %v259_v7  ;;  %v290_v5 = vld [vmem:[%s18976_s0 + $0x888] sm:$0xff]  ;;  %v83_v6 = vld [vmem:[%s18976_s0 + $0x210] sm:$0xff] }
  0x49   :  { %v291_v7 = vld [vmem:[%s18976_s0 + $0x890] sm:$0xff] }
  0x4b   :  { %8589 = vmatmul.mubr.msk.f32.gmra.mxu0 %vm435_vm0, %v52_v8  ;;  %8901 = vmatmul.mubr.msk.f32.gmra.mxu1 %vm435_vm0, %v260_v9  ;;  %v84_v8 = vld [vmem:[%s18976_s0 + $0x218] sm:$0xff] }
  0x4c   :  { %8591 = vmatprep.mubr.msk.f32.mxu0 %vm435_vm0, %v53_v10  ;;  %8903 = vmatprep.mubr.msk.f32.mxu1 %vm435_vm0, %v261_v11  ;;  %v292_v9 = vld [vmem:[%s18976_s0 + $0x898] sm:$0xff]  ;;  %v85_v10 = vld [vmem:[%s18976_s0 + $0x220] sm:$0xff] }
  0x4d   :  { %v293_v11 = vld [vmem:[%s18976_s0 + $0x8a0] sm:$0xff] }
  0x4f   :  { %8592 = vmatmul.mubr.msk.f32.gmra.mxu0 %vm435_vm0, %v54_v12  ;;  %8904 = vmatmul.mubr.msk.f32.gmra.mxu1 %vm435_vm0, %v262_v13  ;;  %v86_v12 = vld [vmem:[%s18976_s0 + $0x228] sm:$0xff] }
  0x50   :  { %8594 = vmatprep.mubr.msk.f32.mxu0 %vm435_vm0, %v55_v14  ;;  %8906 = vmatprep.mubr.msk.f32.mxu1 %vm435_vm0, %v263_v15  ;;  %v294_v13 = vld [vmem:[%s18976_s0 + $0x8a8] sm:$0xff]  ;;  %v87_v14 = vld [vmem:[%s18976_s0 + $0x230] sm:$0xff] }
  0x51   :  { %v295_v15 = vld [vmem:[%s18976_s0 + $0x8b0] sm:$0xff] }
  0x53   :  { %8595 = vmatmul.mubr.msk.f32.gmra.mxu0 %vm435_vm0, %v56_v16  ;;  %8907 = vmatmul.mubr.msk.f32.gmra.mxu1 %vm435_vm0, %v264_v17  ;;  %v88_v16 = vld [vmem:[%s18976_s0 + $0x238] sm:$0xff] }
  0x54   :  { %8597 = vmatprep.mubr.msk.f32.mxu0 %vm435_vm0, %v57_v18  ;;  %8909 = vmatprep.mubr.msk.f32.mxu1 %vm435_vm0, %v265_v19  ;;  %v296_v17 = vld [vmem:[%s18976_s0 + $0x8b8] sm:$0xff]  ;;  %v89_v18 = vld [vmem:[%s18976_s0 + $0x240] sm:$0xff] }
  0x55   :  { %v297_v19 = vld [vmem:[%s18976_s0 + $0x8c0] sm:$0xff] }
  0x57   :  { %8598 = vmatmul.mubr.msk.f32.gmra.mxu0 %vm435_vm0, %v58_v20  ;;  %8910 = vmatmul.mubr.msk.f32.gmra.mxu1 %vm435_vm0, %v266_v21  ;;  %v90_v20 = vld [vmem:[%s18976_s0 + $0x248] sm:$0xff] }
  0x58   :  { %8600 = vmatprep.mubr.msk.f32.mxu0 %vm435_vm0, %v59_v22  ;;  %8912 = vmatprep.mubr.msk.f32.mxu1 %vm435_vm0, %v267_v23  ;;  %v298_v21 = vld [vmem:[%s18976_s0 + $0x8c8] sm:$0xff]  ;;  %v91_v22 = vld [vmem:[%s18976_s0 + $0x250] sm:$0xff] }
  0x59   :  { %v299_v23 = vld [vmem:[%s18976_s0 + $0x8d0] sm:$0xff] }
  0x5b   :  { %8601 = vmatmul.mubr.msk.f32.gmra.mxu0 %vm435_vm0, %v60_v24  ;;  %8913 = vmatmul.mubr.msk.f32.gmra.mxu1 %vm435_vm0, %v268_v25  ;;  %v92_v24 = vld [vmem:[%s18976_s0 + $0x258] sm:$0xff] }
  0x5c   :  { %8603 = vmatprep.mubr.msk.f32.mxu0 %vm435_vm0, %v61_v26  ;;  %8915 = vmatprep.mubr.msk.f32.mxu1 %vm435_vm0, %v269_v27  ;;  %v300_v25 = vld [vmem:[%s18976_s0 + $0x8d8] sm:$0xff]  ;;  %v93_v26 = vld [vmem:[%s18976_s0 + $0x260] sm:$0xff] }
  0x5d   :  { %v301_v27 = vld [vmem:[%s18976_s0 + $0x8e0] sm:$0xff] }
  0x5f   :  { %8604 = vmatmul.mubr.msk.f32.gmra.mxu0 %vm435_vm0, %v62_v28  ;;  %8916 = vmatmul.mubr.msk.f32.gmra.mxu1 %vm435_vm0, %v270_v29  ;;  %v94_v28 = vld [vmem:[%s18976_s0 + $0x268] sm:$0xff] }
  0x60   :  { %8606 = vmatprep.mubr.msk.f32.mxu0 %vm435_vm0, %v63_v30  ;;  %8918 = vmatprep.mubr.msk.f32.mxu1 %vm435_vm0, %v271_v31  ;;  %v302_v29 = vld [vmem:[%s18976_s0 + $0x8e8] sm:$0xff]  ;;  %v95_v30 = vld [vmem:[%s18976_s0 + $0x270] sm:$0xff] }
  0x61   :  { %v303_v31 = vld [vmem:[%s18976_s0 + $0x8f0] sm:$0xff] }
  0x63   :  { %8607 = vmatmul.mubr.msk.f32.gmra.mxu0 %vm435_vm0, %v64_v32  ;;  %8919 = vmatmul.mubr.msk.f32.gmra.mxu1 %vm435_vm0, %v272_v33  ;;  %v96_v32 = vld [vmem:[%s18976_s0 + $0x278] sm:$0xff] }
  0x64   :  { %8609 = vmatprep.mubr.msk.f32.mxu0 %vm435_vm0, %v65_v34  ;;  %8921 = vmatprep.mubr.msk.f32.mxu1 %vm435_vm0, %v273_v35  ;;  %v304_v33 = vld [vmem:[%s18976_s0 + $0x8f8] sm:$0xff]  ;;  %v97_v34 = vld [vmem:[%s18976_s0 + $0x280] sm:$0xff] }
  0x65   :  { %v305_v35 = vld [vmem:[%s18976_s0 + $0x900] sm:$0xff] }
  0x67   :  { %8610 = vmatmul.mubr.msk.f32.gmra.mxu0 %vm435_vm0, %v66_v36  ;;  %8922 = vmatmul.mubr.msk.f32.gmra.mxu1 %vm435_vm0, %v274_v37  ;;  %v98_v36 = vld [vmem:[%s18976_s0 + $0x288] sm:$0xff] }
  0x68   :  { %8612 = vmatprep.mubr.msk.f32.mxu0 %vm435_vm0, %v67_v38  ;;  %8924 = vmatprep.mubr.msk.f32.mxu1 %vm435_vm0, %v275_v39  ;;  %v306_v37 = vld [vmem:[%s18976_s0 + $0x908] sm:$0xff]  ;;  %v99_v38 = vld [vmem:[%s18976_s0 + $0x290] sm:$0xff] }
  0x69   :  { %v307_v39 = vld [vmem:[%s18976_s0 + $0x910] sm:$0xff] }
  0x6b   :  { %8613 = vmatmul.mubr.msk.f32.gmra.mxu0 %vm435_vm0, %v68_v40  ;;  %8925 = vmatmul.mubr.msk.f32.gmra.mxu1 %vm435_vm0, %v276_v41  ;;  %v100_v40 = vld [vmem:[%s18976_s0 + $0x298] sm:$0xff] }
  0x6c   :  { %8615 = vmatprep.mubr.msk.f32.mxu0 %vm435_vm0, %v69_v42  ;;  %8927 = vmatprep.mubr.msk.f32.mxu1 %vm435_vm0, %v277_v43  ;;  %v308_v41 = vld [vmem:[%s18976_s0 + $0x918] sm:$0xff]  ;;  %v101_v42 = vld [vmem:[%s18976_s0 + $0x2a0] sm:$0xff] }
  0x6d   :  { %v309_v43 = vld [vmem:[%s18976_s0 + $0x920] sm:$0xff] }
  0x6f   :  { %8616 = vmatmul.mubr.msk.f32.gmra.mxu0 %vm435_vm0, %v70_v44  ;;  %8928 = vmatmul.mubr.msk.f32.gmra.mxu1 %vm435_vm0, %v278_v45  ;;  %v102_v44 = vld [vmem:[%s18976_s0 + $0x2a8] sm:$0xff] }
  0x70   :  { %8618 = vmatprep.mubr.msk.f32.mxu0 %vm435_vm0, %v71_v46  ;;  %8930 = vmatprep.mubr.msk.f32.mxu1 %vm435_vm0, %v279_v47  ;;  %v310_v45 = vld [vmem:[%s18976_s0 + $0x928] sm:$0xff]  ;;  %v103_v46 = vld [vmem:[%s18976_s0 + $0x2b0] sm:$0xff] }
  0x71   :  { %v311_v47 = vld [vmem:[%s18976_s0 + $0x930] sm:$0xff] }
  0x73   :  { %8619 = vmatmul.mubr.msk.f32.gmra.mxu0 %vm435_vm0, %v72_v48  ;;  %8931 = vmatmul.mubr.msk.f32.gmra.mxu1 %vm435_vm0, %v280_v49  ;;  %v104_v48 = vld [vmem:[%s18976_s0 + $0x2b8] sm:$0xff] }
  0x74   :  { %8621 = vmatprep.mubr.msk.f32.mxu0 %vm435_vm0, %v73_v50  ;;  %8933 = vmatprep.mubr.msk.f32.mxu1 %vm435_vm0, %v281_v51  ;;  %v312_v49 = vld [vmem:[%s18976_s0 + $0x938] sm:$0xff]  ;;  %v105_v50 = vld [vmem:[%s18976_s0 + $0x2c0] sm:$0xff] }
  0x75   :  { %v313_v51 = vld [vmem:[%s18976_s0 + $0x940] sm:$0xff] }
  0x77   :  { %8622 = vmatmul.mubr.msk.f32.gmra.mxu0 %vm435_vm0, %v74_v52  ;;  %8934 = vmatmul.mubr.msk.f32.gmra.mxu1 %vm435_vm0, %v282_v53  ;;  %v106_v52 = vld [vmem:[%s18976_s0 + $0x2c8] sm:$0xff] }
  0x78   :  { %8624 = vmatprep.mubr.msk.f32.mxu0 %vm435_vm0, %v75_v54  ;;  %8936 = vmatprep.mubr.msk.f32.mxu1 %vm435_vm0, %v283_v55  ;;  %v314_v53 = vld [vmem:[%s18976_s0 + $0x948] sm:$0xff]  ;;  %v107_v54 = vld [vmem:[%s18976_s0 + $0x2d0] sm:$0xff] }
  0x79   :  { %v315_v55 = vld [vmem:[%s18976_s0 + $0x950] sm:$0xff] }
  0x7b   :  { %8625 = vmatmul.mubr.msk.f32.gmra.mxu0 %vm435_vm0, %v76_v56  ;;  %8937 = vmatmul.mubr.msk.f32.gmra.mxu1 %vm435_vm0, %v284_v57  ;;  %v108_v56 = vld [vmem:[%s18976_s0 + $0x2d8] sm:$0xff] }
  0x7c   :  { %8627 = vmatprep.mubr.msk.f32.mxu0 %vm435_vm0, %v77_v58  ;;  %8939 = vmatprep.mubr.msk.f32.mxu1 %vm435_vm0, %v285_v59  ;;  %v316_v57 = vld [vmem:[%s18976_s0 + $0x958] sm:$0xff]  ;;  %v109_v58 = vld [vmem:[%s18976_s0 + $0x2e0] sm:$0xff] }
  0x7d   :  { %v317_v59 = vld [vmem:[%s18976_s0 + $0x960] sm:$0xff] }
  0x7f   :  { %8628 = vmatmul.mubr.msk.f32.gmra.mxu0 %vm435_vm0, %v78_v60  ;;  %8940 = vmatmul.mubr.msk.f32.gmra.mxu1 %vm435_vm0, %v286_v61  ;;  %v110_v60 = vld [vmem:[%s18976_s0 + $0x2e8] sm:$0xff] }
  0x80   :  { %8630 = vmatprep.mubr.msk.f32.mxu0 %vm435_vm0, %v79_v62  ;;  %8942 = vmatprep.mubr.msk.f32.mxu1 %vm435_vm0, %v287_v63  ;;  %v318_v61 = vld [vmem:[%s18976_s0 + $0x968] sm:$0xff]  ;;  %v111_v62 = vld [vmem:[%s18976_s0 + $0x2f0] sm:$0xff] }
  0x81   :  { %v319_v63 = vld [vmem:[%s18976_s0 + $0x970] sm:$0xff] }
  0x83   :  { %8631 = vmatmul.mubr.msk.f32.gmra.mxu0 %vm435_vm0, %v80_v0  ;;  %8943 = vmatmul.mubr.msk.f32.gmra.mxu1 %vm435_vm0, %v288_v1  ;;  %v112_v0 = vld [vmem:[%s18976_s0 + $0x2f8] sm:$0xff] }
  0x84   :  { %8633 = vmatprep.mubr.msk.f32.mxu0 %vm435_vm0, %v81_v2  ;;  %8945 = vmatprep.mubr.msk.f32.mxu1 %vm435_vm0, %v289_v3  ;;  %v320_v1 = vld [vmem:[%s18976_s0 + $0x978] sm:$0xff]  ;;  %v113_v2 = vld [vmem:[%s18976_s0 + $0x300] sm:$0xff] }
  0x85   :  { %v321_v3 = vld [vmem:[%s18976_s0 + $0x980] sm:$0xff] }
  0x87   :  { %8634 = vmatmul.mubr.msk.f32.gmra.mxu0 %vm435_vm0, %v82_v4  ;;  %8946 = vmatmul.mubr.msk.f32.gmra.mxu1 %vm435_vm0, %v290_v5  ;;  %v114_v4 = vld [vmem:[%s18976_s0 + $0x308] sm:$0xff] }
  0x88   :  { %8636 = vmatprep.mubr.msk.f32.mxu0 %vm435_vm0, %v83_v6  ;;  %8948 = vmatprep.mubr.msk.f32.mxu1 %vm435_vm0, %v291_v7  ;;  %v322_v5 = vld [vmem:[%s18976_s0 + $0x988] sm:$0xff]  ;;  %v9997_v6 = vld [vmem:[%s18977_s2] ss:$0 sm:$0xff]  ;;  %v115_v7 = vld [vmem:[%s18976_s0 + $0x310] sm:$0xff] }
  0x8b   :  { %8637 = vmatmul.mubr.msk.f32.gmra.mxu0 %vm435_vm0, %v84_v8  ;;  %8949 = vmatmul.mubr.msk.f32.gmra.mxu1 %vm435_vm0, %v292_v9  ;;  %v323_v8 = vld [vmem:[%s18976_s0 + $0x990] sm:$0xff] }
  0x8c   :  { %8639 = vmatprep.mubr.msk.f32.mxu0 %vm435_vm0, %v85_v10  ;;  %8951 = vmatprep.mubr.msk.f32.mxu1 %vm435_vm0, %v293_v11  ;;  %v10008_v10 = vld [vmem:[%s18978_s3] ss:$0 sm:$0xff] }
  0x8f   :  { %8640 = vmatmul.mubr.msk.f32.gmra.mxu0 %vm435_vm0, %v86_v12  ;;  %8952 = vmatmul.mubr.msk.f32.gmra.mxu1 %vm435_vm0, %v294_v13 }
  0x90   :  { %8642 = vmatprep.mubr.msk.f32.mxu0 %vm435_vm0, %v87_v14  ;;  %8954 = vmatprep.mubr.msk.f32.mxu1 %vm435_vm0, %v295_v15  ;;  %v116_v14 = vld [vmem:[%s18976_s0 + $0x318] sm:$0xff] }
  0x91   :  { %v324_v15 = vld [vmem:[%s18976_s0 + $0x998] sm:$0xff] }
  0x93   :  { %8643 = vmatmul.mubr.msk.f32.gmra.mxu0 %vm435_vm0, %v88_v16  ;;  %8955 = vmatmul.mubr.msk.f32.gmra.mxu1 %vm435_vm0, %v296_v17 }
  0x94   :  { %8645 = vmatprep.mubr.msk.f32.mxu0 %vm435_vm0, %v89_v18  ;;  %8957 = vmatprep.mubr.msk.f32.mxu1 %vm435_vm0, %v297_v19  ;;  %v117_v18 = vld [vmem:[%s18976_s0 + $0x320] sm:$0xff] }
  0x95   :  { %v325_v19 = vld [vmem:[%s18976_s0 + $0x9a0] sm:$0xff] }
  0x97   :  { %8646 = vmatmul.mubr.msk.f32.gmra.mxu0 %vm435_vm0, %v90_v20  ;;  %8958 = vmatmul.mubr.msk.f32.gmra.mxu1 %vm435_vm0, %v298_v21 }
  0x98   :  { %8648 = vmatprep.mubr.msk.f32.mxu0 %vm435_vm0, %v91_v22  ;;  %8960 = vmatprep.mubr.msk.f32.mxu1 %vm435_vm0, %v299_v23 }
  0x9b   :  { %8649 = vmatmul.mubr.msk.f32.gmra.mxu0 %vm435_vm0, %v92_v24  ;;  %8961 = vmatmul.mubr.msk.f32.gmra.mxu1 %vm435_vm0, %v300_v25 }
  0x9c   :  { %8651 = vmatprep.mubr.msk.f32.mxu0 %vm435_vm0, %v93_v26  ;;  %8963 = vmatprep.mubr.msk.f32.mxu1 %vm435_vm0, %v301_v27 }
  0x9f   :  { %8652 = vmatmul.mubr.msk.f32.gmra.mxu0 %vm435_vm0, %v94_v28  ;;  %8964 = vmatmul.mubr.msk.f32.gmra.mxu1 %vm435_vm0, %v302_v29 }
  0xa0   :  { %8654 = vmatprep.mubr.msk.f32.mxu0 %vm435_vm0, %v95_v30  ;;  %8966 = vmatprep.mubr.msk.f32.mxu1 %vm435_vm0, %v303_v31  ;;  %v118_v30 = vld [vmem:[%s18976_s0 + $0x328] sm:$0xff] }
  0xa3   :  { %8655 = vmatmul.mubr.msk.f32.gmra.mxu0 %vm435_vm0, %v96_v32  ;;  %8967 = vmatmul.mubr.msk.f32.gmra.mxu1 %vm435_vm0, %v304_v33 }
  0xa4   :  { %8657 = vmatprep.mubr.msk.f32.mxu0 %vm435_vm0, %v97_v34  ;;  %8969 = vmatprep.mubr.msk.f32.mxu1 %vm435_vm0, %v305_v35  ;;  %v326_v35 = vld [vmem:[%s18976_s0 + $0x9a8] sm:$0xff] }
  0xa7   :  { %8658 = vmatmul.mubr.msk.f32.gmra.mxu0 %vm435_vm0, %v98_v36  ;;  %8970 = vmatmul.mubr.msk.f32.gmra.mxu1 %vm435_vm0, %v306_v37  ;;  %v119_v36 = vld [vmem:[%s18976_s0 + $0x330] sm:$0xff] }
  0xa8   :  { %8660 = vmatprep.mubr.msk.f32.mxu0 %vm435_vm0, %v99_v38  ;;  %8972 = vmatprep.mubr.msk.f32.mxu1 %vm435_vm0, %v307_v39 }
  0xab   :  { %8661 = vmatmul.mubr.msk.f32.gmra.mxu0 %vm435_vm0, %v100_v40  ;;  %8973 = vmatmul.mubr.msk.f32.gmra.mxu1 %vm435_vm0, %v308_v41  ;;  %v327_v41 = vld [vmem:[%s18976_s0 + $0x9b0] sm:$0xff] }
  0xac   :  { %8663 = vmatprep.mubr.msk.f32.mxu0 %vm435_vm0, %v101_v42  ;;  %8975 = vmatprep.mubr.msk.f32.mxu1 %vm435_vm0, %v309_v43 }
  0xaf   :  { %8664 = vmatmul.mubr.msk.f32.gmra.mxu0 %vm435_vm0, %v102_v44  ;;  %8976 = vmatmul.mubr.msk.f32.gmra.mxu1 %vm435_vm0, %v310_v45 }
  0xb0   :  { %8666 = vmatprep.mubr.msk.f32.mxu0 %vm435_vm0, %v103_v46  ;;  %8978 = vmatprep.mubr.msk.f32.mxu1 %vm435_vm0, %v311_v47 }
  0xb3   :  { %8667 = vmatmul.mubr.msk.f32.gmra.mxu0 %vm435_vm0, %v104_v48  ;;  %8979 = vmatmul.mubr.msk.f32.gmra.mxu1 %vm435_vm0, %v312_v49 }
  0xb4   :  { %8669 = vmatprep.mubr.msk.f32.mxu0 %vm435_vm0, %v105_v50  ;;  %8981 = vmatprep.mubr.msk.f32.mxu1 %vm435_vm0, %v313_v51 }
  0xb7   :  { %8670 = vmatmul.mubr.msk.f32.gmra.mxu0 %vm435_vm0, %v106_v52  ;;  %8982 = vmatmul.mubr.msk.f32.gmra.mxu1 %vm435_vm0, %v314_v53  ;;  %v120_v52 = vld [vmem:[%s18976_s0 + $0x338] sm:$0xff] }
  0xb8   :  { %8672 = vmatprep.mubr.msk.f32.mxu0 %vm435_vm0, %v107_v54  ;;  %8984 = vmatprep.mubr.msk.f32.mxu1 %vm435_vm0, %v315_v55 }
  0xbb   :  { %8673 = vmatmul.mubr.msk.f32.gmra.mxu0 %vm435_vm0, %v108_v56  ;;  %8985 = vmatmul.mubr.msk.f32.gmra.mxu1 %vm435_vm0, %v316_v57 }
  0xbc   :  { %8675 = vmatprep.mubr.msk.f32.mxu0 %vm435_vm0, %v109_v58  ;;  %8987 = vmatprep.mubr.msk.f32.mxu1 %vm435_vm0, %v317_v59  ;;  %v328_v59 = vld [vmem:[%s18976_s0 + $0x9b8] sm:$0xff] }
  0xbf   :  { %8676 = vmatmul.mubr.msk.f32.gmra.mxu0 %vm435_vm0, %v110_v60  ;;  %8988 = vmatmul.mubr.msk.f32.gmra.mxu1 %vm435_vm0, %v318_v61  ;;  %v121_v60 = vld [vmem:[%s18976_s0 + $0x340] sm:$0xff] }
  0xc0   :  { %8678 = vmatprep.mubr.msk.f32.mxu0 %vm435_vm0, %v111_v62  ;;  %8990 = vmatprep.mubr.msk.f32.mxu1 %vm435_vm0, %v319_v63 }
  0xc3   :  { %8679 = vmatmul.mubr.msk.f32.gmra.mxu0 %vm435_vm0, %v112_v0  ;;  %8991 = vmatmul.mubr.msk.f32.gmra.mxu1 %vm435_vm0, %v320_v1  ;;  %v329_v1 = vld [vmem:[%s18976_s0 + $0x9c0] sm:$0xff] }
  0xc4   :  { %8681 = vmatprep.mubr.msk.f32.mxu0 %vm435_vm0, %v113_v2  ;;  %8993 = vmatprep.mubr.msk.f32.mxu1 %vm435_vm0, %v321_v3 }
  0xc7   :  { %v8539_v9 = vpop.f32.mrf.mxu0  ;;  %8682 = vmatmul.mubr.msk.f32.gmra.mxu0 %vm435_vm0, %v114_v4  ;;  %v8851_v11 = vpop.f32.mrf.mxu1  ;;  %8994 = vmatmul.mubr.msk.f32.gmra.mxu1 %vm435_vm0, %v322_v5 }
  0xc8   :  { %v3837_v12 = vmul.f32 %v8539_v9, %v9997_v6  ;;  %v4045_v13 = vmul.f32 %v8851_v11, %v9997_v6  ;;  %8684 = vmatprep.mubr.msk.f32.mxu0 %vm435_vm0, %v115_v7  ;;  %8996 = vmatprep.mubr.msk.f32.mxu1 %vm435_vm0, %v323_v8 }
  0xc9   :  { %v1750_v16 = vpop.f32.mrf.mxu0  ;;  %v2790_v17 = vpop.f32.mrf.mxu1 }
  0xca   :  { %v10029_v20 = vadd.f32 %v10008_v10, %v3837_v12  ;;  %v10032_v21 = vadd.f32 %v10008_v10, %v4045_v13  ;;  %v3836_v22 = vmul.f32 %v9997_v6, %v1750_v16  ;;  %v4044_v23 = vmul.f32 %v9997_v6, %v2790_v17 }
  0xcb   :  { %v8542_v24 = vpop.f32.mrf.mxu0  ;;  %8685 = vmatmul.mubr.msk.f32.gmra.mxu0 %vm435_vm0, %v116_v14  ;;  %v8854_v25 = vpop.f32.mrf.mxu1  ;;  %8997 = vmatmul.mubr.msk.f32.gmra.mxu1 %vm435_vm0, %v324_v15  ;;  %v122_v14 = vld [vmem:[%s18976_s0 + $0x348] sm:$0xff] }
  0xcc   :  { %19675 = vst [vmem:[#allocation2_spill] sm:$0xff] %v10029_v20  ;;  %19676 = vst [vmem:[#allocation3_spill] sm:$0xff] %v10032_v21  ;;  %v19006_v26 = vmax.f32 %v10029_v20, 0.0  ;;  %v18997_v27 = vmax.f32 %v10032_v21, 0.0  ;;  %v10041_v28 = vadd.f32 %v10008_v10, %v3836_v22  ;;  %v10044_v29 = vadd.f32 %v10008_v10, %v4044_v23  ;;  %8687 = vmatprep.mubr.msk.f32.mxu0 %vm435_vm0, %v117_v18  ;;  %v330_v23 = vld [vmem:[%s18976_s0 + $0x9c8] sm:$0xff] }
  0xcd   :  { %8999 = vmatprep.mubr.msk.f32.mxu1 %vm435_vm0, %v325_v19  ;;  %v3839_v31 = vmul.f32 %v8542_v24, %v9997_v6  ;;  %v4047_v32 = vmul.f32 %v8854_v25, %v9997_v6  ;;  %v1760_v33 = vpop.f32.mrf.mxu0  ;;  %v2800_v34 = vpop.f32.mrf.mxu1 }
  0xce   :  { %19677 = vst [vmem:[#allocation4_spill] sm:$0xff] %v10041_v28  ;;  %19678 = vst [vmem:[#allocation5_spill] sm:$0xff] %v10044_v29  ;;  %v5093_v37 = vsel %vm5091_vm1, %v19006_v26, -inf  ;;  %v5769_v38 = vsel %vm5091_vm1, %v18997_v27, -inf  ;;  %v19007_v39 = vmax.f32 %v10041_v28, 0.0  ;;  %v18998_v40 = vmax.f32 %v10044_v29, 0.0 }
  0xcf   :  { %v10071_v42 = vadd.f32 %v10008_v10, %v3839_v31  ;;  %v10074_v43 = vadd.f32 %v10008_v10, %v4047_v32  ;;  %v3838_v44 = vmul.f32 %v9997_v6, %v1760_v33  ;;  %v4046_v45 = vmul.f32 %v9997_v6, %v2800_v34  ;;  %v8545_v46 = vpop.f32.mrf.mxu0  ;;  %8688 = vmatmul.mubr.msk.f32.gmra.mxu0 %vm435_vm0, %v118_v30  ;;  %v8857_v47 = vpop.f32.mrf.mxu1  ;;  %v123_v32 = vld [vmem:[%s18976_s0 + $0x350] sm:$0xff] }
  0xd0   :  { %v5092_v48 = vsel %vm5091_vm1, %v19007_v39, -inf  ;;  %v5768_v49 = vsel %vm5091_vm1, %v18998_v40, -inf  ;;  %v3841_v50 = vmul.f32 %v8545_v46, %v9997_v6  ;;  %v4049_v51 = vmul.f32 %v8857_v47, %v9997_v6  ;;  %9000 = vmatmul.mubr.msk.f32.gmra.mxu1 %vm435_vm0, %v326_v35  ;;  %8690 = vmatprep.mubr.msk.f32.mxu0 %vm435_vm0, %v119_v36  ;;  %v331_v33 = vld [vmem:[%s18976_s0 + $0x9d0] sm:$0xff] }
  0xd1   :  { %19679 = vst [vmem:[#allocation6_spill] sm:$0xff] %v10071_v42  ;;  %19680 = vst [vmem:[#allocation7_spill] sm:$0xff] %v10074_v43  ;;  %v5094_v53 = vmax.f32 %v5092_v48, %v5093_v37  ;;  %v5770_v54 = vmax.f32 %v5768_v49, %v5769_v38  ;;  %v19000_v55 = vmax.f32 %v10071_v42, 0.0  ;;  %v18994_v56 = vmax.f32 %v10074_v43, 0.0  ;;  %v1770_v57 = vpop.f32.mrf.mxu0  ;;  %v2810_v58 = vpop.f32.mrf.mxu1  ;;  %9002 = vmatprep.mubr.msk.f32.mxu1 %vm435_vm0, %v327_v41  ;;  %v124_v48 = vld [vmem:[%s18976_s0 + $0x358] sm:$0xff] }
  0xd2   :  { %v10102_v61 = vadd.f32 %v10008_v10, %v3838_v44  ;;  %v10105_v62 = vadd.f32 %v10008_v10, %v4046_v45  ;;  %v10108_v63 = vadd.f32 %v10008_v10, %v3841_v50  ;;  %v10111_v0 = vadd.f32 %v10008_v10, %v4049_v51 }
  0xd3   :  { %v10119_v2 = vsel %vm5091_vm1, %v19000_v55, -inf  ;;  %v5773_v3 = vsel %vm5091_vm1, %v18994_v56, -inf  ;;  %v3840_v4 = vmul.f32 %v9997_v6, %v1770_v57  ;;  %v4048_v5 = vmul.f32 %v9997_v6, %v2810_v58  ;;  %v8548_v7 = vpop.f32.mrf.mxu0  ;;  %8691 = vmatmul.mubr.msk.f32.gmra.mxu0 %vm435_vm0, %v120_v52  ;;  %v8860_v8 = vpop.f32.mrf.mxu1  ;;  %v332_v57 = vld [vmem:[%s18976_s0 + $0x9d8] sm:$0xff]  ;;  %v125_v58 = vld [vmem:[%s18976_s0 + $0x360] sm:$0xff] }
  0xd4   :  { %19681 = vst [vmem:[#allocation8_spill] sm:$0xff] %v10102_v61  ;;  %19682 = vst [vmem:[#allocation9_spill] sm:$0xff] %v10105_v62  ;;  %v19001_v9 = vmax.f32 %v10102_v61, 0.0  ;;  %v18995_v11 = vmax.f32 %v10105_v62, 0.0  ;;  %v18985_v12 = vmax.f32 %v10108_v63, 0.0  ;;  %v18992_v13 = vmax.f32 %v10111_v0, 0.0  ;;  %9003 = vmatmul.mubr.msk.f32.gmra.mxu1 %vm435_vm0, %v328_v59  ;;  %8693 = vmatprep.mubr.msk.f32.mxu0 %vm435_vm0, %v121_v60 }
  0xd5   :  { %19683 = vst [vmem:[#allocation10_spill] sm:$0xff] %v10108_v63  ;;  %19684 = vst [vmem:[#allocation11_spill] sm:$0xff] %v10111_v0  ;;  %v10137_v15 = vadd.f32 %v10008_v10, %v3840_v4  ;;  %v10140_v16 = vadd.f32 %v10008_v10, %v4048_v5  ;;  %v3843_v17 = vmul.f32 %v8548_v7, %v9997_v6  ;;  %v1780_v19 = vpop.f32.mrf.mxu0  ;;  %v2820_v22 = vpop.f32.mrf.mxu1  ;;  %9005 = vmatprep.mubr.msk.f32.mxu1 %vm435_vm0, %v329_v1  ;;  %v333_v4 = vld [vmem:[%s18976_s0 + $0x9e0] sm:$0xff] }
  0xd6   :  { %v4051_v18 = vmul.f32 %v8860_v8, %v9997_v6  ;;  %v5095_v24 = vsel %vm5091_vm1, %v19001_v9, -inf  ;;  %v5771_v25 = vsel %vm5091_vm1, %v18995_v11, -inf  ;;  %v10157_v30 = vsel %vm5091_vm1, %v18985_v12, -inf }
  0xd7   :  { %19685 = vst [vmem:[#allocation12_spill] sm:$0xff] %v10137_v15  ;;  %19686 = vst [vmem:[#allocation13_spill] sm:$0xff] %v10140_v16  ;;  %v10162_v31 = vsel %vm5091_vm1, %v18992_v13, -inf  ;;  %v10170_v34 = vmax.f32 %v5094_v53, %v5095_v24  ;;  %v5772_v35 = vmax.f32 %v5770_v54, %v5771_v25  ;;  %v18987_v36 = vmax.f32 %v10137_v15, 0.0  ;;  %v8551_v38 = vpop.f32.mrf.mxu0  ;;  %8694 = vmatmul.mubr.msk.f32.gmra.mxu0 %vm435_vm0, %v122_v14  ;;  %v8863_v41 = vpop.f32.mrf.mxu1  ;;  %v126_v25 = vld [vmem:[%s18976_s0 + $0x368] sm:$0xff] }
  0xd8   :  { %v18993_v37 = vmax.f32 %v10140_v16, 0.0  ;;  %v10176_v44 = vadd.f32 %v10008_v10, %v3843_v17  ;;  %v10179_v45 = vadd.f32 %v10008_v10, %v4051_v18  ;;  %v3842_v46 = vmul.f32 %v9997_v6, %v1780_v19  ;;  %9006 = vmatmul.mubr.msk.f32.gmra.mxu1 %vm435_vm0, %v330_v23  ;;  %8696 = vmatprep.mubr.msk.f32.mxu0 %vm435_vm0, %v123_v32 }
  0xd9   :  { %v4050_v47 = vmul.f32 %v9997_v6, %v2820_v22  ;;  %v10187_v49 = vmax.f32 %v5772_v35, %v5773_v3  ;;  %v5105_v50 = vsel %vm5091_vm1, %v18987_v36, -inf  ;;  %v3845_v52 = vmul.f32 %v8551_v38, %v9997_v6  ;;  %v1790_v53 = vpop.f32.mrf.mxu0  ;;  %v2830_v54 = vpop.f32.mrf.mxu1  ;;  %9008 = vmatprep.mubr.msk.f32.mxu1 %vm435_vm0, %v331_v33 }
  0xda   :  { %19687 = vst [vmem:[#allocation14_spill] sm:$0xff] %v10176_v44  ;;  %19688 = vst [vmem:[#allocation15_spill] sm:$0xff] %v10179_v45  ;;  %v5781_v51 = vsel %vm5091_vm1, %v18993_v37, -inf  ;;  %v5107_v59 = vmax.f32 %v5105_v50, %v10157_v30  ;;  %v18981_v1 = vmax.f32 %v10176_v44, 0.0  ;;  %v18988_v3 = vmax.f32 %v10179_v45, 0.0 }
  0xdb   :  { %v5783_v60 = vmax.f32 %v5781_v51, %v10162_v31  ;;  %v10212_v5 = vadd.f32 %v10008_v10, %v3842_v46  ;;  %v10215_v7 = vadd.f32 %v10008_v10, %v4050_v47  ;;  %v10218_v8 = vadd.f32 %v10008_v10, %v3845_v52  ;;  %v8554_v17 = vpop.f32.mrf.mxu0  ;;  %8697 = vmatmul.mubr.msk.f32.gmra.mxu0 %vm435_vm0, %v124_v48  ;;  %v8866_v18 = vpop.f32.mrf.mxu1  ;;  %v127_v46 = vld [vmem:[%s18976_s0 + $0x370] sm:$0xff] }
  0xdc   :  { %v4053_v14 = vmul.f32 %v8863_v41, %v9997_v6  ;;  %v5110_v19 = vsel %vm5091_vm1, %v18981_v1, -inf  ;;  %v10228_v22 = vsel %vm5091_vm1, %v18988_v3, -inf  ;;  %v3844_v23 = vmul.f32 %v9997_v6, %v1790_v53  ;;  %9009 = vmatmul.mubr.msk.f32.gmra.mxu1 %vm435_vm0, %v332_v57  ;;  %8699 = vmatprep.mubr.msk.f32.mxu0 %vm435_vm0, %v125_v58  ;;  %v334_v41 = vld [vmem:[%s18976_s0 + $0x9e8] sm:$0xff]  ;;  %v335_v52 = vld [vmem:[%s18976_s0 + $0x9f0] sm:$0xff] }
  0xdd   :  { %19689 = vst [vmem:[#allocation16_spill] sm:$0xff] %v10212_v5  ;;  %19690 = vst [vmem:[#allocation17_spill] sm:$0xff] %v10215_v7  ;;  %v4052_v24 = vmul.f32 %v9997_v6, %v2830_v54  ;;  %v18983_v30 = vmax.f32 %v10212_v5, 0.0  ;;  %v18989_v31 = vmax.f32 %v10215_v7, 0.0  ;;  %v18980_v32 = vmax.f32 %v10218_v8, 0.0  ;;  %v1800_v35 = vpop.f32.mrf.mxu0  ;;  %v2840_v38 = vpop.f32.mrf.mxu1  ;;  %9011 = vmatprep.mubr.msk.f32.mxu1 %vm435_vm0, %v333_v4 }
  0xde   :  { %19691 = vst [vmem:[#allocation18_spill] sm:$0xff] %v10218_v8  ;;  %v10241_v33 = vadd.f32 %v10008_v10, %v4053_v14  ;;  %v10251_v47 = vadd.f32 %v10008_v10, %v3844_v23  ;;  %v3847_v50 = vmul.f32 %v8554_v17, %v9997_v6  ;;  %v4055_v51 = vmul.f32 %v8866_v18, %v9997_v6 }
  0xdf   :  { %v10254_v48 = vadd.f32 %v10008_v10, %v4052_v24  ;;  %v5108_v53 = vsel %vm5091_vm1, %v18983_v30, -inf  ;;  %v5784_v54 = vsel %vm5091_vm1, %v18989_v31, -inf  ;;  %v10270_v57 = vsel %vm5091_vm1, %v18980_v32, -inf  ;;  %v8557_v4 = vpop.f32.mrf.mxu0  ;;  %8700 = vmatmul.mubr.msk.f32.gmra.mxu0 %vm435_vm0, %v126_v25  ;;  %v8869_v14 = vpop.f32.mrf.mxu1  ;;  %v128_v32 = vld [vmem:[%s18976_s0 + $0x378] sm:$0xff] }
  0xe0   :  { %19692 = vst [vmem:[#allocation19_spill] sm:$0xff] %v10241_v33  ;;  %19693 = vst [vmem:[#allocation20_spill] sm:$0xff] %v10251_v47  ;;  %v18982_v58 = vmax.f32 %v10241_v33, 0.0  ;;  %v5109_v17 = vmax.f32 %v5107_v59, %v5108_v53  ;;  %v10274_v18 = vmax.f32 %v5783_v60, %v5784_v54  ;;  %v18984_v23 = vmax.f32 %v10251_v47, 0.0  ;;  %9012 = vmatmul.mubr.msk.f32.gmra.mxu1 %vm435_vm0, %v334_v41 }
  0xe1   :  { %19694 = vst [vmem:[#allocation21_spill] sm:$0xff] %v10254_v48  ;;  %v18986_v24 = vmax.f32 %v10254_v48, 0.0  ;;  %8702 = vmatprep.mubr.msk.f32.mxu0 %vm435_vm0, %v127_v46  ;;  %v10287_v59 = vadd.f32 %v10008_v10, %v3847_v50  ;;  %v10290_v60 = vadd.f32 %v10008_v10, %v4055_v51  ;;  %v3846_v53 = vmul.f32 %v9997_v6, %v1800_v35  ;;  %v1810_v54 = vpop.f32.mrf.mxu0  ;;  %v2850_v41 = vpop.f32.mrf.mxu1  ;;  %v336_v46 = vld [vmem:[%s18976_s0 + $0x9f8] sm:$0xff] }
  0xe2   :  { %v5795_v25 = vsel %vm5091_vm1, %v18982_v58, -inf  ;;  %9014 = vmatprep.mubr.msk.f32.mxu1 %vm435_vm0, %v335_v52  ;;  %v10297_v1 = vmax.f32 %v5109_v17, %v5110_v19  ;;  %v5118_v50 = vsel %vm5091_vm1, %v18984_v23, -inf  ;;  %v4054_v35 = vmul.f32 %v9997_v6, %v2840_v38  ;;  %v129_v52 = vld [vmem:[%s18976_s0 + $0x380] sm:$0xff] }
  0xe3   :  { %19695 = vst [vmem:[#allocation22_spill] sm:$0xff] %v10287_v59  ;;  %19696 = vst [vmem:[#allocation23_spill] sm:$0xff] %v10290_v60  ;;  %v5794_v51 = vsel %vm5091_vm1, %v18986_v24, -inf  ;;  %v337_v58 = vld [vmem:[%s18976_s0 + $0xa00] sm:$0xff]  ;;  %v5120_v19 = vmax.f32 %v5118_v50, %v10270_v57  ;;  %v18990_v30 = vmax.f32 %v10287_v59, 0.0  ;;  %v18991_v23 = vmax.f32 %v10290_v60, 0.0  ;;  %v8560_v12 = vpop.f32.mrf.mxu0  ;;  %8703 = vmatmul.mubr.msk.f32.gmra.mxu0 %vm435_vm0, %v128_v32  ;;  %v8872_v24 = vpop.f32.mrf.mxu1 }
  0xe4   :  { %v5796_v17 = vmax.f32 %v5794_v51, %v5795_v25  ;;  %v10317_v38 = vadd.f32 %v10008_v10, %v3846_v53  ;;  %v10320_v36 = vadd.f32 %v10008_v10, %v4054_v35  ;;  %v3849_v3 = vmul.f32 %v8557_v4, %v9997_v6  ;;  %9015 = vmatmul.mubr.msk.f32.gmra.mxu1 %vm435_vm0, %v336_v46  ;;  %v130_v57 = vld [vmem:[%s18976_s0 + $0x388] sm:$0xff]  ;;  %v131_v51 = vld [vmem:[%s18976_s0 + $0x390] sm:$0xff] }
  0xe5   :  { %v4057_v31 = vmul.f32 %v8869_v14, %v9997_v6  ;;  %v5123_v32 = vsel %vm5091_vm1, %v18990_v30, -inf  ;;  %v5799_v25 = vsel %vm5091_vm1, %v18991_v23, -inf  ;;  %v3848_v53 = vmul.f32 %v9997_v6, %v1810_v54  ;;  %v2860_v50 = vpop.f32.mrf.mxu1  ;;  %v1820_v14 = vpop.f32.mrf.mxu0  ;;  %8705 = vmatprep.mubr.msk.f32.mxu0 %vm435_vm0, %v129_v52  ;;  %9017 = vmatprep.mubr.msk.f32.mxu1 %vm435_vm0, %v337_v58  ;;  %v338_v46 = vld [vmem:[%s18976_s0 + $0xa08] sm:$0xff]  ;;  %v339_v58 = vld [vmem:[%s18976_s0 + $0xa10] sm:$0xff] }
  0xe6   :  { %19697 = vst [vmem:[#allocation24_spill] sm:$0xff] %v10317_v38  ;;  %19698 = vst [vmem:[#allocation25_spill] sm:$0xff] %v10320_v36  ;;  %v4056_v4 = vmul.f32 %v9997_v6, %v2850_v41  ;;  %v18996_v35 = vmax.f32 %v10317_v38, 0.0  ;;  %v18999_v54 = vmax.f32 %v10320_v36, 0.0  ;;  %v10347_v41 = vadd.f32 %v10008_v10, %v3849_v3 }
  0xe7   :  { %v10350_v30 = vadd.f32 %v10008_v10, %v4057_v31  ;;  %v10356_v52 = vadd.f32 %v10008_v10, %v3848_v53  ;;  %v3851_v13 = vmul.f32 %v8560_v12, %v9997_v6  ;;  %v4059_v37 = vmul.f32 %v8872_v24, %v9997_v6  ;;  %v8563_v56 = vpop.f32.mrf.mxu0  ;;  %8706 = vmatmul.mubr.msk.f32.gmra.mxu0 %vm435_vm0, %v130_v57  ;;  %v8875_v3 = vpop.f32.mrf.mxu1  ;;  %v132_v12 = vld [vmem:[%s18976_s0 + $0x398] sm:$0xff] }
  0xe8   :  { %19699 = vst [vmem:[#allocation26_spill] sm:$0xff] %v10347_v41  ;;  %v10359_v23 = vadd.f32 %v10008_v10, %v4056_v4  ;;  %v5121_v31 = vsel %vm5091_vm1, %v18996_v35, -inf  ;;  %v5797_v53 = vsel %vm5091_vm1, %v18999_v54, -inf  ;;  %v19002_v11 = vmax.f32 %v10347_v41, 0.0  ;;  %9018 = vmatmul.mubr.msk.f32.gmra.mxu1 %vm435_vm0, %v338_v46  ;;  %8708 = vmatprep.mubr.msk.f32.mxu0 %vm435_vm0, %v131_v51  ;;  %v340_v46 = vld [vmem:[%s18976_s0 + $0xa18] sm:$0xff]  ;;  %v133_v51 = vld [vmem:[%s18976_s0 + $0x3a0] sm:$0xff] }
  0xe9   :  { %19700 = vst [vmem:[#allocation27_spill] sm:$0xff] %v10350_v30  ;;  %19701 = vst [vmem:[#allocation28_spill] sm:$0xff] %v10356_v52  ;;  %v19003_v4 = vmax.f32 %v10350_v30, 0.0  ;;  %v5122_v24 = vmax.f32 %v5120_v19, %v5121_v31  ;;  %v5798_v57 = vmax.f32 %v5796_v17, %v5797_v53  ;;  %v19005_v35 = vmax.f32 %v10356_v52, 0.0  ;;  %v2870_v40 = vpop.f32.mrf.mxu1  ;;  %v1830_v54 = vpop.f32.mrf.mxu0  ;;  %9020 = vmatprep.mubr.msk.f32.mxu1 %vm435_vm0, %v339_v58  ;;  %v341_v53 = vld [vmem:[%s18976_s0 + $0xa20] sm:$0xff] }
  0xea   :  { %19702 = vst [vmem:[#allocation29_spill] sm:$0xff] %v10359_v23  ;;  %v19004_v27 = vmax.f32 %v10359_v23, 0.0  ;;  %v10389_v19 = vsel %vm5091_vm1, %v19002_v11, -inf  ;;  %v10397_v58 = vadd.f32 %v10008_v10, %v3851_v13  ;;  %v10400_v31 = vadd.f32 %v10008_v10, %v4059_v37 }
  0xeb   :  { %v10394_v17 = vsel %vm5091_vm1, %v19003_v4, -inf  ;;  %v10405_v55 = vmax.f32 %v5122_v24, %v5123_v32  ;;  %v10407_v9 = vmax.f32 %v5798_v57, %v5799_v25  ;;  %v10412_v11 = vsel %vm5091_vm1, %v19005_v35, -inf  ;;  %v10417_v4 = vpop.f32.mrf.mxu0  ;;  %8709 = vmatmul.mubr.msk.f32.gmra.mxu0 %vm435_vm0, %v132_v12  ;;  %v10420_v37 = vpop.f32.mrf.mxu1 }
  0xec   :  { %19703 = vst [vmem:[#allocation30_spill] sm:$0xff] %v10397_v58  ;;  %19704 = vst [vmem:[#allocation31_spill] sm:$0xff] %v10400_v31  ;;  %v5807_v13 = vsel %vm5091_vm1, %v19004_v27, -inf  ;;  %v5133_v32 = vmax.f32 %v10412_v11, %v10389_v19  ;;  %v19008_v24 = vmax.f32 %v10397_v58, 0.0  ;;  %v19010_v57 = vmax.f32 %v10400_v31, 0.0  ;;  %9021 = vmatmul.mubr.msk.f32.gmra.mxu1 %vm435_vm0, %v340_v46  ;;  %8711 = vmatprep.mubr.msk.f32.mxu0 %vm435_vm0, %v133_v51  ;;  %v134_v27 = vld [vmem:[%s18976_s0 + $0x3a8] sm:$0xff] }
  0xed   :  { %v5809_v25 = vmax.f32 %v5807_v13, %v10394_v17  ;;  %v4058_v12 = vmul.f32 %v9997_v6, %v2860_v50  ;;  %v5098_v35 = vmax.f32 %v10170_v34, %v10119_v2  ;;  %v3850_v11 = vmul.f32 %v9997_v6, %v1820_v14  ;;  %v10437_v17 = vpop.f32.mrf.mxu1  ;;  %v10439_v13 = vpop.f32.mrf.mxu0  ;;  %9023 = vmatprep.mubr.msk.f32.mxu1 %vm435_vm0, %v341_v53  ;;  %v342_v46 = vld [vmem:[%s18976_s0 + $0xa28] sm:$0xff]  ;;  %v135_v50 = vld [vmem:[%s18976_s0 + $0x3b0] sm:$0xff] }
  0xee   :  { %v3853_v19 = vmul.f32 %v8563_v56, %v9997_v6  ;;  %v5136_v2 = vsel %vm5091_vm1, %v19008_v24, -inf  ;;  %v5812_v56 = vsel %vm5091_vm1, %v19010_v57, -inf  ;;  %v4061_v34 = vmul.f32 %v8875_v3, %v9997_v6  ;;  %v343_v51 = vld [vmem:[%s18976_s0 + $0xa30] sm:$0xff] }
  0xef   :  { %v4060_v14 = vmul.f32 %v9997_v6, %v2870_v40  ;;  %v10460_v53 = vadd.f32 %v10008_v10, %v4058_v12  ;;  %v5099_v26 = vrot.slane %v5098_v35, 4  ;;  %v10463_v39 = vadd.f32 %v10008_v10, %v3850_v11  ;;  %v10468_v31 = vpop.f32.mrf.mxu0  ;;  %8712 = vmatmul.mubr.msk.f32.gmra.mxu0 %vm435_vm0, %v134_v27  ;;  %v10471_v3 = vpop.f32.mrf.mxu1  ;;  %v136_v27 = vld [vmem:[%s18976_s0 + $0x3b8] sm:$0xff] }
  0xf0   :  { %v10466_v24 = vadd.f32 %v10008_v10, %v3853_v19  ;;  %v10474_v40 = vadd.f32 %v10008_v10, %v4061_v34  ;;  %v5775_v12 = vrot.slane %v10187_v49, 4  ;;  %v3852_v11 = vmul.f32 %v9997_v6, %v1830_v54  ;;  %9024 = vmatmul.mubr.msk.f32.gmra.mxu1 %vm435_vm0, %v342_v46  ;;  %8714 = vmatprep.mubr.msk.f32.mxu0 %vm435_vm0, %v135_v50  ;;  %v344_v54 = vld [vmem:[%s18976_s0 + $0xa38] sm:$0xff]  ;;  %v137_v46 = vld [vmem:[%s18976_s0 + $0x3c0] sm:$0xff] }
  0xf1   :  { %19705 = vst [vmem:[#allocation32_spill] sm:$0xff] %v10460_v53  ;;  %19706 = vst [vmem:[#allocation33_spill] sm:$0xff] %v10463_v39  ;;  %v10477_v57 = vadd.f32 %v10008_v10, %v4060_v14  ;;  %v19018_v19 = vmax.f32 %v10460_v53, 0.0  ;;  %v5100_v30 = vmax.f32 %v5098_v35, %v5099_v26  ;;  %v10489_v23 = vpop.f32.mrf.mxu0  ;;  %v10491_v58 = vpop.f32.mrf.mxu1  ;;  %9026 = vmatprep.mubr.msk.f32.mxu1 %vm435_vm0, %v343_v51  ;;  %v345_v51 = vld [vmem:[%s18976_s0 + $0xa40] sm:$0xff]  ;;  %v19711_v52 = vmax.f32 %v10463_v39, 0.0 }
  0xf2   :  { %19707 = vst [vmem:[#allocation34_spill] sm:$0xff] %v10466_v24  ;;  %19708 = vst [vmem:[#allocation35_spill] sm:$0xff] %v10474_v40  ;;  %v5776_v50 = vmax.f32 %v10187_v49, %v5775_v12  ;;  %v10504_v14 = vadd.f32 %v10008_v10, %v3852_v11  ;;  %v19712_v35 = vmax.f32 %v10466_v24, 0.0 }
  0xf3   :  { %19709 = vst [vmem:[#allocation36_spill] sm:$0xff] %v10477_v57  ;;  %v5810_v34 = vsel %vm5091_vm1, %v19018_v19, -inf  ;;  %v5101_v41 = vrot.slane %v5100_v30, 2  ;;  %v5134_v26 = vsel %vm5091_vm1, %v19711_v52, -inf  ;;  %v10520_v12 = vpop.f32.mrf.mxu0  ;;  %8715 = vmatmul.mubr.msk.f32.gmra.mxu0 %vm435_vm0, %v136_v27  ;;  %v10523_v11 = vpop.f32.mrf.mxu1  ;;  %v19713_v19 = vmax.f32 %v10474_v40, 0.0  ;;  %v138_v27 = vld [vmem:[%s18976_s0 + $0x3c8] sm:$0xff] }
  0xf4   :  { %19710 = vst [vmem:[#allocation37_spill] sm:$0xff] %v10504_v14  ;;  %v10518_v49 = vsel %vm5091_vm1, %v19712_v35, -inf  ;;  %v5811_v59 = vmax.f32 %v5809_v25, %v5810_v34  ;;  %v5135_v53 = vmax.f32 %v5133_v32, %v5134_v26  ;;  %v19714_v52 = vmax.f32 %v10477_v57, 0.0  ;;  %9027 = vmatmul.mubr.msk.f32.gmra.mxu1 %vm435_vm0, %v344_v54  ;;  %8717 = vmatprep.mubr.msk.f32.mxu0 %vm435_vm0, %v137_v46  ;;  %v346_v54 = vld [vmem:[%s18976_s0 + $0xa48] sm:$0xff]  ;;  %v139_v32 = vld [vmem:[%s18976_s0 + $0x3d0] sm:$0xff] }
  0xf5   :  { %v10528_v38 = vsel %vm5091_vm1, %v19713_v19, -inf  ;;  %v5102_v25 = vmax.f32 %v5100_v30, %v5101_v41  ;;  %v5777_v34 = vrot.slane %v5776_v50, 2  ;;  %v10543_v26 = vpop.f32.mrf.mxu1  ;;  %v10545_v35 = vpop.f32.mrf.mxu0  ;;  %9029 = vmatprep.mubr.msk.f32.mxu1 %vm435_vm0, %v345_v51  ;;  %v3855_v30 = vmul.f32 %v10417_v4, %v9997_v6  ;;  %v347_v51 = vld [vmem:[%s18976_s0 + $0xa50] sm:$0xff] }
  0xf6   :  { %v10533_v24 = vsel %vm5091_vm1, %v19714_v52, -inf  ;;  %v10551_v46 = vmax.f32 %v5811_v59, %v5812_v56  ;;  %v10553_v52 = vmax.f32 %v5135_v53, %v5136_v2  ;;  %v4063_v41 = vmul.f32 %v10420_v37, %v9997_v6 }
  0xf7   :  { %v5103_v19 = vrot.slane %v5102_v25, 1  ;;  %v5778_v40 = vmax.f32 %v5776_v50, %v5777_v34  ;;  %v19715_v59 = vmax.f32 %v10504_v14, 0.0  ;;  %v5787_v4 = vmax.f32 %v10274_v18, %v10228_v22  ;;  %v10572_v56 = vpop.f32.mrf.mxu0  ;;  %8718 = vmatmul.mubr.msk.f32.gmra.mxu0 %vm435_vm0, %v138_v27  ;;  %v10575_v37 = vpop.f32.mrf.mxu1 }
  0xf8   :  { %v10580_v57 = vadd.f32 %v10008_v10, %v3855_v30  ;;  %v10583_v50 = vadd.f32 %v10008_v10, %v4063_v41  ;;  %v4062_v34 = vmul.f32 %v9997_v6, %v10437_v17  ;;  %9030 = vmatmul.mubr.msk.f32.gmra.mxu1 %vm435_vm0, %v346_v54  ;;  %v5112_v27 = vrot.slane %v10297_v1, 4  ;;  %8720 = vmatprep.mubr.msk.f32.mxu0 %vm435_vm0, %v139_v32  ;;  %v140_v30 = vld [vmem:[%s18976_s0 + $0x3d8] sm:$0xff]  ;;  %v141_v41 = vld [vmem:[%s18976_s0 + $0x3e0] sm:$0xff] }
  0xf9   :  { %v10568_v2 = vsel %vm5091_vm1, %v19715_v59, -inf  ;;  %v5104_v22 = vmax.f32 %v5102_v25, %v5103_v19  ;;  %v5779_v18 = vrot.slane %v5778_v40, 1  ;;  %v5788_v59 = vrot.slane %v5787_v4, 4  ;;  %v10589_v14 = vpop.f32.mrf.mxu0  ;;  %v10591_v39 = vpop.f32.mrf.mxu1  ;;  %9032 = vmatprep.mubr.msk.f32.mxu1 %vm435_vm0, %v347_v51  ;;  %v348_v17 = vld [vmem:[%s18976_s0 + $0xa58] sm:$0xff]  ;;  %v349_v51 = vld [vmem:[%s18976_s0 + $0xa60] sm:$0xff] }
  0xfa   :  { %19716 = vst [vmem:[#allocation38_spill] sm:$0xff] %v10580_v57  ;;  %19717 = vst [vmem:[#allocation39_spill] sm:$0xff] %v10583_v50  ;;  %v10604_v54 = vadd.f32 %v10008_v10, %v4062_v34  ;;  %v3854_v32 = vmul.f32 %v9997_v6, %v10439_v13  ;;  %v5113_v19 = vmax.f32 %v10297_v1, %v5112_v27  ;;  %v19719_v47 = vmax.f32 %v10580_v57, 0.0  ;;  %v350_v27 = vld [vmem:[%s18976_s0 + $0xa68] sm:$0xff] }
  0xfb   :  { %6548 = vrot.lane.b32.xlu0 %v5104_v22, %s9180_s10  ;;  %v5780_v53 = vmax.f32 %v5778_v40, %v5779_v18  ;;  %v5789_v25 = vmax.f32 %v5787_v4, %v5788_v59  ;;  %v3857_v34 = vmul.f32 %v10468_v31, %v9997_v6  ;;  %v10618_v8 = vpop.f32.mrf.mxu0  ;;  %v10620_v13 = vpop.f32.mrf.mxu1  ;;  %v19720_v36 = vmax.f32 %v10583_v50, 0.0  ;;  %8721 = vmatmul.mubr.msk.f32.gmra.mxu0 %vm435_vm0, %v140_v30  ;;  %v142_v59 = vld [vmem:[%s18976_s0 + $0x3e8] sm:$0xff] }
  0xfc   :  { %19718 = vst [vmem:[#allocation40_spill] sm:$0xff] %v10604_v54  ;;  %v5149_v60 = vsel %vm5091_vm1, %v19719_v47, -inf  ;;  %v19030_v40 = vmax.f32 %v10604_v54, 0.0  ;;  %v10630_v4 = vadd.f32 %v10008_v10, %v3854_v32  ;;  %9033 = vmatmul.mubr.msk.f32.gmra.mxu1 %vm435_vm0, %v348_v17  ;;  %v5114_v31 = vrot.slane %v5113_v19, 2  ;;  %8723 = vmatprep.mubr.msk.f32.mxu0 %vm435_vm0, %v141_v41  ;;  %v143_v41 = vld [vmem:[%s18976_s0 + $0x3f0] sm:$0xff] }
  0xfd   :  { %v5825_v33 = vsel %vm5091_vm1, %v19720_v36, -inf  ;;  %v5790_v1 = vrot.slane %v5789_v25, 2  ;;  %v10635_v22 = vadd.f32 %v10008_v10, %v3857_v34  ;;  %v4065_v47 = vmul.f32 %v10471_v3, %v9997_v6  ;;  %v10639_v18 = vpop.f32.mrf.mxu1  ;;  %v10641_v36 = vpop.f32.mrf.mxu0  ;;  %9035 = vmatprep.mubr.msk.f32.mxu1 %vm435_vm0, %v349_v51  ;;  %v351_v51 = vld [vmem:[%s18976_s0 + $0xa70] sm:$0xff] }
  0xfe   :  { %19721 = vst [vmem:[#allocation41_spill] sm:$0xff] %v10630_v4  ;;  %v5823_v3 = vsel %vm5091_vm1, %v19030_v40, -inf  ;;  %v3856_v17 = vmul.f32 %v9997_v6, %v10489_v23  ;;  %v4064_v32 = vmul.f32 %v9997_v6, %v10491_v58  ;;  %v19723_v40 = vmax.f32 %v10533_v24, %v10528_v38 }
  0xff   :  { %19722 = vst [vmem:[#allocation42_spill] sm:$0xff] %v10635_v22  ;;  %6652 = vrot.lane.b32.xlu0 %v5780_v53, %s9180_s10  ;;  %v5791_v34 = vmax.f32 %v5789_v25, %v5790_v1  ;;  %v5115_v50 = vmax.f32 %v5113_v19, %v5114_v31  ;;  %v19038_v23 = vmax.f32 %v10635_v22, 0.0  ;;  %v10670_v54 = vpop.f32.mrf.mxu0  ;;  %v10672_v58 = vpop.f32.mrf.mxu1  ;;  %v19724_v57 = vmax.f32 %v10630_v4, 0.0  ;;  %8724 = vmatmul.mubr.msk.f32.gmra.mxu0 %vm435_vm0, %v142_v59 }
 0x100   :  { %v5824_v30 = vmax.f32 %v19723_v40, %v5823_v3  ;;  %v10678_v44 = vadd.f32 %v10008_v10, %v4065_v47  ;;  %v10681_v53 = vadd.f32 %v10008_v10, %v3856_v17  ;;  %v10684_v38 = vadd.f32 %v10008_v10, %v4064_v32  ;;  %9036 = vmatmul.mubr.msk.f32.gmra.mxu1 %vm435_vm0, %v350_v27  ;;  %v144_v47 = vld [vmem:[%s18976_s0 + $0x3f8] sm:$0xff] }
 0x101   :  { %v5147_v48 = vsel %vm5091_vm1, %v19724_v57, -inf  ;;  %v5792_v24 = vrot.slane %v5791_v34, 1  ;;  %v5116_v19 = vrot.slane %v5115_v50, 1  ;;  %v19728_v57 = vmax.f32 %v10568_v2, %v10518_v49  ;;  %v10693_v1 = vpop.f32.mrf.mxu1  ;;  %v10695_v31 = vpop.f32.mrf.mxu0  ;;  %8726 = vmatprep.mubr.msk.f32.mxu0 %vm435_vm0, %v143_v41  ;;  %9038 = vmatprep.mubr.msk.f32.mxu1 %vm435_vm0, %v351_v51  ;;  %v145_v51 = vld [vmem:[%s18976_s0 + $0x400] sm:$0xff] }
 0x102   :  { %19725 = vst [vmem:[#allocation43_spill] sm:$0xff] %v10678_v44  ;;  %19726 = vst [vmem:[#allocation44_spill] sm:$0xff] %v10681_v53  ;;  %v10688_v25 = vmax.f32 %v5824_v30, %v5825_v33  ;;  %v352_v33 = vld [vmem:[%s18976_s0 + $0xa78] sm:$0xff]  ;;  %v19036_v49 = vmax.f32 %v10678_v44, 0.0  ;;  %v19039_v2 = vmax.f32 %v10681_v53, 0.0  ;;  %v19037_v59 = vmax.f32 %v10684_v38, 0.0 }
 0x103   :  { %19727 = vst [vmem:[#allocation45_spill] sm:$0xff] %v10684_v38  ;;  %v5148_v40 = vmax.f32 %v19728_v57, %v5147_v48  ;;  %v10708_v48 = vsel %vm5091_vm1, %v19038_v23, -inf  ;;  %v5793_v27 = vmax.f32 %v5791_v34, %v5792_v24  ;;  %v5117_v3 = vmax.f32 %v5115_v50, %v5116_v19  ;;  %v10717_v32 = vpop.f32.mrf.mxu0  ;;  %v10719_v41 = vpop.f32.mrf.mxu1  ;;  %v353_v57 = vld [vmem:[%s18976_s0 + $0xa80] sm:$0xff]  ;;  %8727 = vmatmul.mubr.msk.f32.gmra.mxu0 %vm435_vm0, %v144_v47 }
 0x104   :  { %v3859_v17 = vmul.f32 %v10520_v12, %v9997_v6  ;;  %v10735_v12 = vsel %vm5091_vm1, %v19039_v2, -inf  ;;  %v10740_v50 = vsel %vm5091_vm1, %v19037_v59, -inf  ;;  %v4067_v34 = vmul.f32 %v10523_v11, %v9997_v6  ;;  %9039 = vmatmul.mubr.msk.f32.gmra.mxu1 %vm435_vm0, %v352_v33  ;;  %v146_v33 = vld [vmem:[%s18976_s0 + $0x408] sm:$0xff]  ;;  %8729 = vmatprep.mubr.msk.f32.mxu0 %vm435_vm0, %v145_v51 }
 0x105   :  { %v10713_v30 = vmax.f32 %v5148_v40, %v5149_v60  ;;  %v10730_v60 = vsel %vm5091_vm1, %v19036_v49, -inf  ;;  %6654 = vrot.lane.b32.xlu1 %v5793_v27, %s9180_s10  ;;  %6550 = vrot.lane.b32.xlu0 %v5117_v3, %s9180_s10  ;;  %v5159_v24 = vmax.f32 %v10735_v12, %v10708_v48  ;;  %v5801_v49 = vrot.slane %v10407_v9, 4  ;;  %v10756_v11 = vpop.f32.mrf.mxu1  ;;  %v10758_v47 = vpop.f32.mrf.mxu0  ;;  %v354_v48 = vld [vmem:[%s18976_s0 + $0xa88] sm:$0xff]  ;;  %v147_v12 = vld [vmem:[%s18976_s0 + $0x410] sm:$0xff] }
 0x106   :  { %v5835_v19 = vmax.f32 %v10740_v50, %v10730_v60  ;;  %v10753_v40 = vadd.f32 %v10008_v10, %v3859_v17  ;;  %v10767_v27 = vadd.f32 %v10008_v10, %v4067_v34  ;;  %v4066_v3 = vmul.f32 %v9997_v6, %v10543_v26  ;;  %9041 = vmatprep.mubr.msk.f32.mxu1 %vm435_vm0, %v353_v57  ;;  %v355_v50 = vld [vmem:[%s18976_s0 + $0xa90] sm:$0xff] }
 0x107   :  { %v5125_v17 = vrot.slane %v10405_v55, 4  ;;  %v3858_v60 = vmul.f32 %v9997_v6, %v10545_v35  ;;  %v5802_v26 = vmax.f32 %v10407_v9, %v5801_v49  ;;  %v3861_v59 = vmul.f32 %v10572_v56, %v9997_v6  ;;  %v10788_v51 = vpop.f32.mrf.mxu0  ;;  %v10790_v57 = vpop.f32.mrf.mxu1  ;;  %8730 = vmatmul.mubr.msk.f32.gmra.mxu0 %vm435_vm0, %v146_v33  ;;  %v148_v33 = vld [vmem:[%s18976_s0 + $0x418] sm:$0xff] }
 0x108   :  { %19729 = vst [vmem:[#allocation46_spill] sm:$0xff] %v10753_v40  ;;  %19730 = vst [vmem:[#allocation47_spill] sm:$0xff] %v10767_v27  ;;  %v4069_v35 = vmul.f32 %v10575_v37, %v9997_v6  ;;  %v10794_v2 = vadd.f32 %v10008_v10, %v4066_v3  ;;  %9042 = vmatmul.mubr.msk.f32.gmra.mxu1 %vm435_vm0, %v354_v48  ;;  %v19733_v9 = vmax.f32 %v10753_v40, 0.0  ;;  %8732 = vmatprep.mubr.msk.f32.mxu0 %vm435_vm0, %v147_v12  ;;  %v149_v12 = vld [vmem:[%s18976_s0 + $0x420] sm:$0xff] }
 0x109   :  { %v5126_v44 = vmax.f32 %v10405_v55, %v5125_v17  ;;  %v10798_v34 = vadd.f32 %v10008_v10, %v3858_v60  ;;  %v5803_v37 = vrot.slane %v5802_v26, 2  ;;  %v10806_v49 = vadd.f32 %v10008_v10, %v3861_v59  ;;  %v10811_v23 = vpop.f32.mrf.mxu1  ;;  %v10813_v55 = vpop.f32.mrf.mxu0  ;;  %9044 = vmatprep.mubr.msk.f32.mxu1 %vm435_vm0, %v355_v50  ;;  %v356_v59 = vld [vmem:[%s18976_s0 + $0xa98] sm:$0xff]  ;;  %v357_v50 = vld [vmem:[%s18976_s0 + $0xaa0] sm:$0xff] }
 0x10a   :  { %19731 = vst [vmem:[#allocation48_spill] sm:$0xff] %v10794_v2  ;;  %v5162_v56 = vsel %vm5091_vm1, %v19733_v9, -inf  ;;  %v10809_v3 = vadd.f32 %v10008_v10, %v4069_v35  ;;  %v19736_v48 = vmax.f32 %v10767_v27, 0.0  ;;  %v19737_v9 = vmax.f32 %v10794_v2, 0.0 }
 0x10b   :  { %19732 = vst [vmem:[#allocation49_spill] sm:$0xff] %v10798_v34  ;;  %19734 = vst [vmem:[#allocation50_spill] sm:$0xff] %v10806_v49  ;;  %v5127_v35 = vrot.slane %v5126_v44, 2  ;;  %v5804_v38 = vmax.f32 %v5802_v26, %v5803_v37  ;;  %v10838_v60 = vpop.f32.mrf.mxu0  ;;  %v10840_v22 = vpop.f32.mrf.mxu1  ;;  %v19738_v5 = vmax.f32 %v10798_v34, 0.0  ;;  %v4068_v37 = vmul.f32 %v9997_v6, %v10591_v39  ;;  %8733 = vmatmul.mubr.msk.f32.gmra.mxu0 %vm435_vm0, %v148_v33  ;;  %v150_v39 = vld [vmem:[%s18976_s0 + $0x428] sm:$0xff] }
 0x10c   :  { %19735 = vst [vmem:[#allocation51_spill] sm:$0xff] %v10809_v3  ;;  %v5838_v17 = vsel %vm5091_vm1, %v19736_v48, -inf  ;;  %v3860_v48 = vmul.f32 %v9997_v6, %v10589_v14  ;;  %v5836_v53 = vsel %vm5091_vm1, %v19737_v9, -inf  ;;  %9045 = vmatmul.mubr.msk.f32.gmra.mxu1 %vm435_vm0, %v356_v59  ;;  %v19739_v63 = vmax.f32 %v10806_v49, 0.0  ;;  %8735 = vmatprep.mubr.msk.f32.mxu0 %vm435_vm0, %v149_v12  ;;  %v151_v59 = vld [vmem:[%s18976_s0 + $0x430] sm:$0xff] }
 0x10d   :  { %v5128_v4 = vmax.f32 %v5126_v44, %v5127_v35  ;;  %v5160_v26 = vsel %vm5091_vm1, %v19738_v5, -inf  ;;  %v5837_v14 = vmax.f32 %v5835_v19, %v5836_v53  ;;  %v5805_v27 = vrot.slane %v5804_v38, 1  ;;  %v10857_v44 = vpop.f32.mrf.mxu1  ;;  %v10859_v35 = vpop.f32.mrf.mxu0  ;;  %9047 = vmatprep.mubr.msk.f32.mxu1 %vm435_vm0, %v357_v50  ;;  %v358_v5 = vld [vmem:[%s18976_s0 + $0xaa8] sm:$0xff] }
 0x10e   :  { %v5161_v40 = vmax.f32 %v5159_v24, %v5160_v26  ;;  %v10855_v2 = vsel %vm5091_vm1, %v19739_v63, -inf  ;;  %v19740_v63 = vmax.f32 %v10809_v3, 0.0  ;;  %v10875_v19 = vadd.f32 %v10008_v10, %v3860_v48  ;;  %v359_v48 = vld [vmem:[%s18976_s0 + $0xab0] sm:$0xff] }
 0x10f   :  { %v5129_v53 = vrot.slane %v5128_v4, 1  ;;  %v10878_v33 = vadd.f32 %v10008_v10, %v4068_v37  ;;  %v10883_v9 = vmax.f32 %v5837_v14, %v5838_v17  ;;  %v5806_v12 = vmax.f32 %v5804_v38, %v5805_v27  ;;  %v10891_v3 = vpop.f32.mrf.mxu1  ;;  %8736 = vmatmul.mubr.msk.f32.gmra.mxu0 %vm435_vm0, %v150_v39  ;;  %v360_v14 = vld [vmem:[%s18976_s0 + $0xab8] sm:$0xff]  ;;  %v10937_v39 = vld [vmem:[%s18978_s3] ss:$0 sm:$0xff] }
 0x110   :  { %v10872_v24 = vsel %vm5091_vm1, %v19740_v63, -inf  ;;  %19741 = vst [vmem:[#allocation52_spill] sm:$0xff] %v10875_v19  ;;  %v10885_v50 = vmax.f32 %v5161_v40, %v5162_v56  ;;  %v3863_v26 = vmul.f32 %v10618_v8, %v9997_v6  ;;  %v10889_v63 = vpop.f32.mrf.mxu0  ;;  %v19053_v49 = vmax.f32 %v10875_v19, 0.0  ;;  %9048 = vmatmul.mubr.msk.f32.gmra.mxu1 %vm435_vm0, %v358_v5  ;;  %8738 = vmatprep.mubr.msk.f32.mxu0 %vm435_vm0, %v151_v59  ;;  %v153_v59 = vld [vmem:[%s18976_s0 + $0x440] sm:$0xff] }
 0x111   :  { %19742 = vst [vmem:[#allocation53_spill] sm:$0xff] %v10878_v33  ;;  %v5130_v37 = vmax.f32 %v5128_v4, %v5129_v53  ;;  %v19052_v17 = vmax.f32 %v10878_v33, 0.0  ;;  %v4071_v38 = vmul.f32 %v10620_v13, %v9997_v6  ;;  %6656 = vrot.lane.b32.xlu0 %v5806_v12, %s9180_s10  ;;  %v10909_v4 = vld [vmem:[%s18977_s2] ss:$0 sm:$0xff]  ;;  %v5138_v27 = vrot.slane %v10553_v52, 4  ;;  %v10916_v13 = vpop.f32.mrf.mxu1  ;;  %9050 = vmatprep.mubr.msk.f32.mxu1 %vm435_vm0, %v359_v48 }
 0x112   :  { %v10904_v8 = vadd.f32 %v10008_v10, %v3863_v26  ;;  %v4070_v40 = vmul.f32 %v10909_v4, %v10639_v18  ;;  %v3862_v6 = vmul.f32 %v10909_v4, %v10641_v36  ;;  %v10918_v56 = vpop.f32.mrf.mxu0  ;;  %v152_v10 = vld [vmem:[%s18976_s0 + $0x438] sm:$0xff]  ;;  %v5170_v18 = vsel %vm5091_vm1, %v19053_v49, -inf  ;;  %v361_v12 = vld [vmem:[%s18976_s0 + $0xac0] sm:$0xff] }
 0x113   :  { %6552 = vrot.lane.b32.xlu1 %v5130_v37, %s9180_s10  ;;  %v5846_v36 = vsel %vm5091_vm1, %v19052_v17, -inf  ;;  %v10940_v5 = vadd.f32 %v10937_v39, %v4071_v38  ;;  %v3865_v53 = vmul.f32 %v10909_v4, %v10670_v54  ;;  %v5172_v26 = vmax.f32 %v5170_v18, %v10855_v2  ;;  %v10959_v48 = vpop.f32.mrf.mxu1  ;;  %8739 = vmatmul.mubr.msk.f32.gmra.mxu0 %vm435_vm0, %v152_v10  ;;  %v154_v10 = vld [vmem:[%s18976_s0 + $0x448] sm:$0xff] }
 0x114   :  { %19743 = vst [vmem:[#allocation54_spill] sm:$0xff] %v10904_v8  ;;  %v5848_v37 = vmax.f32 %v5846_v36, %v10872_v24  ;;  %v19056_v38 = vmax.f32 %v10904_v8, 0.0  ;;  %v10955_v17 = vadd.f32 %v10937_v39, %v4070_v40  ;;  %v10957_v54 = vpop.f32.mrf.mxu0  ;;  %v5139_v33 = vmax.f32 %v10553_v52, %v5138_v27  ;;  %9051 = vmatmul.mubr.msk.f32.gmra.mxu1 %vm435_vm0, %v360_v14  ;;  %v362_v14 = vld [vmem:[%s18976_s0 + $0xac8] sm:$0xff] }
 0x115   :  { %19744 = vst [vmem:[#allocation55_spill] sm:$0xff] %v10940_v5  ;;  %v19058_v49 = vmax.f32 %v10940_v5, 0.0  ;;  %v10964_v19 = vadd.f32 %v10937_v39, %v3862_v6  ;;  %v10967_v2 = vadd.f32 %v10937_v39, %v3865_v53  ;;  %v4073_v18 = vmul.f32 %v10909_v4, %v10672_v58  ;;  %v10979_v27 = vpop.f32.mrf.mxu1  ;;  %8741 = vmatprep.mubr.msk.f32.mxu0 %vm435_vm0, %v153_v59  ;;  %v155_v59 = vld [vmem:[%s18976_s0 + $0x450] sm:$0xff] }
 0x116   :  { %19745 = vst [vmem:[#allocation56_spill] sm:$0xff] %v10955_v17  ;;  %v5175_v24 = vsel %vm5091_vm1, %v19056_v38, -inf  ;;  %v19064_v40 = vmax.f32 %v10955_v17, 0.0  ;;  %v4072_v52 = vmul.f32 %v10909_v4, %v10693_v1  ;;  %v10981_v6 = vpop.f32.mrf.mxu0  ;;  %9053 = vmatprep.mubr.msk.f32.mxu1 %vm435_vm0, %v361_v12  ;;  %v5140_v1 = vrot.slane %v5139_v33, 2  ;;  %v363_v12 = vld [vmem:[%s18976_s0 + $0xad0] sm:$0xff] }
 0x117   :  { %19746 = vst [vmem:[#allocation57_spill] sm:$0xff] %v10964_v19  ;;  %19747 = vst [vmem:[#allocation58_spill] sm:$0xff] %v10967_v2  ;;  %v5851_v58 = vsel %vm5091_vm1, %v19058_v49, -inf  ;;  %v11006_v5 = vadd.f32 %v10937_v39, %v4073_v18  ;;  %v5814_v53 = vrot.slane %v10551_v46, 4  ;;  %v11014_v8 = vpop.f32.mrf.mxu1  ;;  %v19750_v45 = vmax.f32 %v10964_v19, 0.0  ;;  %8742 = vmatmul.mubr.msk.f32.gmra.mxu0 %vm435_vm0, %v154_v10  ;;  %v364_v10 = vld [vmem:[%s18976_s0 + $0xad8] sm:$0xff] }
 0x118   :  { %v5849_v38 = vsel %vm5091_vm1, %v19064_v40, -inf  ;;  %v11009_v49 = vadd.f32 %v10937_v39, %v4072_v52  ;;  %v11012_v36 = vpop.f32.mrf.mxu0  ;;  %v5141_v15 = vmax.f32 %v5139_v33, %v5140_v1  ;;  %v19751_v40 = vmax.f32 %v10967_v2, 0.0  ;;  %9054 = vmatmul.mubr.msk.f32.gmra.mxu1 %vm435_vm0, %v362_v14  ;;  %8744 = vmatprep.mubr.msk.f32.mxu0 %vm435_vm0, %v155_v59  ;;  %v157_v14 = vld [vmem:[%s18976_s0 + $0x460] sm:$0xff] }
 0x119   :  { %19748 = vst [vmem:[#allocation59_spill] sm:$0xff] %v11006_v5  ;;  %v5850_v34 = vmax.f32 %v5848_v37, %v5849_v38  ;;  %v5173_v17 = vsel %vm5091_vm1, %v19750_v45, -inf  ;;  %v19067_v7 = vmax.f32 %v11006_v5, 0.0  ;;  %v5815_v33 = vmax.f32 %v10551_v46, %v5814_v53  ;;  %v11029_v37 = vpop.f32.mrf.mxu1  ;;  %9056 = vmatprep.mubr.msk.f32.mxu1 %vm435_vm0, %v363_v12  ;;  %v156_v45 = vld [vmem:[%s18976_s0 + $0x458] sm:$0xff] }
 0x11a   :  { %19749 = vst [vmem:[#allocation60_spill] sm:$0xff] %v11009_v49  ;;  %v11022_v18 = vsel %vm5091_vm1, %v19751_v40, -inf  ;;  %v5174_v52 = vmax.f32 %v5172_v26, %v5173_v17  ;;  %v19068_v0 = vmax.f32 %v11009_v49, 0.0  ;;  %v11031_v38 = vpop.f32.mrf.mxu0  ;;  %v5142_v17 = vrot.slane %v5141_v15, 1 }
 0x11b   :  { %v11038_v40 = vmax.f32 %v5850_v34, %v5851_v58  ;;  %v3864_v26 = vmul.f32 %v10909_v4, %v10695_v31  ;;  %v3867_v46 = vmul.f32 %v10909_v4, %v10717_v32  ;;  %v11055_v34 = vsel %vm5091_vm1, %v19067_v7, -inf  ;;  %v11064_v53 = vpop.f32.mrf.mxu1  ;;  %8745 = vmatmul.mubr.msk.f32.gmra.mxu0 %vm435_vm0, %v156_v45 }
 0x11c   :  { %v11050_v1 = vmax.f32 %v5174_v52, %v5175_v24  ;;  %v11060_v31 = vsel %vm5091_vm1, %v19068_v0, -inf  ;;  %v5816_v32 = vrot.slane %v5815_v33, 2  ;;  %v11062_v58 = vpop.f32.mrf.mxu0  ;;  %v365_v24 = vld [vmem:[%s18976_s0 + $0xae0] sm:$0xff]  ;;  %v5143_v59 = vmax.f32 %v5141_v15, %v5142_v17  ;;  %9057 = vmatmul.mubr.msk.f32.gmra.mxu1 %vm435_vm0, %v364_v10  ;;  %8747 = vmatprep.mubr.msk.f32.mxu0 %vm435_vm0, %v157_v14  ;;  %v366_v10 = vld [vmem:[%s18976_s0 + $0xae8] sm:$0xff]  ;;  %v159_v14 = vld [vmem:[%s18976_s0 + $0x470] sm:$0xff] }
 0x11d   :  { %v5861_v12 = vmax.f32 %v11060_v31, %v11055_v34  ;;  %v11072_v52 = vadd.f32 %v10937_v39, %v3864_v26  ;;  %v11075_v7 = vadd.f32 %v10937_v39, %v3867_v46  ;;  %v4075_v5 = vmul.f32 %v10909_v4, %v10719_v41  ;;  %v11084_v17 = vpop.f32.mrf.mxu1  ;;  %9059 = vmatprep.mubr.msk.f32.mxu1 %vm435_vm0, %v365_v24 }
 0x11e   :  { %v5817_v0 = vmax.f32 %v5815_v33, %v5816_v32  ;;  %v4074_v49 = vmul.f32 %v10909_v4, %v10756_v11  ;;  %v5151_v15 = vrot.slane %v10713_v30, 4  ;;  %v11086_v26 = vpop.f32.mrf.mxu0  ;;  %v158_v33 = vld [vmem:[%s18976_s0 + $0x468] sm:$0xff]  ;;  %6554 = vrot.lane.b32.xlu1 %v5143_v59, %s9180_s10  ;;  %v3866_v45 = vmul.f32 %v10909_v4, %v10758_v47  ;;  %v367_v59 = vld [vmem:[%s18976_s0 + $0xaf0] sm:$0xff] }
 0x11f   :  { %19752 = vst [vmem:[#allocation61_spill] sm:$0xff] %v11072_v52  ;;  %19753 = vst [vmem:[#allocation62_spill] sm:$0xff] %v11075_v7  ;;  %v19075_v41 = vmax.f32 %v11072_v52, 0.0  ;;  %v3869_v46 = vmul.f32 %v10909_v4, %v10788_v51  ;;  %v11107_v31 = vadd.f32 %v10937_v39, %v4075_v5  ;;  %v11115_v24 = vpop.f32.mrf.mxu1  ;;  %v19756_v5 = vmax.f32 %v11075_v7, 0.0  ;;  %8748 = vmatmul.mubr.msk.f32.gmra.mxu0 %vm435_vm0, %v158_v33 }
 0x120   :  { %v5818_v34 = vrot.slane %v5817_v0, 1  ;;  %v11110_v32 = vadd.f32 %v10937_v39, %v4074_v49  ;;  %v5152_v47 = vmax.f32 %v10713_v30, %v5151_v15  ;;  %v11113_v51 = vpop.f32.mrf.mxu0  ;;  %v11127_v49 = vadd.f32 %v10937_v39, %v3866_v45  ;;  %9060 = vmatmul.mubr.msk.f32.gmra.mxu1 %vm435_vm0, %v366_v10  ;;  %8750 = vmatprep.mubr.msk.f32.mxu0 %vm435_vm0, %v159_v14  ;;  %v160_v45 = vld [vmem:[%s18976_s0 + $0x478] sm:$0xff] }
 0x121   :  { %19754 = vst [vmem:[#allocation63_spill] sm:$0xff] %v11107_v31  ;;  %v5183_v11 = vsel %vm5091_vm1, %v19075_v41, -inf  ;;  %v5188_v2 = vsel %vm5091_vm1, %v19756_v5, -inf  ;;  %v11130_v30 = vadd.f32 %v10937_v39, %v3869_v46  ;;  %v19076_v16 = vmax.f32 %v11107_v31, 0.0  ;;  %v11137_v41 = vpop.f32.mrf.mxu1  ;;  %9062 = vmatprep.mubr.msk.f32.mxu1 %vm435_vm0, %v367_v59  ;;  %v368_v46 = vld [vmem:[%s18976_s0 + $0xaf8] sm:$0xff] }
 0x122   :  { %19755 = vst [vmem:[#allocation64_spill] sm:$0xff] %v11110_v32  ;;  %19757 = vst [vmem:[#allocation65_spill] sm:$0xff] %v11127_v49  ;;  %v5819_v15 = vmax.f32 %v5817_v0, %v5818_v34  ;;  %v5185_v19 = vmax.f32 %v5183_v11, %v11022_v18  ;;  %v19078_v52 = vmax.f32 %v11110_v32, 0.0  ;;  %v11139_v5 = vpop.f32.mrf.mxu0  ;;  %v5153_v33 = vrot.slane %v5152_v47, 2 }
 0x123   :  { %19758 = vst [vmem:[#allocation66_spill] sm:$0xff] %v11130_v30  ;;  %v4077_v11 = vmul.f32 %v10909_v4, %v10790_v57  ;;  %v5864_v10 = vsel %vm5091_vm1, %v19076_v16, -inf  ;;  %v4076_v34 = vmul.f32 %v10909_v4, %v10811_v23  ;;  %v5827_v57 = vrot.slane %v10688_v25, 4  ;;  %v11165_v18 = vpop.f32.mrf.mxu1  ;;  %v369_v16 = vld [vmem:[%s18976_s0 + $0xb00] sm:$0xff]  ;;  %8751 = vmatmul.mubr.msk.f32.gmra.mxu0 %vm435_vm0, %v160_v45 }
 0x124   :  { %6658 = vrot.lane.b32.xlu1 %v5819_v15, %s9180_s10  ;;  %v5862_v14 = vsel %vm5091_vm1, %v19078_v52, -inf  ;;  %v11163_v59 = vpop.f32.mrf.mxu0  ;;  %v161_v15 = vld [vmem:[%s18976_s0 + $0x480] sm:$0xff]  ;;  %v5154_v31 = vmax.f32 %v5152_v47, %v5153_v33  ;;  %v19759_v52 = vmax.f32 %v11127_v49, 0.0  ;;  %v19760_v32 = vmax.f32 %v11130_v30, 0.0  ;;  %9063 = vmatmul.mubr.msk.f32.gmra.mxu1 %vm435_vm0, %v368_v46 }
 0x125   :  { %v5863_v0 = vmax.f32 %v5861_v12, %v5862_v14  ;;  %v11183_v62 = vadd.f32 %v10937_v39, %v4077_v11  ;;  %v11186_v21 = vadd.f32 %v10937_v39, %v4076_v34  ;;  %v5828_v12 = vmax.f32 %v10688_v25, %v5827_v57  ;;  %v11190_v47 = vpop.f32.mrf.mxu1  ;;  %8753 = vmatprep.mubr.msk.f32.mxu0 %vm435_vm0, %v161_v15  ;;  %v370_v25 = vld [vmem:[%s18976_s0 + $0xb08] sm:$0xff] }
 0x126   :  { %v5186_v23 = vsel %vm5091_vm1, %v19759_v52, -inf  ;;  %v11179_v7 = vsel %vm5091_vm1, %v19760_v32, -inf  ;;  %v11192_v52 = vpop.f32.mrf.mxu0  ;;  %v162_v32 = vld [vmem:[%s18976_s0 + $0x488] sm:$0xff]  ;;  %v3868_v33 = vmul.f32 %v10909_v4, %v10813_v55  ;;  %v3871_v11 = vmul.f32 %v10909_v4, %v10838_v60  ;;  %9065 = vmatprep.mubr.msk.f32.mxu1 %vm435_vm0, %v369_v16  ;;  %v371_v16 = vld [vmem:[%s18976_s0 + $0xb10] sm:$0xff] }
 0x127   :  { %v5187_v43 = vmax.f32 %v5185_v19, %v5186_v23  ;;  %19761 = vst [vmem:[#allocation67_spill] sm:$0xff] %v11183_v62  ;;  %19762 = vst [vmem:[#allocation68_spill] sm:$0xff] %v11186_v21  ;;  %v11197_v45 = vmax.f32 %v5863_v0, %v5864_v10  ;;  %v5155_v19 = vrot.slane %v5154_v31, 1  ;;  %v163_v0 = vld [vmem:[%s18976_s0 + $0x490] sm:$0xff]  ;;  %v19085_v10 = vmax.f32 %v11183_v62, 0.0  ;;  %v11217_v34 = vpop.f32.mrf.mxu1  ;;  %8754 = vmatmul.mubr.msk.f32.gmra.mxu0 %vm435_vm0, %v162_v32 }
 0x128   :  { %v19086_v55 = vmax.f32 %v11186_v21, 0.0  ;;  %v5829_v14 = vrot.slane %v5828_v12, 2  ;;  %v11215_v60 = vpop.f32.mrf.mxu0  ;;  %v11223_v15 = vadd.f32 %v10937_v39, %v3868_v33  ;;  %9066 = vmatmul.mubr.msk.f32.gmra.mxu1 %vm435_vm0, %v370_v25  ;;  %8756 = vmatprep.mubr.msk.f32.mxu0 %vm435_vm0, %v163_v0  ;;  %v372_v25 = vld [vmem:[%s18976_s0 + $0xb18] sm:$0xff]  ;;  %v165_v0 = vld [vmem:[%s18976_s0 + $0x4a0] sm:$0xff]  ;;  %v3872_v61 = vmul.f32 %v10909_v4, %v10918_v56 }
 0x129   :  { %v11211_v46 = vmax.f32 %v5187_v43, %v5188_v2  ;;  %v5156_v57 = vmax.f32 %v5154_v31, %v5155_v19  ;;  %v11226_v43 = vadd.f32 %v10937_v39, %v3871_v11  ;;  %v4079_v2 = vmul.f32 %v10909_v4, %v10840_v22  ;;  %v11240_v33 = vpop.f32.mrf.mxu1  ;;  %v164_v22 = vld [vmem:[%s18976_s0 + $0x498] sm:$0xff]  ;;  %9068 = vmatprep.mubr.msk.f32.mxu1 %vm435_vm0, %v371_v16 }
 0x12a   :  { %19763 = vst [vmem:[#allocation69_spill] sm:$0xff] %v11223_v15  ;;  %v5873_v23 = vsel %vm5091_vm1, %v19085_v10, -inf  ;;  %v5872_v30 = vsel %vm5091_vm1, %v19086_v55, -inf  ;;  %v5830_v31 = vmax.f32 %v5828_v12, %v5829_v14  ;;  %v4078_v19 = vmul.f32 %v10909_v4, %v10857_v44  ;;  %v11242_v11 = vpop.f32.mrf.mxu0  ;;  %v373_v55 = vld [vmem:[%s18976_s0 + $0xb20] sm:$0xff] }
 0x12b   :  { %19764 = vst [vmem:[#allocation70_spill] sm:$0xff] %v11226_v43  ;;  %6556 = vrot.lane.b32.xlu0 %v5156_v57, %s9180_s10  ;;  %v5874_v32 = vmax.f32 %v5872_v30, %v5873_v23  ;;  %v19093_v12 = vmax.f32 %v11223_v15, 0.0  ;;  %v11252_v44 = vadd.f32 %v10937_v39, %v4079_v2  ;;  %v5164_v57 = vrot.slane %v10885_v50, 4  ;;  %v11269_v16 = vpop.f32.mrf.mxu1  ;;  %8757 = vmatmul.mubr.msk.f32.gmra.mxu0 %vm435_vm0, %v164_v22  ;;  %v374_v22 = vld [vmem:[%s18976_s0 + $0xb28] sm:$0xff] }
 0x12c   :  { %v5831_v10 = vrot.slane %v5830_v31, 1  ;;  %v11262_v30 = vadd.f32 %v10937_v39, %v4078_v19  ;;  %v3870_v2 = vmul.f32 %v10909_v4, %v10859_v35  ;;  %v11267_v23 = vpop.f32.mrf.mxu0  ;;  %v19767_v19 = vmax.f32 %v11226_v43, 0.0  ;;  %9069 = vmatmul.mubr.msk.f32.gmra.mxu1 %vm435_vm0, %v372_v25  ;;  %8759 = vmatprep.mubr.msk.f32.mxu0 %vm435_vm0, %v165_v0 }
 0x12d   :  { %19765 = vst [vmem:[#allocation71_spill] sm:$0xff] %v11252_v44  ;;  %v5196_v14 = vsel %vm5091_vm1, %v19093_v12, -inf  ;;  %v19095_v21 = vmax.f32 %v11252_v44, 0.0  ;;  %v3873_v35 = vmul.f32 %v10909_v4, %v10889_v63  ;;  %v5165_v15 = vmax.f32 %v10885_v50, %v5164_v57  ;;  %v11288_v12 = vpop.f32.mrf.mxu1  ;;  %v166_v63 = vld [vmem:[%s18976_s0 + $0x4a8] sm:$0xff]  ;;  %9071 = vmatprep.mubr.msk.f32.mxu1 %vm435_vm0, %v373_v55  ;;  %v167_v55 = vld [vmem:[%s18976_s0 + $0x4b0] sm:$0xff] }
 0x12e   :  { %19766 = vst [vmem:[#allocation72_spill] sm:$0xff] %v11262_v30  ;;  %v5201_v62 = vsel %vm5091_vm1, %v19767_v19, -inf  ;;  %v5832_v49 = vmax.f32 %v5830_v31, %v5831_v10  ;;  %v5198_v29 = vmax.f32 %v5196_v14, %v11179_v7  ;;  %v19096_v42 = vmax.f32 %v11262_v30, 0.0  ;;  %v11290_v43 = vpop.f32.mrf.mxu0 }
 0x12f   :  { %v5877_v7 = vsel %vm5091_vm1, %v19095_v21, -inf  ;;  %v11300_v10 = vadd.f32 %v10937_v39, %v3870_v2  ;;  %v11303_v50 = vadd.f32 %v10937_v39, %v3873_v35  ;;  %v4081_v31 = vmul.f32 %v10909_v4, %v10891_v3  ;;  %v11320_v3 = vpop.f32.mrf.mxu1  ;;  %8760 = vmatmul.mubr.msk.f32.gmra.mxu0 %vm435_vm0, %v166_v63 }
 0x130   :  { %6660 = vrot.lane.b32.xlu0 %v5832_v49, %s9180_s10  ;;  %v5875_v14 = vsel %vm5091_vm1, %v19096_v42, -inf  ;;  %v5166_v25 = vrot.slane %v5165_v15, 2  ;;  %v4080_v0 = vmul.f32 %v10909_v4, %v10916_v13  ;;  %v5840_v57 = vrot.slane %v10883_v9, 4  ;;  %v11318_v2 = vpop.f32.mrf.mxu0  ;;  %v375_v49 = vld [vmem:[%s18976_s0 + $0xb30] sm:$0xff]  ;;  %9072 = vmatmul.mubr.msk.f32.gmra.mxu1 %vm435_vm0, %v374_v22  ;;  %v169_v22 = vld [vmem:[%s18976_s0 + $0x4c0] sm:$0xff] }
 0x131   :  { %19768 = vst [vmem:[#allocation73_spill] sm:$0xff] %v11300_v10  ;;  %19769 = vst [vmem:[#allocation74_spill] sm:$0xff] %v11303_v50  ;;  %v5876_v19 = vmax.f32 %v5874_v32, %v5875_v14  ;;  %v19101_v35 = vmax.f32 %v11300_v10, 0.0  ;;  %v19100_v21 = vmax.f32 %v11303_v50, 0.0  ;;  %v11331_v13 = vadd.f32 %v10937_v39, %v4081_v31  ;;  %v11341_v32 = vpop.f32.mrf.mxu1  ;;  %v168_v31 = vld [vmem:[%s18976_s0 + $0x4b8] sm:$0xff]  ;;  %8762 = vmatprep.mubr.msk.f32.mxu0 %vm435_vm0, %v167_v55  ;;  %v377_v55 = vld [vmem:[%s18976_s0 + $0xb40] sm:$0xff] }
 0x132   :  { %v5167_v42 = vmax.f32 %v5165_v15, %v5166_v25  ;;  %v11335_v44 = vadd.f32 %v10937_v39, %v4080_v0  ;;  %v5841_v30 = vmax.f32 %v10883_v9, %v5840_v57  ;;  %v11343_v14 = vpop.f32.mrf.mxu0  ;;  %9074 = vmatprep.mubr.msk.f32.mxu1 %vm435_vm0, %v375_v49  ;;  %v11381_v50 = vadd.f32 %v10937_v39, %v3872_v61 }
 0x133   :  { %19770 = vst [vmem:[#allocation75_spill] sm:$0xff] %v11331_v13  ;;  %v11348_v63 = vmax.f32 %v5876_v19, %v5877_v7  ;;  %v5199_v15 = vsel %vm5091_vm1, %v19101_v35, -inf  ;;  %v11356_v9 = vsel %vm5091_vm1, %v19100_v21, -inf  ;;  %v19106_v56 = vmax.f32 %v11331_v13, 0.0  ;;  %v376_v7 = vld [vmem:[%s18976_s0 + $0xb38] sm:$0xff]  ;;  %v11370_v35 = vpop.f32.mrf.mxu1  ;;  %8763 = vmatmul.mubr.msk.f32.gmra.mxu0 %vm435_vm0, %v168_v31 }
 0x134   :  { %19771 = vst [vmem:[#allocation76_spill] sm:$0xff] %v11335_v44  ;;  %v5168_v25 = vrot.slane %v5167_v42, 1  ;;  %v5200_v0 = vmax.f32 %v5198_v29, %v5199_v15  ;;  %v5842_v19 = vrot.slane %v5841_v30, 2  ;;  %v11368_v21 = vpop.f32.mrf.mxu0  ;;  %19772 = vst [vmem:[#allocation77_spill] sm:$0xff] %v11381_v50  ;;  %v3875_v29 = vmul.f32 %v10909_v4, %v10957_v54  ;;  %9075 = vmatmul.mubr.msk.f32.gmra.mxu1 %vm435_vm0, %v376_v7 }
 0x135   :  { %v11378_v49 = vsel %vm5091_vm1, %v19106_v56, -inf  ;;  %v4083_v15 = vmul.f32 %v10909_v4, %v10959_v48  ;;  %v19773_v20 = vmax.f32 %v11335_v44, 0.0  ;;  %v11396_v61 = vpop.f32.mrf.mxu1  ;;  %8765 = vmatprep.mubr.msk.f32.mxu0 %vm435_vm0, %v169_v22  ;;  %v19109_v54 = vmax.f32 %v11381_v50, 0.0  ;;  %9077 = vmatprep.mubr.msk.f32.mxu1 %vm435_vm0, %v377_v55 }
 0x136   :  { %v5169_v57 = vmax.f32 %v5167_v42, %v5168_v25  ;;  %v11388_v10 = vmax.f32 %v5200_v0, %v5201_v62  ;;  %v5843_v56 = vmax.f32 %v5841_v30, %v5842_v19  ;;  %v11398_v28 = vpop.f32.mrf.mxu0  ;;  %v170_v42 = vld [vmem:[%s18976_s0 + $0x4c8] sm:$0xff]  ;;  %v5177_v7 = vrot.slane %v11050_v1, 4  ;;  %v171_v19 = vld [vmem:[%s18976_s0 + $0x4d0] sm:$0xff] }
 0x137   :  { %v11393_v13 = vsel %vm5091_vm1, %v19773_v20, -inf  ;;  %v11408_v20 = vadd.f32 %v10937_v39, %v3875_v29  ;;  %v11411_v48 = vadd.f32 %v10937_v39, %v4083_v15  ;;  %v378_v30 = vld [vmem:[%s18976_s0 + $0xb48] sm:$0xff]  ;;  %v3874_v22 = vmul.f32 %v10909_v4, %v10981_v6  ;;  %v11425_v0 = vpop.f32.mrf.mxu1  ;;  %8766 = vmatmul.mubr.msk.f32.gmra.mxu0 %vm435_vm0, %v170_v42 }
 0x138   :  { %v5887_v62 = vmax.f32 %v11393_v13, %v11378_v49  ;;  %6558 = vrot.lane.b32.xlu1 %v5169_v57, %s9180_s10  ;;  %v5844_v31 = vrot.slane %v5843_v56, 1  ;;  %v4082_v13 = vmul.f32 %v10909_v4, %v10979_v27  ;;  %v11423_v25 = vpop.f32.mrf.mxu0  ;;  %19776 = vst [vmem:[#allocation80_spill] sm:$0xff] %v11425_v0  ;;  %v379_v57 = vld [vmem:[%s18976_s0 + $0xb50] sm:$0xff]  ;;  %v5209_v27 = vsel %vm5091_vm1, %v19109_v54, -inf  ;;  %9078 = vmatmul.mubr.msk.f32.gmra.mxu1 %vm435_vm0, %v378_v30 }
 0x139   :  { %19774 = vst [vmem:[#allocation78_spill] sm:$0xff] %v11408_v20  ;;  %19775 = vst [vmem:[#allocation79_spill] sm:$0xff] %v11411_v48  ;;  %v19110_v6 = vmax.f32 %v11411_v48, 0.0  ;;  %v3877_v49 = vmul.f32 %v10909_v4, %v11012_v36  ;;  %v5211_v15 = vmax.f32 %v5209_v27, %v11356_v9  ;;  %v5178_v0 = vmax.f32 %v11050_v1, %v5177_v7  ;;  %v11447_v54 = vpop.f32.mrf.mxu1  ;;  %v172_v36 = vld [vmem:[%s18976_s0 + $0x4d8] sm:$0xff] }
 0x13a   :  { %v5845_v29 = vmax.f32 %v5843_v56, %v5844_v31  ;;  %v11443_v44 = vadd.f32 %v10937_v39, %v4082_v13  ;;  %v11449_v55 = vpop.f32.mrf.mxu0  ;;  %v19778_v42 = vmax.f32 %v11408_v20, 0.0  ;;  %v11461_v1 = vadd.f32 %v10937_v39, %v3874_v22  ;;  %8768 = vmatprep.mubr.msk.f32.mxu0 %vm435_vm0, %v171_v19  ;;  %9080 = vmatprep.mubr.msk.f32.mxu1 %vm435_vm0, %v379_v57  ;;  %v380_v31 = vld [vmem:[%s18976_s0 + $0xb58] sm:$0xff]  ;;  %v173_v13 = vld [vmem:[%s18976_s0 + $0x4e0] sm:$0xff] }
 0x13b   :  { %v5890_v9 = vsel %vm5091_vm1, %v19110_v6, -inf  ;;  %v11464_v30 = vadd.f32 %v10937_v39, %v3877_v49  ;;  %v5179_v22 = vrot.slane %v5178_v0, 2  ;;  %v4085_v27 = vmul.f32 %v10909_v4, %v11014_v8  ;;  %v11482_v49 = vpop.f32.mrf.mxu1  ;;  %8769 = vmatmul.mubr.msk.f32.gmra.mxu0 %vm435_vm0, %v172_v36 }
 0x13c   :  { %19777 = vst [vmem:[#allocation81_spill] sm:$0xff] %v11443_v44  ;;  %v5214_v56 = vsel %vm5091_vm1, %v19778_v42, -inf  ;;  %19779 = vst [vmem:[#allocation82_spill] sm:$0xff] %v11461_v1  ;;  %6662 = vrot.lane.b32.xlu1 %v5845_v29, %s9180_s10  ;;  %v4084_v19 = vmul.f32 %v10909_v4, %v11029_v37  ;;  %v11480_v57 = vpop.f32.mrf.mxu0  ;;  %v381_v42 = vld [vmem:[%s18976_s0 + $0xb60] sm:$0xff]  ;;  %v5853_v7 = vrot.slane %v11038_v40, 4  ;;  %v3876_v8 = vmul.f32 %v10909_v4, %v11031_v38  ;;  %v174_v38 = vld [vmem:[%s18976_s0 + $0x4e8] sm:$0xff] }
 0x13d   :  { %19780 = vst [vmem:[#allocation83_spill] sm:$0xff] %v11464_v30  ;;  %19781 = vst [vmem:[#allocation84_spill] sm:$0xff] %v11482_v49  ;;  %v19782_v37 = vmax.f32 %v11443_v44, 0.0  ;;  %v5180_v20 = vmax.f32 %v5178_v0, %v5179_v22  ;;  %v11497_v50 = vadd.f32 %v10937_v39, %v4085_v27  ;;  %9081 = vmatmul.mubr.msk.f32.gmra.mxu1 %vm435_vm0, %v380_v31  ;;  %v11503_v29 = vpop.f32.mrf.mxu1  ;;  %8771 = vmatprep.mubr.msk.f32.mxu0 %vm435_vm0, %v173_v13  ;;  %v382_v13 = vld [vmem:[%s18976_s0 + $0xb68] sm:$0xff] }
 0x13e   :  { %v11500_v49 = vadd.f32 %v10937_v39, %v4084_v19  ;;  %v11505_v6 = vpop.f32.mrf.mxu0  ;;  %v19785_v0 = vmax.f32 %v11461_v1, 0.0  ;;  %v19786_v27 = vmax.f32 %v11464_v30, 0.0  ;;  %v5854_v31 = vmax.f32 %v11038_v40, %v5853_v7  ;;  %9083 = vmatprep.mubr.msk.f32.mxu1 %vm435_vm0, %v381_v42  ;;  %v383_v40 = vld [vmem:[%s18976_s0 + $0xb70] sm:$0xff] }
 0x13f   :  { %v5888_v48 = vsel %vm5091_vm1, %v19782_v37, -inf  ;;  %19783 = vst [vmem:[#allocation85_spill] sm:$0xff] %v11497_v50  ;;  %v11531_v44 = vpop.f32.mrf.mxu1  ;;  %v11539_v1 = vadd.f32 %v10937_v39, %v3876_v8  ;;  %8772 = vmatmul.mubr.msk.f32.gmra.mxu0 %vm435_vm0, %v174_v38 }
 0x140   :  { %19784 = vst [vmem:[#allocation86_spill] sm:$0xff] %v11500_v49  ;;  %v5889_v36 = vmax.f32 %v5887_v62, %v5888_v48  ;;  %v5212_v22 = vsel %vm5091_vm1, %v19785_v0, -inf  ;;  %v11517_v19 = vsel %vm5091_vm1, %v19786_v27, -inf  ;;  %v175_v62 = vld [vmem:[%s18976_s0 + $0x4f0] sm:$0xff]  ;;  %v5181_v48 = vrot.slane %v5180_v20, 1  ;;  %v11529_v27 = vpop.f32.mrf.mxu0  ;;  %19787 = vst [vmem:[#allocation87_spill] sm:$0xff] %v11531_v44 }
 0x141   :  { %v5213_v37 = vmax.f32 %v5211_v15, %v5212_v22  ;;  %v19117_v0 = vmax.f32 %v11497_v50, 0.0  ;;  %v5855_v42 = vrot.slane %v5854_v31, 2  ;;  %19788 = vst [vmem:[#allocation88_spill] sm:$0xff] %v11539_v1  ;;  %v3879_v15 = vmul.f32 %v10909_v4, %v11062_v58  ;;  %9084 = vmatmul.mubr.msk.f32.gmra.mxu1 %vm435_vm0, %v382_v13  ;;  %v11557_v8 = vpop.f32.mrf.mxu1  ;;  %8774 = vmatprep.mubr.msk.f32.mxu0 %vm435_vm0, %v175_v62  ;;  %v384_v13 = vld [vmem:[%s18976_s0 + $0xb78] sm:$0xff] }
 0x142   :  { %v11536_v7 = vmax.f32 %v5889_v36, %v5890_v9  ;;  %v5182_v22 = vmax.f32 %v5180_v20, %v5181_v48  ;;  %v19789_v9 = vmax.f32 %v11500_v49, 0.0  ;;  %v11559_v58 = vpop.f32.mrf.mxu0  ;;  %v176_v20 = vld [vmem:[%s18976_s0 + $0x4f8] sm:$0xff]  ;;  %v19120_v48 = vmax.f32 %v11539_v1, 0.0  ;;  %9086 = vmatprep.mubr.msk.f32.mxu1 %vm435_vm0, %v383_v40 }
 0x143   :  { %v11544_v30 = vmax.f32 %v5213_v37, %v5214_v56  ;;  %v11549_v44 = vsel %vm5091_vm1, %v19117_v0, -inf  ;;  %v5856_v38 = vmax.f32 %v5854_v31, %v5855_v42  ;;  %v11569_v37 = vadd.f32 %v10937_v39, %v3879_v15  ;;  %v11585_v40 = vpop.f32.mrf.mxu1  ;;  %8775 = vmatmul.mubr.msk.f32.gmra.mxu0 %vm435_vm0, %v176_v20 }
 0x144   :  { %v11554_v36 = vsel %vm5091_vm1, %v19789_v9, -inf  ;;  %6560 = vrot.lane.b32.xlu0 %v5182_v22, %s9180_s10  ;;  %v4087_v62 = vmul.f32 %v10909_v4, %v11064_v53  ;;  %v5190_v31 = vrot.slane %v11211_v46, 4  ;;  %v3878_v42 = vmul.f32 %v10909_v4, %v11086_v26  ;;  %v11583_v15 = vpop.f32.mrf.mxu0  ;;  %19791 = vst [vmem:[#allocation90_spill] sm:$0xff] %v11585_v40  ;;  %v177_v9 = vld [vmem:[%s18976_s0 + $0x500] sm:$0xff] }
 0x145   :  { %v5900_v56 = vmax.f32 %v11554_v36, %v11549_v44  ;;  %19790 = vst [vmem:[#allocation89_spill] sm:$0xff] %v11569_v37  ;;  %v4086_v44 = vmul.f32 %v10909_v4, %v11084_v17  ;;  %v385_v53 = vld [vmem:[%s18976_s0 + $0xb80] sm:$0xff]  ;;  %v5857_v22 = vrot.slane %v5856_v38, 1  ;;  %v5222_v17 = vsel %vm5091_vm1, %v19120_v48, -inf  ;;  %9087 = vmatmul.mubr.msk.f32.gmra.mxu1 %vm435_vm0, %v384_v13  ;;  %v11609_v48 = vpop.f32.mrf.mxu1  ;;  %8777 = vmatprep.mubr.msk.f32.mxu0 %vm435_vm0, %v177_v9  ;;  %v386_v13 = vld [vmem:[%s18976_s0 + $0xb88] sm:$0xff] }
 0x146   :  { %v3881_v26 = vmul.f32 %v10909_v4, %v11113_v51  ;;  %v5224_v0 = vmax.f32 %v5222_v17, %v11517_v19  ;;  %v11602_v50 = vadd.f32 %v10937_v39, %v4087_v62  ;;  %v5191_v40 = vmax.f32 %v11211_v46, %v5190_v31  ;;  %v11611_v36 = vpop.f32.mrf.mxu0  ;;  %v178_v51 = vld [vmem:[%s18976_s0 + $0x508] sm:$0xff]  ;;  %9089 = vmatprep.mubr.msk.f32.mxu1 %vm435_vm0, %v385_v53  ;;  %v387_v53 = vld [vmem:[%s18976_s0 + $0xb90] sm:$0xff] }
 0x147   :  { %v11605_v49 = vadd.f32 %v10937_v39, %v4086_v44  ;;  %v5858_v20 = vmax.f32 %v5856_v38, %v5857_v22  ;;  %v19794_v19 = vmax.f32 %v11569_v37, 0.0  ;;  %v11620_v44 = vadd.f32 %v10937_v39, %v3878_v42  ;;  %v179_v38 = vld [vmem:[%s18976_s0 + $0x510] sm:$0xff]  ;;  %v11639_v9 = vpop.f32.mrf.mxu1  ;;  %8778 = vmatmul.mubr.msk.f32.gmra.mxu0 %vm435_vm0, %v178_v51  ;;  %v180_v51 = vld [vmem:[%s18976_s0 + $0x518] sm:$0xff] }
 0x148   :  { %19792 = vst [vmem:[#allocation91_spill] sm:$0xff] %v11602_v50  ;;  %v11623_v46 = vadd.f32 %v10937_v39, %v3881_v26  ;;  %v5192_v22 = vrot.slane %v5191_v40, 2  ;;  %v4089_v17 = vmul.f32 %v10909_v4, %v11115_v24  ;;  %v11637_v26 = vpop.f32.mrf.mxu0  ;;  %19798 = vst [vmem:[#allocation96_spill] sm:$0xff] %v11639_v9  ;;  %v4088_v42 = vmul.f32 %v10909_v4, %v11137_v41 }
 0x149   :  { %19793 = vst [vmem:[#allocation92_spill] sm:$0xff] %v11605_v49  ;;  %v5227_v62 = vsel %vm5091_vm1, %v19794_v19, -inf  ;;  %19795 = vst [vmem:[#allocation93_spill] sm:$0xff] %v11620_v44  ;;  %6664 = vrot.lane.b32.xlu0 %v5858_v20, %s9180_s10  ;;  %v5866_v37 = vrot.slane %v11197_v45, 4  ;;  %v19799_v24 = vmax.f32 %v11602_v50, 0.0  ;;  %v19800_v9 = vmax.f32 %v11605_v49, 0.0  ;;  %9090 = vmatmul.mubr.msk.f32.gmra.mxu1 %vm435_vm0, %v386_v13  ;;  %v11661_v31 = vpop.f32.mrf.mxu1 }
 0x14a   :  { %19796 = vst [vmem:[#allocation94_spill] sm:$0xff] %v11623_v46  ;;  %19797 = vst [vmem:[#allocation95_spill] sm:$0xff] %v11637_v26  ;;  %v5193_v20 = vmax.f32 %v5191_v40, %v5192_v22  ;;  %v11658_v19 = vadd.f32 %v10937_v39, %v4089_v17  ;;  %v11663_v41 = vpop.f32.mrf.mxu0  ;;  %8780 = vmatprep.mubr.msk.f32.mxu0 %vm435_vm0, %v179_v38  ;;  %v19803_v50 = vmax.f32 %v11620_v44, 0.0  ;;  %v19804_v22 = vmax.f32 %v11623_v46, 0.0  ;;  %v388_v38 = vld [vmem:[%s18976_s0 + $0xb98] sm:$0xff] }
 0x14b   :  { %v5903_v1 = vsel %vm5091_vm1, %v19799_v24, -inf  ;;  %v5901_v26 = vsel %vm5091_vm1, %v19800_v9, -inf  ;;  %19802 = vst [vmem:[#allocation98_spill] sm:$0xff] %v11663_v41  ;;  %v11678_v13 = vadd.f32 %v10937_v39, %v4088_v42  ;;  %9092 = vmatprep.mubr.msk.f32.mxu1 %vm435_vm0, %v387_v53  ;;  %v11691_v42 = vpop.f32.mrf.mxu1  ;;  %v389_v53 = vld [vmem:[%s18976_s0 + $0xba0] sm:$0xff]  ;;  %v3880_v41 = vmul.f32 %v10909_v4, %v11139_v5  ;;  %8781 = vmatmul.mubr.msk.f32.gmra.mxu0 %vm435_vm0, %v180_v51  ;;  %v182_v5 = vld [vmem:[%s18976_s0 + $0x528] sm:$0xff] }
 0x14c   :  { %19801 = vst [vmem:[#allocation97_spill] sm:$0xff] %v11658_v19  ;;  %v5902_v24 = vmax.f32 %v5900_v56, %v5901_v26  ;;  %v5225_v40 = vsel %vm5091_vm1, %v19803_v50, -inf  ;;  %v11675_v17 = vsel %vm5091_vm1, %v19804_v22, -inf  ;;  %v181_v56 = vld [vmem:[%s18976_s0 + $0x520] sm:$0xff]  ;;  %v5194_v26 = vrot.slane %v5193_v20, 1  ;;  %v11689_v46 = vpop.f32.mrf.mxu0 }
 0x14d   :  { %19805 = vst [vmem:[#allocation99_spill] sm:$0xff] %v11678_v13  ;;  %v5226_v50 = vmax.f32 %v5224_v0, %v5225_v40  ;;  %v19127_v9 = vmax.f32 %v11658_v19, 0.0  ;;  %v5867_v22 = vmax.f32 %v11197_v45, %v5866_v37  ;;  %v3883_v0 = vmul.f32 %v10909_v4, %v11163_v59  ;;  %9093 = vmatmul.mubr.msk.f32.gmra.mxu1 %vm435_vm0, %v388_v38 }
 0x14e   :  { %v11696_v49 = vmax.f32 %v5902_v24, %v5903_v1  ;;  %v5195_v45 = vmax.f32 %v5193_v20, %v5194_v26  ;;  %v11712_v24 = vpop.f32.mrf.mxu1  ;;  %v11714_v44 = vpop.f32.mrf.mxu0  ;;  %8783 = vmatprep.mubr.msk.f32.mxu0 %vm435_vm0, %v181_v56  ;;  %v19806_v59 = vmax.f32 %v11678_v13, 0.0  ;;  %v11724_v20 = vadd.f32 %v10937_v39, %v3880_v41  ;;  %9095 = vmatprep.mubr.msk.f32.mxu1 %vm435_vm0, %v389_v53  ;;  %v390_v56 = vld [vmem:[%s18976_s0 + $0xba8] sm:$0xff]  ;;  %v183_v26 = vld [vmem:[%s18976_s0 + $0x530] sm:$0xff] }
 0x14f   :  { %v11704_v37 = vmax.f32 %v5226_v50, %v5227_v62  ;;  %v11709_v40 = vsel %vm5091_vm1, %v19127_v9, -inf  ;;  %v5868_v1 = vrot.slane %v5867_v22, 2  ;;  %v11727_v51 = vadd.f32 %v10937_v39, %v3883_v0  ;;  %v391_v9 = vld [vmem:[%s18976_s0 + $0xbb0] sm:$0xff]  ;;  %8784 = vmatmul.mubr.msk.f32.gmra.mxu0 %vm435_vm0, %v182_v5 }
 0x150   :  { %v5911_v62 = vsel %vm5091_vm1, %v19806_v59, -inf  ;;  %19807 = vst [vmem:[#allocation100_spill] sm:$0xff] %v11724_v20  ;;  %v4091_v38 = vmul.f32 %v10909_v4, %v11165_v18  ;;  %6562 = vrot.lane.b32.xlu1 %v5195_v45, %s9180_s10  ;;  %v4090_v0 = vmul.f32 %v10909_v4, %v11190_v47  ;;  %v5203_v18 = vrot.slane %v11388_v10, 4  ;;  %v11743_v59 = vpop.f32.mrf.mxu0  ;;  %v11745_v53 = vpop.f32.mrf.mxu1  ;;  %8786 = vmatprep.mubr.msk.f32.mxu0 %vm435_vm0, %v183_v26  ;;  %v392_v26 = vld [vmem:[%s18976_s0 + $0xbb8] sm:$0xff] }
 0x151   :  { %19808 = vst [vmem:[#allocation101_spill] sm:$0xff] %v11727_v51  ;;  %v5913_v41 = vmax.f32 %v5911_v62, %v11709_v40  ;;  %v5869_v50 = vmax.f32 %v5867_v22, %v5868_v1  ;;  %v19131_v19 = vmax.f32 %v11724_v20, 0.0  ;;  %v3882_v47 = vmul.f32 %v10909_v4, %v11192_v52  ;;  %9096 = vmatmul.mubr.msk.f32.gmra.mxu1 %vm435_vm0, %v390_v56  ;;  %v184_v52 = vld [vmem:[%s18976_s0 + $0x538] sm:$0xff] }
 0x152   :  { %v11753_v40 = vadd.f32 %v10937_v39, %v4091_v38  ;;  %v11759_v1 = vadd.f32 %v10937_v39, %v4090_v0  ;;  %v5204_v62 = vmax.f32 %v11388_v10, %v5203_v18  ;;  %v3885_v13 = vmul.f32 %v10909_v4, %v11215_v60  ;;  %v11765_v45 = vpop.f32.mrf.mxu1  ;;  %v11767_v38 = vpop.f32.mrf.mxu0  ;;  %9098 = vmatprep.mubr.msk.f32.mxu1 %vm435_vm0, %v391_v9  ;;  %v393_v9 = vld [vmem:[%s18976_s0 + $0xbc0] sm:$0xff] }
 0x153   :  { %v5870_v22 = vrot.slane %v5869_v50, 1  ;;  %19811 = vst [vmem:[#allocation104_spill] sm:$0xff] %v11767_v38  ;;  %v5235_v5 = vsel %vm5091_vm1, %v19131_v19, -inf  ;;  %v19812_v10 = vmax.f32 %v11727_v51, 0.0  ;;  %v11781_v0 = vadd.f32 %v10937_v39, %v3882_v47  ;;  %v185_v47 = vld [vmem:[%s18976_s0 + $0x540] sm:$0xff]  ;;  %8787 = vmatmul.mubr.msk.f32.gmra.mxu0 %vm435_vm0, %v184_v52 }
 0x154   :  { %19809 = vst [vmem:[#allocation102_spill] sm:$0xff] %v11753_v40  ;;  %19810 = vst [vmem:[#allocation103_spill] sm:$0xff] %v11759_v1  ;;  %v19133_v56 = vmax.f32 %v11753_v40, 0.0  ;;  %v5237_v20 = vmax.f32 %v5235_v5, %v11675_v17  ;;  %v19135_v19 = vmax.f32 %v11759_v1, 0.0  ;;  %v5205_v38 = vrot.slane %v5204_v62, 2  ;;  %v11789_v51 = vpop.f32.mrf.mxu0  ;;  %8789 = vmatprep.mubr.msk.f32.mxu0 %vm435_vm0, %v185_v47  ;;  %v395_v47 = vld [vmem:[%s18976_s0 + $0xbd0] sm:$0xff] }
 0x155   :  { %v5240_v60 = vsel %vm5091_vm1, %v19812_v10, -inf  ;;  %19813 = vst [vmem:[#allocation105_spill] sm:$0xff] %v11781_v0  ;;  %v5871_v18 = vmax.f32 %v5869_v50, %v5870_v22  ;;  %19814 = vst [vmem:[#allocation106_spill] sm:$0xff] %v11789_v51  ;;  %v11791_v10 = vpop.f32.mrf.mxu1  ;;  %v11804_v22 = vadd.f32 %v10937_v39, %v3885_v13  ;;  %v4093_v5 = vmul.f32 %v10909_v4, %v11217_v34  ;;  %v186_v34 = vld [vmem:[%s18976_s0 + $0x548] sm:$0xff] }
 0x156   :  { %19815 = vst [vmem:[#allocation107_spill] sm:$0xff] %v11791_v10  ;;  %v5916_v50 = vsel %vm5091_vm1, %v19133_v56, -inf  ;;  %v5914_v10 = vsel %vm5091_vm1, %v19135_v19, -inf  ;;  %v5206_v51 = vmax.f32 %v5204_v62, %v5205_v38  ;;  %v4092_v56 = vmul.f32 %v10909_v4, %v11240_v33  ;;  %9099 = vmatmul.mubr.msk.f32.gmra.mxu1 %vm435_vm0, %v392_v26  ;;  %v11819_v40 = vpop.f32.mrf.mxu0  ;;  %v394_v26 = vld [vmem:[%s18976_s0 + $0xbc8] sm:$0xff] }
 0x157   :  { %19816 = vst [vmem:[#allocation108_spill] sm:$0xff] %v11804_v22  ;;  %6666 = vrot.lane.b32.xlu1 %v5871_v18, %s9180_s10  ;;  %v5879_v17 = vrot.slane %v11348_v63, 4  ;;  %v11817_v13 = vpop.f32.mrf.mxu1  ;;  %v5915_v52 = vmax.f32 %v5913_v41, %v5914_v10  ;;  %v19817_v18 = vmax.f32 %v11781_v0, 0.0  ;;  %v11829_v33 = vadd.f32 %v10937_v39, %v4093_v5  ;;  %9101 = vmatprep.mubr.msk.f32.mxu1 %vm435_vm0, %v393_v9  ;;  %v187_v41 = vld [vmem:[%s18976_s0 + $0x550] sm:$0xff] }
 0x158   :  { %v5207_v10 = vrot.slane %v5206_v51, 1  ;;  %v19820_v1 = vmax.f32 %v11804_v22, 0.0  ;;  %8790 = vmatmul.mubr.msk.f32.gmra.mxu0 %vm435_vm0, %v186_v34  ;;  %v396_v34 = vld [vmem:[%s18976_s0 + $0xbd8] sm:$0xff] }
 0x159   :  { %v5238_v62 = vsel %vm5091_vm1, %v19817_v18, -inf  ;;  %19818 = vst [vmem:[#allocation109_spill] sm:$0xff] %v11829_v33  ;;  %v11840_v18 = vadd.f32 %v10937_v39, %v4092_v56  ;;  %v5880_v5 = vmax.f32 %v11348_v63, %v5879_v17  ;;  %v11843_v38 = vpop.f32.mrf.mxu1  ;;  %v11848_v9 = vmax.f32 %v5915_v52, %v5916_v50  ;;  %8792 = vmatprep.mubr.msk.f32.mxu0 %vm435_vm0, %v187_v41 }
 0x15a   :  { %v5239_v19 = vmax.f32 %v5237_v20, %v5238_v62  ;;  %v11853_v0 = vsel %vm5091_vm1, %v19820_v1, -inf  ;;  %v19138_v20 = vmax.f32 %v11829_v33, 0.0  ;;  %v3884_v56 = vmul.f32 %v10909_v4, %v11242_v11  ;;  %v11858_v62 = vpop.f32.mrf.mxu0  ;;  %9102 = vmatmul.mubr.msk.f32.gmra.mxu1 %vm435_vm0, %v394_v26  ;;  %v188_v1 = vld [vmem:[%s18976_s0 + $0x558] sm:$0xff]  ;;  %v191_v33 = vld [vmem:[%s18976_s0 + $0x570] sm:$0xff] }
 0x15b   :  { %19819 = vst [vmem:[#allocation110_spill] sm:$0xff] %v11840_v18  ;;  %v5208_v63 = vmax.f32 %v5206_v51, %v5207_v10  ;;  %v19139_v50 = vmax.f32 %v11840_v18, 0.0  ;;  %v5881_v52 = vrot.slane %v5880_v5, 2  ;;  %9104 = vmatprep.mubr.msk.f32.mxu1 %vm435_vm0, %v395_v47  ;;  %v5216_v41 = vrot.slane %v11544_v30, 4  ;;  %v11898_v10 = vpop.f32.mrf.mxu1  ;;  %v397_v47 = vld [vmem:[%s18976_s0 + $0xbe0] sm:$0xff] }
 0x15c   :  { %v11861_v17 = vmax.f32 %v5239_v19, %v5240_v60  ;;  %v5925_v4 = vsel %vm5091_vm1, %v19138_v20, -inf  ;;  %v11873_v11 = vadd.f32 %v10937_v39, %v3884_v56  ;;  %v11878_v19 = vld [vmem:[%s18977_s2] ss:$0 sm:$0xff]  ;;  %8793 = vmatmul.mubr.msk.f32.gmra.mxu0 %vm435_vm0, %v188_v1 }
 0x15d   :  { %v3887_v51 = vmul.f32 %v11878_v19, %v11267_v23  ;;  %v4095_v60 = vmul.f32 %v11878_v19, %v11269_v16  ;;  %v189_v39 = vld [vmem:[%s18976_s0 + $0x560] sm:$0xff]  ;;  %6564 = vrot.lane.b32.xlu0 %v5208_v63, %s9180_s10  ;;  %v5924_v26 = vsel %vm5091_vm1, %v19139_v50, -inf  ;;  %v5882_v23 = vmax.f32 %v5880_v5, %v5881_v52  ;;  %v11915_v52 = vpop.f32.mrf.mxu0 }
 0x15e   :  { %19821 = vst [vmem:[#allocation111_spill] sm:$0xff] %v11873_v11  ;;  %v4094_v16 = vmul.f32 %v11878_v19, %v11288_v12  ;;  %v5926_v56 = vmax.f32 %v5924_v26, %v5925_v4  ;;  %v11907_v63 = vld [vmem:[%s18978_s3] ss:$0 sm:$0xff]  ;;  %v5217_v26 = vmax.f32 %v11544_v30, %v5216_v41  ;;  %v3886_v20 = vmul.f32 %v11878_v19, %v11290_v43  ;;  %v398_v43 = vld [vmem:[%s18976_s0 + $0xbe8] sm:$0xff] }
 0x15f   :  { %v11910_v5 = vadd.f32 %v11907_v63, %v3887_v51  ;;  %v11913_v12 = vadd.f32 %v11907_v63, %v4095_v60  ;;  %v5883_v50 = vrot.slane %v5882_v23, 1  ;;  %9105 = vmatmul.mubr.msk.f32.gmra.mxu1 %vm435_vm0, %v396_v34  ;;  %8795 = vmatprep.mubr.msk.f32.mxu0 %vm435_vm0, %v189_v39  ;;  %v190_v51 = vld [vmem:[%s18976_s0 + $0x568] sm:$0xff]  ;;  %v19825_v60 = vmax.f32 %v11873_v11, 0.0  ;;  %v11962_v41 = vpop.f32.mrf.mxu0 }
 0x160   :  { %v11919_v4 = vadd.f32 %v11907_v63, %v4094_v16  ;;  %v3889_v30 = vmul.f32 %v11878_v19, %v11318_v2  ;;  %9107 = vmatprep.mubr.msk.f32.mxu1 %vm435_vm0, %v397_v47  ;;  %v5218_v18 = vrot.slane %v5217_v26, 2  ;;  %v399_v2 = vld [vmem:[%s18976_s0 + $0xbf0] sm:$0xff]  ;;  %8796 = vmatmul.mubr.msk.f32.gmra.mxu0 %vm435_vm0, %v190_v51 }
 0x161   :  { %19822 = vst [vmem:[#allocation112_spill] sm:$0xff] %v11910_v5  ;;  %19823 = vst [vmem:[#allocation113_spill] sm:$0xff] %v11913_v12  ;;  %v5248_v1 = vsel %vm5091_vm1, %v19825_v60, -inf  ;;  %v19143_v16 = vmax.f32 %v11910_v5, 0.0  ;;  %v5884_v34 = vmax.f32 %v5882_v23, %v5883_v50  ;;  %v11942_v60 = vpop.f32.mrf.mxu1  ;;  %v19826_v50 = vmax.f32 %v11913_v12, 0.0  ;;  %8798 = vmatprep.mubr.msk.f32.mxu0 %vm435_vm0, %v191_v33 }
 0x162   :  { %19824 = vst [vmem:[#allocation114_spill] sm:$0xff] %v11919_v4  ;;  %v5250_v39 = vmax.f32 %v5248_v1, %v11853_v0  ;;  %v11957_v23 = vadd.f32 %v11907_v63, %v3886_v20  ;;  %v11960_v1 = vadd.f32 %v11907_v63, %v3889_v30  ;;  %v19829_v5 = vmax.f32 %v11919_v4, 0.0  ;;  %v192_v30 = vld [vmem:[%s18976_s0 + $0x578] sm:$0xff] }
 0x163   :  { %v5253_v47 = vsel %vm5091_vm1, %v19143_v16, -inf  ;;  %v5929_v0 = vsel %vm5091_vm1, %v19826_v50, -inf  ;;  %6668 = vrot.lane.b32.xlu0 %v5884_v34, %s9180_s10  ;;  %v5219_v22 = vmax.f32 %v5217_v26, %v5218_v18  ;;  %v4097_v50 = vmul.f32 %v11878_v19, %v11320_v3  ;;  %9108 = vmatmul.mubr.msk.f32.gmra.mxu1 %vm435_vm0, %v398_v43  ;;  %v400_v3 = vld [vmem:[%s18976_s0 + $0xbf8] sm:$0xff]  ;;  %v401_v43 = vld [vmem:[%s18976_s0 + $0xc00] sm:$0xff] }
 0x164   :  { %19827 = vst [vmem:[#allocation115_spill] sm:$0xff] %v11957_v23  ;;  %19828 = vst [vmem:[#allocation116_spill] sm:$0xff] %v11960_v1  ;;  %v5927_v16 = vsel %vm5091_vm1, %v19829_v5, -inf  ;;  %v4096_v20 = vmul.f32 %v11878_v19, %v11341_v32  ;;  %v19148_v34 = vmax.f32 %v11957_v23, 0.0  ;;  %v5892_v5 = vrot.slane %v11536_v7, 4  ;;  %9110 = vmatprep.mubr.msk.f32.mxu1 %vm435_vm0, %v399_v2  ;;  %v193_v32 = vld [vmem:[%s18976_s0 + $0x580] sm:$0xff]  ;;  %8799 = vmatmul.mubr.msk.f32.gmra.mxu0 %vm435_vm0, %v192_v30 }
 0x165   :  { %v5928_v51 = vmax.f32 %v5926_v56, %v5927_v16  ;;  %v5220_v18 = vrot.slane %v5219_v22, 1  ;;  %v11989_v56 = vadd.f32 %v11907_v63, %v4097_v50  ;;  %v3888_v33 = vmul.f32 %v11878_v19, %v11343_v14  ;;  %v11996_v16 = vpop.f32.mrf.mxu1  ;;  %v12012_v14 = vpop.f32.mrf.mxu0  ;;  %8801 = vmatprep.mubr.msk.f32.mxu0 %vm435_vm0, %v193_v32  ;;  %v195_v30 = vld [vmem:[%s18976_s0 + $0x590] sm:$0xff] }
 0x166   :  { %v11992_v26 = vadd.f32 %v11907_v63, %v4096_v20  ;;  %19832 = vst [vmem:[#allocation119_spill] sm:$0xff] %v11996_v16  ;;  %v5251_v12 = vsel %vm5091_vm1, %v19148_v34, -inf  ;;  %v19833_v50 = vmax.f32 %v11960_v1, 0.0  ;;  %v5893_v4 = vmax.f32 %v11536_v7, %v5892_v5 }
 0x167   :  { %19830 = vst [vmem:[#allocation117_spill] sm:$0xff] %v11989_v56  ;;  %v12001_v2 = vmax.f32 %v5928_v51, %v5929_v0  ;;  %v5221_v11 = vmax.f32 %v5219_v22, %v5220_v18  ;;  %v5252_v16 = vmax.f32 %v5250_v39, %v5251_v12  ;;  %v19149_v0 = vmax.f32 %v11989_v56, 0.0  ;;  %9111 = vmatmul.mubr.msk.f32.gmra.mxu1 %vm435_vm0, %v400_v3  ;;  %v402_v39 = vld [vmem:[%s18976_s0 + $0xc08] sm:$0xff]  ;;  %v12047_v32 = vpop.f32.mrf.mxu1  ;;  %v403_v18 = vld [vmem:[%s18976_s0 + $0xc10] sm:$0xff] }
 0x168   :  { %19831 = vst [vmem:[#allocation118_spill] sm:$0xff] %v11992_v26  ;;  %v12009_v20 = vsel %vm5091_vm1, %v19833_v50, -inf  ;;  %v19150_v51 = vmax.f32 %v11992_v26, 0.0  ;;  %v194_v50 = vld [vmem:[%s18976_s0 + $0x588] sm:$0xff]  ;;  %v5894_v34 = vrot.slane %v5893_v4, 2  ;;  %v12023_v7 = vadd.f32 %v11907_v63, %v3888_v33  ;;  %9113 = vmatprep.mubr.msk.f32.mxu1 %vm435_vm0, %v401_v43  ;;  %v12056_v43 = vpop.f32.mrf.mxu0 }
 0x169   :  { %v3891_v22 = vmul.f32 %v11878_v19, %v11368_v21  ;;  %v4099_v12 = vmul.f32 %v11878_v19, %v11370_v35  ;;  %6566 = vrot.lane.b32.xlu1 %v5221_v11, %s9180_s10  ;;  %v12037_v5 = vmax.f32 %v5252_v16, %v5253_v47  ;;  %v5938_v21 = vsel %vm5091_vm1, %v19149_v0, -inf  ;;  %8802 = vmatmul.mubr.msk.f32.gmra.mxu0 %vm435_vm0, %v194_v50 }
 0x16a   :  { %19834 = vst [vmem:[#allocation120_spill] sm:$0xff] %v12023_v7  ;;  %v5937_v35 = vsel %vm5091_vm1, %v19150_v51, -inf  ;;  %v4098_v3 = vmul.f32 %v11878_v19, %v11396_v61  ;;  %v5895_v47 = vmax.f32 %v5893_v4, %v5894_v34  ;;  %v19151_v33 = vmax.f32 %v12023_v7, 0.0  ;;  %8804 = vmatprep.mubr.msk.f32.mxu0 %vm435_vm0, %v195_v30  ;;  %v196_v34 = vld [vmem:[%s18976_s0 + $0x598] sm:$0xff] }
 0x16b   :  { %v5939_v11 = vmax.f32 %v5937_v35, %v5938_v21  ;;  %v12054_v16 = vadd.f32 %v11907_v63, %v3891_v22  ;;  %v12060_v0 = vadd.f32 %v11907_v63, %v4099_v12  ;;  %v5229_v51 = vrot.slane %v11704_v37, 4  ;;  %9114 = vmatmul.mubr.msk.f32.gmra.mxu1 %vm435_vm0, %v402_v39  ;;  %v197_v39 = vld [vmem:[%s18976_s0 + $0x5a0] sm:$0xff]  ;;  %v12090_v12 = vpop.f32.mrf.mxu1 }
 0x16c   :  { %v12063_v61 = vadd.f32 %v11907_v63, %v4098_v3  ;;  %v3890_v4 = vmul.f32 %v11878_v19, %v11398_v28  ;;  %v5896_v50 = vrot.slane %v5895_v47, 1  ;;  %v5261_v22 = vsel %vm5091_vm1, %v19151_v33, -inf  ;;  %9116 = vmatprep.mubr.msk.f32.mxu1 %vm435_vm0, %v403_v18  ;;  %v404_v28 = vld [vmem:[%s18976_s0 + $0xc18] sm:$0xff] }
 0x16d   :  { %19835 = vst [vmem:[#allocation121_spill] sm:$0xff] %v12054_v16  ;;  %19836 = vst [vmem:[#allocation122_spill] sm:$0xff] %v12060_v0  ;;  %v3893_v21 = vmul.f32 %v11878_v19, %v11423_v25  ;;  %v5263_v30 = vmax.f32 %v5261_v22, %v12009_v20  ;;  %v19155_v35 = vmax.f32 %v12060_v0, 0.0  ;;  %v5230_v33 = vmax.f32 %v11704_v37, %v5229_v51  ;;  %v405_v25 = vld [vmem:[%s18976_s0 + $0xc20] sm:$0xff]  ;;  %v12104_v22 = vpop.f32.mrf.mxu0 }
 0x16e   :  { %19837 = vst [vmem:[#allocation123_spill] sm:$0xff] %v12063_v61  ;;  %v19156_v3 = vmax.f32 %v12063_v61, 0.0  ;;  %v5897_v18 = vmax.f32 %v5895_v47, %v5896_v50  ;;  %v19838_v56 = vmax.f32 %v12054_v16, 0.0  ;;  %v12099_v1 = vadd.f32 %v11907_v63, %v3890_v4  ;;  %8805 = vmatmul.mubr.msk.f32.gmra.mxu0 %vm435_vm0, %v196_v34  ;;  %v198_v34 = vld [vmem:[%s18976_s0 + $0x5a8] sm:$0xff] }
 0x16f   :  { %v12102_v20 = vadd.f32 %v11907_v63, %v3893_v21  ;;  %v5942_v37 = vsel %vm5091_vm1, %v19155_v35, -inf  ;;  %v5231_v47 = vrot.slane %v5230_v33, 2  ;;  %9117 = vmatmul.mubr.msk.f32.gmra.mxu1 %vm435_vm0, %v404_v28  ;;  %8807 = vmatprep.mubr.msk.f32.mxu0 %vm435_vm0, %v197_v39  ;;  %v406_v28 = vld [vmem:[%s18976_s0 + $0xc28] sm:$0xff]  ;;  %v199_v39 = vld [vmem:[%s18976_s0 + $0x5b0] sm:$0xff] }
 0x170   :  { %v5266_v26 = vsel %vm5091_vm1, %v19838_v56, -inf  ;;  %19839 = vst [vmem:[#allocation124_spill] sm:$0xff] %v12099_v1  ;;  %v5940_v51 = vsel %vm5091_vm1, %v19156_v3, -inf  ;;  %v19841_v56 = vld [vmem:[#allocation80_spill] sm:$0xff]  ;;  %6670 = vrot.lane.b32.xlu1 %v5897_v18, %s9180_s10  ;;  %v19160_v21 = vmax.f32 %v12099_v1, 0.0  ;;  %v4100_v3 = vmul.f32 %v11878_v19, %v11447_v54  ;;  %9119 = vmatprep.mubr.msk.f32.mxu1 %vm435_vm0, %v405_v25  ;;  %v12138_v54 = vpop.f32.mrf.mxu1  ;;  %v19852_v1 = vld [vmem:[#allocation87_spill] sm:$0xff] }
 0x171   :  { %19840 = vst [vmem:[#allocation125_spill] sm:$0xff] %v12102_v20  ;;  %v4101_v4 = vmul.f32 %v11878_v19, %v19841_v56  ;;  %v5941_v50 = vmax.f32 %v5939_v11, %v5940_v51  ;;  %v5232_v56 = vmax.f32 %v5230_v33, %v5231_v47  ;;  %v5905_v18 = vrot.slane %v11696_v49, 4  ;;  %v407_v25 = vld [vmem:[%s18976_s0 + $0xc30] sm:$0xff] }
 0x172   :  { %v3892_v51 = vmul.f32 %v11878_v19, %v11449_v55  ;;  %v5264_v33 = vsel %vm5091_vm1, %v19160_v21, -inf  ;;  %v19843_v47 = vmax.f32 %v12102_v20, 0.0  ;;  %v12154_v0 = vadd.f32 %v11907_v63, %v4100_v3  ;;  %v12156_v55 = vpop.f32.mrf.mxu0  ;;  %8808 = vmatmul.mubr.msk.f32.gmra.mxu0 %vm435_vm0, %v198_v34  ;;  %v19846_v34 = vld [vmem:[#allocation84_spill] sm:$0xff]  ;;  %v12183_v3 = vpop.f32.mrf.mxu1 }
 0x173   :  { %v12133_v11 = vadd.f32 %v11907_v63, %v4101_v4  ;;  %v12143_v35 = vmax.f32 %v5941_v50, %v5942_v37  ;;  %v5233_v61 = vrot.slane %v5232_v56, 1  ;;  %v5265_v16 = vmax.f32 %v5263_v30, %v5264_v33  ;;  %9120 = vmatmul.mubr.msk.f32.gmra.mxu1 %vm435_vm0, %v406_v28  ;;  %8810 = vmatprep.mubr.msk.f32.mxu0 %vm435_vm0, %v199_v39 }
 0x174   :  { %v12151_v4 = vsel %vm5091_vm1, %v19843_v47, -inf  ;;  %19844 = vst [vmem:[#allocation126_spill] sm:$0xff] %v12154_v0  ;;  %v5906_v50 = vmax.f32 %v11696_v49, %v5905_v18  ;;  %v200_v47 = vld [vmem:[%s18976_s0 + $0x5b8] sm:$0xff]  ;;  %v12168_v21 = vadd.f32 %v11907_v63, %v3892_v51  ;;  %v3895_v30 = vmul.f32 %v11878_v19, %v11480_v57  ;;  %9122 = vmatprep.mubr.msk.f32.mxu1 %vm435_vm0, %v407_v25  ;;  %v201_v57 = vld [vmem:[%s18976_s0 + $0x5c0] sm:$0xff] }
 0x175   :  { %19842 = vst [vmem:[#allocation80_spill] sm:$0xff] %v12133_v11  ;;  %v19161_v37 = vmax.f32 %v12133_v11, 0.0  ;;  %v4103_v33 = vmul.f32 %v11878_v19, %v19846_v34  ;;  %v408_v49 = vld [vmem:[%s18976_s0 + $0xc38] sm:$0xff]  ;;  %v5234_v28 = vmax.f32 %v5232_v56, %v5233_v61  ;;  %v12178_v39 = vmax.f32 %v5265_v16, %v5266_v26  ;;  %v409_v25 = vld [vmem:[%s18976_s0 + $0xc40] sm:$0xff] }
 0x176   :  { %19845 = vst [vmem:[#allocation127_spill] sm:$0xff] %v12168_v21  ;;  %v5907_v51 = vrot.slane %v5906_v50, 2  ;;  %v19847_v34 = vmax.f32 %v12154_v0, 0.0  ;;  %v19165_v16 = vmax.f32 %v12168_v21, 0.0  ;;  %v12196_v61 = vadd.f32 %v11907_v63, %v3895_v30  ;;  %8811 = vmatmul.mubr.msk.f32.gmra.mxu0 %vm435_vm0, %v200_v47  ;;  %v202_v30 = vld [vmem:[%s18976_s0 + $0x5c8] sm:$0xff] }
 0x177   :  { %v5951_v18 = vsel %vm5091_vm1, %v19161_v37, -inf  ;;  %v12199_v56 = vadd.f32 %v11907_v63, %v4103_v33  ;;  %v12201_v37 = vpop.f32.mrf.mxu0  ;;  %6568 = vrot.lane.b32.xlu0 %v5234_v28, %s9180_s10  ;;  %v4102_v0 = vmul.f32 %v11878_v19, %v11503_v29  ;;  %9123 = vmatmul.mubr.msk.f32.gmra.mxu1 %vm435_vm0, %v408_v49  ;;  %v410_v29 = vld [vmem:[%s18976_s0 + $0xc48] sm:$0xff]  ;;  %v203_v49 = vld [vmem:[%s18976_s0 + $0x5d0] sm:$0xff] }
 0x178   :  { %v5950_v26 = vsel %vm5091_vm1, %v19847_v34, -inf  ;;  %19848 = vst [vmem:[#allocation84_spill] sm:$0xff] %v12196_v61  ;;  %v5908_v20 = vmax.f32 %v5906_v50, %v5907_v51  ;;  %v5242_v34 = vrot.slane %v11861_v17, 4  ;;  %v5274_v33 = vsel %vm5091_vm1, %v19165_v16, -inf  ;;  %8813 = vmatprep.mubr.msk.f32.mxu0 %vm435_vm0, %v201_v57  ;;  %9125 = vmatprep.mubr.msk.f32.mxu1 %vm435_vm0, %v409_v25  ;;  %v12232_v16 = vpop.f32.mrf.mxu1  ;;  %v411_v57 = vld [vmem:[%s18976_s0 + $0xc50] sm:$0xff] }
 0x179   :  { %19849 = vst [vmem:[#allocation128_spill] sm:$0xff] %v12199_v56  ;;  %v5952_v11 = vmax.f32 %v5950_v26, %v5951_v18  ;;  %v19169_v47 = vmax.f32 %v12196_v61, 0.0  ;;  %v19170_v28 = vmax.f32 %v12199_v56, 0.0  ;;  %v3894_v50 = vmul.f32 %v11878_v19, %v11505_v6 }
 0x17a   :  { %v5909_v18 = vrot.slane %v5908_v20, 1  ;;  %v5276_v51 = vmax.f32 %v5274_v33, %v12151_v4  ;;  %v12229_v26 = vadd.f32 %v11907_v63, %v4102_v0  ;;  %v5243_v6 = vmax.f32 %v11861_v17, %v5242_v34  ;;  %v12248_v0 = vpop.f32.mrf.mxu0  ;;  %8814 = vmatmul.mubr.msk.f32.gmra.mxu0 %vm435_vm0, %v202_v30 }
 0x17b   :  { %v5279_v25 = vsel %vm5091_vm1, %v19169_v47, -inf  ;;  %v5955_v21 = vsel %vm5091_vm1, %v19170_v28, -inf  ;;  %v12244_v4 = vadd.f32 %v11907_v63, %v3894_v50  ;;  %v3897_v17 = vmul.f32 %v11878_v19, %v11529_v27  ;;  %9126 = vmatmul.mubr.msk.f32.gmra.mxu1 %vm435_vm0, %v410_v29  ;;  %8816 = vmatprep.mubr.msk.f32.mxu0 %vm435_vm0, %v203_v49  ;;  %v204_v50 = vld [vmem:[%s18976_s0 + $0x5d8] sm:$0xff]  ;;  %v205_v29 = vld [vmem:[%s18976_s0 + $0x5e0] sm:$0xff] }
 0x17c   :  { %19850 = vst [vmem:[#allocation129_spill] sm:$0xff] %v12229_v26  ;;  %v5910_v34 = vmax.f32 %v5908_v20, %v5909_v18  ;;  %v19173_v33 = vmax.f32 %v12229_v26, 0.0  ;;  %v5244_v61 = vrot.slane %v5243_v6, 2  ;;  %v4105_v47 = vmul.f32 %v11878_v19, %v19852_v1  ;;  %9128 = vmatprep.mubr.msk.f32.mxu1 %vm435_vm0, %v411_v57  ;;  %v412_v1 = vld [vmem:[%s18976_s0 + $0xc58] sm:$0xff]  ;;  %v413_v27 = vld [vmem:[%s18976_s0 + $0xc60] sm:$0xff] }
 0x17d   :  { %19851 = vst [vmem:[#allocation130_spill] sm:$0xff] %v12244_v4  ;;  %v12261_v28 = vadd.f32 %v11907_v63, %v3897_v17  ;;  %v4104_v20 = vmul.f32 %v11878_v19, %v11557_v8  ;;  %v5918_v30 = vrot.slane %v11848_v9, 4  ;;  %v3896_v57 = vmul.f32 %v11878_v19, %v11559_v58  ;;  %v12282_v17 = vpop.f32.mrf.mxu1 }
 0x17e   :  { %6672 = vrot.lane.b32.xlu0 %v5910_v34, %s9180_s10  ;;  %v5953_v49 = vsel %vm5091_vm1, %v19173_v33, -inf  ;;  %v5245_v18 = vmax.f32 %v5243_v6, %v5244_v61  ;;  %v12278_v8 = vadd.f32 %v11907_v63, %v4105_v47  ;;  %v19855_v34 = vmax.f32 %v12244_v4, 0.0  ;;  %v12294_v47 = vpop.f32.mrf.mxu0  ;;  %8817 = vmatmul.mubr.msk.f32.gmra.mxu0 %vm435_vm0, %v204_v50 }
 0x17f   :  { %19853 = vst [vmem:[#allocation87_spill] sm:$0xff] %v12261_v28  ;;  %v5954_v56 = vmax.f32 %v5952_v11, %v5953_v49  ;;  %v19177_v33 = vmax.f32 %v12261_v28, 0.0  ;;  %v12292_v61 = vadd.f32 %v11907_v63, %v4104_v20  ;;  %v5919_v23 = vmax.f32 %v11848_v9, %v5918_v30  ;;  %9129 = vmatmul.mubr.msk.f32.gmra.mxu1 %vm435_vm0, %v412_v1  ;;  %v206_v11 = vld [vmem:[%s18976_s0 + $0x5e8] sm:$0xff]  ;;  %v207_v49 = vld [vmem:[%s18976_s0 + $0x5f0] sm:$0xff] }
 0x180   :  { %19854 = vst [vmem:[#allocation131_spill] sm:$0xff] %v12278_v8  ;;  %v5277_v26 = vsel %vm5091_vm1, %v19855_v34, -inf  ;;  %v5246_v58 = vrot.slane %v5245_v18, 1  ;;  %v19176_v7 = vmax.f32 %v12278_v8, 0.0  ;;  %8819 = vmatprep.mubr.msk.f32.mxu0 %vm435_vm0, %v205_v29  ;;  %9131 = vmatprep.mubr.msk.f32.mxu1 %vm435_vm0, %v413_v27  ;;  %v414_v9 = vld [vmem:[%s18976_s0 + $0xc68] sm:$0xff]  ;;  %v12324_v29 = vpop.f32.mrf.mxu1  ;;  %v415_v27 = vld [vmem:[%s18976_s0 + $0xc70] sm:$0xff]  ;;  %v4106_v8 = vmul.f32 %v11878_v19, %v11609_v48 }
 0x181   :  { %19856 = vst [vmem:[#allocation132_spill] sm:$0xff] %v12292_v61  ;;  %v5278_v6 = vmax.f32 %v5276_v51, %v5277_v26  ;;  %v12304_v20 = vmax.f32 %v5954_v56, %v5955_v21  ;;  %v12309_v50 = vsel %vm5091_vm1, %v19177_v33, -inf  ;;  %v19179_v51 = vmax.f32 %v12292_v61, 0.0  ;;  %v19858_v34 = vld [vmem:[#allocation90_spill] sm:$0xff]  ;;  %v19863_v61 = vld [vmem:[#allocation95_spill] sm:$0xff]  ;;  %v19864_v28 = vld [vmem:[#allocation96_spill] sm:$0xff] }
 0x182   :  { %v12313_v26 = vadd.f32 %v11907_v63, %v3896_v57  ;;  %v5247_v30 = vmax.f32 %v5245_v18, %v5246_v58  ;;  %v5964_v21 = vsel %vm5091_vm1, %v19176_v7, -inf  ;;  %v5920_v56 = vrot.slane %v5919_v23, 2  ;;  %8820 = vmatmul.mubr.msk.f32.gmra.mxu0 %vm435_vm0, %v206_v11 }
 0x183   :  { %v12319_v1 = vmax.f32 %v5278_v6, %v5279_v25  ;;  %v5963_v25 = vsel %vm5091_vm1, %v19179_v51, -inf  ;;  %v3899_v57 = vmul.f32 %v11878_v19, %v11583_v15  ;;  %v4107_v58 = vmul.f32 %v11878_v19, %v19858_v34  ;;  %v12340_v6 = vpop.f32.mrf.mxu0  ;;  %9132 = vmatmul.mubr.msk.f32.gmra.mxu1 %vm435_vm0, %v414_v9  ;;  %v208_v15 = vld [vmem:[%s18976_s0 + $0x5f8] sm:$0xff]  ;;  %8822 = vmatprep.mubr.msk.f32.mxu0 %vm435_vm0, %v207_v49  ;;  %v417_v49 = vld [vmem:[%s18976_s0 + $0xc80] sm:$0xff] }
 0x184   :  { %19857 = vst [vmem:[#allocation133_spill] sm:$0xff] %v12313_v26  ;;  %v19180_v18 = vmax.f32 %v12313_v26, 0.0  ;;  %6570 = vrot.lane.b32.xlu1 %v5247_v30, %s9180_s10  ;;  %v5965_v7 = vmax.f32 %v5963_v25, %v5964_v21  ;;  %v5921_v33 = vmax.f32 %v5919_v23, %v5920_v56  ;;  %v5255_v51 = vrot.slane %v12037_v5, 4  ;;  %9134 = vmatprep.mubr.msk.f32.mxu1 %vm435_vm0, %v415_v27  ;;  %v416_v9 = vld [vmem:[%s18976_s0 + $0xc78] sm:$0xff]  ;;  %v209_v30 = vld [vmem:[%s18976_s0 + $0x600] sm:$0xff] }
 0x185   :  { %v12355_v11 = vadd.f32 %v11907_v63, %v3899_v57  ;;  %v12358_v23 = vadd.f32 %v11907_v63, %v4107_v58  ;;  %v3898_v48 = vmul.f32 %v11878_v19, %v11611_v36  ;;  %v12372_v25 = vadd.f32 %v11907_v63, %v4106_v8  ;;  %v12375_v57 = vpop.f32.mrf.mxu1  ;;  %v12387_v8 = vpop.f32.mrf.mxu0 }
 0x186   :  { %v5287_v34 = vsel %vm5091_vm1, %v19180_v18, -inf  ;;  %v5922_v21 = vrot.slane %v5921_v33, 1  ;;  %v5256_v36 = vmax.f32 %v12037_v5, %v5255_v51  ;;  %8823 = vmatmul.mubr.msk.f32.gmra.mxu0 %vm435_vm0, %v208_v15  ;;  %v4109_v26 = vmul.f32 %v11878_v19, %v19864_v28  ;;  %v419_v15 = vld [vmem:[%s18976_s0 + $0xc90] sm:$0xff] }
 0x187   :  { %19859 = vst [vmem:[#allocation90_spill] sm:$0xff] %v12355_v11  ;;  %19860 = vst [vmem:[#allocation134_spill] sm:$0xff] %v12358_v23  ;;  %v5289_v56 = vmax.f32 %v5287_v34, %v12309_v50  ;;  %v19185_v27 = vmax.f32 %v12355_v11, 0.0  ;;  %v19184_v58 = vmax.f32 %v12358_v23, 0.0  ;;  %v12383_v18 = vadd.f32 %v11907_v63, %v3898_v48  ;;  %9135 = vmatmul.mubr.msk.f32.gmra.mxu1 %vm435_vm0, %v416_v9  ;;  %v210_v48 = vld [vmem:[%s18976_s0 + $0x608] sm:$0xff] }
 0x188   :  { %19861 = vst [vmem:[#allocation135_spill] sm:$0xff] %v12372_v25  ;;  %v3901_v50 = vmul.f32 %v11878_v19, %v19863_v61  ;;  %v5923_v5 = vmax.f32 %v5921_v33, %v5922_v21  ;;  %v19188_v51 = vmax.f32 %v12372_v25, 0.0  ;;  %v5257_v34 = vrot.slane %v5256_v36, 2  ;;  %8825 = vmatprep.mubr.msk.f32.mxu0 %vm435_vm0, %v209_v30  ;;  %9137 = vmatprep.mubr.msk.f32.mxu1 %vm435_vm0, %v417_v49  ;;  %v418_v9 = vld [vmem:[%s18976_s0 + $0xc88] sm:$0xff]  ;;  %v211_v30 = vld [vmem:[%s18976_s0 + $0x610] sm:$0xff] }
 0x189   :  { %19862 = vst [vmem:[#allocation136_spill] sm:$0xff] %v12383_v18  ;;  %v5292_v61 = vsel %vm5091_vm1, %v19185_v27, -inf  ;;  %v5968_v33 = vsel %vm5091_vm1, %v19184_v58, -inf  ;;  %v4108_v49 = vmul.f32 %v11878_v19, %v11661_v31  ;;  %v12424_v27 = vpop.f32.mrf.mxu1 }
 0x18a   :  { %v12406_v28 = vadd.f32 %v11907_v63, %v3901_v50  ;;  %6674 = vrot.lane.b32.xlu1 %v5923_v5, %s9180_s10  ;;  %v5966_v21 = vsel %vm5091_vm1, %v19188_v51, -inf  ;;  %v5258_v58 = vmax.f32 %v5256_v36, %v5257_v34  ;;  %v12420_v50 = vadd.f32 %v11907_v63, %v4109_v26  ;;  %v12434_v26 = vpop.f32.mrf.mxu0  ;;  %8826 = vmatmul.mubr.msk.f32.gmra.mxu0 %vm435_vm0, %v210_v48 }
 0x18b   :  { %v5967_v23 = vmax.f32 %v5965_v7, %v5966_v21  ;;  %v19867_v5 = vmax.f32 %v12383_v18, 0.0  ;;  %v5931_v36 = vrot.slane %v12001_v2, 4  ;;  %v12439_v4 = vadd.f32 %v11907_v63, %v4108_v49  ;;  %9138 = vmatmul.mubr.msk.f32.gmra.mxu1 %vm435_vm0, %v418_v9  ;;  %8828 = vmatprep.mubr.msk.f32.mxu0 %vm435_vm0, %v211_v30  ;;  %v212_v7 = vld [vmem:[%s18976_s0 + $0x618] sm:$0xff] }
 0x18c   :  { %19865 = vst [vmem:[#allocation95_spill] sm:$0xff] %v12406_v28  ;;  %19866 = vst [vmem:[#allocation96_spill] sm:$0xff] %v12420_v50  ;;  %v19191_v51 = vmax.f32 %v12406_v28, 0.0  ;;  %v5259_v31 = vrot.slane %v5258_v58, 1  ;;  %v19192_v11 = vmax.f32 %v12420_v50, 0.0  ;;  %9140 = vmatprep.mubr.msk.f32.mxu1 %vm435_vm0, %v419_v15  ;;  %v420_v9 = vld [vmem:[%s18976_s0 + $0xc98] sm:$0xff]  ;;  %v3903_v15 = vmul.f32 %v11878_v19, %v11689_v46 }
 0x18d   :  { %v5290_v25 = vsel %vm5091_vm1, %v19867_v5, -inf  ;;  %19868 = vst [vmem:[#allocation137_spill] sm:$0xff] %v12439_v4  ;;  %v12446_v21 = vmax.f32 %v5967_v23, %v5968_v33  ;;  %v19193_v33 = vmax.f32 %v12439_v4, 0.0  ;;  %v3902_v46 = vmul.f32 %v11878_v19, %v11714_v44  ;;  %v422_v44 = vld [vmem:[%s18976_s0 + $0xca8] sm:$0xff] }
 0x18e   :  { %v5291_v34 = vmax.f32 %v5289_v56, %v5290_v25  ;;  %v12451_v48 = vsel %vm5091_vm1, %v19191_v51, -inf  ;;  %v5932_v56 = vmax.f32 %v12001_v2, %v5931_v36  ;;  %v19869_v25 = vld [vmem:[#allocation98_spill] sm:$0xff]  ;;  %v5260_v30 = vmax.f32 %v5258_v58, %v5259_v31  ;;  %v12466_v51 = vpop.f32.mrf.mxu1  ;;  %8829 = vmatmul.mubr.msk.f32.gmra.mxu0 %vm435_vm0, %v212_v7 }
 0x18f   :  { %v3900_v49 = vmul.f32 %v11878_v19, %v19869_v25  ;;  %v5977_v23 = vsel %vm5091_vm1, %v19192_v11, -inf  ;;  %v4111_v58 = vmul.f32 %v11878_v19, %v11691_v42  ;;  %v5976_v31 = vsel %vm5091_vm1, %v19193_v33, -inf  ;;  %9141 = vmatmul.mubr.msk.f32.gmra.mxu1 %vm435_vm0, %v420_v9  ;;  %v213_v42 = vld [vmem:[%s18976_s0 + $0x620] sm:$0xff]  ;;  %v214_v9 = vld [vmem:[%s18976_s0 + $0x628] sm:$0xff] }
 0x190   :  { %v12460_v5 = vmax.f32 %v5291_v34, %v5292_v61  ;;  %v5933_v2 = vrot.slane %v5932_v56, 2  ;;  %v12475_v61 = vpop.f32.mrf.mxu0  ;;  %6572 = vrot.lane.b32.xlu0 %v5260_v30, %s9180_s10  ;;  %v4110_v34 = vmul.f32 %v11878_v19, %v11712_v24  ;;  %v5268_v25 = vrot.slane %v12178_v39, 4  ;;  %v421_v7 = vld [vmem:[%s18976_s0 + $0xca0] sm:$0xff]  ;;  %8831 = vmatprep.mubr.msk.f32.mxu0 %vm435_vm0, %v213_v42 }
 0x191   :  { %v12469_v36 = vadd.f32 %v11907_v63, %v3900_v49  ;;  %v5978_v49 = vmax.f32 %v5976_v31, %v5977_v23  ;;  %v12496_v24 = vadd.f32 %v11907_v63, %v3903_v15  ;;  %9143 = vmatprep.mubr.msk.f32.mxu1 %vm435_vm0, %v421_v7  ;;  %v12507_v23 = vadd.f32 %v11907_v63, %v4111_v58  ;;  %v12516_v31 = vpop.f32.mrf.mxu1 }
 0x192   :  { %v5934_v30 = vmax.f32 %v5932_v56, %v5933_v2  ;;  %v12510_v56 = vadd.f32 %v11907_v63, %v4110_v34  ;;  %v5269_v2 = vmax.f32 %v12178_v39, %v5268_v25  ;;  %v12514_v15 = vadd.f32 %v11907_v63, %v3902_v46  ;;  %v12524_v50 = vpop.f32.mrf.mxu0  ;;  %8832 = vmatmul.mubr.msk.f32.gmra.mxu0 %vm435_vm0, %v214_v9 }
 0x193   :  { %19870 = vst [vmem:[#allocation98_spill] sm:$0xff] %v12469_v36  ;;  %v19196_v11 = vmax.f32 %v12469_v36, 0.0  ;;  %19871 = vst [vmem:[#allocation138_spill] sm:$0xff] %v12496_v24  ;;  %v19200_v33 = vmax.f32 %v12496_v24, 0.0  ;;  %v3905_v58 = vmul.f32 %v11878_v19, %v11743_v59  ;;  %v19198_v34 = vmax.f32 %v12507_v23, 0.0  ;;  %9144 = vmatmul.mubr.msk.f32.gmra.mxu1 %vm435_vm0, %v422_v44  ;;  %v12546_v44 = vpop.f32.mrf.mxu1 }
 0x194   :  { %19872 = vst [vmem:[#allocation139_spill] sm:$0xff] %v12507_v23  ;;  %19873 = vst [vmem:[#allocation140_spill] sm:$0xff] %v12510_v56  ;;  %v5935_v42 = vrot.slane %v5934_v30, 1  ;;  %v19199_v25 = vmax.f32 %v12510_v56, 0.0  ;;  %v5270_v46 = vrot.slane %v5269_v2, 2  ;;  %v19204_v59 = vmax.f32 %v12514_v15, 0.0 }
 0x195   :  { %19874 = vst [vmem:[#allocation141_spill] sm:$0xff] %v12514_v15  ;;  %v5300_v7 = vsel %vm5091_vm1, %v19196_v11, -inf  ;;  %v5305_v11 = vsel %vm5091_vm1, %v19200_v33, -inf  ;;  %v12536_v28 = vadd.f32 %v11907_v63, %v3905_v58  ;;  %v423_v58 = vld [vmem:[%s18976_s0 + $0xcb0] sm:$0xff]  ;;  %v12564_v33 = vpop.f32.mrf.mxu0 }
 0x196   :  { %v5302_v39 = vmax.f32 %v5300_v7, %v12451_v48  ;;  %v5936_v4 = vmax.f32 %v5934_v30, %v5935_v42  ;;  %v5981_v48 = vsel %vm5091_vm1, %v19198_v34, -inf  ;;  %v5979_v9 = vsel %vm5091_vm1, %v19199_v25, -inf  ;;  %v215_v42 = vld [vmem:[%s18976_s0 + $0x630] sm:$0xff]  ;;  %v424_v34 = vld [vmem:[%s18976_s0 + $0xcb8] sm:$0xff]  ;;  %9146 = vmatprep.mubr.msk.f32.mxu1 %vm435_vm0, %v423_v58 }
 0x197   :  { %19875 = vst [vmem:[#allocation142_spill] sm:$0xff] %v12536_v28  ;;  %v5271_v7 = vmax.f32 %v5269_v2, %v5270_v46  ;;  %v4113_v30 = vmul.f32 %v11878_v19, %v11745_v53  ;;  %v5980_v2 = vmax.f32 %v5978_v49, %v5979_v9  ;;  %v5303_v53 = vsel %vm5091_vm1, %v19204_v59, -inf  ;;  %8834 = vmatprep.mubr.msk.f32.mxu0 %vm435_vm0, %v215_v42  ;;  %v216_v49 = vld [vmem:[%s18976_s0 + $0x638] sm:$0xff]  ;;  %v12593_v59 = vpop.f32.mrf.mxu1 }
 0x198   :  { %6676 = vrot.lane.b32.xlu0 %v5936_v4, %s9180_s10  ;;  %v19205_v46 = vmax.f32 %v12536_v28, 0.0  ;;  %v4112_v25 = vmul.f32 %v11878_v19, %v11765_v45  ;;  %v5304_v56 = vmax.f32 %v5302_v39, %v5303_v53  ;;  %v5944_v4 = vrot.slane %v12143_v35, 4  ;;  %9147 = vmatmul.mubr.msk.f32.gmra.mxu1 %vm435_vm0, %v424_v34  ;;  %v19880_v28 = vld [vmem:[#allocation106_spill] sm:$0xff]  ;;  %v19881_v34 = vld [vmem:[#allocation107_spill] sm:$0xff] }
 0x199   :  { %v5272_v23 = vrot.slane %v5271_v7, 1  ;;  %v12568_v24 = vadd.f32 %v11907_v63, %v4113_v30  ;;  %v12575_v9 = vmax.f32 %v5980_v2, %v5981_v48  ;;  %v19878_v30 = vld [vmem:[#allocation104_spill] sm:$0xff]  ;;  %8835 = vmatmul.mubr.msk.f32.gmra.mxu0 %vm435_vm0, %v216_v49  ;;  %v4115_v49 = vmul.f32 %v11878_v19, %v19881_v34  ;;  %v12626_v15 = vpop.f32.mrf.mxu1 }
 0x19a   :  { %v12580_v45 = vsel %vm5091_vm1, %v19205_v46, -inf  ;;  %v12583_v39 = vadd.f32 %v11907_v63, %v4112_v25  ;;  %v3904_v42 = vmul.f32 %v11878_v19, %v19878_v30  ;;  %v12589_v53 = vmax.f32 %v5304_v56, %v5305_v11 }
 0x19b   :  { %19876 = vst [vmem:[#allocation143_spill] sm:$0xff] %v12568_v24  ;;  %v5273_v58 = vmax.f32 %v5271_v7, %v5272_v23  ;;  %v19207_v48 = vmax.f32 %v12568_v24, 0.0  ;;  %v5945_v2 = vmax.f32 %v12143_v35, %v5944_v4  ;;  %v3907_v30 = vmul.f32 %v11878_v19, %v19880_v28  ;;  %v12603_v23 = vpop.f32.mrf.mxu0 }
 0x19c   :  { %19877 = vst [vmem:[#allocation144_spill] sm:$0xff] %v12583_v39  ;;  %v19210_v46 = vmax.f32 %v12583_v39, 0.0  ;;  %v12597_v25 = vadd.f32 %v11907_v63, %v3904_v42  ;;  %v4114_v56 = vmul.f32 %v11878_v19, %v11817_v13  ;;  %v5281_v7 = vrot.slane %v12319_v1, 4 }
 0x19d   :  { %6574 = vrot.lane.b32.xlu1 %v5273_v58, %s9180_s10  ;;  %v5990_v35 = vsel %vm5091_vm1, %v19207_v48, -inf  ;;  %v5946_v11 = vrot.slane %v5945_v2, 2  ;;  %v12617_v42 = vadd.f32 %v11907_v63, %v3907_v30  ;;  %v12620_v58 = vadd.f32 %v11907_v63, %v4115_v49  ;;  %v218_v30 = vld [vmem:[%s18976_s0 + $0x648] sm:$0xff] }
 0x19e   :  { %19879 = vst [vmem:[#allocation104_spill] sm:$0xff] %v12597_v25  ;;  %v5989_v28 = vsel %vm5091_vm1, %v19210_v46, -inf  ;;  %v19212_v4 = vmax.f32 %v12597_v25, 0.0  ;;  %v12623_v24 = vadd.f32 %v11907_v63, %v4114_v56  ;;  %v5282_v13 = vmax.f32 %v12319_v1, %v5281_v7  ;;  %v217_v1 = vld [vmem:[%s18976_s0 + $0x640] sm:$0xff]  ;;  %v426_v56 = vld [vmem:[%s18976_s0 + $0xcc8] sm:$0xff] }
 0x19f   :  { %19882 = vst [vmem:[#allocation106_spill] sm:$0xff] %v12617_v42  ;;  %19883 = vst [vmem:[#allocation107_spill] sm:$0xff] %v12620_v58  ;;  %v5991_v34 = vmax.f32 %v5989_v28, %v5990_v35  ;;  %v5947_v48 = vmax.f32 %v5945_v2, %v5946_v11  ;;  %v19216_v39 = vmax.f32 %v12617_v42, 0.0  ;;  %v3906_v49 = vmul.f32 %v11878_v19, %v11819_v40  ;;  %v6549_v35 = vpop.permute.xlu0 %6548  ;;  %v12635_v2 = vpop.f32.mrf.mxu0  ;;  %v425_v11 = vld [vmem:[%s18976_s0 + $0xcc0] sm:$0xff] }
 0x1a0   :  { %19884 = vst [vmem:[#allocation145_spill] sm:$0xff] %v12623_v24  ;;  %v5313_v46 = vsel %vm5091_vm1, %v19212_v4, -inf  ;;  %19885 = vst [vmem:[#allocation146_spill] sm:$0xff] %v12635_v2  ;;  %v19219_v40 = vmax.f32 %v12623_v24, 0.0  ;;  %v5283_v4 = vrot.slane %v5282_v13, 2  ;;  %8837 = vmatprep.mubr.msk.f32.mxu0 %vm435_vm0, %v217_v1  ;;  %9149 = vmatprep.mubr.msk.f32.mxu1 %vm435_vm0, %v425_v11  ;;  %v19886_v36 = vmax.f32 %v12620_v58, 0.0  ;;  %v12669_v58 = vpop.f32.mrf.mxu1 }
 0x1a1   :  { %v5948_v7 = vrot.slane %v5947_v48, 1  ;;  %v5315_v28 = vmax.f32 %v5313_v46, %v12580_v45  ;;  %v5318_v25 = vsel %vm5091_vm1, %v19216_v39, -inf  ;;  %v12660_v46 = vadd.f32 %v11907_v63, %v3906_v49  ;;  %9150 = vmatmul.mubr.msk.f32.gmra.mxu1 %vm435_vm0, %v426_v56  ;;  %8838 = vmatmul.mubr.msk.f32.gmra.mxu0 %vm435_vm0, %v218_v30  ;;  %v12678_v30 = vpop.f32.mrf.mxu0  ;;  %v19895_v49 = vld [vmem:[#allocation6_spill] sm:$0xff] }
 0x1a2   :  { %v5994_v18 = vsel %vm5091_vm1, %v19886_v36, -inf  ;;  %v4117_v45 = vmul.f32 %v11878_v19, %v11843_v38  ;;  %v5992_v11 = vsel %vm5091_vm1, %v19219_v40, -inf  ;;  %v5284_v39 = vmax.f32 %v5282_v13, %v5283_v4  ;;  %v19889_v38 = vld [vmem:[#allocation4_spill] sm:$0xff] }
 0x1a3   :  { %19887 = vst [vmem:[#allocation147_spill] sm:$0xff] %v12660_v46  ;;  %v5949_v1 = vmax.f32 %v5947_v48, %v5948_v7  ;;  %v5993_v36 = vmax.f32 %v5991_v34, %v5992_v11  ;;  %v19890_v2 = vmax.f32 %v19889_v38, 0.0  ;;  %v19891_v7 = vld [vmem:[#allocation2_spill] sm:$0xff]  ;;  %v19893_v40 = vld [vmem:[#allocation8_spill] sm:$0xff] }
 0x1a4   :  { %v12673_v42 = vadd.f32 %v11907_v63, %v4117_v45  ;;  %v5285_v48 = vrot.slane %v5284_v39, 1  ;;  %v19892_v4 = vmax.f32 %v19891_v7, 0.0  ;;  %v19894_v34 = vmax.f32 %v19893_v40, 0.0 }
 0x1a5   :  { %v6860_v56 = vsel %vm5091_vm1, %v19890_v2, %v6549_v35  ;;  %6678 = vrot.lane.b32.xlu1 %v5949_v1, %s9180_s10  ;;  %v19896_v45 = vmax.f32 %v19895_v49, 0.0  ;;  %v12694_v2 = vmax.f32 %v5993_v36, %v5994_v18  ;;  %v19897_v1 = vmax.f32 %v12660_v46, 0.0 }
 0x1a6   :  { %19888 = vst [vmem:[#allocation148_spill] sm:$0xff] %v12673_v42  ;;  %v6861_v13 = vsel %vm5091_vm1, %v19892_v4, %v6549_v35  ;;  %v6862_v11 = vsel %vm5091_vm1, %v19894_v34, %v6549_v35  ;;  %7277 = vst.msk [vmem:[%s18979_s4] sm:$0xff] %vm7276_vm2, %v6860_v56  ;;  %v19221_v7 = vmax.f32 %v12673_v42, 0.0  ;;  %v3909_v18 = vmul.f32 %v11878_v19, %v11858_v62  ;;  %v12717_v4 = vpop.f32.mrf.mxu1  ;;  %v428_v62 = vld [vmem:[%s18976_s0 + $0xcd8] sm:$0xff]  ;;  %v12740_v34 = vpop.f32.mrf.mxu0  ;;  %v222_v42 = vld [vmem:[%s18976_s0 + $0x668] sm:$0xff] }
 0x1a7   :  { %v6863_v24 = vsel %vm5091_vm1, %v19896_v45, %v6549_v35  ;;  %v5316_v38 = vsel %vm5091_vm1, %v19897_v1, -inf  ;;  %7278 = vst.msk [vmem:[%s18979_s4 + $0x8] sm:$0xff] %vm7276_vm2, %v6861_v13  ;;  %7279 = vst.msk [vmem:[%s18979_s4 + $0x10] sm:$0xff] %vm7276_vm2, %v6862_v11  ;;  %v6653_v35 = vpop.permute.xlu0 %6652  ;;  %v5286_v40 = vmax.f32 %v5284_v39, %v5285_v48  ;;  %v4116_v49 = vmul.f32 %v11878_v19, %v11898_v10  ;;  %v219_v13 = vld [vmem:[%s18976_s0 + $0x650] sm:$0xff]  ;;  %v220_v11 = vld [vmem:[%s18976_s0 + $0x658] sm:$0xff] }
 0x1a8   :  { %7280 = vst.msk [vmem:[%s18979_s4 + $0x18] sm:$0xff] %vm7276_vm2, %v6863_v24  ;;  %v5317_v36 = vmax.f32 %v5315_v28, %v5316_v38  ;;  %v5957_v56 = vrot.slane %v12304_v20, 4  ;;  %v427_v24 = vld [vmem:[%s18976_s0 + $0xcd0] sm:$0xff]  ;;  %v12731_v10 = vsel %vm5091_vm1, %v19221_v7, -inf  ;;  %v12734_v39 = vadd.f32 %v11907_v63, %v3909_v18  ;;  %8840 = vmatprep.mubr.msk.f32.mxu0 %vm435_vm0, %v219_v13 }
 0x1a9   :  { %v3908_v28 = vmul.f32 %v11878_v19, %v11915_v52  ;;  %v4119_v48 = vmul.f32 %v11878_v19, %v11942_v60  ;;  %9152 = vmatprep.mubr.msk.f32.mxu1 %vm435_vm0, %v427_v24  ;;  %6576 = vrot.lane.b32.xlu0 %v5286_v40, %s9180_s10  ;;  %v12751_v1 = vadd.f32 %v11907_v63, %v4116_v49  ;;  %v19900_v60 = vld [vmem:[#allocation5_spill] sm:$0xff]  ;;  %v19904_v40 = vld [vmem:[#allocation3_spill] sm:$0xff] }
 0x1aa   :  { %19898 = vst [vmem:[#allocation4_spill] sm:$0xff] %v12734_v39  ;;  %v12748_v45 = vmax.f32 %v5317_v36, %v5318_v25  ;;  %v5958_v52 = vmax.f32 %v12304_v20, %v5957_v56  ;;  %v19901_v38 = vmax.f32 %v19900_v60, 0.0  ;;  %v19222_v13 = vmax.f32 %v12734_v39, 0.0  ;;  %9153 = vmatmul.mubr.msk.f32.gmra.mxu1 %vm435_vm0, %v428_v62  ;;  %8841 = vmatmul.mubr.msk.f32.gmra.mxu0 %vm435_vm0, %v220_v11  ;;  %v19906_v56 = vld [vmem:[#allocation9_spill] sm:$0xff]  ;;  %v19908_v60 = vld [vmem:[#allocation7_spill] sm:$0xff] }
 0x1ab   :  { %19899 = vst [vmem:[#allocation2_spill] sm:$0xff] %v12751_v1  ;;  %v12759_v24 = vadd.f32 %v11907_v63, %v3908_v28  ;;  %v12762_v7 = vadd.f32 %v11907_v63, %v4119_v48  ;;  %v19905_v25 = vmax.f32 %v19904_v40, 0.0  ;;  %v19223_v20 = vmax.f32 %v12751_v1, 0.0 }
 0x1ac   :  { %v7068_v18 = vsel %vm5091_vm1, %v19901_v38, %v6653_v35  ;;  %v5959_v49 = vrot.slane %v5958_v52, 2  ;;  %v19907_v28 = vmax.f32 %v19906_v56, 0.0  ;;  %v19909_v38 = vmax.f32 %v19908_v60, 0.0  ;;  %v12811_v60 = vld [vmem:[%s18977_s2] ss:$0 sm:$0xff] }
 0x1ad   :  { %19902 = vst [vmem:[#allocation8_spill] sm:$0xff] %v12759_v24  ;;  %19903 = vst [vmem:[#allocation6_spill] sm:$0xff] %v12762_v7  ;;  %v7069_v36 = vsel %vm5091_vm1, %v19905_v25, %v6653_v35  ;;  %v12789_v62 = vsel %vm5091_vm1, %v19222_v13, -inf  ;;  %v19224_v11 = vmax.f32 %v12759_v24, 0.0  ;;  %v19225_v25 = vmax.f32 %v12762_v7, 0.0  ;;  %v6655_v13 = vpop.permute.xlu1 %6654 }
 0x1ae   :  { %7485 = vst.msk [vmem:[%s18979_s4 + $0x680] sm:$0xff] %vm7276_vm2, %v7068_v18  ;;  %v7070_v48 = vsel %vm5091_vm1, %v19907_v28, %v6653_v35  ;;  %v7071_v40 = vsel %vm5091_vm1, %v19909_v38, %v6653_v35  ;;  %7486 = vst.msk [vmem:[%s18979_s4 + $0x688] sm:$0xff] %vm7276_vm2, %v7069_v36  ;;  %v12784_v18 = vpop.f32.mrf.mxu1  ;;  %v3911_v35 = vmul.f32 %v11878_v19, %v11962_v41  ;;  %v12803_v36 = vpop.f32.mrf.mxu0  ;;  %v6002_v56 = vsel %vm5091_vm1, %v19223_v20, -inf }
 0x1af   :  { %7487 = vst.msk [vmem:[%s18979_s4 + $0x690] sm:$0xff] %vm7276_vm2, %v7070_v48  ;;  %7488 = vst.msk [vmem:[%s18979_s4 + $0x698] sm:$0xff] %vm7276_vm2, %v7071_v40  ;;  %v5960_v28 = vmax.f32 %v5958_v52, %v5959_v49  ;;  %v19910_v48 = vld [vmem:[#allocation119_spill] sm:$0xff]  ;;  %v5294_v40 = vrot.slane %v12460_v5, 4  ;;  %v6004_v19 = vmax.f32 %v6002_v56, %v12731_v10  ;;  %v12820_v41 = vsel %vm5091_vm1, %v19224_v11, -inf  ;;  %v429_v10 = vld [vmem:[%s18976_s0 + $0xce0] sm:$0xff] }
 0x1b0   :  { %v4118_v38 = vmul.f32 %v12811_v60, %v19910_v48  ;;  %v6007_v52 = vsel %vm5091_vm1, %v19225_v25, -inf  ;;  %v12826_v49 = vadd.f32 %v11907_v63, %v3911_v35  ;;  %v221_v48 = vld [vmem:[%s18976_s0 + $0x660] sm:$0xff]  ;;  %v430_v56 = vld [vmem:[%s18976_s0 + $0xce8] sm:$0xff]  ;;  %v5328_v11 = vmax.f32 %v12820_v41, %v12789_v62  ;;  %v12843_v7 = vpop.f32.mrf.mxu1  ;;  %9155 = vmatprep.mubr.msk.f32.mxu1 %vm435_vm0, %v429_v10  ;;  %v19912_v41 = vld [vmem:[#allocation13_spill] sm:$0xff]  ;;  %v12859_v24 = vpop.f32.mrf.mxu0 }
 0x1b1   :  { %v5961_v20 = vrot.slane %v5960_v28, 1  ;;  %v5295_v35 = vmax.f32 %v12460_v5, %v5294_v40  ;;  %19911 = vst [vmem:[#allocation5_spill] sm:$0xff] %v12843_v7  ;;  %8843 = vmatprep.mubr.msk.f32.mxu0 %vm435_vm0, %v221_v48  ;;  %v3910_v62 = vmul.f32 %v12811_v60, %v12012_v14  ;;  %v19914_v5 = vld [vmem:[#allocation11_spill] sm:$0xff]  ;;  %v6551_v48 = vpop.permute.xlu0 %6550  ;;  %9156 = vmatmul.mubr.msk.f32.gmra.mxu1 %vm435_vm0, %v430_v56  ;;  %v19916_v14 = vld [vmem:[#allocation17_spill] sm:$0xff] }
 0x1b2   :  { %v12840_v25 = vadd.f32 %v11907_v63, %v4118_v38  ;;  %v19913_v63 = vmax.f32 %v19912_v41, 0.0  ;;  %v19915_v40 = vmax.f32 %v19914_v5, 0.0  ;;  %8844 = vmatmul.mubr.msk.f32.gmra.mxu0 %vm435_vm0, %v222_v42  ;;  %v19917_v7 = vmax.f32 %v19916_v14, 0.0  ;;  %v19919_v56 = vld [vmem:[#allocation15_spill] sm:$0xff] }
 0x1b3   :  { %v5962_v10 = vmax.f32 %v5960_v28, %v5961_v20  ;;  %v5296_v46 = vrot.slane %v5295_v35, 2  ;;  %v19918_v42 = vmax.f32 %v12826_v49, 0.0  ;;  %v12881_v28 = vld [vmem:[%s18978_s3] ss:$0 sm:$0xff] }
 0x1b4   :  { %v7072_v38 = vsel %vm5091_vm1, %v19913_v63, %v6655_v13  ;;  %v7073_v39 = vsel %vm5091_vm1, %v19915_v40, %v6655_v13  ;;  %v19232_v1 = vmax.f32 %v12840_v25, 0.0  ;;  %v7074_v41 = vsel %vm5091_vm1, %v19917_v7, %v6655_v13 }
 0x1b5   :  { %7489 = vst.msk [vmem:[%s18979_s4 + $0x6a0] sm:$0xff] %vm7276_vm2, %v7072_v38  ;;  %7490 = vst.msk [vmem:[%s18979_s4 + $0x6a8] sm:$0xff] %vm7276_vm2, %v7073_v39  ;;  %v5331_v20 = vsel %vm5091_vm1, %v19918_v42, -inf  ;;  %v12884_v7 = vadd.f32 %v12881_v28, %v3910_v62  ;;  %v19920_v63 = vmax.f32 %v19919_v56, 0.0  ;;  %v4121_v39 = vmul.f32 %v12811_v60, %v12047_v32  ;;  %6680 = vrot.lane.b32.xlu0 %v5962_v10, %s9180_s10  ;;  %v12909_v56 = vpop.f32.mrf.mxu1 }
 0x1b6   :  { %7491 = vst.msk [vmem:[%s18979_s4 + $0x6b0] sm:$0xff] %vm7276_vm2, %v7074_v41  ;;  %v6005_v5 = vsel %vm5091_vm1, %v19232_v1, -inf  ;;  %v5297_v62 = vmax.f32 %v5295_v35, %v5296_v46  ;;  %v19923_v41 = vld [vmem:[#allocation10_spill] sm:$0xff]  ;;  %v19926_v35 = vld [vmem:[#allocation16_spill] sm:$0xff] }
 0x1b7   :  { %v7075_v38 = vsel %vm5091_vm1, %v19920_v63, %v6655_v13  ;;  %v19921_v13 = vld [vmem:[#allocation12_spill] sm:$0xff]  ;;  %v19924_v42 = vmax.f32 %v19923_v41, 0.0  ;;  %v6006_v10 = vmax.f32 %v6004_v19, %v6005_v5  ;;  %v19233_v63 = vmax.f32 %v12884_v7, 0.0  ;;  %v12926_v19 = vpop.f32.mrf.mxu0 }
 0x1b8   :  { %7492 = vst.msk [vmem:[%s18979_s4 + $0x6b8] sm:$0xff] %vm7276_vm2, %v7075_v38  ;;  %v19922_v40 = vmax.f32 %v19921_v13, 0.0  ;;  %v12913_v46 = vadd.f32 %v12881_v28, %v4121_v39  ;;  %v19927_v1 = vmax.f32 %v19926_v35, 0.0  ;;  %v5298_v5 = vrot.slane %v5297_v62, 1  ;;  %v19928_v13 = vld [vmem:[#allocation14_spill] sm:$0xff]  ;;  %v223_v41 = vld [vmem:[%s18976_s0 + $0x670] sm:$0xff] }
 0x1b9   :  { %v6865_v32 = vsel %vm5091_vm1, %v19924_v42, %v6551_v48  ;;  %v19929_v39 = vmax.f32 %v19928_v13, 0.0  ;;  %v431_v42 = vld [vmem:[%s18976_s0 + $0xcf0] sm:$0xff]  ;;  %v5970_v35 = vrot.slane %v12446_v21, 4  ;;  %8846 = vmatprep.mubr.msk.f32.mxu0 %vm435_vm0, %v223_v41 }
 0x1ba   :  { %v6864_v14 = vsel %vm5091_vm1, %v19922_v40, %v6551_v48  ;;  %19925 = vst [vmem:[#allocation3_spill] sm:$0xff] %v12913_v46  ;;  %v6866_v38 = vsel %vm5091_vm1, %v19927_v1, %v6551_v48  ;;  %7282 = vst.msk [vmem:[%s18979_s4 + $0x28] sm:$0xff] %vm7276_vm2, %v6865_v32  ;;  %v3913_v1 = vmul.f32 %v12811_v60, %v12056_v43  ;;  %v5329_v43 = vsel %vm5091_vm1, %v19233_v63, -inf  ;;  %v12970_v63 = vpop.f32.mrf.mxu1 }
 0x1bb   :  { %7281 = vst.msk [vmem:[%s18979_s4 + $0x20] sm:$0xff] %vm7276_vm2, %v6864_v14  ;;  %v6867_v40 = vsel %vm5091_vm1, %v19929_v39, %v6551_v48  ;;  %7283 = vst.msk [vmem:[%s18979_s4 + $0x30] sm:$0xff] %vm7276_vm2, %v6866_v38  ;;  %v4120_v14 = vmul.f32 %v12811_v60, %v12090_v12  ;;  %v432_v48 = vld [vmem:[%s18976_s0 + $0xcf8] sm:$0xff]  ;;  %v12948_v32 = vmax.f32 %v6006_v10, %v6007_v52  ;;  %v19234_v12 = vmax.f32 %v12913_v46, 0.0 }
 0x1bc   :  { %7284 = vst.msk [vmem:[%s18979_s4 + $0x38] sm:$0xff] %vm7276_vm2, %v6867_v40  ;;  %9158 = vmatprep.mubr.msk.f32.mxu1 %vm435_vm0, %v431_v42  ;;  %v224_v52 = vld [vmem:[%s18976_s0 + $0x678] sm:$0xff]  ;;  %v5299_v10 = vmax.f32 %v5297_v62, %v5298_v5  ;;  %v5330_v38 = vmax.f32 %v5328_v11, %v5329_v43  ;;  %v12965_v13 = vadd.f32 %v12881_v28, %v3913_v1  ;;  %v12981_v5 = vpop.f32.mrf.mxu0 }
 0x1bd   :  { %v12968_v39 = vadd.f32 %v12881_v28, %v4120_v14  ;;  %9159 = vmatmul.mubr.msk.f32.gmra.mxu1 %vm435_vm0, %v432_v48  ;;  %v6016_v40 = vsel %vm5091_vm1, %v19234_v12, -inf  ;;  %v5971_v41 = vmax.f32 %v12446_v21, %v5970_v35  ;;  %v3912_v62 = vmul.f32 %v12811_v60, %v12104_v22  ;;  %8847 = vmatmul.mubr.msk.f32.gmra.mxu0 %vm435_vm0, %v224_v52 }
 0x1be   :  { %19930 = vst [vmem:[#allocation9_spill] sm:$0xff] %v12965_v13  ;;  %v3915_v11 = vmul.f32 %v12811_v60, %v12156_v55  ;;  %6578 = vrot.lane.b32.xlu1 %v5299_v10, %s9180_s10  ;;  %v12985_v1 = vmax.f32 %v5330_v38, %v5331_v20  ;;  %v19235_v14 = vmax.f32 %v12965_v13, 0.0  ;;  %v4123_v21 = vmul.f32 %v12811_v60, %v12138_v54 }
 0x1bf   :  { %19931 = vst [vmem:[#allocation7_spill] sm:$0xff] %v12968_v39  ;;  %v19236_v42 = vmax.f32 %v12968_v39, 0.0  ;;  %v5972_v48 = vrot.slane %v5971_v41, 2  ;;  %v12992_v22 = vadd.f32 %v12881_v28, %v3912_v62  ;;  %v4122_v43 = vmul.f32 %v12811_v60, %v12183_v3 }
 0x1c0   :  { %v12995_v55 = vadd.f32 %v12881_v28, %v3915_v11  ;;  %v5340_v20 = vsel %vm5091_vm1, %v19235_v14, -inf  ;;  %v13006_v54 = vadd.f32 %v12881_v28, %v4123_v21  ;;  %v5307_v52 = vrot.slane %v12589_v53, 4  ;;  %v6657_v21 = vpop.permute.xlu0 %6656 }
 0x1c1   :  { %19932 = vst [vmem:[#allocation119_spill] sm:$0xff] %v12992_v22  ;;  %v6015_v35 = vsel %vm5091_vm1, %v19236_v42, -inf  ;;  %v5973_v38 = vmax.f32 %v5971_v41, %v5972_v48  ;;  %v19239_v62 = vmax.f32 %v12992_v22, 0.0  ;;  %v13013_v12 = vadd.f32 %v12881_v28, %v4122_v43 }
 0x1c2   :  { %19933 = vst [vmem:[#allocation13_spill] sm:$0xff] %v12995_v55  ;;  %19934 = vst [vmem:[#allocation11_spill] sm:$0xff] %v13006_v54  ;;  %v6017_v10 = vmax.f32 %v6015_v35, %v6016_v40  ;;  %v19241_v11 = vmax.f32 %v12995_v55, 0.0  ;;  %v19243_v3 = vmax.f32 %v13006_v54, 0.0  ;;  %v5308_v14 = vmax.f32 %v12589_v53, %v5307_v52  ;;  %v19935_v55 = vld [vmem:[#allocation21_spill] sm:$0xff] }
 0x1c3   :  { %v3914_v42 = vmul.f32 %v12811_v60, %v12201_v37  ;;  %v5974_v46 = vrot.slane %v5973_v38, 1  ;;  %v5339_v40 = vsel %vm5091_vm1, %v19239_v62, -inf  ;;  %v4125_v48 = vmul.f32 %v12811_v60, %v12232_v16  ;;  %v6553_v16 = vpop.permute.xlu1 %6552 }
 0x1c4   :  { %v5344_v41 = vsel %vm5091_vm1, %v19241_v11, -inf  ;;  %v5341_v43 = vmax.f32 %v5339_v40, %v5340_v20  ;;  %v6020_v53 = vsel %vm5091_vm1, %v19243_v3, -inf  ;;  %v19252_v37 = vmax.f32 %v13013_v12, 0.0  ;;  %v19937_v3 = vld [vmem:[#allocation19_spill] sm:$0xff] }
 0x1c5   :  { %v5309_v35 = vrot.slane %v5308_v14, 2  ;;  %v5975_v52 = vmax.f32 %v5973_v38, %v5974_v46  ;;  %v13031_v39 = vadd.f32 %v12881_v28, %v3914_v42  ;;  %v13034_v62 = vadd.f32 %v12881_v28, %v4125_v48  ;;  %v19939_v38 = vld [vmem:[#allocation25_spill] sm:$0xff]  ;;  %v19941_v48 = vld [vmem:[#allocation23_spill] sm:$0xff] }
 0x1c6   :  { %v19936_v11 = vmax.f32 %v19935_v55, 0.0  ;;  %v6018_v20 = vsel %vm5091_vm1, %v19252_v37, -inf  ;;  %v19938_v54 = vmax.f32 %v19937_v3, 0.0  ;;  %v19940_v42 = vmax.f32 %v19939_v38, 0.0 }
 0x1c7   :  { %v5310_v40 = vmax.f32 %v5308_v14, %v5309_v35  ;;  %6682 = vrot.lane.b32.xlu1 %v5975_v52, %s9180_s10  ;;  %v6019_v55 = vmax.f32 %v6017_v10, %v6018_v20  ;;  %v19246_v14 = vmax.f32 %v13034_v62, 0.0  ;;  %v19942_v3 = vmax.f32 %v19941_v48, 0.0  ;;  %v19943_v10 = vld [vmem:[#allocation20_spill] sm:$0xff]  ;;  %v19945_v52 = vld [vmem:[#allocation18_spill] sm:$0xff] }
 0x1c8   :  { %v7076_v13 = vsel %vm5091_vm1, %v19936_v11, %v6657_v21  ;;  %v7077_v46 = vsel %vm5091_vm1, %v19938_v54, %v6657_v21  ;;  %v7078_v22 = vsel %vm5091_vm1, %v19940_v42, %v6657_v21  ;;  %v19254_v11 = vmax.f32 %v13031_v39, 0.0 }
 0x1c9   :  { %7493 = vst.msk [vmem:[%s18979_s4 + $0x6c0] sm:$0xff] %vm7276_vm2, %v7076_v13  ;;  %v7079_v54 = vsel %vm5091_vm1, %v19942_v3, %v6657_v21  ;;  %7494 = vst.msk [vmem:[%s18979_s4 + $0x6c8] sm:$0xff] %vm7276_vm2, %v7077_v46  ;;  %v5311_v13 = vrot.slane %v5310_v40, 1  ;;  %v19944_v35 = vmax.f32 %v19943_v10, 0.0  ;;  %v19946_v20 = vmax.f32 %v19945_v52, 0.0  ;;  %v19947_v46 = vld [vmem:[#allocation24_spill] sm:$0xff] }
 0x1ca   :  { %7495 = vst.msk [vmem:[%s18979_s4 + $0x6d0] sm:$0xff] %vm7276_vm2, %v7078_v22  ;;  %7496 = vst.msk [vmem:[%s18979_s4 + $0x6d8] sm:$0xff] %vm7276_vm2, %v7079_v54  ;;  %v19948_v42 = vmax.f32 %v19947_v46, 0.0  ;;  %v13079_v3 = vmax.f32 %v6019_v55, %v6020_v53  ;;  %v5342_v22 = vsel %vm5091_vm1, %v19254_v11, -inf  ;;  %v6029_v54 = vsel %vm5091_vm1, %v19246_v14, -inf  ;;  %v19949_v10 = vld [vmem:[#allocation22_spill] sm:$0xff] }
 0x1cb   :  { %v6868_v21 = vsel %vm5091_vm1, %v19944_v35, %v6553_v16  ;;  %v6869_v38 = vsel %vm5091_vm1, %v19946_v20, %v6553_v16  ;;  %v19950_v35 = vmax.f32 %v19949_v10, 0.0  ;;  %v5312_v53 = vmax.f32 %v5310_v40, %v5311_v13  ;;  %v19956_v11 = vld [vmem:[#allocation33_spill] sm:$0xff] }
 0x1cc   :  { %v6870_v48 = vsel %vm5091_vm1, %v19948_v42, %v6553_v16  ;;  %7285 = vst.msk [vmem:[%s18979_s4 + $0x40] sm:$0xff] %vm7276_vm2, %v6868_v21  ;;  %7286 = vst.msk [vmem:[%s18979_s4 + $0x48] sm:$0xff] %vm7276_vm2, %v6869_v38  ;;  %v5343_v55 = vmax.f32 %v5341_v43, %v5342_v22  ;;  %v4124_v21 = vmul.f32 %v12811_v60, %v12282_v17  ;;  %v5983_v20 = vrot.slane %v12575_v9, 4 }
 0x1cd   :  { %v6871_v52 = vsel %vm5091_vm1, %v19950_v35, %v6553_v16  ;;  %7287 = vst.msk [vmem:[%s18979_s4 + $0x50] sm:$0xff] %vm7276_vm2, %v6870_v48  ;;  %v3917_v16 = vmul.f32 %v12811_v60, %v12248_v0  ;;  %v3916_v38 = vmul.f32 %v12811_v60, %v12294_v47  ;;  %v3919_v40 = vmul.f32 %v12811_v60, %v12340_v6 }
 0x1ce   :  { %7288 = vst.msk [vmem:[%s18979_s4 + $0x58] sm:$0xff] %vm7276_vm2, %v6871_v52  ;;  %v4127_v43 = vmul.f32 %v12811_v60, %v12324_v29  ;;  %6580 = vrot.lane.b32.xlu0 %v5312_v53, %s9180_s10  ;;  %v13118_v13 = vmax.f32 %v5343_v55, %v5344_v41  ;;  %v13124_v17 = vadd.f32 %v12881_v28, %v4124_v21 }
 0x1cf   :  { %v13121_v0 = vadd.f32 %v12881_v28, %v3917_v16  ;;  %v4126_v46 = vmul.f32 %v12811_v60, %v12375_v57  ;;  %v5984_v47 = vmax.f32 %v12575_v9, %v5983_v20  ;;  %v13130_v6 = vadd.f32 %v12881_v28, %v3916_v38 }
 0x1d0   :  { %v13133_v29 = vadd.f32 %v12881_v28, %v3919_v40  ;;  %v13136_v41 = vadd.f32 %v12881_v28, %v4127_v43  ;;  %v19247_v48 = vmax.f32 %v13124_v17, 0.0  ;;  %v5320_v57 = vrot.slane %v12748_v45, 4 }
 0x1d1   :  { %v19249_v42 = vmax.f32 %v13121_v0, 0.0  ;;  %v13141_v22 = vadd.f32 %v12881_v28, %v4126_v46  ;;  %v5985_v10 = vrot.slane %v5984_v47, 2  ;;  %v19251_v9 = vmax.f32 %v13130_v6, 0.0  ;;  %v6555_v46 = vpop.permute.xlu1 %6554 }
 0x1d2   :  { %19951 = vst [vmem:[#allocation17_spill] sm:$0xff] %v13136_v41  ;;  %v19248_v35 = vmax.f32 %v13133_v29, 0.0  ;;  %v19250_v52 = vmax.f32 %v13136_v41, 0.0  ;;  %v6028_v55 = vsel %vm5091_vm1, %v19247_v48, -inf  ;;  %v5321_v21 = vmax.f32 %v12748_v45, %v5320_v57 }
 0x1d3   :  { %v5353_v53 = vsel %vm5091_vm1, %v19249_v42, -inf  ;;  %v19253_v16 = vmax.f32 %v13141_v22, 0.0  ;;  %v6030_v20 = vmax.f32 %v6028_v55, %v6029_v54  ;;  %v5986_v38 = vmax.f32 %v5984_v47, %v5985_v10 }
 0x1d4   :  { %v5352_v40 = vsel %vm5091_vm1, %v19251_v9, -inf  ;;  %v5357_v43 = vsel %vm5091_vm1, %v19248_v35, -inf  ;;  %v6033_v48 = vsel %vm5091_vm1, %v19250_v52, -inf  ;;  %v5322_v54 = vrot.slane %v5321_v21, 2  ;;  %v13171_v35 = vpop.f32.mrf.mxu1  ;;  %v19954_v9 = vld [vmem:[#allocation26_spill] sm:$0xff] }
 0x1d5   :  { %v5354_v14 = vmax.f32 %v5352_v40, %v5353_v53  ;;  %v6031_v45 = vsel %vm5091_vm1, %v19253_v16, -inf  ;;  %v5987_v47 = vrot.slane %v5986_v38, 1  ;;  %v3918_v10 = vmul.f32 %v12811_v60, %v12387_v8  ;;  %v19952_v40 = vld [vmem:[#allocation28_spill] sm:$0xff] }
 0x1d6   :  { %v6032_v57 = vmax.f32 %v6030_v20, %v6031_v45  ;;  %v4129_v55 = vmul.f32 %v12811_v60, %v12424_v27  ;;  %v5323_v53 = vmax.f32 %v5321_v21, %v5322_v54  ;;  %v19953_v42 = vmax.f32 %v19952_v40, 0.0 }
 0x1d7   :  { %v19955_v37 = vmax.f32 %v19954_v9, 0.0  ;;  %v19957_v41 = vmax.f32 %v19956_v11, 0.0  ;;  %v5988_v45 = vmax.f32 %v5986_v38, %v5987_v47  ;;  %v13185_v27 = vadd.f32 %v12881_v28, %v3918_v10 }
 0x1d8   :  { %v6872_v52 = vsel %vm5091_vm1, %v19953_v42, %v6555_v46  ;;  %v13182_v8 = vmax.f32 %v6032_v57, %v6033_v48  ;;  %v13188_v21 = vadd.f32 %v12881_v28, %v4129_v55  ;;  %v5324_v11 = vrot.slane %v5323_v53, 1  ;;  %v6659_v55 = vpop.permute.xlu1 %6658 }
 0x1d9   :  { %v6873_v16 = vsel %vm5091_vm1, %v19955_v37, %v6555_v46  ;;  %v6874_v20 = vsel %vm5091_vm1, %v19957_v41, %v6555_v46  ;;  %7289 = vst.msk [vmem:[%s18979_s4 + $0x60] sm:$0xff] %vm7276_vm2, %v6872_v52  ;;  %v13202_v37 = vpop.f32.mrf.mxu0  ;;  %v19959_v41 = vld [vmem:[#allocation30_spill] sm:$0xff]  ;;  %v3921_v9 = vmul.f32 %v12811_v60, %v12434_v26  ;;  %v4128_v52 = vmul.f32 %v12811_v60, %v12466_v51  ;;  %v13221_v26 = vpop.f32.mrf.mxu1 }
 0x1da   :  { %19958 = vst [vmem:[#allocation15_spill] sm:$0xff] %v13188_v21  ;;  %7290 = vst.msk [vmem:[%s18979_s4 + $0x68] sm:$0xff] %vm7276_vm2, %v6873_v16  ;;  %v19960_v42 = vmax.f32 %v19959_v41, 0.0  ;;  %6684 = vrot.lane.b32.xlu0 %v5988_v45, %s9180_s10  ;;  %v19257_v16 = vmax.f32 %v13185_v27, 0.0  ;;  %v19256_v38 = vmax.f32 %v13188_v21, 0.0  ;;  %v5996_v54 = vrot.slane %v12694_v2, 4 }
 0x1db   :  { %7291 = vst.msk [vmem:[%s18979_s4 + $0x70] sm:$0xff] %vm7276_vm2, %v6874_v20  ;;  %v5325_v47 = vmax.f32 %v5323_v53, %v5324_v11  ;;  %v13224_v51 = vadd.f32 %v12881_v28, %v3921_v9  ;;  %v13227_v57 = vadd.f32 %v12881_v28, %v4128_v52  ;;  %v4131_v10 = vmul.f32 %v12811_v60, %v12516_v31  ;;  %v13243_v45 = vpop.f32.mrf.mxu0  ;;  %v19964_v52 = vld [vmem:[#allocation29_spill] sm:$0xff] }
 0x1dc   :  { %v6875_v48 = vsel %vm5091_vm1, %v19960_v42, %v6555_v46  ;;  %v3920_v46 = vmul.f32 %v12811_v60, %v12475_v61  ;;  %v5355_v40 = vsel %vm5091_vm1, %v19257_v16, -inf  ;;  %v13237_v61 = vsel %vm5091_vm1, %v19256_v38, -inf }
 0x1dd   :  { %7292 = vst.msk [vmem:[%s18979_s4 + $0x78] sm:$0xff] %vm7276_vm2, %v6875_v48  ;;  %19961 = vst [vmem:[#allocation12_spill] sm:$0xff] %v13224_v51  ;;  %v5997_v53 = vmax.f32 %v12694_v2, %v5996_v54  ;;  %6582 = vrot.lane.b32.xlu1 %v5325_v47, %s9180_s10  ;;  %v5356_v31 = vmax.f32 %v5354_v14, %v5355_v40  ;;  %v19259_v11 = vmax.f32 %v13224_v51, 0.0  ;;  %v19258_v41 = vmax.f32 %v13227_v57, 0.0  ;;  %v13258_v47 = vpop.f32.mrf.mxu1 }
 0x1de   :  { %19962 = vst [vmem:[#allocation10_spill] sm:$0xff] %v13227_v57  ;;  %v13241_v20 = vadd.f32 %v12881_v28, %v3920_v46  ;;  %v13249_v42 = vadd.f32 %v12881_v28, %v4131_v10  ;;  %v19965_v2 = vmax.f32 %v19964_v52, 0.0  ;;  %v19966_v46 = vld [vmem:[#allocation27_spill] sm:$0xff]  ;;  %v13284_v52 = vpop.f32.mrf.mxu0 }
 0x1df   :  { %v5998_v48 = vrot.slane %v5997_v53, 2  ;;  %v19967_v38 = vmax.f32 %v19966_v46, 0.0  ;;  %v13260_v14 = vmax.f32 %v5356_v31, %v5357_v43  ;;  %v5366_v10 = vsel %vm5091_vm1, %v19259_v11, -inf  ;;  %v6557_v11 = vpop.permute.xlu0 %6556 }
 0x1e0   :  { %19963 = vst [vmem:[#allocation16_spill] sm:$0xff] %v13249_v42  ;;  %v19263_v9 = vmax.f32 %v13241_v20, 0.0  ;;  %v7080_v54 = vsel %vm5091_vm1, %v19965_v2, %v6659_v55  ;;  %v6041_v40 = vsel %vm5091_vm1, %v19258_v41, -inf  ;;  %v19968_v2 = vld [vmem:[#allocation32_spill] sm:$0xff]  ;;  %v19970_v21 = vmax.f32 %v13249_v42, 0.0 }
 0x1e1   :  { %v7081_v16 = vsel %vm5091_vm1, %v19967_v38, %v6659_v55  ;;  %7497 = vst.msk [vmem:[%s18979_s4 + $0x6e0] sm:$0xff] %vm7276_vm2, %v7080_v54  ;;  %v6043_v43 = vmax.f32 %v6041_v40, %v13237_v61  ;;  %v5999_v38 = vmax.f32 %v5997_v53, %v5998_v48  ;;  %v19969_v46 = vmax.f32 %v19968_v2, 0.0  ;;  %v19974_v40 = vld [vmem:[#allocation37_spill] sm:$0xff] }
 0x1e2   :  { %7498 = vst.msk [vmem:[%s18979_s4 + $0x6e8] sm:$0xff] %vm7276_vm2, %v7081_v16  ;;  %v5365_v31 = vsel %vm5091_vm1, %v19263_v9, -inf  ;;  %v6046_v57 = vsel %vm5091_vm1, %v19970_v21, -inf  ;;  %v19971_v16 = vld [vmem:[#allocation31_spill] sm:$0xff]  ;;  %v3923_v53 = vmul.f32 %v12811_v60, %v12524_v50  ;;  %v4130_v21 = vmul.f32 %v12811_v60, %v12546_v44 }
 0x1e3   :  { %v7082_v41 = vsel %vm5091_vm1, %v19969_v46, %v6659_v55  ;;  %v5367_v54 = vmax.f32 %v5365_v31, %v5366_v10  ;;  %v19972_v51 = vmax.f32 %v19971_v16, 0.0  ;;  %v6000_v48 = vrot.slane %v5999_v38, 1  ;;  %v19976_v46 = vld [vmem:[#allocation34_spill] sm:$0xff] }
 0x1e4   :  { %7499 = vst.msk [vmem:[%s18979_s4 + $0x6f0] sm:$0xff] %vm7276_vm2, %v7082_v41  ;;  %v5333_v10 = vrot.slane %v12985_v1, 4  ;;  %v13310_v41 = vadd.f32 %v12881_v28, %v3923_v53  ;;  %v4133_v50 = vmul.f32 %v12811_v60, %v12593_v59  ;;  %v19975_v31 = vmax.f32 %v19974_v40, 0.0  ;;  %v13335_v59 = vpop.f32.mrf.mxu0 }
 0x1e5   :  { %v7083_v61 = vsel %vm5091_vm1, %v19972_v51, %v6659_v55  ;;  %v3922_v51 = vmul.f32 %v12811_v60, %v12564_v33  ;;  %v13307_v55 = vpop.f32.mrf.mxu1  ;;  %v19977_v16 = vmax.f32 %v19976_v46, 0.0  ;;  %v13321_v9 = vadd.f32 %v12881_v28, %v4130_v21 }
 0x1e6   :  { %7500 = vst.msk [vmem:[%s18979_s4 + $0x6f8] sm:$0xff] %vm7276_vm2, %v7083_v61  ;;  %19973 = vst [vmem:[#allocation14_spill] sm:$0xff] %v13310_v41  ;;  %v6876_v2 = vsel %vm5091_vm1, %v19975_v31, %v6557_v11  ;;  %v6001_v61 = vmax.f32 %v5999_v38, %v6000_v48  ;;  %v5334_v33 = vmax.f32 %v12985_v1, %v5333_v10  ;;  %v19264_v38 = vmax.f32 %v13310_v41, 0.0  ;;  %v19981_v1 = vld [vmem:[#allocation41_spill] sm:$0xff]  ;;  %v6661_v41 = vpop.permute.xlu0 %6660 }
 0x1e7   :  { %v6877_v44 = vsel %vm5091_vm1, %v19977_v16, %v6557_v11  ;;  %19978 = vst [vmem:[#allocation21_spill] sm:$0xff] %v13321_v9  ;;  %v13325_v53 = vadd.f32 %v12881_v28, %v3922_v51  ;;  %7293 = vst.msk [vmem:[%s18979_s4 + $0x80] sm:$0xff] %vm7276_vm2, %v6876_v2  ;;  %v13339_v48 = vadd.f32 %v12881_v28, %v4133_v50  ;;  %v19982_v21 = vmax.f32 %v19981_v1, 0.0  ;;  %v19983_v51 = vld [vmem:[#allocation38_spill] sm:$0xff]  ;;  %v13360_v50 = vpop.f32.mrf.mxu1 }
 0x1e8   :  { %7294 = vst.msk [vmem:[%s18979_s4 + $0x88] sm:$0xff] %vm7276_vm2, %v6877_v44  ;;  %v19984_v40 = vmax.f32 %v19983_v51, 0.0  ;;  %6686 = vrot.lane.b32.xlu1 %v6001_v61, %s9180_s10  ;;  %v19267_v2 = vmax.f32 %v13321_v9, 0.0  ;;  %v5335_v46 = vrot.slane %v5334_v33, 2  ;;  %v5370_v44 = vsel %vm5091_vm1, %v19264_v38, -inf }
 0x1e9   :  { %19979 = vst [vmem:[#allocation19_spill] sm:$0xff] %v13325_v53  ;;  %19980 = vst [vmem:[#allocation25_spill] sm:$0xff] %v13339_v48  ;;  %v6878_v10 = vsel %vm5091_vm1, %v19982_v21, %v6557_v11  ;;  %v19268_v16 = vmax.f32 %v13325_v53, 0.0  ;;  %v4132_v1 = vmul.f32 %v12811_v60, %v12626_v15  ;;  %v6009_v21 = vrot.slane %v12948_v32, 4  ;;  %v13392_v53 = vpop.f32.mrf.mxu1 }
 0x1ea   :  { %v6879_v31 = vsel %vm5091_vm1, %v19984_v40, %v6557_v11  ;;  %7295 = vst.msk [vmem:[%s18979_s4 + $0x90] sm:$0xff] %vm7276_vm2, %v6878_v10  ;;  %v3925_v11 = vmul.f32 %v12811_v60, %v12603_v23  ;;  %v6044_v10 = vsel %vm5091_vm1, %v19267_v2, -inf  ;;  %v5336_v51 = vmax.f32 %v5334_v33, %v5335_v46 }
 0x1eb   :  { %7296 = vst.msk [vmem:[%s18979_s4 + $0x98] sm:$0xff] %vm7276_vm2, %v6879_v31  ;;  %v5368_v23 = vsel %vm5091_vm1, %v19268_v16, -inf  ;;  %v13378_v31 = vpop.f32.mrf.mxu0  ;;  %v6045_v38 = vmax.f32 %v6043_v43, %v6044_v10  ;;  %v19986_v15 = vmax.f32 %v13339_v48, 0.0  ;;  %v13386_v9 = vadd.f32 %v12881_v28, %v4132_v1  ;;  %v19988_v16 = vld [vmem:[#allocation146_spill] sm:$0xff] }
 0x1ec   :  { %v13376_v40 = vadd.f32 %v12881_v28, %v3925_v11  ;;  %v5369_v61 = vmax.f32 %v5367_v54, %v5368_v23  ;;  %v5337_v33 = vrot.slane %v5336_v51, 1  ;;  %v6010_v2 = vmax.f32 %v12948_v32, %v6009_v21 }
 0x1ed   :  { %v13383_v42 = vsel %vm5091_vm1, %v19986_v15, -inf  ;;  %19987 = vst [vmem:[#allocation20_spill] sm:$0xff] %v13386_v9  ;;  %v3924_v11 = vmul.f32 %v12811_v60, %v19988_v16  ;;  %v13394_v43 = vmax.f32 %v6045_v38, %v6046_v57  ;;  %v19275_v10 = vmax.f32 %v13386_v9, 0.0  ;;  %v13407_v15 = vpop.f32.mrf.mxu0 }
 0x1ee   :  { %19985 = vst [vmem:[#allocation23_spill] sm:$0xff] %v13376_v40  ;;  %v19271_v46 = vmax.f32 %v13376_v40, 0.0  ;;  %v13396_v54 = vmax.f32 %v5369_v61, %v5370_v44  ;;  %v4135_v1 = vmul.f32 %v12811_v60, %v12669_v58  ;;  %v5338_v23 = vmax.f32 %v5336_v51, %v5337_v33  ;;  %v19991_v44 = vld [vmem:[#allocation36_spill] sm:$0xff]  ;;  %v19993_v51 = vld [vmem:[#allocation35_spill] sm:$0xff] }
 0x1ef   :  { %v6011_v21 = vrot.slane %v6010_v2, 2  ;;  %v13405_v16 = vadd.f32 %v12881_v28, %v3924_v11  ;;  %v6054_v57 = vsel %vm5091_vm1, %v19275_v10, -inf  ;;  %v19992_v58 = vmax.f32 %v19991_v44, 0.0  ;;  %v19995_v40 = vld [vmem:[#allocation40_spill] sm:$0xff] }
 0x1f0   :  { %v5379_v32 = vsel %vm5091_vm1, %v19271_v46, -inf  ;;  %v13413_v38 = vadd.f32 %v12881_v28, %v4135_v1  ;;  %v19994_v33 = vmax.f32 %v19993_v51, 0.0  ;;  %6584 = vrot.lane.b32.xlu0 %v5338_v23, %s9180_s10  ;;  %v6056_v11 = vmax.f32 %v6054_v57, %v13383_v42  ;;  %v13435_v23 = vpop.f32.mrf.mxu1 }
 0x1f1   :  { %19989 = vst [vmem:[#allocation18_spill] sm:$0xff] %v13405_v16  ;;  %v7084_v61 = vsel %vm5091_vm1, %v19992_v58, %v6661_v41  ;;  %v6012_v48 = vmax.f32 %v6010_v2, %v6011_v21  ;;  %v19277_v9 = vmax.f32 %v13405_v16, 0.0  ;;  %v19996_v10 = vmax.f32 %v19995_v40, 0.0  ;;  %v19997_v2 = vld [vmem:[#allocation39_spill] sm:$0xff] }
 0x1f2   :  { %19990 = vst [vmem:[#allocation24_spill] sm:$0xff] %v13413_v38  ;;  %v7085_v46 = vsel %vm5091_vm1, %v19994_v33, %v6661_v41  ;;  %7501 = vst.msk [vmem:[%s18979_s4 + $0x700] sm:$0xff] %vm7276_vm2, %v7084_v61  ;;  %v19276_v42 = vmax.f32 %v13413_v38, 0.0  ;;  %v19998_v21 = vmax.f32 %v19997_v2, 0.0  ;;  %v4134_v57 = vmul.f32 %v12811_v60, %v12717_v4  ;;  %v6559_v61 = vpop.permute.xlu1 %6558  ;;  %v20004_v38 = vld [vmem:[#allocation42_spill] sm:$0xff] }
 0x1f3   :  { %v7086_v1 = vsel %vm5091_vm1, %v19996_v10, %v6661_v41  ;;  %7502 = vst.msk [vmem:[%s18979_s4 + $0x708] sm:$0xff] %vm7276_vm2, %v7085_v46  ;;  %v3927_v10 = vmul.f32 %v12811_v60, %v12678_v30  ;;  %v6013_v46 = vrot.slane %v6012_v48, 1  ;;  %v5378_v44 = vsel %vm5091_vm1, %v19277_v9, -inf  ;;  %v13459_v30 = vpop.f32.mrf.mxu0 }
 0x1f4   :  { %v7087_v40 = vsel %vm5091_vm1, %v19998_v21, %v6661_v41  ;;  %7503 = vst.msk [vmem:[%s18979_s4 + $0x710] sm:$0xff] %vm7276_vm2, %v7086_v1  ;;  %v5346_v41 = vrot.slane %v13118_v13, 4  ;;  %v3926_v58 = vmul.f32 %v12811_v60, %v12740_v34  ;;  %v5380_v51 = vmax.f32 %v5378_v44, %v5379_v32  ;;  %v13476_v32 = vpop.f32.mrf.mxu1 }
 0x1f5   :  { %7504 = vst.msk [vmem:[%s18979_s4 + $0x718] sm:$0xff] %vm7276_vm2, %v7087_v40  ;;  %v6059_v4 = vsel %vm5091_vm1, %v19276_v42, -inf  ;;  %v13465_v33 = vadd.f32 %v12881_v28, %v3927_v10  ;;  %v13468_v1 = vadd.f32 %v12881_v28, %v4134_v57  ;;  %v6014_v2 = vmax.f32 %v6012_v48, %v6013_v46  ;;  %v20002_v10 = vld [vmem:[#allocation44_spill] sm:$0xff] }
 0x1f6   :  { %v5347_v21 = vmax.f32 %v13118_v13, %v5346_v41  ;;  %v13472_v40 = vadd.f32 %v12881_v28, %v3926_v58  ;;  %v4137_v34 = vmul.f32 %v12811_v60, %v12784_v18  ;;  %v20003_v9 = vmax.f32 %v20002_v10, 0.0  ;;  %v20007_v58 = vld [vmem:[#allocation49_spill] sm:$0xff]  ;;  %v20011_v10 = vld [vmem:[#allocation46_spill] sm:$0xff] }
 0x1f7   :  { %19999 = vst [vmem:[#allocation22_spill] sm:$0xff] %v13465_v33  ;;  %20000 = vst [vmem:[#allocation28_spill] sm:$0xff] %v13468_v1  ;;  %v20005_v48 = vmax.f32 %v20004_v38, 0.0  ;;  %6688 = vrot.lane.b32.xlu0 %v6014_v2, %s9180_s10  ;;  %v20008_v44 = vmax.f32 %v20007_v58, 0.0  ;;  %v20009_v38 = vmax.f32 %v13465_v33, 0.0 }
 0x1f8   :  { %20001 = vst [vmem:[#allocation26_spill] sm:$0xff] %v13472_v40  ;;  %v6880_v57 = vsel %vm5091_vm1, %v20003_v9, %v6559_v61  ;;  %v5348_v46 = vrot.slane %v5347_v21, 2  ;;  %v13489_v18 = vadd.f32 %v12881_v28, %v4137_v34  ;;  %v13502_v9 = vpop.f32.mrf.mxu0  ;;  %v20010_v34 = vmax.f32 %v13468_v1, 0.0 }
 0x1f9   :  { %v6881_v13 = vsel %vm5091_vm1, %v20005_v48, %v6559_v61  ;;  %v6882_v42 = vsel %vm5091_vm1, %v20008_v44, %v6559_v61  ;;  %7297 = vst.msk [vmem:[%s18979_s4 + $0xa0] sm:$0xff] %vm7276_vm2, %v6880_v57  ;;  %v5383_v2 = vsel %vm5091_vm1, %v20009_v38, -inf  ;;  %v20012_v48 = vmax.f32 %v20011_v10, 0.0 }
 0x1fa   :  { %20006 = vst [vmem:[#allocation33_spill] sm:$0xff] %v13489_v18  ;;  %7298 = vst.msk [vmem:[%s18979_s4 + $0xa8] sm:$0xff] %vm7276_vm2, %v6881_v13  ;;  %v6057_v44 = vsel %vm5091_vm1, %v20010_v34, -inf  ;;  %v3929_v57 = vmul.f32 %v12811_v60, %v12803_v36  ;;  %v5349_v41 = vmax.f32 %v5347_v21, %v5348_v46  ;;  %v20013_v38 = vmax.f32 %v13472_v40, 0.0  ;;  %v20015_v36 = vld [vmem:[#allocation5_spill] sm:$0xff]  ;;  %v6663_v46 = vpop.permute.xlu1 %6662 }
 0x1fb   :  { %v6883_v58 = vsel %vm5091_vm1, %v20012_v48, %v6559_v61  ;;  %7299 = vst.msk [vmem:[%s18979_s4 + $0xb0] sm:$0xff] %vm7276_vm2, %v6882_v42  ;;  %v6058_v13 = vmax.f32 %v6056_v11, %v6057_v44  ;;  %v19281_v34 = vmax.f32 %v13489_v18, 0.0  ;;  %v13527_v61 = vpop.f32.mrf.mxu1  ;;  %v4136_v11 = vmul.f32 %v12811_v60, %v20015_v36  ;;  %v20018_v18 = vld [vmem:[#allocation45_spill] sm:$0xff] }
 0x1fc   :  { %v5381_v1 = vsel %vm5091_vm1, %v20013_v38, -inf  ;;  %7300 = vst.msk [vmem:[%s18979_s4 + $0xb8] sm:$0xff] %vm7276_vm2, %v6883_v58  ;;  %v13530_v42 = vadd.f32 %v12881_v28, %v3929_v57  ;;  %v6022_v21 = vrot.slane %v13079_v3, 4  ;;  %v5350_v48 = vrot.slane %v5349_v41, 1 }
 0x1fd   :  { %v5382_v10 = vmax.f32 %v5380_v51, %v5381_v1  ;;  %v13535_v44 = vmax.f32 %v6058_v13, %v6059_v4  ;;  %v6068_v38 = vsel %vm5091_vm1, %v19281_v34, -inf  ;;  %v3928_v58 = vmul.f32 %v12811_v60, %v12859_v24  ;;  %v13542_v51 = vpop.f32.mrf.mxu0 }
 0x1fe   :  { %20014 = vst [vmem:[#allocation30_spill] sm:$0xff] %v13530_v42  ;;  %v19284_v57 = vmax.f32 %v13530_v42, 0.0  ;;  %v13548_v36 = vadd.f32 %v12881_v28, %v4136_v11  ;;  %v6023_v4 = vmax.f32 %v13079_v3, %v6022_v21  ;;  %v5351_v13 = vmax.f32 %v5349_v41, %v5350_v48  ;;  %v20020_v11 = vld [vmem:[#allocation43_spill] sm:$0xff] }
 0x1ff   :  { %v13544_v1 = vmax.f32 %v5382_v10, %v5383_v2  ;;  %v13552_v33 = vadd.f32 %v12881_v28, %v3928_v58  ;;  %v4139_v34 = vmul.f32 %v12811_v60, %v12909_v56  ;;  %v20019_v24 = vmax.f32 %v20018_v18, 0.0  ;;  %v13559_v2 = vpop.f32.mrf.mxu1  ;;  %v20023_v58 = vld [vmem:[#allocation48_spill] sm:$0xff]  ;;  %v20025_v3 = vld [vmem:[#allocation47_spill] sm:$0xff] }
 0x200   :  { %20016 = vst [vmem:[#allocation29_spill] sm:$0xff] %v13548_v36  ;;  %v13564_v10 = vsel %vm5091_vm1, %v19284_v57, -inf  ;;  %v6024_v41 = vrot.slane %v6023_v4, 2  ;;  %v20021_v21 = vmax.f32 %v20020_v11, 0.0  ;;  %6586 = vrot.lane.b32.xlu1 %v5351_v13, %s9180_s10  ;;  %v20026_v11 = vmax.f32 %v20025_v3, 0.0 }
 0x201   :  { %20017 = vst [vmem:[#allocation27_spill] sm:$0xff] %v13552_v33  ;;  %v7088_v40 = vsel %vm5091_vm1, %v20019_v24, %v6663_v46  ;;  %v13577_v18 = vadd.f32 %v12881_v28, %v4139_v34  ;;  %v20024_v24 = vmax.f32 %v20023_v58, 0.0  ;;  %v20027_v13 = vmax.f32 %v13548_v36, 0.0 }
 0x202   :  { %v7089_v48 = vsel %vm5091_vm1, %v20021_v21, %v6663_v46  ;;  %7505 = vst.msk [vmem:[%s18979_s4 + $0x720] sm:$0xff] %vm7276_vm2, %v7088_v40  ;;  %v7091_v21 = vsel %vm5091_vm1, %v20026_v11, %v6663_v46  ;;  %v13589_v40 = vpop.f32.mrf.mxu0  ;;  %v6025_v56 = vmax.f32 %v6023_v4, %v6024_v41  ;;  %v4138_v3 = vmul.f32 %v12811_v60, %v12970_v63  ;;  %v13611_v11 = vpop.f32.mrf.mxu1 }
 0x203   :  { %20022 = vst [vmem:[#allocation32_spill] sm:$0xff] %v13577_v18  ;;  %v7090_v57 = vsel %vm5091_vm1, %v20024_v24, %v6663_v46  ;;  %7506 = vst.msk [vmem:[%s18979_s4 + $0x728] sm:$0xff] %vm7276_vm2, %v7089_v48  ;;  %v6067_v34 = vsel %vm5091_vm1, %v20027_v13, -inf  ;;  %v3931_v46 = vmul.f32 %v12811_v60, %v12926_v19  ;;  %v20028_v58 = vmax.f32 %v13552_v33, 0.0  ;;  %v6561_v24 = vpop.permute.xlu0 %6560 }
 0x204   :  { %7507 = vst.msk [vmem:[%s18979_s4 + $0x730] sm:$0xff] %vm7276_vm2, %v7090_v57  ;;  %7508 = vst.msk [vmem:[%s18979_s4 + $0x738] sm:$0xff] %vm7276_vm2, %v7091_v21  ;;  %v6069_v48 = vmax.f32 %v6067_v34, %v6068_v38  ;;  %v19289_v41 = vmax.f32 %v13577_v18, 0.0  ;;  %v5359_v57 = vrot.slane %v13260_v14, 4  ;;  %v6026_v13 = vrot.slane %v6025_v56, 1  ;;  %v13628_v42 = vpop.f32.mrf.mxu0 }
 0x205   :  { %v5391_v4 = vsel %vm5091_vm1, %v20028_v58, -inf  ;;  %v13615_v19 = vadd.f32 %v12881_v28, %v3931_v46  ;;  %v13618_v63 = vadd.f32 %v12881_v28, %v4138_v3  ;;  %v3930_v58 = vmul.f32 %v12811_v60, %v12981_v5 }
 0x206   :  { %v5393_v21 = vmax.f32 %v5391_v4, %v13564_v10  ;;  %v6072_v38 = vsel %vm5091_vm1, %v19289_v41, -inf  ;;  %v5360_v34 = vmax.f32 %v13260_v14, %v5359_v57  ;;  %v4141_v36 = vmul.f32 %v12811_v60, %v13171_v35  ;;  %v20031_v4 = vld [vmem:[#allocation52_spill] sm:$0xff]  ;;  %v20035_v57 = vld [vmem:[#allocation50_spill] sm:$0xff] }
 0x207   :  { %20029 = vst [vmem:[#allocation31_spill] sm:$0xff] %v13615_v19  ;;  %20030 = vst [vmem:[#allocation37_spill] sm:$0xff] %v13618_v63  ;;  %v6027_v10 = vmax.f32 %v6025_v56, %v6026_v13  ;;  %v19292_v46 = vmax.f32 %v13615_v19, 0.0  ;;  %v19294_v3 = vmax.f32 %v13618_v63, 0.0  ;;  %v20032_v33 = vmax.f32 %v20031_v4, 0.0  ;;  %v13648_v56 = vpop.f32.mrf.mxu1  ;;  %v20037_v13 = vld [vmem:[#allocation57_spill] sm:$0xff] }
 0x208   :  { %v5361_v41 = vrot.slane %v5360_v34, 2  ;;  %v13636_v14 = vadd.f32 %v12881_v28, %v3930_v58  ;;  %v13639_v5 = vadd.f32 %v12881_v28, %v4141_v36  ;;  %v20036_v35 = vmax.f32 %v20035_v57, 0.0  ;;  %v20039_v57 = vld [vmem:[#allocation54_spill] sm:$0xff] }
 0x209   :  { %v6884_v18 = vsel %vm5091_vm1, %v20032_v33, %v6561_v24  ;;  %6690 = vrot.lane.b32.xlu1 %v6027_v10, %s9180_s10  ;;  %v5396_v33 = vsel %vm5091_vm1, %v19292_v46, -inf  ;;  %v6070_v36 = vsel %vm5091_vm1, %v19294_v3, -inf  ;;  %v20038_v58 = vmax.f32 %v20037_v13, 0.0 }
 0x20a   :  { %20033 = vst [vmem:[#allocation34_spill] sm:$0xff] %v13636_v14  ;;  %20034 = vst [vmem:[#allocation41_spill] sm:$0xff] %v13639_v5  ;;  %v6885_v16 = vsel %vm5091_vm1, %v20036_v35, %v6561_v24  ;;  %v20040_v35 = vmax.f32 %v20039_v57, 0.0  ;;  %v6071_v10 = vmax.f32 %v6069_v48, %v6070_v36  ;;  %v5362_v19 = vmax.f32 %v5360_v34, %v5361_v41  ;;  %v6665_v36 = vpop.permute.xlu0 %6664  ;;  %v13696_v57 = vpop.f32.mrf.mxu1 }
 0x20b   :  { %7301 = vst.msk [vmem:[%s18979_s4 + $0xc0] sm:$0xff] %vm7276_vm2, %v6884_v18  ;;  %v6886_v4 = vsel %vm5091_vm1, %v20038_v58, %v6561_v24  ;;  %7302 = vst.msk [vmem:[%s18979_s4 + $0xc8] sm:$0xff] %vm7276_vm2, %v6885_v16  ;;  %v19296_v46 = vmax.f32 %v13636_v14, 0.0  ;;  %v19295_v63 = vmax.f32 %v13639_v5, 0.0  ;;  %v3933_v16 = vmul.f32 %v12811_v60, %v13202_v37 }
 0x20c   :  { %v6887_v18 = vsel %vm5091_vm1, %v20040_v35, %v6561_v24  ;;  %7303 = vst.msk [vmem:[%s18979_s4 + $0xd0] sm:$0xff] %vm7276_vm2, %v6886_v4  ;;  %v13677_v24 = vpop.f32.mrf.mxu0  ;;  %v4140_v48 = vmul.f32 %v12811_v60, %v13221_v26  ;;  %v6035_v41 = vrot.slane %v13182_v8, 4  ;;  %v3932_v34 = vmul.f32 %v12811_v60, %v13243_v45 }
 0x20d   :  { %7304 = vst.msk [vmem:[%s18979_s4 + $0xd8] sm:$0xff] %vm7276_vm2, %v6887_v18  ;;  %v13686_v13 = vmax.f32 %v6071_v10, %v6072_v38  ;;  %v5363_v58 = vrot.slane %v5362_v19, 1  ;;  %v5394_v4 = vsel %vm5091_vm1, %v19296_v46, -inf  ;;  %v13694_v37 = vsel %vm5091_vm1, %v19295_v63, -inf  ;;  %v20043_v63 = vld [vmem:[#allocation53_spill] sm:$0xff] }
 0x20e   :  { %v5395_v26 = vmax.f32 %v5393_v21, %v5394_v4  ;;  %v13699_v35 = vadd.f32 %v12881_v28, %v3933_v16  ;;  %v13702_v45 = vadd.f32 %v12881_v28, %v4140_v48  ;;  %v6036_v38 = vmax.f32 %v13182_v8, %v6035_v41  ;;  %v13713_v21 = vpop.f32.mrf.mxu0  ;;  %v20048_v41 = vld [vmem:[#allocation56_spill] sm:$0xff] }
 0x20f   :  { %v5364_v18 = vmax.f32 %v5362_v19, %v5363_v58  ;;  %v13706_v10 = vadd.f32 %v12881_v28, %v3932_v34  ;;  %v4143_v3 = vmul.f32 %v12811_v60, %v13258_v47  ;;  %v20044_v46 = vmax.f32 %v20043_v63, 0.0  ;;  %v20046_v63 = vld [vmem:[#allocation51_spill] sm:$0xff] }
 0x210   :  { %20041 = vst [vmem:[#allocation38_spill] sm:$0xff] %v13699_v35  ;;  %20042 = vst [vmem:[#allocation146_spill] sm:$0xff] %v13702_v45  ;;  %v13715_v16 = vmax.f32 %v5395_v26, %v5396_v33  ;;  %v19300_v48 = vmax.f32 %v13699_v35, 0.0  ;;  %v19299_v4 = vmax.f32 %v13702_v45, 0.0  ;;  %v6037_v8 = vrot.slane %v6036_v38, 2  ;;  %v13734_v26 = vpop.f32.mrf.mxu1  ;;  %v20050_v47 = vld [vmem:[#allocation55_spill] sm:$0xff] }
 0x211   :  { %v7092_v5 = vsel %vm5091_vm1, %v20044_v46, %v6665_v36  ;;  %6588 = vrot.lane.b32.xlu0 %v5364_v18, %s9180_s10  ;;  %v13726_v19 = vadd.f32 %v12881_v28, %v4143_v3  ;;  %v20047_v46 = vmax.f32 %v20046_v63, 0.0  ;;  %v20049_v34 = vmax.f32 %v20048_v41, 0.0 }
 0x212   :  { %7509 = vst.msk [vmem:[%s18979_s4 + $0x740] sm:$0xff] %vm7276_vm2, %v7092_v5  ;;  %v5405_v5 = vsel %vm5091_vm1, %v19300_v48, -inf  ;;  %v6080_v18 = vsel %vm5091_vm1, %v19299_v4, -inf  ;;  %v6038_v3 = vmax.f32 %v6036_v38, %v6037_v8  ;;  %v20051_v14 = vmax.f32 %v20050_v47, 0.0  ;;  %v13764_v47 = vpop.f32.mrf.mxu0  ;;  %v13779_v4 = vpop.f32.mrf.mxu1  ;;  %v20055_v48 = vld [vmem:[#allocation61_spill] sm:$0xff] }
 0x213   :  { %20045 = vst [vmem:[#allocation36_spill] sm:$0xff] %v13726_v19  ;;  %v7093_v33 = vsel %vm5091_vm1, %v20047_v46, %v6665_v36  ;;  %v7094_v58 = vsel %vm5091_vm1, %v20049_v34, %v6665_v36  ;;  %v6082_v46 = vmax.f32 %v6080_v18, %v13694_v37  ;;  %v20052_v41 = vmax.f32 %v13706_v10, 0.0 }
 0x214   :  { %v7095_v63 = vsel %vm5091_vm1, %v20051_v14, %v6665_v36  ;;  %7510 = vst.msk [vmem:[%s18979_s4 + $0x748] sm:$0xff] %vm7276_vm2, %v7093_v33  ;;  %7511 = vst.msk [vmem:[%s18979_s4 + $0x750] sm:$0xff] %vm7276_vm2, %v7094_v58  ;;  %v19302_v8 = vmax.f32 %v13726_v19, 0.0  ;;  %v3935_v14 = vmul.f32 %v12811_v60, %v13284_v52  ;;  %v6563_v36 = vpop.permute.xlu1 %6562  ;;  %v6039_v33 = vrot.slane %v6038_v3, 1 }
 0x215   :  { %v5404_v38 = vsel %vm5091_vm1, %v20052_v41, -inf  ;;  %7512 = vst.msk [vmem:[%s18979_s4 + $0x758] sm:$0xff] %vm7276_vm2, %v7095_v63  ;;  %v4142_v37 = vmul.f32 %v12811_v60, %v13307_v55  ;;  %v5372_v58 = vrot.slane %v13396_v54, 4  ;;  %v3934_v52 = vmul.f32 %v12811_v60, %v13335_v59 }
 0x216   :  { %v5406_v34 = vmax.f32 %v5404_v38, %v5405_v5  ;;  %v6085_v18 = vsel %vm5091_vm1, %v19302_v8, -inf  ;;  %v13773_v41 = vadd.f32 %v12881_v28, %v3935_v14  ;;  %v4145_v63 = vmul.f32 %v12811_v60, %v13360_v50  ;;  %v20058_v50 = vld [vmem:[#allocation58_spill] sm:$0xff] }
 0x217   :  { %v6040_v5 = vmax.f32 %v6038_v3, %v6039_v33  ;;  %v13782_v55 = vadd.f32 %v12881_v28, %v4142_v37  ;;  %v5373_v38 = vmax.f32 %v13396_v54, %v5372_v58  ;;  %v20056_v19 = vmax.f32 %v20055_v48, 0.0  ;;  %v13802_v54 = vpop.f32.mrf.mxu0  ;;  %v20060_v33 = vld [vmem:[#allocation65_spill] sm:$0xff] }
 0x218   :  { %20053 = vst [vmem:[#allocation35_spill] sm:$0xff] %v13773_v41  ;;  %v19305_v14 = vmax.f32 %v13773_v41, 0.0  ;;  %v13790_v45 = vadd.f32 %v12881_v28, %v3934_v52  ;;  %v13793_v59 = vadd.f32 %v12881_v28, %v4145_v63  ;;  %v20059_v35 = vmax.f32 %v20058_v50, 0.0  ;;  %v20062_v52 = vld [vmem:[#allocation62_spill] sm:$0xff]  ;;  %v20072_v41 = vld [vmem:[#allocation64_spill] sm:$0xff] }
 0x219   :  { %20054 = vst [vmem:[#allocation40_spill] sm:$0xff] %v13782_v55  ;;  %v6888_v8 = vsel %vm5091_vm1, %v20056_v19, %v6563_v36  ;;  %6692 = vrot.lane.b32.xlu0 %v6040_v5, %s9180_s10  ;;  %v19306_v48 = vmax.f32 %v13782_v55, 0.0  ;;  %v5374_v19 = vrot.slane %v5373_v38, 2  ;;  %v20061_v37 = vmax.f32 %v20060_v33, 0.0 }
 0x21a   :  { %20057 = vst [vmem:[#allocation39_spill] sm:$0xff] %v13793_v59  ;;  %v6889_v3 = vsel %vm5091_vm1, %v20059_v35, %v6563_v36  ;;  %7305 = vst.msk [vmem:[%s18979_s4 + $0xe0] sm:$0xff] %vm7276_vm2, %v6888_v8  ;;  %v20063_v63 = vmax.f32 %v20062_v52, 0.0  ;;  %v5409_v8 = vsel %vm5091_vm1, %v19305_v14, -inf  ;;  %v19307_v5 = vmax.f32 %v13790_v45, 0.0 }
 0x21b   :  { %v6890_v58 = vsel %vm5091_vm1, %v20061_v37, %v6563_v36  ;;  %7306 = vst.msk [vmem:[%s18979_s4 + $0xe8] sm:$0xff] %vm7276_vm2, %v6889_v3  ;;  %v19308_v50 = vmax.f32 %v13793_v59, 0.0  ;;  %v13831_v3 = vpop.f32.mrf.mxu1  ;;  %v6083_v33 = vsel %vm5091_vm1, %v19306_v48, -inf  ;;  %v5375_v37 = vmax.f32 %v5373_v38, %v5374_v19  ;;  %v13850_v48 = vpop.f32.mrf.mxu0 }
 0x21c   :  { %v6891_v35 = vsel %vm5091_vm1, %v20063_v63, %v6563_v36  ;;  %7307 = vst.msk [vmem:[%s18979_s4 + $0xf0] sm:$0xff] %vm7276_vm2, %v6890_v58  ;;  %v3937_v36 = vmul.f32 %v12811_v60, %v13378_v31  ;;  %v4144_v52 = vmul.f32 %v12811_v60, %v13392_v53  ;;  %v6048_v58 = vrot.slane %v13394_v43, 4 }
 0x21d   :  { %7308 = vst.msk [vmem:[%s18979_s4 + $0xf8] sm:$0xff] %vm7276_vm2, %v6891_v35  ;;  %v6084_v63 = vmax.f32 %v6082_v46, %v6083_v33  ;;  %v5407_v35 = vsel %vm5091_vm1, %v19307_v5, -inf  ;;  %v13845_v31 = vsel %vm5091_vm1, %v19308_v50, -inf  ;;  %v5376_v38 = vrot.slane %v5375_v37, 1  ;;  %v6667_v46 = vpop.permute.xlu1 %6666  ;;  %v13862_v50 = vld [vmem:[%s18977_s2] ss:$0 sm:$0xff] }
 0x21e   :  { %v13848_v14 = vadd.f32 %v12881_v28, %v3937_v36  ;;  %v5408_v19 = vmax.f32 %v5406_v34, %v5407_v35  ;;  %v13853_v60 = vadd.f32 %v12881_v28, %v4144_v52  ;;  %v6049_v53 = vmax.f32 %v13394_v43, %v6048_v58  ;;  %v13868_v52 = vpop.f32.mrf.mxu1 }
 0x21f   :  { %v13856_v33 = vmax.f32 %v6084_v63, %v6085_v18  ;;  %v3936_v36 = vmul.f32 %v13862_v50, %v13407_v15  ;;  %v4147_v34 = vmul.f32 %v13862_v50, %v13435_v23  ;;  %v5377_v35 = vmax.f32 %v5375_v37, %v5376_v38  ;;  %v20068_v23 = vld [vmem:[#allocation60_spill] sm:$0xff] }
 0x220   :  { %20064 = vst [vmem:[#allocation44_spill] sm:$0xff] %v13848_v14  ;;  %20065 = vst [vmem:[#allocation42_spill] sm:$0xff] %v13853_v60  ;;  %v19311_v5 = vmax.f32 %v13848_v14, 0.0  ;;  %v13870_v43 = vmax.f32 %v5408_v19, %v5409_v8  ;;  %v19314_v18 = vmax.f32 %v13853_v60, 0.0  ;;  %v6050_v58 = vrot.slane %v6049_v53, 2  ;;  %v13887_v8 = vpop.f32.mrf.mxu0 }
 0x221   :  { %v13879_v59 = vadd.f32 %v12881_v28, %v3936_v36  ;;  %v13882_v15 = vadd.f32 %v12881_v28, %v4147_v34  ;;  %v20069_v55 = vmax.f32 %v20068_v23, 0.0  ;;  %6590 = vrot.lane.b32.xlu1 %v5377_v35, %s9180_s10  ;;  %v20073_v28 = vmax.f32 %v20072_v41, 0.0  ;;  %v13917_v41 = vpop.f32.mrf.mxu1 }
 0x222   :  { %v13876_v63 = vsel %vm5091_vm1, %v19311_v5, -inf  ;;  %v6093_v38 = vsel %vm5091_vm1, %v19314_v18, -inf  ;;  %v6051_v19 = vmax.f32 %v6049_v53, %v6050_v58  ;;  %v20070_v5 = vld [vmem:[#allocation59_spill] sm:$0xff] }
 0x223   :  { %20066 = vst [vmem:[#allocation49_spill] sm:$0xff] %v13879_v59  ;;  %20067 = vst [vmem:[#allocation46_spill] sm:$0xff] %v13882_v15  ;;  %v7096_v37 = vsel %vm5091_vm1, %v20069_v55, %v6667_v46  ;;  %v20071_v14 = vmax.f32 %v20070_v5, 0.0  ;;  %v7098_v34 = vsel %vm5091_vm1, %v20073_v28, %v6667_v46  ;;  %v6095_v55 = vmax.f32 %v6093_v38, %v13845_v31  ;;  %v20074_v53 = vld [vmem:[#allocation63_spill] sm:$0xff]  ;;  %v6565_v38 = vpop.permute.xlu0 %6564 }
 0x224   :  { %7513 = vst.msk [vmem:[%s18979_s4 + $0x760] sm:$0xff] %vm7276_vm2, %v7096_v37  ;;  %v19316_v35 = vmax.f32 %v13879_v59, 0.0  ;;  %v19315_v23 = vmax.f32 %v13882_v15, 0.0  ;;  %v20075_v58 = vmax.f32 %v20074_v53, 0.0  ;;  %7515 = vst.msk [vmem:[%s18979_s4 + $0x770] sm:$0xff] %vm7276_vm2, %v7098_v34  ;;  %v3939_v31 = vmul.f32 %v13862_v50, %v13459_v30  ;;  %v13938_v53 = vpop.f32.mrf.mxu0  ;;  %v20082_v15 = vld [vmem:[#allocation66_spill] sm:$0xff] }
 0x225   :  { %v7097_v36 = vsel %vm5091_vm1, %v20071_v14, %v6667_v46  ;;  %v6052_v14 = vrot.slane %v6051_v19, 1  ;;  %v5385_v37 = vrot.slane %v13544_v1, 4  ;;  %v3938_v34 = vmul.f32 %v13862_v50, %v13502_v9 }
 0x226   :  { %v7099_v5 = vsel %vm5091_vm1, %v20075_v58, %v6667_v46  ;;  %7514 = vst.msk [vmem:[%s18979_s4 + $0x768] sm:$0xff] %vm7276_vm2, %v7097_v36  ;;  %v4146_v46 = vmul.f32 %v13862_v50, %v13476_v32  ;;  %v5417_v36 = vsel %vm5091_vm1, %v19316_v35, -inf  ;;  %v6098_v28 = vsel %vm5091_vm1, %v19315_v23, -inf  ;;  %v13962_v35 = vpop.f32.mrf.mxu1 }
 0x227   :  { %7516 = vst.msk [vmem:[%s18979_s4 + $0x778] sm:$0xff] %vm7276_vm2, %v7099_v5  ;;  %v4149_v30 = vmul.f32 %v13862_v50, %v13527_v61  ;;  %v6053_v32 = vmax.f32 %v6051_v19, %v6052_v14  ;;  %v5419_v58 = vmax.f32 %v5417_v36, %v13876_v63  ;;  %v13944_v5 = vld [vmem:[%s18978_s3] ss:$0 sm:$0xff]  ;;  %v5386_v9 = vmax.f32 %v13544_v1, %v5385_v37  ;;  %v20080_v63 = vld [vmem:[#allocation69_spill] sm:$0xff] }
 0x228   :  { %v13947_v18 = vadd.f32 %v13944_v5, %v3939_v31  ;;  %v13950_v23 = vadd.f32 %v13944_v5, %v4146_v46  ;;  %v13954_v61 = vadd.f32 %v13944_v5, %v3938_v34  ;;  %v20081_v14 = vmax.f32 %v20080_v63, 0.0  ;;  %v20084_v34 = vld [vmem:[#allocation73_spill] sm:$0xff]  ;;  %v20086_v31 = vld [vmem:[#allocation70_spill] sm:$0xff] }
 0x229   :  { %v13957_v19 = vadd.f32 %v13944_v5, %v4149_v30  ;;  %6694 = vrot.lane.b32.xlu1 %v6053_v32, %s9180_s10  ;;  %v20083_v1 = vmax.f32 %v20082_v15, 0.0  ;;  %v20085_v60 = vmax.f32 %v20084_v34, 0.0  ;;  %v5387_v63 = vrot.slane %v5386_v9, 2 }
 0x22a   :  { %20076 = vst [vmem:[#allocation5_spill] sm:$0xff] %v13947_v18  ;;  %20077 = vst [vmem:[#allocation45_spill] sm:$0xff] %v13950_v23  ;;  %v6892_v36 = vsel %vm5091_vm1, %v20081_v14, %v6565_v38  ;;  %v19322_v32 = vmax.f32 %v13954_v61, 0.0  ;;  %v20087_v46 = vmax.f32 %v20086_v31, 0.0  ;;  %v20089_v31 = vmax.f32 %v13950_v23, 0.0  ;;  %v14014_v23 = vpop.f32.mrf.mxu1 }
 0x22b   :  { %20078 = vst [vmem:[#allocation43_spill] sm:$0xff] %v13954_v61  ;;  %20079 = vst [vmem:[#allocation48_spill] sm:$0xff] %v13957_v19  ;;  %v6893_v37 = vsel %vm5091_vm1, %v20083_v1, %v6565_v38  ;;  %v6894_v30 = vsel %vm5091_vm1, %v20085_v60, %v6565_v38  ;;  %v19321_v14 = vmax.f32 %v13957_v19, 0.0  ;;  %v13990_v60 = vpop.f32.mrf.mxu0 }
 0x22c   :  { %7309 = vst.msk [vmem:[%s18979_s4 + $0x100] sm:$0xff] %vm7276_vm2, %v6892_v36  ;;  %v6895_v15 = vsel %vm5091_vm1, %v20087_v46, %v6565_v38  ;;  %7310 = vst.msk [vmem:[%s18979_s4 + $0x108] sm:$0xff] %vm7276_vm2, %v6893_v37  ;;  %v20088_v36 = vmax.f32 %v13947_v18, 0.0  ;;  %v6096_v38 = vsel %vm5091_vm1, %v20089_v31, -inf  ;;  %v3941_v46 = vmul.f32 %v13862_v50, %v13542_v51  ;;  %v14045_v59 = vpop.f32.mrf.mxu1 }
 0x22d   :  { %7311 = vst.msk [vmem:[%s18979_s4 + $0x110] sm:$0xff] %vm7276_vm2, %v6894_v30  ;;  %7312 = vst.msk [vmem:[%s18979_s4 + $0x118] sm:$0xff] %vm7276_vm2, %v6895_v15  ;;  %v4148_v37 = vmul.f32 %v13862_v50, %v13559_v2  ;;  %v6097_v34 = vmax.f32 %v6095_v55, %v6096_v38  ;;  %v5388_v30 = vmax.f32 %v5386_v9, %v5387_v63  ;;  %v14012_v31 = vsel %vm5091_vm1, %v19321_v14, -inf  ;;  %v6669_v55 = vpop.permute.xlu0 %6668 }
 0x22e   :  { %v5422_v1 = vsel %vm5091_vm1, %v20088_v36, -inf  ;;  %v5420_v36 = vsel %vm5091_vm1, %v19322_v32, -inf  ;;  %v14017_v18 = vadd.f32 %v13944_v5, %v3941_v46  ;;  %v6061_v2 = vrot.slane %v13535_v44, 4  ;;  %v14029_v32 = vpop.f32.mrf.mxu0 }
 0x22f   :  { %v5421_v15 = vmax.f32 %v5419_v58, %v5420_v36  ;;  %v14020_v51 = vadd.f32 %v13944_v5, %v4148_v37  ;;  %v14023_v9 = vmax.f32 %v6097_v34, %v6098_v28  ;;  %v5389_v63 = vrot.slane %v5388_v30, 1 }
 0x230   :  { %20090 = vst [vmem:[#allocation47_spill] sm:$0xff] %v14017_v18  ;;  %v3940_v38 = vmul.f32 %v13862_v50, %v13589_v40  ;;  %v4151_v14 = vmul.f32 %v13862_v50, %v13611_v11  ;;  %v19327_v46 = vmax.f32 %v14017_v18, 0.0  ;;  %v6062_v36 = vmax.f32 %v13535_v44, %v6061_v2  ;;  %v20094_v40 = vld [vmem:[#allocation68_spill] sm:$0xff] }
 0x231   :  { %20091 = vst [vmem:[#allocation52_spill] sm:$0xff] %v14020_v51  ;;  %v14031_v58 = vmax.f32 %v5421_v15, %v5422_v1  ;;  %v19326_v37 = vmax.f32 %v14020_v51, 0.0  ;;  %v5390_v19 = vmax.f32 %v5388_v30, %v5389_v63  ;;  %v20095_v61 = vmax.f32 %v20094_v40, 0.0  ;;  %v20096_v15 = vld [vmem:[#allocation67_spill] sm:$0xff]  ;;  %v20098_v40 = vld [vmem:[#allocation72_spill] sm:$0xff] }
 0x232   :  { %v14037_v28 = vadd.f32 %v13944_v5, %v3940_v38  ;;  %v14040_v34 = vadd.f32 %v13944_v5, %v4151_v14  ;;  %v5431_v1 = vsel %vm5091_vm1, %v19327_v46, -inf  ;;  %v6063_v30 = vrot.slane %v6062_v36, 2 }
 0x233   :  { %v7100_v11 = vsel %vm5091_vm1, %v20095_v61, %v6669_v55  ;;  %v6106_v44 = vsel %vm5091_vm1, %v19326_v37, -inf  ;;  %v20097_v2 = vmax.f32 %v20096_v15, 0.0  ;;  %6592 = vrot.lane.b32.xlu0 %v5390_v19, %s9180_s10  ;;  %v20099_v37 = vmax.f32 %v20098_v40, 0.0  ;;  %v14071_v15 = vpop.f32.mrf.mxu0  ;;  %v6567_v40 = vpop.permute.xlu1 %6566 }
 0x234   :  { %20092 = vst [vmem:[#allocation50_spill] sm:$0xff] %v14037_v28  ;;  %20093 = vst [vmem:[#allocation57_spill] sm:$0xff] %v14040_v34  ;;  %v6108_v61 = vmax.f32 %v6106_v44, %v14012_v31  ;;  %v19329_v63 = vmax.f32 %v14037_v28, 0.0  ;;  %v19328_v38 = vmax.f32 %v14040_v34, 0.0  ;;  %v4150_v44 = vmul.f32 %v13862_v50, %v13648_v56  ;;  %v14097_v56 = vpop.f32.mrf.mxu1  ;;  %v20104_v34 = vld [vmem:[#allocation77_spill] sm:$0xff] }
 0x235   :  { %v7101_v14 = vsel %vm5091_vm1, %v20097_v2, %v6669_v55  ;;  %7517 = vst.msk [vmem:[%s18979_s4 + $0x780] sm:$0xff] %vm7276_vm2, %v7100_v11  ;;  %v7102_v46 = vsel %vm5091_vm1, %v20099_v37, %v6669_v55  ;;  %v6064_v11 = vmax.f32 %v6062_v36, %v6063_v30  ;;  %v20100_v2 = vld [vmem:[#allocation71_spill] sm:$0xff]  ;;  %v3943_v37 = vmul.f32 %v13862_v50, %v13628_v42  ;;  %v14114_v18 = vpop.f32.mrf.mxu0 }
 0x236   :  { %7518 = vst.msk [vmem:[%s18979_s4 + $0x788] sm:$0xff] %vm7276_vm2, %v7101_v14  ;;  %v20101_v19 = vmax.f32 %v20100_v2, 0.0  ;;  %7519 = vst.msk [vmem:[%s18979_s4 + $0x790] sm:$0xff] %vm7276_vm2, %v7102_v46  ;;  %v5430_v36 = vsel %vm5091_vm1, %v19329_v63, -inf  ;;  %v5398_v46 = vrot.slane %v13715_v16, 4  ;;  %v3942_v42 = vmul.f32 %v13862_v50, %v13677_v24 }
 0x237   :  { %v6065_v30 = vrot.slane %v6064_v11, 1  ;;  %v5432_v14 = vmax.f32 %v5430_v36, %v5431_v1  ;;  %v14100_v2 = vadd.f32 %v13944_v5, %v3943_v37  ;;  %v20105_v24 = vmax.f32 %v20104_v34, 0.0  ;;  %v20106_v36 = vld [vmem:[#allocation74_spill] sm:$0xff] }
 0x238   :  { %v7103_v31 = vsel %vm5091_vm1, %v20101_v19, %v6669_v55  ;;  %v6111_v55 = vsel %vm5091_vm1, %v19328_v38, -inf  ;;  %v14103_v19 = vadd.f32 %v13944_v5, %v4150_v44  ;;  %v5399_v38 = vmax.f32 %v13715_v16, %v5398_v46 }
 0x239   :  { %7520 = vst.msk [vmem:[%s18979_s4 + $0x798] sm:$0xff] %vm7276_vm2, %v7103_v31  ;;  %20102 = vst [vmem:[#allocation54_spill] sm:$0xff] %v14100_v2  ;;  %v14107_v63 = vadd.f32 %v13944_v5, %v3942_v42  ;;  %v4153_v31 = vmul.f32 %v13862_v50, %v13696_v57  ;;  %v6896_v51 = vsel %vm5091_vm1, %v20105_v24, %v6567_v40  ;;  %v19334_v37 = vmax.f32 %v14100_v2, 0.0  ;;  %v20111_v24 = vld [vmem:[#allocation78_spill] sm:$0xff] }
 0x23a   :  { %20103 = vst [vmem:[#allocation53_spill] sm:$0xff] %v14103_v19  ;;  %v6066_v1 = vmax.f32 %v6064_v11, %v6065_v30  ;;  %v19335_v44 = vmax.f32 %v14103_v19, 0.0  ;;  %v20107_v28 = vmax.f32 %v20106_v36, 0.0  ;;  %7313 = vst.msk [vmem:[%s18979_s4 + $0x120] sm:$0xff] %vm7276_vm2, %v6896_v51  ;;  %v5400_v57 = vrot.slane %v5399_v38, 2  ;;  %v20109_v11 = vld [vmem:[#allocation82_spill] sm:$0xff] }
 0x23b   :  { %v19336_v34 = vmax.f32 %v14107_v63, 0.0  ;;  %v14127_v46 = vadd.f32 %v13944_v5, %v4153_v31  ;;  %v20110_v42 = vmax.f32 %v20109_v11, 0.0  ;;  %v5435_v51 = vsel %vm5091_vm1, %v19334_v37, -inf }
 0x23c   :  { %v6897_v16 = vsel %vm5091_vm1, %v20107_v28, %v6567_v40  ;;  %v14136_v28 = vpop.f32.mrf.mxu1  ;;  %6696 = vrot.lane.b32.xlu0 %v6066_v1, %s9180_s10  ;;  %v6109_v31 = vsel %vm5091_vm1, %v19335_v44, -inf  ;;  %v20112_v36 = vmax.f32 %v20111_v24, 0.0  ;;  %v3945_v1 = vmul.f32 %v13862_v50, %v13713_v21 }
 0x23d   :  { %20108 = vst [vmem:[#allocation51_spill] sm:$0xff] %v14127_v46  ;;  %v6898_v30 = vsel %vm5091_vm1, %v20110_v42, %v6567_v40  ;;  %7314 = vst.msk [vmem:[%s18979_s4 + $0x128] sm:$0xff] %vm7276_vm2, %v6897_v16  ;;  %v6110_v16 = vmax.f32 %v6108_v61, %v6109_v31  ;;  %v5401_v42 = vmax.f32 %v5399_v38, %v5400_v57  ;;  %v5433_v37 = vsel %vm5091_vm1, %v19336_v34, -inf  ;;  %v6671_v38 = vpop.permute.xlu1 %6670 }
 0x23e   :  { %v6899_v11 = vsel %vm5091_vm1, %v20112_v36, %v6567_v40  ;;  %7315 = vst.msk [vmem:[%s18979_s4 + $0x130] sm:$0xff] %vm7276_vm2, %v6898_v30  ;;  %v19337_v44 = vmax.f32 %v14127_v46, 0.0  ;;  %v14162_v40 = vpop.f32.mrf.mxu0  ;;  %v5434_v24 = vmax.f32 %v5432_v14, %v5433_v37  ;;  %v14165_v30 = vadd.f32 %v13944_v5, %v3945_v1  ;;  %v14177_v14 = vpop.f32.mrf.mxu1  ;;  %v20116_v46 = vld [vmem:[#allocation76_spill] sm:$0xff] }
 0x23f   :  { %7316 = vst.msk [vmem:[%s18979_s4 + $0x138] sm:$0xff] %vm7276_vm2, %v6899_v11  ;;  %v4152_v21 = vmul.f32 %v13862_v50, %v13734_v26  ;;  %v6074_v61 = vrot.slane %v13686_v13, 4  ;;  %v14170_v57 = vmax.f32 %v6110_v16, %v6111_v55  ;;  %v5402_v31 = vrot.slane %v5401_v42, 1 }
 0x240   :  { %20113 = vst [vmem:[#allocation56_spill] sm:$0xff] %v14165_v30  ;;  %v6120_v36 = vsel %vm5091_vm1, %v19337_v44, -inf  ;;  %v3944_v11 = vmul.f32 %v13862_v50, %v13764_v47  ;;  %v14179_v37 = vmax.f32 %v5434_v24, %v5435_v51  ;;  %v19340_v1 = vmax.f32 %v14165_v30, 0.0  ;;  %v14194_v51 = vpop.f32.mrf.mxu0 }
 0x241   :  { %v14183_v26 = vadd.f32 %v13944_v5, %v4152_v21  ;;  %v6075_v55 = vmax.f32 %v13686_v13, %v6074_v61  ;;  %v5403_v16 = vmax.f32 %v5401_v42, %v5402_v31  ;;  %v4155_v44 = vmul.f32 %v13862_v50, %v13779_v4  ;;  %v20118_v21 = vld [vmem:[#allocation75_spill] sm:$0xff] }
 0x242   :  { %v14187_v34 = vadd.f32 %v13944_v5, %v3944_v11  ;;  %v20117_v47 = vmax.f32 %v20116_v46, 0.0  ;;  %v14199_v24 = vsel %vm5091_vm1, %v19340_v1, -inf  ;;  %v20119_v61 = vmax.f32 %v20118_v21, 0.0  ;;  %v20121_v11 = vld [vmem:[#allocation81_spill] sm:$0xff]  ;;  %v20123_v13 = vld [vmem:[#allocation79_spill] sm:$0xff] }
 0x243   :  { %20114 = vst [vmem:[#allocation55_spill] sm:$0xff] %v14183_v26  ;;  %v6076_v42 = vrot.slane %v6075_v55, 2  ;;  %6594 = vrot.lane.b32.xlu1 %v5403_v16, %s9180_s10  ;;  %v14212_v46 = vadd.f32 %v13944_v5, %v4155_v44  ;;  %v20124_v21 = vmax.f32 %v20123_v13, 0.0  ;;  %v20125_v16 = vmax.f32 %v14183_v26, 0.0 }
 0x244   :  { %20115 = vst [vmem:[#allocation61_spill] sm:$0xff] %v14187_v34  ;;  %v7104_v19 = vsel %vm5091_vm1, %v20117_v47, %v6671_v38  ;;  %v7105_v31 = vsel %vm5091_vm1, %v20119_v61, %v6671_v38  ;;  %v20122_v47 = vmax.f32 %v20121_v11, 0.0  ;;  %v4154_v13 = vmul.f32 %v13862_v50, %v13831_v3 }
 0x245   :  { %7521 = vst.msk [vmem:[%s18979_s4 + $0x7a0] sm:$0xff] %vm7276_vm2, %v7104_v19  ;;  %20120 = vst [vmem:[#allocation58_spill] sm:$0xff] %v14212_v46  ;;  %v7107_v61 = vsel %vm5091_vm1, %v20124_v21, %v6671_v38  ;;  %v14224_v19 = vpop.f32.mrf.mxu1  ;;  %v6119_v44 = vsel %vm5091_vm1, %v20125_v16, -inf  ;;  %v6077_v4 = vmax.f32 %v6075_v55, %v6076_v42  ;;  %v20126_v11 = vmax.f32 %v14187_v34, 0.0  ;;  %v14246_v21 = vpop.f32.mrf.mxu0 }
 0x246   :  { %v7106_v1 = vsel %vm5091_vm1, %v20122_v47, %v6671_v38  ;;  %7522 = vst.msk [vmem:[%s18979_s4 + $0x7a8] sm:$0xff] %vm7276_vm2, %v7105_v31  ;;  %7524 = vst.msk [vmem:[%s18979_s4 + $0x7b8] sm:$0xff] %vm7276_vm2, %v7107_v61  ;;  %v3947_v38 = vmul.f32 %v13862_v50, %v13802_v54  ;;  %v6121_v31 = vmax.f32 %v6119_v44, %v6120_v36  ;;  %v19345_v42 = vmax.f32 %v14212_v46, 0.0  ;;  %v6569_v47 = vpop.permute.xlu0 %6568 }
 0x247   :  { %7523 = vst.msk [vmem:[%s18979_s4 + $0x7b0] sm:$0xff] %vm7276_vm2, %v7106_v1  ;;  %v5443_v55 = vsel %vm5091_vm1, %v20126_v11, -inf  ;;  %v5411_v1 = vrot.slane %v13870_v43, 4  ;;  %v6078_v16 = vrot.slane %v6077_v4, 1  ;;  %v14253_v3 = vadd.f32 %v13944_v5, %v4154_v13  ;;  %v14263_v30 = vpop.f32.mrf.mxu1 }
 0x248   :  { %v5445_v61 = vmax.f32 %v5443_v55, %v14199_v24  ;;  %v14250_v54 = vadd.f32 %v13944_v5, %v3947_v38  ;;  %v6124_v36 = vsel %vm5091_vm1, %v19345_v42, -inf  ;;  %v3946_v11 = vmul.f32 %v13862_v50, %v13850_v48  ;;  %v20129_v55 = vld [vmem:[#allocation88_spill] sm:$0xff] }
 0x249   :  { %20128 = vst [vmem:[#allocation62_spill] sm:$0xff] %v14253_v3  ;;  %v5412_v44 = vmax.f32 %v13870_v43, %v5411_v1  ;;  %v4157_v26 = vmul.f32 %v13862_v50, %v13868_v52  ;;  %v6079_v24 = vmax.f32 %v6077_v4, %v6078_v16  ;;  %v19350_v13 = vmax.f32 %v14253_v3, 0.0  ;;  %v20133_v1 = vld [vmem:[#allocation83_spill] sm:$0xff]  ;;  %v14283_v4 = vpop.f32.mrf.mxu0  ;;  %v20135_v16 = vld [vmem:[#allocation93_spill] sm:$0xff] }
 0x24a   :  { %20127 = vst [vmem:[#allocation65_spill] sm:$0xff] %v14250_v54  ;;  %v19348_v38 = vmax.f32 %v14250_v54, 0.0  ;;  %v20130_v34 = vmax.f32 %v20129_v55, 0.0  ;;  %v14271_v43 = vadd.f32 %v13944_v5, %v3946_v11  ;;  %v20134_v52 = vmax.f32 %v20133_v1, 0.0  ;;  %v20137_v1 = vld [vmem:[#allocation89_spill] sm:$0xff] }
 0x24b   :  { %v5413_v42 = vrot.slane %v5412_v44, 2  ;;  %v14274_v48 = vadd.f32 %v13944_v5, %v4157_v26  ;;  %6698 = vrot.lane.b32.xlu1 %v6079_v24, %s9180_s10  ;;  %v6122_v26 = vsel %vm5091_vm1, %v19350_v13, -inf  ;;  %v20136_v11 = vmax.f32 %v20135_v16, 0.0 }
 0x24c   :  { %v6900_v46 = vsel %vm5091_vm1, %v20130_v34, %v6569_v47  ;;  %20131 = vst [vmem:[#allocation60_spill] sm:$0xff] %v14271_v43  ;;  %v6901_v2 = vsel %vm5091_vm1, %v20134_v52, %v6569_v47  ;;  %v5448_v34 = vsel %vm5091_vm1, %v19348_v38, -inf  ;;  %v20138_v52 = vmax.f32 %v20137_v1, 0.0  ;;  %v14331_v1 = vpop.f32.mrf.mxu0 }
 0x24d   :  { %20132 = vst [vmem:[#allocation59_spill] sm:$0xff] %v14274_v48  ;;  %7317 = vst.msk [vmem:[%s18979_s4 + $0x140] sm:$0xff] %vm7276_vm2, %v6900_v46  ;;  %v6902_v55 = vsel %vm5091_vm1, %v20136_v11, %v6569_v47  ;;  %v6123_v24 = vmax.f32 %v6121_v31, %v6122_v26  ;;  %v5414_v54 = vmax.f32 %v5412_v44, %v5413_v42  ;;  %v19352_v38 = vmax.f32 %v14271_v43, 0.0  ;;  %v6673_v26 = vpop.permute.xlu0 %6672 }
 0x24e   :  { %v6903_v46 = vsel %vm5091_vm1, %v20138_v52, %v6569_v47  ;;  %7318 = vst.msk [vmem:[%s18979_s4 + $0x148] sm:$0xff] %vm7276_vm2, %v6901_v2  ;;  %v19351_v3 = vmax.f32 %v14274_v48, 0.0  ;;  %7319 = vst.msk [vmem:[%s18979_s4 + $0x150] sm:$0xff] %vm7276_vm2, %v6902_v55  ;;  %v14312_v47 = vpop.f32.mrf.mxu1  ;;  %v3949_v2 = vmul.f32 %v13862_v50, %v13887_v8  ;;  %v4156_v31 = vmul.f32 %v13862_v50, %v13917_v41 }
 0x24f   :  { %7320 = vst.msk [vmem:[%s18979_s4 + $0x158] sm:$0xff] %vm7276_vm2, %v6903_v46  ;;  %v6087_v42 = vrot.slane %v13856_v33, 4  ;;  %v3948_v44 = vmul.f32 %v13862_v50, %v13938_v53  ;;  %v14321_v16 = vmax.f32 %v6123_v24, %v6124_v36  ;;  %v5415_v11 = vrot.slane %v5414_v54, 1 }
 0x250   :  { %v5446_v55 = vsel %vm5091_vm1, %v19352_v38, -inf  ;;  %v14329_v8 = vsel %vm5091_vm1, %v19351_v3, -inf  ;;  %v14334_v52 = vadd.f32 %v13944_v5, %v3949_v2  ;;  %v14337_v53 = vadd.f32 %v13944_v5, %v4156_v31  ;;  %v20141_v3 = vld [vmem:[#allocation86_spill] sm:$0xff] }
 0x251   :  { %v5447_v41 = vmax.f32 %v5445_v61, %v5446_v55  ;;  %v6088_v36 = vmax.f32 %v13856_v33, %v6087_v42  ;;  %v5416_v46 = vmax.f32 %v5414_v54, %v5415_v11  ;;  %v14341_v24 = vadd.f32 %v13944_v5, %v3948_v44  ;;  %v14348_v61 = vpop.f32.mrf.mxu1  ;;  %v20146_v42 = vld [vmem:[#allocation92_spill] sm:$0xff] }
 0x252   :  { %20139 = vst [vmem:[#allocation64_spill] sm:$0xff] %v14334_v52  ;;  %20140 = vst [vmem:[#allocation63_spill] sm:$0xff] %v14337_v53  ;;  %v4159_v13 = vmul.f32 %v13862_v50, %v13962_v35  ;;  %v20142_v38 = vmax.f32 %v20141_v3, 0.0  ;;  %v19356_v31 = vmax.f32 %v14334_v52, 0.0  ;;  %v19355_v55 = vmax.f32 %v14337_v53, 0.0  ;;  %v20144_v3 = vld [vmem:[#allocation85_spill] sm:$0xff] }
 0x253   :  { %v14350_v2 = vmax.f32 %v5447_v41, %v5448_v34  ;;  %v6089_v33 = vrot.slane %v6088_v36, 2  ;;  %6596 = vrot.lane.b32.xlu0 %v5416_v46, %s9180_s10  ;;  %v20147_v44 = vmax.f32 %v20146_v42, 0.0  ;;  %v14369_v41 = vpop.f32.mrf.mxu0  ;;  %v20148_v35 = vld [vmem:[#allocation91_spill] sm:$0xff]  ;;  %v20150_v42 = vmax.f32 %v14341_v24, 0.0 }
 0x254   :  { %v7108_v48 = vsel %vm5091_vm1, %v20142_v38, %v6673_v26  ;;  %v14361_v54 = vadd.f32 %v13944_v5, %v4159_v13  ;;  %v20145_v38 = vmax.f32 %v20144_v3, 0.0  ;;  %v6132_v46 = vsel %vm5091_vm1, %v19355_v55, -inf }
 0x255   :  { %7525 = vst.msk [vmem:[%s18979_s4 + $0x7c0] sm:$0xff] %vm7276_vm2, %v7108_v48  ;;  %v7110_v11 = vsel %vm5091_vm1, %v20147_v44, %v6673_v26  ;;  %v5457_v48 = vsel %vm5091_vm1, %v19356_v31, -inf  ;;  %v6090_v13 = vmax.f32 %v6088_v36, %v6089_v33  ;;  %v20149_v43 = vmax.f32 %v20148_v35, 0.0  ;;  %v14399_v35 = vpop.f32.mrf.mxu1  ;;  %v14414_v55 = vpop.f32.mrf.mxu0  ;;  %v20153_v31 = vld [vmem:[#allocation100_spill] sm:$0xff] }
 0x256   :  { %20143 = vst [vmem:[#allocation69_spill] sm:$0xff] %v14361_v54  ;;  %v7109_v34 = vsel %vm5091_vm1, %v20145_v38, %v6673_v26  ;;  %7527 = vst.msk [vmem:[%s18979_s4 + $0x7d0] sm:$0xff] %vm7276_vm2, %v7110_v11  ;;  %v6134_v38 = vmax.f32 %v6132_v46, %v14329_v8  ;;  %v5456_v36 = vsel %vm5091_vm1, %v20150_v42, -inf  ;;  %v19358_v33 = vmax.f32 %v14361_v54, 0.0 }
 0x257   :  { %v7111_v3 = vsel %vm5091_vm1, %v20149_v43, %v6673_v26  ;;  %7526 = vst.msk [vmem:[%s18979_s4 + $0x7c8] sm:$0xff] %vm7276_vm2, %v7109_v34  ;;  %v3951_v43 = vmul.f32 %v13862_v50, %v13990_v60  ;;  %v6571_v26 = vpop.permute.xlu1 %6570  ;;  %v6091_v34 = vrot.slane %v6090_v13, 1  ;;  %v5458_v44 = vmax.f32 %v5456_v36, %v5457_v48 }
 0x258   :  { %7528 = vst.msk [vmem:[%s18979_s4 + $0x7d8] sm:$0xff] %vm7276_vm2, %v7111_v3  ;;  %v4158_v8 = vmul.f32 %v13862_v50, %v14014_v23  ;;  %v5424_v11 = vrot.slane %v14031_v58, 4  ;;  %v6137_v46 = vsel %vm5091_vm1, %v19358_v33, -inf  ;;  %v3950_v60 = vmul.f32 %v13862_v50, %v14029_v32 }
 0x259   :  { %v14408_v42 = vadd.f32 %v13944_v5, %v3951_v43  ;;  %v4161_v3 = vmul.f32 %v13862_v50, %v14045_v59  ;;  %v6092_v48 = vmax.f32 %v6090_v13, %v6091_v34  ;;  %v20154_v54 = vmax.f32 %v20153_v31, 0.0  ;;  %v20157_v59 = vld [vmem:[#allocation94_spill] sm:$0xff]  ;;  %v20159_v34 = vld [vmem:[#allocation105_spill] sm:$0xff] }
 0x25a   :  { %v14417_v23 = vadd.f32 %v13944_v5, %v4158_v8  ;;  %v5425_v36 = vmax.f32 %v14031_v58, %v5424_v11  ;;  %v14425_v53 = vadd.f32 %v13944_v5, %v3950_v60  ;;  %v20158_v52 = vmax.f32 %v20157_v59, 0.0  ;;  %v14437_v58 = vpop.f32.mrf.mxu1  ;;  %v20161_v60 = vld [vmem:[#allocation101_spill] sm:$0xff] }
 0x25b   :  { %20151 = vst [vmem:[#allocation66_spill] sm:$0xff] %v14408_v42  ;;  %v6904_v33 = vsel %vm5091_vm1, %v20154_v54, %v6571_v26  ;;  %v19361_v43 = vmax.f32 %v14408_v42, 0.0  ;;  %v14428_v32 = vadd.f32 %v13944_v5, %v4161_v3  ;;  %6700 = vrot.lane.b32.xlu0 %v6092_v48, %s9180_s10  ;;  %v20160_v8 = vmax.f32 %v20159_v34, 0.0 }
 0x25c   :  { %20152 = vst [vmem:[#allocation73_spill] sm:$0xff] %v14417_v23  ;;  %20155 = vst [vmem:[#allocation70_spill] sm:$0xff] %v14425_v53  ;;  %v6905_v13 = vsel %vm5091_vm1, %v20158_v52, %v6571_v26  ;;  %v19362_v31 = vmax.f32 %v14417_v23, 0.0  ;;  %v5426_v54 = vrot.slane %v5425_v36, 2  ;;  %v20162_v3 = vmax.f32 %v20161_v60, 0.0 }
 0x25d   :  { %20156 = vst [vmem:[#allocation68_spill] sm:$0xff] %v14428_v32  ;;  %7321 = vst.msk [vmem:[%s18979_s4 + $0x160] sm:$0xff] %vm7276_vm2, %v6904_v33  ;;  %v6906_v11 = vsel %vm5091_vm1, %v20160_v8, %v6571_v26  ;;  %v5461_v33 = vsel %vm5091_vm1, %v19361_v43, -inf  ;;  %v19364_v48 = vmax.f32 %v14425_v53, 0.0  ;;  %v19365_v59 = vmax.f32 %v14428_v32, 0.0 }
 0x25e   :  { %v6907_v52 = vsel %vm5091_vm1, %v20162_v3, %v6571_v26  ;;  %7322 = vst.msk [vmem:[%s18979_s4 + $0x168] sm:$0xff] %vm7276_vm2, %v6905_v13  ;;  %7323 = vst.msk [vmem:[%s18979_s4 + $0x170] sm:$0xff] %vm7276_vm2, %v6906_v11  ;;  %v3953_v26 = vmul.f32 %v13862_v50, %v14071_v15  ;;  %v14466_v13 = vpop.f32.mrf.mxu0  ;;  %v6135_v34 = vsel %vm5091_vm1, %v19362_v31, -inf  ;;  %v5427_v8 = vmax.f32 %v5425_v36, %v5426_v54  ;;  %v14485_v31 = vpop.f32.mrf.mxu1 }
 0x25f   :  { %7324 = vst.msk [vmem:[%s18979_s4 + $0x178] sm:$0xff] %vm7276_vm2, %v6907_v52  ;;  %v4160_v60 = vmul.f32 %v13862_v50, %v14097_v56  ;;  %v6100_v11 = vrot.slane %v14023_v9, 4  ;;  %v6136_v3 = vmax.f32 %v6134_v38, %v6135_v34  ;;  %v5459_v52 = vsel %vm5091_vm1, %v19364_v48, -inf  ;;  %v6675_v34 = vpop.permute.xlu1 %6674 }
 0x260   :  { %v14480_v15 = vsel %vm5091_vm1, %v19365_v59, -inf  ;;  %v14483_v43 = vadd.f32 %v13944_v5, %v3953_v26  ;;  %v5428_v36 = vrot.slane %v5427_v8, 1  ;;  %v5460_v54 = vmax.f32 %v5458_v44, %v5459_v52  ;;  %v14498_v32 = vpop.f32.mrf.mxu0 }
 0x261   :  { %v14488_v56 = vadd.f32 %v13944_v5, %v4160_v60  ;;  %v6101_v38 = vmax.f32 %v14023_v9, %v6100_v11  ;;  %v14491_v23 = vmax.f32 %v6136_v3, %v6137_v46  ;;  %v3952_v59 = vmul.f32 %v13862_v50, %v14114_v18  ;;  %v20166_v11 = vld [vmem:[#allocation99_spill] sm:$0xff] }
 0x262   :  { %20163 = vst [vmem:[#allocation67_spill] sm:$0xff] %v14483_v43  ;;  %v19368_v48 = vmax.f32 %v14483_v43, 0.0  ;;  %v4163_v26 = vmul.f32 %v13862_v50, %v14136_v28  ;;  %v5429_v42 = vmax.f32 %v5427_v8, %v5428_v36  ;;  %v14500_v44 = vmax.f32 %v5460_v54, %v5461_v33  ;;  %v14515_v8 = vpop.f32.mrf.mxu1  ;;  %v20168_v54 = vld [vmem:[#allocation97_spill] sm:$0xff]  ;;  %v20170_v43 = vld [vmem:[#allocation103_spill] sm:$0xff] }
 0x263   :  { %20164 = vst [vmem:[#allocation72_spill] sm:$0xff] %v14488_v56  ;;  %v19371_v60 = vmax.f32 %v14488_v56, 0.0  ;;  %v6102_v52 = vrot.slane %v6101_v38, 2  ;;  %v14507_v46 = vadd.f32 %v13944_v5, %v3952_v59  ;;  %v20167_v28 = vmax.f32 %v20166_v11, 0.0 }
 0x264   :  { %v5470_v9 = vsel %vm5091_vm1, %v19368_v48, -inf  ;;  %v14510_v18 = vadd.f32 %v13944_v5, %v4163_v26  ;;  %6598 = vrot.lane.b32.xlu1 %v5429_v42, %s9180_s10  ;;  %v20169_v48 = vmax.f32 %v20168_v54, 0.0  ;;  %v20171_v26 = vmax.f32 %v20170_v43, 0.0  ;;  %v14545_v43 = vpop.f32.mrf.mxu0 }
 0x265   :  { %v7112_v3 = vsel %vm5091_vm1, %v20167_v28, %v6675_v34  ;;  %v6145_v33 = vsel %vm5091_vm1, %v19371_v60, -inf  ;;  %v6103_v36 = vmax.f32 %v6101_v38, %v6102_v52  ;;  %v19372_v11 = vmax.f32 %v14507_v46, 0.0  ;;  %v20172_v38 = vld [vmem:[#allocation102_spill] sm:$0xff] }
 0x266   :  { %20165 = vst [vmem:[#allocation71_spill] sm:$0xff] %v14510_v18  ;;  %v7113_v59 = vsel %vm5091_vm1, %v20169_v48, %v6675_v34  ;;  %v7114_v53 = vsel %vm5091_vm1, %v20171_v26, %v6675_v34  ;;  %7529 = vst.msk [vmem:[%s18979_s4 + $0x7e0] sm:$0xff] %vm7276_vm2, %v7112_v3  ;;  %v6147_v42 = vmax.f32 %v6145_v33, %v14480_v15  ;;  %v19373_v28 = vmax.f32 %v14510_v18, 0.0  ;;  %v6573_v33 = vpop.permute.xlu0 %6572  ;;  %v20178_v18 = vld [vmem:[#allocation111_spill] sm:$0xff] }
 0x267   :  { %v20173_v52 = vmax.f32 %v20172_v38, 0.0  ;;  %7530 = vst.msk [vmem:[%s18979_s4 + $0x7e8] sm:$0xff] %vm7276_vm2, %v7113_v59  ;;  %7531 = vst.msk [vmem:[%s18979_s4 + $0x7f0] sm:$0xff] %vm7276_vm2, %v7114_v53  ;;  %v6104_v48 = vrot.slane %v6103_v36, 1  ;;  %v3955_v15 = vmul.f32 %v13862_v50, %v14162_v40  ;;  %v5437_v3 = vrot.slane %v14179_v37, 4  ;;  %v14566_v38 = vpop.f32.mrf.mxu1 }
 0x268   :  { %v5469_v53 = vsel %vm5091_vm1, %v19372_v11, -inf  ;;  %v6150_v59 = vsel %vm5091_vm1, %v19373_v28, -inf  ;;  %v3954_v26 = vmul.f32 %v13862_v50, %v14194_v51  ;;  %v4165_v40 = vmul.f32 %v13862_v50, %v14224_v19 }
 0x269   :  { %v7115_v54 = vsel %vm5091_vm1, %v20173_v52, %v6675_v34  ;;  %v4162_v34 = vmul.f32 %v13862_v50, %v14177_v14  ;;  %v6105_v14 = vmax.f32 %v6103_v36, %v6104_v48  ;;  %v5471_v52 = vmax.f32 %v5469_v53, %v5470_v9  ;;  %v14584_v36 = vpop.f32.mrf.mxu0 }
 0x26a   :  { %7532 = vst.msk [vmem:[%s18979_s4 + $0x7f8] sm:$0xff] %vm7276_vm2, %v7115_v54  ;;  %v14569_v54 = vadd.f32 %v13944_v5, %v3955_v15  ;;  %v5438_v11 = vmax.f32 %v14179_v37, %v5437_v3  ;;  %v14576_v28 = vadd.f32 %v13944_v5, %v3954_v26  ;;  %v14579_v51 = vadd.f32 %v13944_v5, %v4165_v40  ;;  %v20180_v15 = vld [vmem:[#allocation108_spill] sm:$0xff]  ;;  %v20182_v3 = vld [vmem:[#allocation115_spill] sm:$0xff] }
 0x26b   :  { %v14572_v60 = vadd.f32 %v13944_v5, %v4162_v34  ;;  %v20179_v19 = vmax.f32 %v20178_v18, 0.0  ;;  %6702 = vrot.lane.b32.xlu1 %v6105_v14, %s9180_s10  ;;  %v20181_v37 = vmax.f32 %v20180_v15, 0.0  ;;  %v20183_v53 = vmax.f32 %v20182_v3, 0.0 }
 0x26c   :  { %20174 = vst [vmem:[#allocation77_spill] sm:$0xff] %v14569_v54  ;;  %20176 = vst [vmem:[#allocation82_spill] sm:$0xff] %v14576_v28  ;;  %v19376_v9 = vmax.f32 %v14569_v54, 0.0  ;;  %v5439_v18 = vrot.slane %v5438_v11, 2  ;;  %v19379_v40 = vmax.f32 %v14576_v28, 0.0  ;;  %v19378_v14 = vmax.f32 %v14579_v51, 0.0 }
 0x26d   :  { %20175 = vst [vmem:[#allocation74_spill] sm:$0xff] %v14572_v60  ;;  %20177 = vst [vmem:[#allocation78_spill] sm:$0xff] %v14579_v51  ;;  %v6908_v56 = vsel %vm5091_vm1, %v20179_v19, %v6573_v33  ;;  %v6909_v34 = vsel %vm5091_vm1, %v20181_v37, %v6573_v33  ;;  %v6910_v26 = vsel %vm5091_vm1, %v20183_v53, %v6573_v33  ;;  %v20184_v19 = vld [vmem:[#allocation112_spill] sm:$0xff]  ;;  %v20186_v3 = vmax.f32 %v14572_v60, 0.0 }
 0x26e   :  { %7325 = vst.msk [vmem:[%s18979_s4 + $0x180] sm:$0xff] %vm7276_vm2, %v6908_v56  ;;  %v20185_v48 = vmax.f32 %v20184_v19, 0.0  ;;  %7326 = vst.msk [vmem:[%s18979_s4 + $0x188] sm:$0xff] %vm7276_vm2, %v6909_v34  ;;  %v14612_v56 = vpop.f32.mrf.mxu1  ;;  %v5474_v37 = vsel %vm5091_vm1, %v19376_v9, -inf  ;;  %v4164_v34 = vmul.f32 %v13862_v50, %v14263_v30  ;;  %v5472_v19 = vsel %vm5091_vm1, %v19379_v40, -inf  ;;  %v14636_v9 = vpop.f32.mrf.mxu0 }
 0x26f   :  { %7327 = vst.msk [vmem:[%s18979_s4 + $0x190] sm:$0xff] %vm7276_vm2, %v6910_v26  ;;  %v5440_v26 = vmax.f32 %v5438_v11, %v5439_v18  ;;  %v6113_v30 = vrot.slane %v14170_v57, 4 }
 0x270   :  { %v6911_v15 = vsel %vm5091_vm1, %v20185_v48, %v6573_v33  ;;  %v6148_v33 = vsel %vm5091_vm1, %v20186_v3, -inf  ;;  %v3957_v48 = vmul.f32 %v13862_v50, %v14246_v21  ;;  %v14634_v3 = vsel %vm5091_vm1, %v19378_v14, -inf  ;;  %v14651_v40 = vpop.f32.mrf.mxu1  ;;  %v14667_v28 = vpop.f32.mrf.mxu0 }
 0x271   :  { %7328 = vst.msk [vmem:[%s18979_s4 + $0x198] sm:$0xff] %vm7276_vm2, %v6911_v15  ;;  %v6149_v53 = vmax.f32 %v6147_v42, %v6148_v33  ;;  %v5473_v15 = vmax.f32 %v5471_v52, %v5472_v19  ;;  %v14642_v21 = vadd.f32 %v13944_v5, %v4164_v34  ;;  %v6677_v42 = vpop.permute.xlu0 %6676  ;;  %v5441_v18 = vrot.slane %v5440_v26, 1 }
 0x272   :  { %v14639_v60 = vadd.f32 %v13944_v5, %v3957_v48  ;;  %v3956_v33 = vmul.f32 %v13862_v50, %v14283_v4  ;;  %v4167_v14 = vmul.f32 %v13862_v50, %v14312_v47  ;;  %v6114_v19 = vmax.f32 %v14170_v57, %v6113_v30  ;;  %v20191_v4 = vld [vmem:[#allocation110_spill] sm:$0xff] }
 0x273   :  { %20188 = vst [vmem:[#allocation75_spill] sm:$0xff] %v14642_v21  ;;  %v14645_v11 = vmax.f32 %v6149_v53, %v6150_v59  ;;  %v14653_v52 = vmax.f32 %v5473_v15, %v5474_v37  ;;  %v19383_v34 = vmax.f32 %v14642_v21, 0.0  ;;  %v5442_v51 = vmax.f32 %v5440_v26, %v5441_v18  ;;  %v20193_v15 = vld [vmem:[#allocation109_spill] sm:$0xff] }
 0x274   :  { %20187 = vst [vmem:[#allocation76_spill] sm:$0xff] %v14639_v60  ;;  %v19384_v48 = vmax.f32 %v14639_v60, 0.0  ;;  %v14659_v59 = vadd.f32 %v13944_v5, %v3956_v33  ;;  %v14662_v53 = vadd.f32 %v13944_v5, %v4167_v14  ;;  %v20192_v54 = vmax.f32 %v20191_v4, 0.0  ;;  %v20195_v4 = vld [vmem:[#allocation114_spill] sm:$0xff] }
 0x275   :  { %v6158_v57 = vsel %vm5091_vm1, %v19383_v34, -inf  ;;  %v6115_v26 = vrot.slane %v6114_v19, 2  ;;  %v20194_v30 = vmax.f32 %v20193_v15, 0.0  ;;  %6600 = vrot.lane.b32.xlu0 %v5442_v51, %s9180_s10  ;;  %v20196_v34 = vmax.f32 %v20195_v4, 0.0  ;;  %v14693_v15 = vpop.f32.mrf.mxu1  ;;  %v6575_v4 = vpop.permute.xlu1 %6574 }
 0x276   :  { %20189 = vst [vmem:[#allocation81_spill] sm:$0xff] %v14659_v59  ;;  %20190 = vst [vmem:[#allocation79_spill] sm:$0xff] %v14662_v53  ;;  %v7116_v47 = vsel %vm5091_vm1, %v20192_v54, %v6677_v42  ;;  %v5483_v37 = vsel %vm5091_vm1, %v19384_v48, -inf  ;;  %v6160_v54 = vmax.f32 %v6158_v57, %v14634_v3  ;;  %v19386_v18 = vmax.f32 %v14659_v59, 0.0 }
 0x277   :  { %v7117_v14 = vsel %vm5091_vm1, %v20194_v30, %v6677_v42  ;;  %7533 = vst.msk [vmem:[%s18979_s4 + $0x800] sm:$0xff] %vm7276_vm2, %v7116_v47  ;;  %v19385_v33 = vmax.f32 %v14662_v53, 0.0  ;;  %v7118_v48 = vsel %vm5091_vm1, %v20196_v34, %v6677_v42  ;;  %v6116_v47 = vmax.f32 %v6114_v19, %v6115_v26  ;;  %v20197_v30 = vld [vmem:[#allocation113_spill] sm:$0xff]  ;;  %v20201_v53 = vld [vmem:[#allocation120_spill] sm:$0xff]  ;;  %v14736_v60 = vpop.f32.mrf.mxu1 }
 0x278   :  { %7534 = vst.msk [vmem:[%s18979_s4 + $0x808] sm:$0xff] %vm7276_vm2, %v7117_v14  ;;  %v20198_v51 = vmax.f32 %v20197_v30, 0.0  ;;  %7535 = vst.msk [vmem:[%s18979_s4 + $0x810] sm:$0xff] %vm7276_vm2, %v7118_v48  ;;  %v3959_v34 = vmul.f32 %v13862_v50, %v14331_v1  ;;  %v4166_v57 = vmul.f32 %v13862_v50, %v14348_v61  ;;  %v5482_v19 = vsel %vm5091_vm1, %v19386_v18, -inf  ;;  %v14719_v61 = vpop.f32.mrf.mxu0 }
 0x279   :  { %v5450_v48 = vrot.slane %v14350_v2, 4  ;;  %v3958_v1 = vmul.f32 %v13862_v50, %v14369_v41  ;;  %v6117_v26 = vrot.slane %v6116_v47, 1  ;;  %v5484_v14 = vmax.f32 %v5482_v19, %v5483_v37  ;;  %v20203_v19 = vld [vmem:[#allocation116_spill] sm:$0xff] }
 0x27a   :  { %v7119_v3 = vsel %vm5091_vm1, %v20198_v51, %v6677_v42  ;;  %v6163_v42 = vsel %vm5091_vm1, %v19385_v33, -inf  ;;  %v14722_v30 = vadd.f32 %v13944_v5, %v3959_v34  ;;  %v14725_v51 = vadd.f32 %v13944_v5, %v4166_v57 }
 0x27b   :  { %7536 = vst.msk [vmem:[%s18979_s4 + $0x818] sm:$0xff] %vm7276_vm2, %v7119_v3  ;;  %v5451_v33 = vmax.f32 %v14350_v2, %v5450_v48  ;;  %v14729_v18 = vadd.f32 %v13944_v5, %v3958_v1  ;;  %v4169_v3 = vmul.f32 %v13862_v50, %v14399_v35  ;;  %v20202_v41 = vmax.f32 %v20201_v53, 0.0 }
 0x27c   :  { %20199 = vst [vmem:[#allocation88_spill] sm:$0xff] %v14722_v30  ;;  %20200 = vst [vmem:[#allocation83_spill] sm:$0xff] %v14725_v51  ;;  %v6118_v37 = vmax.f32 %v6116_v47, %v6117_v26  ;;  %v19391_v34 = vmax.f32 %v14722_v30, 0.0  ;;  %v19392_v57 = vmax.f32 %v14725_v51, 0.0  ;;  %v20204_v59 = vmax.f32 %v20203_v19, 0.0  ;;  %v20206_v47 = vld [vmem:[#allocation124_spill] sm:$0xff] }
 0x27d   :  { %v6912_v21 = vsel %vm5091_vm1, %v20202_v41, %v6575_v4  ;;  %v5452_v35 = vrot.slane %v5451_v33, 2  ;;  %v19393_v53 = vmax.f32 %v14729_v18, 0.0  ;;  %v14749_v48 = vadd.f32 %v13944_v5, %v4169_v3  ;;  %v20208_v41 = vld [vmem:[#allocation121_spill] sm:$0xff] }
 0x27e   :  { %v6913_v2 = vsel %vm5091_vm1, %v20204_v59, %v6575_v4  ;;  %7329 = vst.msk [vmem:[%s18979_s4 + $0x1a0] sm:$0xff] %vm7276_vm2, %v6912_v21  ;;  %v20207_v1 = vmax.f32 %v20206_v47, 0.0  ;;  %v14758_v59 = vpop.f32.mrf.mxu0  ;;  %6704 = vrot.lane.b32.xlu0 %v6118_v37, %s9180_s10  ;;  %v5487_v21 = vsel %vm5091_vm1, %v19391_v34, -inf  ;;  %v6161_v3 = vsel %vm5091_vm1, %v19392_v57, -inf }
 0x27f   :  { %20205 = vst [vmem:[#allocation93_spill] sm:$0xff] %v14749_v48  ;;  %7330 = vst.msk [vmem:[%s18979_s4 + $0x1a8] sm:$0xff] %vm7276_vm2, %v6913_v2  ;;  %v20209_v19 = vmax.f32 %v20208_v41, 0.0  ;;  %v3961_v37 = vmul.f32 %v13862_v50, %v14414_v55  ;;  %v6162_v2 = vmax.f32 %v6160_v54, %v6161_v3  ;;  %v5485_v34 = vsel %vm5091_vm1, %v19393_v53, -inf }
 0x280   :  { %v6914_v26 = vsel %vm5091_vm1, %v20207_v1, %v6575_v4  ;;  %v5453_v1 = vmax.f32 %v5451_v33, %v5452_v35  ;;  %v19394_v57 = vmax.f32 %v14749_v48, 0.0  ;;  %v5486_v41 = vmax.f32 %v5484_v14, %v5485_v34  ;;  %v6679_v33 = vpop.permute.xlu1 %6678  ;;  %v14799_v14 = vpop.f32.mrf.mxu0  ;;  %v20213_v48 = vld [vmem:[#allocation118_spill] sm:$0xff] }
 0x281   :  { %v6915_v47 = vsel %vm5091_vm1, %v20209_v19, %v6575_v4  ;;  %7331 = vst.msk [vmem:[%s18979_s4 + $0x1b0] sm:$0xff] %vm7276_vm2, %v6914_v26  ;;  %v14784_v4 = vpop.f32.mrf.mxu1  ;;  %v14787_v26 = vadd.f32 %v13944_v5, %v3961_v37  ;;  %v4168_v55 = vmul.f32 %v13862_v50, %v14437_v58  ;;  %v6126_v54 = vrot.slane %v14321_v16, 4 }
 0x282   :  { %7332 = vst.msk [vmem:[%s18979_s4 + $0x1b8] sm:$0xff] %vm7276_vm2, %v6915_v47  ;;  %v14792_v35 = vmax.f32 %v6162_v2, %v6163_v42  ;;  %v5454_v3 = vrot.slane %v5453_v1, 1  ;;  %v6172_v19 = vsel %vm5091_vm1, %v19394_v57, -inf  ;;  %v3960_v47 = vmul.f32 %v13862_v50, %v14466_v13 }
 0x283   :  { %20210 = vst [vmem:[#allocation89_spill] sm:$0xff] %v14787_v26  ;;  %v14801_v34 = vmax.f32 %v5486_v41, %v5487_v21  ;;  %v19397_v37 = vmax.f32 %v14787_v26, 0.0  ;;  %v14805_v58 = vadd.f32 %v13944_v5, %v4168_v55  ;;  %v6127_v42 = vmax.f32 %v14321_v16, %v6126_v54  ;;  %v14816_v21 = vpop.f32.mrf.mxu1  ;;  %v20215_v55 = vld [vmem:[#allocation117_spill] sm:$0xff]  ;;  %v20220_v16 = vld [vmem:[#allocation122_spill] sm:$0xff] }
 0x284   :  { %v5455_v2 = vmax.f32 %v5453_v1, %v5454_v3  ;;  %v14809_v53 = vadd.f32 %v13944_v5, %v3960_v47  ;;  %v4171_v57 = vmul.f32 %v13862_v50, %v14485_v31  ;;  %v20214_v13 = vmax.f32 %v20213_v48, 0.0  ;;  %v20218_v47 = vld [vmem:[#allocation123_spill] sm:$0xff] }
 0x285   :  { %20211 = vst [vmem:[#allocation86_spill] sm:$0xff] %v14805_v58  ;;  %v14821_v41 = vsel %vm5091_vm1, %v19397_v37, -inf  ;;  %v6128_v1 = vrot.slane %v6127_v42, 2  ;;  %v20216_v54 = vmax.f32 %v20215_v55, 0.0  ;;  %v20221_v55 = vmax.f32 %v20220_v16, 0.0 }
 0x286   :  { %20212 = vst [vmem:[#allocation85_spill] sm:$0xff] %v14809_v53  ;;  %v7120_v51 = vsel %vm5091_vm1, %v20214_v13, %v6679_v33  ;;  %6602 = vrot.lane.b32.xlu1 %v5455_v2, %s9180_s10  ;;  %v14834_v48 = vadd.f32 %v13944_v5, %v4171_v57  ;;  %v20219_v13 = vmax.f32 %v20218_v47, 0.0  ;;  %v20222_v2 = vmax.f32 %v14805_v58, 0.0 }
 0x287   :  { %v7121_v3 = vsel %vm5091_vm1, %v20216_v54, %v6679_v33  ;;  %7537 = vst.msk [vmem:[%s18979_s4 + $0x820] sm:$0xff] %vm7276_vm2, %v7120_v51  ;;  %v7123_v54 = vsel %vm5091_vm1, %v20221_v55, %v6679_v33  ;;  %v14846_v51 = vpop.f32.mrf.mxu0  ;;  %v6129_v31 = vmax.f32 %v6127_v42, %v6128_v1  ;;  %v4170_v16 = vmul.f32 %v13862_v50, %v14515_v8  ;;  %v14868_v55 = vpop.f32.mrf.mxu1 }
 0x288   :  { %20217 = vst [vmem:[#allocation92_spill] sm:$0xff] %v14834_v48  ;;  %v7122_v37 = vsel %vm5091_vm1, %v20219_v13, %v6679_v33  ;;  %7538 = vst.msk [vmem:[%s18979_s4 + $0x828] sm:$0xff] %vm7276_vm2, %v7121_v3  ;;  %v6171_v57 = vsel %vm5091_vm1, %v20222_v2, -inf  ;;  %v3963_v33 = vmul.f32 %v13862_v50, %v14498_v32  ;;  %v20223_v47 = vmax.f32 %v14809_v53, 0.0  ;;  %v6577_v13 = vpop.permute.xlu0 %6576 }
 0x289   :  { %7539 = vst.msk [vmem:[%s18979_s4 + $0x830] sm:$0xff] %vm7276_vm2, %v7122_v37  ;;  %7540 = vst.msk [vmem:[%s18979_s4 + $0x838] sm:$0xff] %vm7276_vm2, %v7123_v54  ;;  %v6173_v3 = vmax.f32 %v6171_v57, %v6172_v19  ;;  %v19402_v1 = vmax.f32 %v14834_v48, 0.0  ;;  %v5463_v37 = vrot.slane %v14500_v44, 4  ;;  %v6130_v2 = vrot.slane %v6129_v31, 1  ;;  %v14885_v26 = vpop.f32.mrf.mxu0 }
 0x28a   :  { %v5495_v42 = vsel %vm5091_vm1, %v20223_v47, -inf  ;;  %v14872_v32 = vadd.f32 %v13944_v5, %v3963_v33  ;;  %v14875_v8 = vadd.f32 %v13944_v5, %v4170_v16  ;;  %v3962_v47 = vmul.f32 %v13862_v50, %v14545_v43 }
 0x28b   :  { %v5497_v54 = vmax.f32 %v5495_v42, %v14821_v41  ;;  %v6176_v19 = vsel %vm5091_vm1, %v19402_v1, -inf  ;;  %v5464_v57 = vmax.f32 %v14500_v44, %v5463_v37  ;;  %v4173_v58 = vmul.f32 %v13862_v50, %v14566_v38  ;;  %v20226_v42 = vld [vmem:[#allocation127_spill] sm:$0xff]  ;;  %v20230_v37 = vld [vmem:[#allocation125_spill] sm:$0xff] }
 0x28c   :  { %20224 = vst [vmem:[#allocation91_spill] sm:$0xff] %v14872_v32  ;;  %20225 = vst [vmem:[#allocation100_spill] sm:$0xff] %v14875_v8  ;;  %v6131_v41 = vmax.f32 %v6129_v31, %v6130_v2  ;;  %v19404_v33 = vmax.f32 %v14872_v32, 0.0  ;;  %v19406_v16 = vmax.f32 %v14875_v8, 0.0  ;;  %v20227_v53 = vmax.f32 %v20226_v42, 0.0  ;;  %v14905_v31 = vpop.f32.mrf.mxu1  ;;  %v20232_v2 = vld [vmem:[#allocation130_spill] sm:$0xff] }
 0x28d   :  { %v5465_v1 = vrot.slane %v5464_v57, 2  ;;  %v14893_v44 = vadd.f32 %v13944_v5, %v3962_v47  ;;  %v14896_v43 = vadd.f32 %v13944_v5, %v4173_v58  ;;  %v20231_v50 = vmax.f32 %v20230_v37, 0.0  ;;  %v20234_v37 = vld [vmem:[#allocation84_spill] sm:$0xff] }
 0x28e   :  { %v6916_v48 = vsel %vm5091_vm1, %v20227_v53, %v6577_v13  ;;  %6706 = vrot.lane.b32.xlu1 %v6131_v41, %s9180_s10  ;;  %v5500_v53 = vsel %vm5091_vm1, %v19404_v33, -inf  ;;  %v6174_v58 = vsel %vm5091_vm1, %v19406_v16, -inf  ;;  %v20233_v47 = vmax.f32 %v20232_v2, 0.0  ;;  %v6681_v2 = vpop.permute.xlu0 %6680 }
 0x28f   :  { %20228 = vst [vmem:[#allocation94_spill] sm:$0xff] %v14893_v44  ;;  %20229 = vst [vmem:[#allocation105_spill] sm:$0xff] %v14896_v43  ;;  %v6917_v38 = vsel %vm5091_vm1, %v20231_v50, %v6577_v13  ;;  %v20235_v50 = vmax.f32 %v20234_v37, 0.0  ;;  %v6175_v41 = vmax.f32 %v6173_v3, %v6174_v58  ;;  %v5466_v32 = vmax.f32 %v5464_v57, %v5465_v1  ;;  %v14939_v3 = vld [vmem:[%s18977_s2] ss:$0 sm:$0xff] }
 0x290   :  { %7333 = vst.msk [vmem:[%s18979_s4 + $0x1c0] sm:$0xff] %vm7276_vm2, %v6916_v48  ;;  %v6918_v42 = vsel %vm5091_vm1, %v20233_v47, %v6577_v13  ;;  %7334 = vst.msk [vmem:[%s18979_s4 + $0x1c8] sm:$0xff] %vm7276_vm2, %v6917_v38  ;;  %v19407_v33 = vmax.f32 %v14893_v44, 0.0  ;;  %v19408_v8 = vmax.f32 %v14896_v43, 0.0  ;;  %v3965_v1 = vmul.f32 %v14939_v3, %v14584_v36 }
 0x291   :  { %v6919_v48 = vsel %vm5091_vm1, %v20235_v50, %v6577_v13  ;;  %7335 = vst.msk [vmem:[%s18979_s4 + $0x1d0] sm:$0xff] %vm7276_vm2, %v6918_v42  ;;  %v14934_v13 = vpop.f32.mrf.mxu0  ;;  %v4172_v57 = vmul.f32 %v14939_v3, %v14612_v56  ;;  %v6139_v38 = vrot.slane %v14491_v23, 4  ;;  %v3964_v58 = vmul.f32 %v14939_v3, %v14636_v9  ;;  %v14958_v50 = vpop.f32.mrf.mxu1 }
 0x292   :  { %7336 = vst.msk [vmem:[%s18979_s4 + $0x1d8] sm:$0xff] %vm7276_vm2, %v6919_v48  ;;  %v14948_v47 = vmax.f32 %v6175_v41, %v6176_v19  ;;  %v5467_v42 = vrot.slane %v5466_v32, 1  ;;  %v5498_v37 = vsel %vm5091_vm1, %v19407_v33, -inf  ;;  %v14956_v36 = vsel %vm5091_vm1, %v19408_v8, -inf  ;;  %v20238_v8 = vld [vmem:[#allocation126_spill] sm:$0xff] }
 0x293   :  { %v5499_v56 = vmax.f32 %v5497_v54, %v5498_v37  ;;  %v14961_v48 = vadd.f32 %v13944_v5, %v3965_v1  ;;  %v14964_v9 = vadd.f32 %v13944_v5, %v4172_v57  ;;  %v6140_v19 = vmax.f32 %v14491_v23, %v6139_v38  ;;  %v14975_v54 = vpop.f32.mrf.mxu0  ;;  %v20243_v38 = vld [vmem:[#allocation129_spill] sm:$0xff] }
 0x294   :  { %v5468_v41 = vmax.f32 %v5466_v32, %v5467_v42  ;;  %v14968_v16 = vadd.f32 %v13944_v5, %v3964_v58  ;;  %v4175_v33 = vmul.f32 %v14939_v3, %v14651_v40  ;;  %v20239_v43 = vmax.f32 %v20238_v8, 0.0  ;;  %v14990_v40 = vld [vmem:[%s18978_s3] ss:$0 sm:$0xff]  ;;  %v20241_v8 = vld [vmem:[#allocation80_spill] sm:$0xff]  ;;  %v15001_v42 = vpop.f32.mrf.mxu1 }
 0x295   :  { %20236 = vst [vmem:[#allocation101_spill] sm:$0xff] %v14961_v48  ;;  %20237 = vst [vmem:[#allocation99_spill] sm:$0xff] %v14964_v9  ;;  %v14977_v1 = vmax.f32 %v5499_v56, %v5500_v53  ;;  %v19413_v57 = vmax.f32 %v14961_v48, 0.0  ;;  %v19412_v37 = vmax.f32 %v14964_v9, 0.0  ;;  %v6141_v23 = vrot.slane %v6140_v19, 2  ;;  %v20245_v5 = vld [vmem:[#allocation128_spill] sm:$0xff] }
 0x296   :  { %v7124_v44 = vsel %vm5091_vm1, %v20239_v43, %v6681_v2  ;;  %6604 = vrot.lane.b32.xlu0 %v5468_v41, %s9180_s10  ;;  %v14993_v32 = vadd.f32 %v14990_v40, %v4175_v33  ;;  %v20242_v43 = vmax.f32 %v20241_v8, 0.0  ;;  %v20244_v58 = vmax.f32 %v20243_v38, 0.0 }
 0x297   :  { %7541 = vst.msk [vmem:[%s18979_s4 + $0x840] sm:$0xff] %vm7276_vm2, %v7124_v44  ;;  %v5509_v56 = vsel %vm5091_vm1, %v19413_v57, -inf  ;;  %v6184_v41 = vsel %vm5091_vm1, %v19412_v37, -inf  ;;  %v6142_v33 = vmax.f32 %v6140_v19, %v6141_v23  ;;  %v20246_v30 = vmax.f32 %v20245_v5, 0.0  ;;  %v15031_v5 = vpop.f32.mrf.mxu0  ;;  %v15046_v37 = vpop.f32.mrf.mxu1  ;;  %v20250_v57 = vld [vmem:[#allocation133_spill] sm:$0xff] }
 0x298   :  { %20240 = vst [vmem:[#allocation97_spill] sm:$0xff] %v14993_v32  ;;  %v7125_v53 = vsel %vm5091_vm1, %v20242_v43, %v6681_v2  ;;  %v7126_v44 = vsel %vm5091_vm1, %v20244_v58, %v6681_v2  ;;  %v6186_v43 = vmax.f32 %v6184_v41, %v14956_v36  ;;  %v20247_v38 = vmax.f32 %v14968_v16, 0.0 }
 0x299   :  { %v7127_v8 = vsel %vm5091_vm1, %v20246_v30, %v6681_v2  ;;  %7542 = vst.msk [vmem:[%s18979_s4 + $0x848] sm:$0xff] %vm7276_vm2, %v7125_v53  ;;  %7543 = vst.msk [vmem:[%s18979_s4 + $0x850] sm:$0xff] %vm7276_vm2, %v7126_v44  ;;  %v19415_v23 = vmax.f32 %v14993_v32, 0.0  ;;  %v3967_v30 = vmul.f32 %v14939_v3, %v14667_v28  ;;  %v6579_v2 = vpop.permute.xlu1 %6578  ;;  %v6143_v53 = vrot.slane %v6142_v33, 1 }
 0x29a   :  { %v5508_v19 = vsel %vm5091_vm1, %v20247_v38, -inf  ;;  %7544 = vst.msk [vmem:[%s18979_s4 + $0x858] sm:$0xff] %vm7276_vm2, %v7127_v8  ;;  %v4174_v36 = vmul.f32 %v14939_v3, %v14693_v15  ;;  %v5476_v44 = vrot.slane %v14653_v52, 4  ;;  %v3966_v28 = vmul.f32 %v14939_v3, %v14719_v61 }
 0x29b   :  { %v5510_v58 = vmax.f32 %v5508_v19, %v5509_v56  ;;  %v6189_v41 = vsel %vm5091_vm1, %v19415_v23, -inf  ;;  %v15040_v38 = vadd.f32 %v14990_v40, %v3967_v30  ;;  %v4177_v8 = vmul.f32 %v14939_v3, %v14736_v60  ;;  %v20254_v60 = vld [vmem:[#allocation87_spill] sm:$0xff] }
 0x29c   :  { %v6144_v56 = vmax.f32 %v6142_v33, %v6143_v53  ;;  %v15049_v15 = vadd.f32 %v14990_v40, %v4174_v36  ;;  %v5477_v19 = vmax.f32 %v14653_v52, %v5476_v44  ;;  %v20251_v32 = vmax.f32 %v20250_v57, 0.0  ;;  %v15069_v52 = vpop.f32.mrf.mxu0  ;;  %v20256_v53 = vld [vmem:[#allocation136_spill] sm:$0xff] }
 0x29d   :  { %20248 = vst [vmem:[#allocation103_spill] sm:$0xff] %v15040_v38  ;;  %v19418_v30 = vmax.f32 %v15040_v38, 0.0  ;;  %v15057_v9 = vadd.f32 %v14990_v40, %v3966_v28  ;;  %v15060_v61 = vadd.f32 %v14990_v40, %v4177_v8  ;;  %v20255_v48 = vmax.f32 %v20254_v60, 0.0  ;;  %v20258_v28 = vld [vmem:[#allocation90_spill] sm:$0xff] }
 0x29e   :  { %20249 = vst [vmem:[#allocation102_spill] sm:$0xff] %v15049_v15  ;;  %v6920_v23 = vsel %vm5091_vm1, %v20251_v32, %v6579_v2  ;;  %6708 = vrot.lane.b32.xlu0 %v6144_v56, %s9180_s10  ;;  %v19419_v57 = vmax.f32 %v15049_v15, 0.0  ;;  %v5478_v32 = vrot.slane %v5477_v19, 2  ;;  %v20257_v36 = vmax.f32 %v20256_v53, 0.0 }
 0x29f   :  { %20252 = vst [vmem:[#allocation111_spill] sm:$0xff] %v15057_v9  ;;  %20253 = vst [vmem:[#allocation108_spill] sm:$0xff] %v15060_v61  ;;  %v6921_v33 = vsel %vm5091_vm1, %v20255_v48, %v6579_v2  ;;  %v20259_v8 = vmax.f32 %v20258_v28, 0.0  ;;  %v19421_v56 = vmax.f32 %v15057_v9, 0.0  ;;  %v19422_v60 = vmax.f32 %v15060_v61, 0.0 }
 0x2a0   :  { %7337 = vst.msk [vmem:[%s18979_s4 + $0x1e0] sm:$0xff] %vm7276_vm2, %v6920_v23  ;;  %v6922_v44 = vsel %vm5091_vm1, %v20257_v36, %v6579_v2  ;;  %7338 = vst.msk [vmem:[%s18979_s4 + $0x1e8] sm:$0xff] %vm7276_vm2, %v6921_v33  ;;  %v5513_v23 = vsel %vm5091_vm1, %v19418_v30, -inf  ;;  %v15098_v33 = vpop.f32.mrf.mxu1  ;;  %v6187_v53 = vsel %vm5091_vm1, %v19419_v57, -inf  ;;  %v5479_v36 = vmax.f32 %v5477_v19, %v5478_v32  ;;  %v15117_v57 = vpop.f32.mrf.mxu0 }
 0x2a1   :  { %v6923_v48 = vsel %vm5091_vm1, %v20259_v8, %v6579_v2  ;;  %7339 = vst.msk [vmem:[%s18979_s4 + $0x1f0] sm:$0xff] %vm7276_vm2, %v6922_v44  ;;  %v3969_v2 = vmul.f32 %v14939_v3, %v14758_v59  ;;  %v4176_v28 = vmul.f32 %v14939_v3, %v14784_v4  ;;  %v6152_v44 = vrot.slane %v14645_v11, 4 }
 0x2a2   :  { %7340 = vst.msk [vmem:[%s18979_s4 + $0x1f8] sm:$0xff] %vm7276_vm2, %v6923_v48  ;;  %v6188_v8 = vmax.f32 %v6186_v43, %v6187_v53  ;;  %v5511_v48 = vsel %vm5091_vm1, %v19421_v56, -inf  ;;  %v15112_v59 = vsel %vm5091_vm1, %v19422_v60, -inf  ;;  %v5480_v19 = vrot.slane %v5479_v36, 1  ;;  %v6683_v53 = vpop.permute.xlu1 %6682  ;;  %v15130_v61 = vpop.f32.mrf.mxu1 }
 0x2a3   :  { %v15115_v30 = vadd.f32 %v14990_v40, %v3969_v2  ;;  %v5512_v32 = vmax.f32 %v5510_v58, %v5511_v48  ;;  %v15120_v4 = vadd.f32 %v14990_v40, %v4176_v28  ;;  %v6153_v43 = vmax.f32 %v14645_v11, %v6152_v44  ;;  %v20263_v44 = vld [vmem:[#allocation132_spill] sm:$0xff] }
 0x2a4   :  { %v15123_v15 = vmax.f32 %v6188_v8, %v6189_v41  ;;  %v3968_v60 = vmul.f32 %v14939_v3, %v14799_v14  ;;  %v4179_v2 = vmul.f32 %v14939_v3, %v14816_v21  ;;  %v5481_v38 = vmax.f32 %v5479_v36, %v5480_v19  ;;  %v15147_v36 = vpop.f32.mrf.mxu0 }
 0x2a5   :  { %20260 = vst [vmem:[#allocation115_spill] sm:$0xff] %v15115_v30  ;;  %20261 = vst [vmem:[#allocation112_spill] sm:$0xff] %v15120_v4  ;;  %v19425_v56 = vmax.f32 %v15115_v30, 0.0  ;;  %v15132_v58 = vmax.f32 %v5512_v32, %v5513_v23  ;;  %v19428_v28 = vmax.f32 %v15120_v4, 0.0  ;;  %v6154_v48 = vrot.slane %v6153_v43, 2  ;;  %v20265_v32 = vld [vmem:[#allocation131_spill] sm:$0xff] }
 0x2a6   :  { %v15139_v41 = vadd.f32 %v14990_v40, %v3968_v60  ;;  %v15142_v14 = vadd.f32 %v14990_v40, %v4179_v2  ;;  %v20264_v21 = vmax.f32 %v20263_v44, 0.0  ;;  %6606 = vrot.lane.b32.xlu1 %v5481_v38, %s9180_s10  ;;  %v20267_v30 = vld [vmem:[#allocation135_spill] sm:$0xff] }
 0x2a7   :  { %v5522_v11 = vsel %vm5091_vm1, %v19425_v56, -inf  ;;  %v6197_v23 = vsel %vm5091_vm1, %v19428_v28, -inf  ;;  %v6155_v19 = vmax.f32 %v6153_v43, %v6154_v48  ;;  %v20266_v56 = vmax.f32 %v20265_v32, 0.0  ;;  %v20269_v43 = vld [vmem:[#allocation134_spill] sm:$0xff] }
 0x2a8   :  { %20262 = vst [vmem:[#allocation110_spill] sm:$0xff] %v15142_v14  ;;  %v7128_v8 = vsel %vm5091_vm1, %v20264_v21, %v6683_v53  ;;  %v20268_v2 = vmax.f32 %v20267_v30, 0.0  ;;  %v6199_v38 = vmax.f32 %v6197_v23, %v15112_v59  ;;  %v19429_v44 = vmax.f32 %v15139_v41, 0.0  ;;  %v15177_v30 = vpop.f32.mrf.mxu1  ;;  %v6581_v23 = vpop.permute.xlu0 %6580 }
 0x2a9   :  { %v7129_v60 = vsel %vm5091_vm1, %v20266_v56, %v6683_v53  ;;  %7545 = vst.msk [vmem:[%s18979_s4 + $0x860] sm:$0xff] %vm7276_vm2, %v7128_v8  ;;  %v19430_v21 = vmax.f32 %v15142_v14, 0.0  ;;  %v20270_v48 = vmax.f32 %v20269_v43, 0.0  ;;  %v6156_v56 = vrot.slane %v6155_v19, 1  ;;  %v15198_v43 = vpop.f32.mrf.mxu0  ;;  %v20275_v14 = vld [vmem:[#allocation98_spill] sm:$0xff] }
 0x2aa   :  { %v7130_v9 = vsel %vm5091_vm1, %v20268_v2, %v6683_v53  ;;  %7546 = vst.msk [vmem:[%s18979_s4 + $0x868] sm:$0xff] %vm7276_vm2, %v7129_v60  ;;  %v3971_v59 = vmul.f32 %v14939_v3, %v14846_v51  ;;  %v5489_v8 = vrot.slane %v14801_v34, 4  ;;  %v3970_v2 = vmul.f32 %v14939_v3, %v14885_v26 }
 0x2ab   :  { %v7131_v32 = vsel %vm5091_vm1, %v20270_v48, %v6683_v53  ;;  %7547 = vst.msk [vmem:[%s18979_s4 + $0x870] sm:$0xff] %vm7276_vm2, %v7130_v9  ;;  %v4178_v53 = vmul.f32 %v14939_v3, %v14868_v55  ;;  %v5521_v9 = vsel %vm5091_vm1, %v19429_v44, -inf  ;;  %v6202_v60 = vsel %vm5091_vm1, %v19430_v21, -inf }
 0x2ac   :  { %7548 = vst.msk [vmem:[%s18979_s4 + $0x878] sm:$0xff] %vm7276_vm2, %v7131_v32  ;;  %v4181_v51 = vmul.f32 %v14939_v3, %v14905_v31  ;;  %v6157_v55 = vmax.f32 %v6155_v19, %v6156_v56  ;;  %v5523_v48 = vmax.f32 %v5521_v9, %v5522_v11  ;;  %v15201_v32 = vadd.f32 %v14990_v40, %v3971_v59  ;;  %v15216_v19 = vpop.f32.mrf.mxu1  ;;  %v20277_v59 = vld [vmem:[#allocation95_spill] sm:$0xff] }
 0x2ad   :  { %v15204_v28 = vadd.f32 %v14990_v40, %v4178_v53  ;;  %v5490_v44 = vmax.f32 %v14801_v34, %v5489_v8  ;;  %v15208_v21 = vadd.f32 %v14990_v40, %v3970_v2  ;;  %v20276_v31 = vmax.f32 %v20275_v14, 0.0  ;;  %v20279_v8 = vld [vmem:[#allocation141_spill] sm:$0xff] }
 0x2ae   :  { %20271 = vst [vmem:[#allocation109_spill] sm:$0xff] %v15201_v32  ;;  %v15211_v26 = vadd.f32 %v14990_v40, %v4181_v51  ;;  %6710 = vrot.lane.b32.xlu1 %v6157_v55, %s9180_s10  ;;  %v19433_v11 = vmax.f32 %v15201_v32, 0.0  ;;  %v20278_v34 = vmax.f32 %v20277_v59, 0.0  ;;  %v20280_v9 = vmax.f32 %v20279_v8, 0.0 }
 0x2af   :  { %20272 = vst [vmem:[#allocation114_spill] sm:$0xff] %v15204_v28  ;;  %20273 = vst [vmem:[#allocation113_spill] sm:$0xff] %v15208_v21  ;;  %v6924_v4 = vsel %vm5091_vm1, %v20276_v31, %v6581_v23  ;;  %v5491_v14 = vrot.slane %v5490_v44, 2  ;;  %v19436_v51 = vmax.f32 %v15208_v21, 0.0  ;;  %v20281_v31 = vld [vmem:[#allocation138_spill] sm:$0xff]  ;;  %v20283_v8 = vmax.f32 %v15204_v28, 0.0 }
 0x2b0   :  { %20274 = vst [vmem:[#allocation120_spill] sm:$0xff] %v15211_v26  ;;  %v6925_v53 = vsel %vm5091_vm1, %v20278_v34, %v6581_v23  ;;  %v6926_v2 = vsel %vm5091_vm1, %v20280_v9, %v6581_v23  ;;  %7341 = vst.msk [vmem:[%s18979_s4 + $0x200] sm:$0xff] %vm7276_vm2, %v6924_v4  ;;  %v19435_v55 = vmax.f32 %v15211_v26, 0.0  ;;  %v20282_v56 = vmax.f32 %v20281_v31, 0.0  ;;  %v15244_v4 = vpop.f32.mrf.mxu0 }
 0x2b1   :  { %7342 = vst.msk [vmem:[%s18979_s4 + $0x208] sm:$0xff] %vm7276_vm2, %v6925_v53  ;;  %7343 = vst.msk [vmem:[%s18979_s4 + $0x210] sm:$0xff] %vm7276_vm2, %v6926_v2  ;;  %v5526_v34 = vsel %vm5091_vm1, %v19433_v11, -inf  ;;  %v4180_v53 = vmul.f32 %v14939_v3, %v14958_v50  ;;  %v5492_v2 = vmax.f32 %v5490_v44, %v5491_v14  ;;  %v5524_v31 = vsel %vm5091_vm1, %v19436_v51, -inf  ;;  %v15268_v11 = vpop.f32.mrf.mxu1 }
 0x2b2   :  { %v6927_v59 = vsel %vm5091_vm1, %v20282_v56, %v6581_v23  ;;  %v6200_v23 = vsel %vm5091_vm1, %v20283_v8, -inf  ;;  %v3973_v56 = vmul.f32 %v14939_v3, %v14934_v13  ;;  %v15266_v8 = vsel %vm5091_vm1, %v19435_v55, -inf  ;;  %v15283_v51 = vpop.f32.mrf.mxu0 }
 0x2b3   :  { %7344 = vst.msk [vmem:[%s18979_s4 + $0x218] sm:$0xff] %vm7276_vm2, %v6927_v59  ;;  %v6201_v9 = vmax.f32 %v6199_v38, %v6200_v23  ;;  %v5525_v59 = vmax.f32 %v5523_v48, %v5524_v31  ;;  %v15274_v13 = vadd.f32 %v14990_v40, %v4180_v53  ;;  %v6165_v50 = vrot.slane %v14792_v35, 4  ;;  %v6685_v38 = vpop.permute.xlu0 %6684  ;;  %v15299_v21 = vpop.f32.mrf.mxu1 }
 0x2b4   :  { %v15271_v28 = vadd.f32 %v14990_v40, %v3973_v56  ;;  %v5493_v14 = vrot.slane %v5492_v2, 1  ;;  %v3972_v23 = vmul.f32 %v14939_v3, %v14975_v54  ;;  %v4183_v55 = vmul.f32 %v14939_v3, %v15001_v42  ;;  %v20288_v54 = vld [vmem:[#allocation137_spill] sm:$0xff] }
 0x2b5   :  { %20285 = vst [vmem:[#allocation124_spill] sm:$0xff] %v15274_v13  ;;  %v15277_v44 = vmax.f32 %v6201_v9, %v6202_v60  ;;  %v15285_v48 = vmax.f32 %v5525_v59, %v5526_v34  ;;  %v19440_v53 = vmax.f32 %v15274_v13, 0.0  ;;  %v6166_v31 = vmax.f32 %v14792_v35, %v6165_v50  ;;  %v20290_v59 = vld [vmem:[#allocation96_spill] sm:$0xff] }
 0x2b6   :  { %20284 = vst [vmem:[#allocation116_spill] sm:$0xff] %v15271_v28  ;;  %v19441_v56 = vmax.f32 %v15271_v28, 0.0  ;;  %v5494_v26 = vmax.f32 %v5492_v2, %v5493_v14  ;;  %v15291_v60 = vadd.f32 %v14990_v40, %v3972_v23  ;;  %v15294_v9 = vadd.f32 %v14990_v40, %v4183_v55 }
 0x2b7   :  { %v20289_v32 = vmax.f32 %v20288_v54, 0.0  ;;  %v6210_v35 = vsel %vm5091_vm1, %v19440_v53, -inf  ;;  %v6167_v2 = vrot.slane %v6166_v31, 2  ;;  %v20291_v50 = vmax.f32 %v20290_v59, 0.0  ;;  %v20292_v54 = vld [vmem:[#allocation140_spill] sm:$0xff]  ;;  %v15325_v59 = vpop.f32.mrf.mxu0 }
 0x2b8   :  { %20286 = vst [vmem:[#allocation121_spill] sm:$0xff] %v15291_v60  ;;  %20287 = vst [vmem:[#allocation118_spill] sm:$0xff] %v15294_v9  ;;  %v5535_v34 = vsel %vm5091_vm1, %v19441_v56, -inf  ;;  %6608 = vrot.lane.b32.xlu0 %v5494_v26, %s9180_s10  ;;  %v19443_v14 = vmax.f32 %v15291_v60, 0.0  ;;  %v19442_v23 = vmax.f32 %v15294_v9, 0.0  ;;  %v20293_v53 = vmax.f32 %v20292_v54, 0.0  ;;  %v6583_v54 = vpop.permute.xlu1 %6582 }
 0x2b9   :  { %v7132_v42 = vsel %vm5091_vm1, %v20289_v32, %v6685_v38  ;;  %v7133_v55 = vsel %vm5091_vm1, %v20291_v50, %v6685_v38  ;;  %v6212_v32 = vmax.f32 %v6210_v35, %v15266_v8  ;;  %v20294_v50 = vld [vmem:[#allocation139_spill] sm:$0xff]  ;;  %v4182_v35 = vmul.f32 %v14939_v3, %v15046_v37  ;;  %v15351_v37 = vpop.f32.mrf.mxu1  ;;  %v20298_v9 = vld [vmem:[#allocation104_spill] sm:$0xff]  ;;  %v15368_v28 = vpop.f32.mrf.mxu0 }
 0x2ba   :  { %7549 = vst.msk [vmem:[%s18979_s4 + $0x880] sm:$0xff] %vm7276_vm2, %v7132_v42  ;;  %v7134_v56 = vsel %vm5091_vm1, %v20293_v53, %v6685_v38  ;;  %7550 = vst.msk [vmem:[%s18979_s4 + $0x888] sm:$0xff] %vm7276_vm2, %v7133_v55  ;;  %v6168_v42 = vmax.f32 %v6166_v31, %v6167_v2  ;;  %v20295_v26 = vmax.f32 %v20294_v50, 0.0  ;;  %v3975_v53 = vmul.f32 %v14939_v3, %v15031_v5 }
 0x2bb   :  { %7551 = vst.msk [vmem:[%s18979_s4 + $0x890] sm:$0xff] %vm7276_vm2, %v7134_v56  ;;  %v5534_v31 = vsel %vm5091_vm1, %v19443_v14, -inf  ;;  %v5502_v56 = vrot.slane %v14977_v1, 4  ;;  %v3974_v5 = vmul.f32 %v14939_v3, %v15069_v52  ;;  %v20299_v52 = vmax.f32 %v20298_v9, 0.0 }
 0x2bc   :  { %v7135_v8 = vsel %vm5091_vm1, %v20295_v26, %v6685_v38  ;;  %v6215_v38 = vsel %vm5091_vm1, %v19442_v23, -inf  ;;  %v6169_v2 = vrot.slane %v6168_v42, 1  ;;  %v5536_v55 = vmax.f32 %v5534_v31, %v5535_v34  ;;  %v20300_v31 = vld [vmem:[#allocation142_spill] sm:$0xff] }
 0x2bd   :  { %7552 = vst.msk [vmem:[%s18979_s4 + $0x898] sm:$0xff] %vm7276_vm2, %v7135_v8  ;;  %v15354_v50 = vadd.f32 %v14990_v40, %v3975_v53  ;;  %v15357_v26 = vadd.f32 %v14990_v40, %v4182_v35  ;;  %v5503_v23 = vmax.f32 %v14977_v1, %v5502_v56  ;;  %v15361_v14 = vadd.f32 %v14990_v40, %v3974_v5 }
 0x2be   :  { %v4185_v8 = vmul.f32 %v14939_v3, %v15098_v33  ;;  %v6928_v13 = vsel %vm5091_vm1, %v20299_v52, %v6583_v54  ;;  %v6170_v34 = vmax.f32 %v6168_v42, %v6169_v2  ;;  %v20301_v60 = vmax.f32 %v20300_v31, 0.0  ;;  %v20303_v42 = vld [vmem:[#allocation147_spill] sm:$0xff]  ;;  %v20305_v52 = vld [vmem:[#allocation106_spill] sm:$0xff] }
 0x2bf   :  { %20296 = vst [vmem:[#allocation117_spill] sm:$0xff] %v15354_v50  ;;  %20297 = vst [vmem:[#allocation123_spill] sm:$0xff] %v15357_v26  ;;  %v19448_v53 = vmax.f32 %v15354_v50, 0.0  ;;  %v19449_v35 = vmax.f32 %v15357_v26, 0.0  ;;  %v5504_v33 = vrot.slane %v5503_v23, 2  ;;  %v19450_v9 = vmax.f32 %v15361_v14, 0.0 }
 0x2c0   :  { %v6929_v1 = vsel %vm5091_vm1, %v20301_v60, %v6583_v54  ;;  %7345 = vst.msk [vmem:[%s18979_s4 + $0x220] sm:$0xff] %vm7276_vm2, %v6928_v13  ;;  %v15381_v56 = vadd.f32 %v14990_v40, %v4185_v8  ;;  %v20304_v5 = vmax.f32 %v20303_v42, 0.0  ;;  %v15390_v60 = vpop.f32.mrf.mxu1  ;;  %6712 = vrot.lane.b32.xlu0 %v6170_v34, %s9180_s10  ;;  %v20306_v31 = vmax.f32 %v20305_v52, 0.0 }
 0x2c1   :  { %7346 = vst.msk [vmem:[%s18979_s4 + $0x228] sm:$0xff] %vm7276_vm2, %v6929_v1  ;;  %v5539_v13 = vsel %vm5091_vm1, %v19448_v53, -inf  ;;  %v6213_v8 = vsel %vm5091_vm1, %v19449_v35, -inf  ;;  %v3977_v34 = vmul.f32 %v14939_v3, %v15117_v57  ;;  %v5537_v53 = vsel %vm5091_vm1, %v19450_v9, -inf }
 0x2c2   :  { %20302 = vst [vmem:[#allocation122_spill] sm:$0xff] %v15381_v56  ;;  %v6930_v2 = vsel %vm5091_vm1, %v20304_v5, %v6583_v54  ;;  %v6931_v42 = vsel %vm5091_vm1, %v20306_v31, %v6583_v54  ;;  %v6214_v1 = vmax.f32 %v6212_v32, %v6213_v8  ;;  %v5505_v5 = vmax.f32 %v5503_v23, %v5504_v33  ;;  %v15416_v54 = vpop.f32.mrf.mxu0  ;;  %v6687_v23 = vpop.permute.xlu1 %6686 }
 0x2c3   :  { %7347 = vst.msk [vmem:[%s18979_s4 + $0x230] sm:$0xff] %vm7276_vm2, %v6930_v2  ;;  %v19451_v35 = vmax.f32 %v15381_v56, 0.0  ;;  %7348 = vst.msk [vmem:[%s18979_s4 + $0x238] sm:$0xff] %vm7276_vm2, %v6931_v42  ;;  %v5538_v52 = vmax.f32 %v5536_v55, %v5537_v53  ;;  %v15419_v2 = vadd.f32 %v14990_v40, %v3977_v34  ;;  %v4184_v57 = vmul.f32 %v14939_v3, %v15130_v61  ;;  %v15431_v55 = vpop.f32.mrf.mxu1  ;;  %v20310_v56 = vld [vmem:[#allocation144_spill] sm:$0xff] }
 0x2c4   :  { %v6178_v32 = vrot.slane %v14948_v47, 4  ;;  %v15424_v33 = vmax.f32 %v6214_v1, %v6215_v38  ;;  %v5506_v8 = vrot.slane %v5505_v5, 1  ;;  %v3976_v42 = vmul.f32 %v14939_v3, %v15147_v36 }
 0x2c5   :  { %20307 = vst [vmem:[#allocation127_spill] sm:$0xff] %v15419_v2  ;;  %v6224_v31 = vsel %vm5091_vm1, %v19451_v35, -inf  ;;  %v15433_v53 = vmax.f32 %v5538_v52, %v5539_v13  ;;  %v19454_v34 = vmax.f32 %v15419_v2, 0.0  ;;  %v15437_v61 = vadd.f32 %v14990_v40, %v4184_v57  ;;  %v15448_v13 = vpop.f32.mrf.mxu0  ;;  %v20312_v57 = vld [vmem:[#allocation143_spill] sm:$0xff] }
 0x2c6   :  { %v6179_v38 = vmax.f32 %v14948_v47, %v6178_v32  ;;  %v5507_v1 = vmax.f32 %v5505_v5, %v5506_v8  ;;  %v15441_v9 = vadd.f32 %v14990_v40, %v3976_v42  ;;  %v4187_v35 = vmul.f32 %v14939_v3, %v15177_v30  ;;  %v20315_v42 = vld [vmem:[#allocation145_spill] sm:$0xff]  ;;  %v20317_v47 = vld [vmem:[#allocation107_spill] sm:$0xff] }
 0x2c7   :  { %20308 = vst [vmem:[#allocation125_spill] sm:$0xff] %v15437_v61  ;;  %v20311_v36 = vmax.f32 %v20310_v56, 0.0  ;;  %v15453_v52 = vsel %vm5091_vm1, %v19454_v34, -inf  ;;  %v20313_v32 = vmax.f32 %v20312_v57, 0.0  ;;  %v20318_v57 = vmax.f32 %v20317_v47, 0.0 }
 0x2c8   :  { %20309 = vst [vmem:[#allocation130_spill] sm:$0xff] %v15441_v9  ;;  %v6180_v5 = vrot.slane %v6179_v38, 2  ;;  %6610 = vrot.lane.b32.xlu1 %v5507_v1, %s9180_s10  ;;  %v15466_v56 = vadd.f32 %v14990_v40, %v4187_v35  ;;  %v20319_v1 = vmax.f32 %v15437_v61, 0.0  ;;  %v4186_v47 = vmul.f32 %v14939_v3, %v15216_v19 }
 0x2c9   :  { %v7136_v26 = vsel %vm5091_vm1, %v20311_v36, %v6687_v23  ;;  %v7137_v8 = vsel %vm5091_vm1, %v20313_v32, %v6687_v23  ;;  %v20316_v36 = vmax.f32 %v20315_v42, 0.0  ;;  %v7139_v32 = vsel %vm5091_vm1, %v20318_v57, %v6687_v23  ;;  %v15500_v57 = vpop.f32.mrf.mxu0 }
 0x2ca   :  { %7553 = vst.msk [vmem:[%s18979_s4 + $0x8a0] sm:$0xff] %vm7276_vm2, %v7136_v26  ;;  %20314 = vst [vmem:[#allocation84_spill] sm:$0xff] %v15466_v56  ;;  %v15478_v26 = vpop.f32.mrf.mxu1  ;;  %v6223_v35 = vsel %vm5091_vm1, %v20319_v1, -inf  ;;  %v6181_v30 = vmax.f32 %v6179_v38, %v6180_v5  ;;  %v20320_v42 = vmax.f32 %v15441_v9, 0.0  ;;  %v19459_v5 = vmax.f32 %v15466_v56, 0.0 }
 0x2cb   :  { %v7138_v34 = vsel %vm5091_vm1, %v20316_v36, %v6687_v23  ;;  %7554 = vst.msk [vmem:[%s18979_s4 + $0x8a8] sm:$0xff] %vm7276_vm2, %v7137_v8  ;;  %7556 = vst.msk [vmem:[%s18979_s4 + $0x8b8] sm:$0xff] %vm7276_vm2, %v7139_v32  ;;  %v3979_v23 = vmul.f32 %v14939_v3, %v15198_v43  ;;  %v6225_v8 = vmax.f32 %v6223_v35, %v6224_v31  ;;  %v6585_v36 = vpop.permute.xlu0 %6584 }
 0x2cc   :  { %7555 = vst.msk [vmem:[%s18979_s4 + $0x8b0] sm:$0xff] %vm7276_vm2, %v7138_v34  ;;  %v5547_v38 = vsel %vm5091_vm1, %v20320_v42, -inf  ;;  %v5515_v34 = vrot.slane %v15132_v58, 4  ;;  %v6182_v1 = vrot.slane %v6181_v30, 1  ;;  %v15507_v19 = vadd.f32 %v14990_v40, %v4186_v47  ;;  %v15517_v2 = vpop.f32.mrf.mxu1 }
 0x2cd   :  { %v5549_v32 = vmax.f32 %v5547_v38, %v15453_v52  ;;  %v15504_v43 = vadd.f32 %v14990_v40, %v3979_v23  ;;  %v6228_v31 = vsel %vm5091_vm1, %v19459_v5, -inf  ;;  %v3978_v42 = vmul.f32 %v14939_v3, %v15244_v4  ;;  %v20321_v38 = vld [vmem:[#allocation8_spill] sm:$0xff] }
 0x2ce   :  { %v5516_v35 = vmax.f32 %v15132_v58, %v5515_v34  ;;  %v4189_v61 = vmul.f32 %v14939_v3, %v15268_v11  ;;  %v6183_v52 = vmax.f32 %v6181_v30, %v6182_v1  ;;  %v19462_v47 = vmax.f32 %v15507_v19, 0.0  ;;  %v20324_v34 = vld [vmem:[#allocation4_spill] sm:$0xff]  ;;  %v15537_v30 = vpop.f32.mrf.mxu0 }
 0x2cf   :  { %v19461_v23 = vmax.f32 %v15504_v43, 0.0  ;;  %v20322_v9 = vmax.f32 %v20321_v38, 0.0  ;;  %v15525_v58 = vadd.f32 %v14990_v40, %v3978_v42  ;;  %v20325_v11 = vmax.f32 %v20324_v34, 0.0 }
 0x2d0   :  { %v5517_v5 = vrot.slane %v5516_v35, 2  ;;  %v15528_v4 = vadd.f32 %v14990_v40, %v4189_v61  ;;  %6714 = vrot.lane.b32.xlu1 %v6183_v52, %s9180_s10  ;;  %v6226_v61 = vsel %vm5091_vm1, %v19462_v47, -inf  ;;  %v20326_v1 = vmax.f32 %v12884_v7, 0.0 }
 0x2d1   :  { %v6932_v56 = vsel %vm5091_vm1, %v20322_v9, %v6585_v36  ;;  %v6933_v50 = vsel %vm5091_vm1, %v20325_v11, %v6585_v36  ;;  %v5552_v9 = vsel %vm5091_vm1, %v19461_v23, -inf  ;;  %v20327_v38 = vmax.f32 %v12826_v49, 0.0  ;;  %v15566_v49 = vpop.f32.mrf.mxu1 }
 0x2d2   :  { %20323 = vst [vmem:[#allocation126_spill] sm:$0xff] %v15528_v4  ;;  %7349 = vst.msk [vmem:[%s18979_s4 + $0x240] sm:$0xff] %vm7276_vm2, %v6932_v56  ;;  %v6934_v42 = vsel %vm5091_vm1, %v20326_v1, %v6585_v36  ;;  %v6227_v52 = vmax.f32 %v6225_v8, %v6226_v61  ;;  %v5518_v34 = vmax.f32 %v5516_v35, %v5517_v5  ;;  %v19464_v11 = vmax.f32 %v15525_v58, 0.0 }
 0x2d3   :  { %v6935_v56 = vsel %vm5091_vm1, %v20327_v38, %v6585_v36  ;;  %7350 = vst.msk [vmem:[%s18979_s4 + $0x248] sm:$0xff] %vm7276_vm2, %v6933_v50  ;;  %v19463_v23 = vmax.f32 %v15528_v4, 0.0  ;;  %7351 = vst.msk [vmem:[%s18979_s4 + $0x250] sm:$0xff] %vm7276_vm2, %v6934_v42  ;;  %v3981_v7 = vmul.f32 %v14939_v3, %v15283_v51  ;;  %v4188_v50 = vmul.f32 %v14939_v3, %v15299_v21  ;;  %v6689_v36 = vpop.permute.xlu0 %6688  ;;  %v15585_v42 = vpop.f32.mrf.mxu0 }
 0x2d4   :  { %7352 = vst.msk [vmem:[%s18979_s4 + $0x258] sm:$0xff] %vm7276_vm2, %v6935_v56  ;;  %v6191_v8 = vrot.slane %v15123_v15, 4  ;;  %v3980_v5 = vmul.f32 %v14939_v3, %v15325_v59  ;;  %v15575_v35 = vmax.f32 %v6227_v52, %v6228_v31  ;;  %v5519_v61 = vrot.slane %v5518_v34, 1 }
 0x2d5   :  { %v5550_v1 = vsel %vm5091_vm1, %v19464_v11, -inf  ;;  %v15583_v51 = vsel %vm5091_vm1, %v19463_v23, -inf  ;;  %v15588_v38 = vadd.f32 %v14990_v40, %v3981_v7  ;;  %v15591_v59 = vadd.f32 %v14990_v40, %v4188_v50  ;;  %v20330_v23 = vld [vmem:[#allocation2_spill] sm:$0xff] }
 0x2d6   :  { %v5551_v21 = vmax.f32 %v5549_v32, %v5550_v1  ;;  %v6192_v31 = vmax.f32 %v15123_v15, %v6191_v8  ;;  %v5520_v56 = vmax.f32 %v5518_v34, %v5519_v61  ;;  %v15595_v52 = vadd.f32 %v14990_v40, %v3980_v5  ;;  %v15602_v32 = vpop.f32.mrf.mxu1  ;;  %v20333_v34 = vld [vmem:[#allocation148_spill] sm:$0xff]  ;;  %v15623_v61 = vpop.f32.mrf.mxu0 }
 0x2d7   :  { %20328 = vst [vmem:[#allocation80_spill] sm:$0xff] %v15588_v38  ;;  %20329 = vst [vmem:[#allocation129_spill] sm:$0xff] %v15591_v59  ;;  %v4191_v47 = vmul.f32 %v14939_v3, %v15351_v37  ;;  %v20331_v11 = vmax.f32 %v20330_v23, 0.0  ;;  %v19467_v50 = vmax.f32 %v15588_v38, 0.0  ;;  %v19466_v1 = vmax.f32 %v15591_v59, 0.0 }
 0x2d8   :  { %v15604_v7 = vmax.f32 %v5551_v21, %v5552_v9  ;;  %v6193_v15 = vrot.slane %v6192_v31, 2  ;;  %6612 = vrot.lane.b32.xlu0 %v5520_v56, %s9180_s10  ;;  %v20334_v9 = vmax.f32 %v20333_v34, 0.0  ;;  %v20335_v8 = vmax.f32 %v12840_v25, 0.0  ;;  %v20336_v56 = vld [vmem:[#allocation6_spill] sm:$0xff] }
 0x2d9   :  { %v7140_v4 = vsel %vm5091_vm1, %v20331_v11, %v6689_v36  ;;  %v15615_v23 = vadd.f32 %v14990_v40, %v4191_v47  ;;  %v6236_v21 = vsel %vm5091_vm1, %v19466_v1, -inf  ;;  %v20337_v37 = vmax.f32 %v20336_v56, 0.0  ;;  %v15668_v1 = vpop.f32.mrf.mxu0 }
 0x2da   :  { %7557 = vst.msk [vmem:[%s18979_s4 + $0x8c0] sm:$0xff] %vm7276_vm2, %v7140_v4  ;;  %v7141_v11 = vsel %vm5091_vm1, %v20334_v9, %v6689_v36  ;;  %v7142_v5 = vsel %vm5091_vm1, %v20335_v8, %v6689_v36  ;;  %v5561_v4 = vsel %vm5091_vm1, %v19467_v50, -inf  ;;  %v6194_v47 = vmax.f32 %v6192_v31, %v6193_v15  ;;  %v20340_v50 = vld [vmem:[#allocation119_spill] sm:$0xff] }
 0x2db   :  { %20332 = vst [vmem:[#allocation128_spill] sm:$0xff] %v15615_v23  ;;  %v7143_v34 = vsel %vm5091_vm1, %v20337_v37, %v6689_v36  ;;  %7558 = vst.msk [vmem:[%s18979_s4 + $0x8c8] sm:$0xff] %vm7276_vm2, %v7141_v11  ;;  %v6238_v25 = vmax.f32 %v6236_v21, %v15583_v51  ;;  %v20338_v9 = vmax.f32 %v15595_v52, 0.0  ;;  %v19469_v15 = vmax.f32 %v15615_v23, 0.0  ;;  %v6587_v37 = vpop.permute.xlu1 %6586  ;;  %v15653_v11 = vpop.f32.mrf.mxu1 }
 0x2dc   :  { %7559 = vst.msk [vmem:[%s18979_s4 + $0x8d0] sm:$0xff] %vm7276_vm2, %v7142_v5  ;;  %7560 = vst.msk [vmem:[%s18979_s4 + $0x8d8] sm:$0xff] %vm7276_vm2, %v7143_v34  ;;  %v3983_v36 = vmul.f32 %v14939_v3, %v15368_v28  ;;  %v6195_v8 = vrot.slane %v6194_v47, 1  ;;  %v4190_v51 = vmul.f32 %v14939_v3, %v15390_v60  ;;  %v5528_v21 = vrot.slane %v15285_v48, 4 }
 0x2dd   :  { %v5560_v31 = vsel %vm5091_vm1, %v20338_v9, -inf  ;;  %v6241_v56 = vsel %vm5091_vm1, %v19469_v15, -inf  ;;  %v3982_v28 = vmul.f32 %v14939_v3, %v15416_v54  ;;  %v4193_v34 = vmul.f32 %v14939_v3, %v15431_v55  ;;  %v20343_v55 = vld [vmem:[#allocation9_spill] sm:$0xff] }
 0x2de   :  { %v5562_v5 = vmax.f32 %v5560_v31, %v5561_v4  ;;  %v15662_v9 = vadd.f32 %v14990_v40, %v3983_v36  ;;  %v6196_v4 = vmax.f32 %v6194_v47, %v6195_v8  ;;  %v15671_v60 = vadd.f32 %v14990_v40, %v4190_v51 }
 0x2df   :  { %v5529_v31 = vmax.f32 %v15285_v48, %v5528_v21  ;;  %v20341_v23 = vmax.f32 %v20340_v50, 0.0  ;;  %v15679_v59 = vadd.f32 %v14990_v40, %v3982_v28  ;;  %v15682_v54 = vadd.f32 %v14990_v40, %v4193_v34  ;;  %v15691_v48 = vpop.f32.mrf.mxu1  ;;  %v20346_v21 = vld [vmem:[#allocation13_spill] sm:$0xff] }
 0x2e0   :  { %20339 = vst [vmem:[#allocation133_spill] sm:$0xff] %v15671_v60  ;;  %v19473_v36 = vmax.f32 %v15662_v9, 0.0  ;;  %v20344_v38 = vmax.f32 %v20343_v55, 0.0  ;;  %6716 = vrot.lane.b32.xlu0 %v6196_v4, %s9180_s10  ;;  %v19472_v50 = vmax.f32 %v15671_v60, 0.0  ;;  %v20345_v8 = vmax.f32 %v13031_v39, 0.0 }
 0x2e1   :  { %v6936_v15 = vsel %vm5091_vm1, %v20341_v23, %v6587_v37  ;;  %20342 = vst [vmem:[#allocation87_spill] sm:$0xff] %v15682_v54  ;;  %v5530_v23 = vrot.slane %v5529_v31, 2  ;;  %v20347_v28 = vmax.f32 %v20346_v21, 0.0  ;;  %v19474_v34 = vmax.f32 %v15679_v59, 0.0 }
 0x2e2   :  { %v6937_v47 = vsel %vm5091_vm1, %v20344_v38, %v6587_v37  ;;  %7353 = vst.msk [vmem:[%s18979_s4 + $0x260] sm:$0xff] %vm7276_vm2, %v6936_v15  ;;  %v6938_v51 = vsel %vm5091_vm1, %v20345_v8, %v6587_v37  ;;  %v5565_v15 = vsel %vm5091_vm1, %v19473_v36, -inf  ;;  %v19475_v4 = vmax.f32 %v15682_v54, 0.0 }
 0x2e3   :  { %v6939_v38 = vsel %vm5091_vm1, %v20347_v28, %v6587_v37  ;;  %7354 = vst.msk [vmem:[%s18979_s4 + $0x268] sm:$0xff] %vm7276_vm2, %v6937_v47  ;;  %7355 = vst.msk [vmem:[%s18979_s4 + $0x270] sm:$0xff] %vm7276_vm2, %v6938_v51  ;;  %v3985_v39 = vmul.f32 %v14939_v3, %v15448_v13  ;;  %v15720_v37 = vpop.f32.mrf.mxu0  ;;  %v6239_v55 = vsel %vm5091_vm1, %v19472_v50, -inf  ;;  %v5531_v47 = vmax.f32 %v5529_v31, %v5530_v23  ;;  %v15739_v50 = vpop.f32.mrf.mxu1 }
 0x2e4   :  { %7356 = vst.msk [vmem:[%s18979_s4 + $0x278] sm:$0xff] %vm7276_vm2, %v6939_v38  ;;  %v4192_v8 = vmul.f32 %v14939_v3, %v15478_v26  ;;  %v6204_v51 = vrot.slane %v15277_v44, 4  ;;  %v6240_v21 = vmax.f32 %v6238_v25, %v6239_v55  ;;  %v5563_v28 = vsel %vm5091_vm1, %v19474_v34, -inf  ;;  %v6691_v55 = vpop.permute.xlu1 %6690 }
 0x2e5   :  { %v15734_v13 = vsel %vm5091_vm1, %v19475_v4, -inf  ;;  %v15737_v38 = vadd.f32 %v14990_v40, %v3985_v39  ;;  %v5532_v31 = vrot.slane %v5531_v47, 1  ;;  %v5564_v23 = vmax.f32 %v5562_v5, %v5563_v28  ;;  %v15752_v54 = vpop.f32.mrf.mxu0 }
 0x2e6   :  { %v15742_v26 = vadd.f32 %v14990_v40, %v4192_v8  ;;  %v6205_v25 = vmax.f32 %v15277_v44, %v6204_v51  ;;  %v15745_v36 = vmax.f32 %v6240_v21, %v6241_v56  ;;  %v3984_v4 = vmul.f32 %v14939_v3, %v15500_v57  ;;  %v20350_v51 = vld [vmem:[#allocation7_spill] sm:$0xff] }
 0x2e7   :  { %20348 = vst [vmem:[#allocation136_spill] sm:$0xff] %v15737_v38  ;;  %v19478_v34 = vmax.f32 %v15737_v38, 0.0  ;;  %v4195_v39 = vmul.f32 %v14939_v3, %v15517_v2  ;;  %v5533_v60 = vmax.f32 %v5531_v47, %v5532_v31  ;;  %v15754_v5 = vmax.f32 %v5564_v23, %v5565_v15  ;;  %v15769_v47 = vpop.f32.mrf.mxu1  ;;  %v20352_v23 = vld [vmem:[#allocation3_spill] sm:$0xff] }
 0x2e8   :  { %v19480_v8 = vmax.f32 %v15742_v26, 0.0  ;;  %v6206_v28 = vrot.slane %v6205_v25, 2  ;;  %v15761_v56 = vadd.f32 %v14990_v40, %v3984_v4  ;;  %v20351_v2 = vmax.f32 %v20350_v51, 0.0 }
 0x2e9   :  { %v5574_v44 = vsel %vm5091_vm1, %v19478_v34, -inf  ;;  %v15764_v57 = vadd.f32 %v14990_v40, %v4195_v39  ;;  %6614 = vrot.lane.b32.xlu1 %v5533_v60, %s9180_s10  ;;  %v20353_v34 = vmax.f32 %v20352_v23, 0.0  ;;  %v20354_v39 = vmax.f32 %v13013_v12, 0.0  ;;  %v15799_v12 = vpop.f32.mrf.mxu0 }
 0x2ea   :  { %v7144_v21 = vsel %vm5091_vm1, %v20351_v2, %v6691_v55  ;;  %v6249_v15 = vsel %vm5091_vm1, %v19480_v8, -inf  ;;  %v6207_v31 = vmax.f32 %v6205_v25, %v6206_v28  ;;  %v19481_v51 = vmax.f32 %v15761_v56, 0.0  ;;  %v20355_v25 = vld [vmem:[#allocation11_spill] sm:$0xff] }
 0x2eb   :  { %20349 = vst [vmem:[#allocation90_spill] sm:$0xff] %v15764_v57  ;;  %v7145_v4 = vsel %vm5091_vm1, %v20353_v34, %v6691_v55  ;;  %v7146_v38 = vsel %vm5091_vm1, %v20354_v39, %v6691_v55  ;;  %7561 = vst.msk [vmem:[%s18979_s4 + $0x8e0] sm:$0xff] %vm7276_vm2, %v7144_v21  ;;  %v6251_v60 = vmax.f32 %v6249_v15, %v15734_v13  ;;  %v19482_v2 = vmax.f32 %v15764_v57, 0.0  ;;  %v6589_v15 = vpop.permute.xlu0 %6588 }
 0x2ec   :  { %v20356_v28 = vmax.f32 %v20355_v25, 0.0  ;;  %7562 = vst.msk [vmem:[%s18979_s4 + $0x8e8] sm:$0xff] %vm7276_vm2, %v7145_v4  ;;  %7563 = vst.msk [vmem:[%s18979_s4 + $0x8f0] sm:$0xff] %vm7276_vm2, %v7146_v38  ;;  %v6208_v34 = vrot.slane %v6207_v31, 1  ;;  %v3987_v13 = vmul.f32 %v14939_v3, %v15537_v30  ;;  %v5541_v21 = vrot.slane %v15433_v53, 4  ;;  %v15820_v25 = vpop.f32.mrf.mxu1 }
 0x2ed   :  { %v5573_v38 = vsel %vm5091_vm1, %v19481_v51, -inf  ;;  %v6254_v4 = vsel %vm5091_vm1, %v19482_v2, -inf  ;;  %v3986_v39 = vmul.f32 %v14939_v3, %v15585_v42  ;;  %v4197_v30 = vmul.f32 %v14939_v3, %v15602_v32 }
 0x2ee   :  { %v7147_v23 = vsel %vm5091_vm1, %v20356_v28, %v6691_v55  ;;  %v4194_v55 = vmul.f32 %v14939_v3, %v15566_v49  ;;  %v6209_v49 = vmax.f32 %v6207_v31, %v6208_v34  ;;  %v5575_v28 = vmax.f32 %v5573_v38, %v5574_v44  ;;  %v15838_v31 = vpop.f32.mrf.mxu0 }
 0x2ef   :  { %7564 = vst.msk [vmem:[%s18979_s4 + $0x8f8] sm:$0xff] %vm7276_vm2, %v7147_v23  ;;  %v15823_v23 = vadd.f32 %v14990_v40, %v3987_v13  ;;  %v5542_v51 = vmax.f32 %v15433_v53, %v5541_v21  ;;  %v15830_v2 = vadd.f32 %v14990_v40, %v3986_v39  ;;  %v15833_v42 = vadd.f32 %v14990_v40, %v4197_v30 }
 0x2f0   :  { %v15826_v8 = vadd.f32 %v14990_v40, %v4194_v55  ;;  %v20358_v32 = vmax.f32 %v13130_v6, 0.0  ;;  %6718 = vrot.lane.b32.xlu1 %v6209_v49, %s9180_s10  ;;  %v20359_v53 = vmax.f32 %v13121_v0, 0.0  ;;  %v20360_v55 = vmax.f32 %v13185_v27, 0.0  ;;  %v15866_v27 = vpop.f32.mrf.mxu1 }
 0x2f1   :  { %20357 = vst [vmem:[#allocation132_spill] sm:$0xff] %v15833_v42  ;;  %v19486_v44 = vmax.f32 %v15823_v23, 0.0  ;;  %v5543_v6 = vrot.slane %v5542_v51, 2  ;;  %v19487_v38 = vmax.f32 %v15830_v2, 0.0  ;;  %v19484_v39 = vmax.f32 %v15833_v42, 0.0 }
 0x2f2   :  { %v6940_v57 = vsel %vm5091_vm1, %v20358_v32, %v6589_v15  ;;  %v19485_v34 = vmax.f32 %v15826_v8, 0.0  ;;  %v6941_v13 = vsel %vm5091_vm1, %v20359_v53, %v6589_v15  ;;  %v6942_v21 = vsel %vm5091_vm1, %v20360_v55, %v6589_v15 }
 0x2f3   :  { %7357 = vst.msk [vmem:[%s18979_s4 + $0x280] sm:$0xff] %vm7276_vm2, %v6940_v57  ;;  %v20361_v30 = vmax.f32 %v13133_v29, 0.0  ;;  %7358 = vst.msk [vmem:[%s18979_s4 + $0x288] sm:$0xff] %vm7276_vm2, %v6941_v13  ;;  %v5578_v57 = vsel %vm5091_vm1, %v19486_v44, -inf  ;;  %v4196_v49 = vmul.f32 %v14939_v3, %v15653_v11  ;;  %v5544_v53 = vmax.f32 %v5542_v51, %v5543_v6 }
 0x2f4   :  { %7359 = vst.msk [vmem:[%s18979_s4 + $0x290] sm:$0xff] %vm7276_vm2, %v6942_v21  ;;  %v6252_v29 = vsel %vm5091_vm1, %v19485_v34, -inf  ;;  %v5576_v13 = vsel %vm5091_vm1, %v19487_v38, -inf  ;;  %v15888_v55 = vsel %vm5091_vm1, %v19484_v39, -inf  ;;  %v15890_v21 = vpop.f32.mrf.mxu0  ;;  %v6217_v11 = vrot.slane %v15424_v33, 4  ;;  %v15905_v34 = vpop.f32.mrf.mxu1 }
 0x2f5   :  { %v6943_v0 = vsel %vm5091_vm1, %v20361_v30, %v6589_v15  ;;  %v3989_v15 = vmul.f32 %v14939_v3, %v15623_v61  ;;  %v6253_v32 = vmax.f32 %v6251_v60, %v6252_v29  ;;  %v5577_v30 = vmax.f32 %v5575_v28, %v5576_v13  ;;  %v6693_v60 = vpop.permute.xlu0 %6692 }
 0x2f6   :  { %7360 = vst.msk [vmem:[%s18979_s4 + $0x298] sm:$0xff] %vm7276_vm2, %v6943_v0  ;;  %v15896_v61 = vadd.f32 %v14990_v40, %v4196_v49  ;;  %v5545_v6 = vrot.slane %v5544_v53, 1  ;;  %v3988_v29 = vmul.f32 %v14939_v3, %v15668_v1  ;;  %v4199_v39 = vmul.f32 %v14939_v3, %v15691_v48  ;;  %v15921_v38 = vpop.f32.mrf.mxu0 }
 0x2f7   :  { %v15893_v0 = vadd.f32 %v14990_v40, %v3989_v15  ;;  %v15899_v51 = vmax.f32 %v6253_v32, %v6254_v4  ;;  %v15907_v28 = vmax.f32 %v5577_v30, %v5578_v57  ;;  %v6218_v13 = vmax.f32 %v15424_v33, %v6217_v11 }
 0x2f8   :  { %v19489_v49 = vmax.f32 %v15896_v61, 0.0  ;;  %v5546_v44 = vmax.f32 %v5544_v53, %v5545_v6  ;;  %v15913_v4 = vadd.f32 %v14990_v40, %v3988_v29  ;;  %v15916_v32 = vadd.f32 %v14990_v40, %v4199_v39 }
 0x2f9   :  { %v19490_v15 = vmax.f32 %v15893_v0, 0.0  ;;  %v20363_v1 = vmax.f32 %v13124_v17, 0.0  ;;  %v6219_v53 = vrot.slane %v6218_v13, 2  ;;  %v20364_v30 = vmax.f32 %v13034_v62, 0.0  ;;  %v15947_v62 = vpop.f32.mrf.mxu1 }
 0x2fa   :  { %20362 = vst [vmem:[#allocation131_spill] sm:$0xff] %v15916_v32  ;;  %v6262_v33 = vsel %vm5091_vm1, %v19489_v49, -inf  ;;  %6616 = vrot.lane.b32.xlu0 %v5546_v44, %s9180_s10  ;;  %v19491_v11 = vmax.f32 %v15913_v4, 0.0  ;;  %v19488_v6 = vmax.f32 %v15916_v32, 0.0  ;;  %v20365_v29 = vmax.f32 %v13141_v22, 0.0 }
 0x2fb   :  { %v7148_v48 = vsel %vm5091_vm1, %v20363_v1, %v6693_v60  ;;  %v5587_v57 = vsel %vm5091_vm1, %v19490_v15, -inf  ;;  %v7149_v39 = vsel %vm5091_vm1, %v20364_v30, %v6693_v60  ;;  %v6264_v17 = vmax.f32 %v6262_v33, %v15888_v55  ;;  %v20366_v30 = vld [vmem:[#allocation17_spill] sm:$0xff] }
 0x2fc   :  { %7565 = vst.msk [vmem:[%s18979_s4 + $0x900] sm:$0xff] %vm7276_vm2, %v7148_v48  ;;  %v7150_v1 = vsel %vm5091_vm1, %v20365_v29, %v6693_v60  ;;  %7566 = vst.msk [vmem:[%s18979_s4 + $0x908] sm:$0xff] %vm7276_vm2, %v7149_v39  ;;  %v6220_v48 = vmax.f32 %v6218_v13, %v6219_v53  ;;  %v20367_v44 = vmax.f32 %v20366_v30, 0.0  ;;  %v3991_v22 = vmul.f32 %v14939_v3, %v15720_v37  ;;  %v6591_v29 = vpop.permute.xlu1 %6590 }
 0x2fd   :  { %7567 = vst.msk [vmem:[%s18979_s4 + $0x910] sm:$0xff] %vm7276_vm2, %v7150_v1  ;;  %v4198_v33 = vmul.f32 %v14939_v3, %v15739_v50  ;;  %v5586_v13 = vsel %vm5091_vm1, %v19491_v11, -inf  ;;  %v5554_v53 = vrot.slane %v15604_v7, 4  ;;  %v3990_v37 = vmul.f32 %v14939_v3, %v15752_v54  ;;  %v15973_v50 = vpop.f32.mrf.mxu0 }
 0x2fe   :  { %v7151_v55 = vsel %vm5091_vm1, %v20367_v44, %v6693_v60  ;;  %v6267_v60 = vsel %vm5091_vm1, %v19488_v6, -inf  ;;  %v6221_v39 = vrot.slane %v6220_v48, 1  ;;  %v5588_v1 = vmax.f32 %v5586_v13, %v5587_v57 }
 0x2ff   :  { %7568 = vst.msk [vmem:[%s18979_s4 + $0x918] sm:$0xff] %vm7276_vm2, %v7151_v55  ;;  %v15976_v30 = vadd.f32 %v14990_v40, %v3991_v22  ;;  %v15979_v44 = vadd.f32 %v14990_v40, %v4198_v33  ;;  %v5555_v6 = vmax.f32 %v15604_v7, %v5554_v53  ;;  %v15983_v49 = vadd.f32 %v14990_v40, %v3990_v37  ;;  %v15988_v55 = vld [vmem:[%s18977_s2] ss:$0 sm:$0xff]  ;;  %v15995_v22 = vpop.f32.mrf.mxu1  ;;  %v20370_v53 = vld [vmem:[#allocation12_spill] sm:$0xff] }
 0x300   :  { %v4201_v3 = vmul.f32 %v15988_v55, %v15769_v47  ;;  %v20369_v54 = vmax.f32 %v13241_v20, 0.0  ;;  %v6222_v33 = vmax.f32 %v6220_v48, %v6221_v39  ;;  %v20371_v37 = vmax.f32 %v20370_v53, 0.0  ;;  %v20373_v48 = vld [vmem:[#allocation19_spill] sm:$0xff]  ;;  %v16017_v53 = vpop.f32.mrf.mxu0 }
 0x301   :  { %20368 = vst [vmem:[#allocation135_spill] sm:$0xff] %v15979_v44  ;;  %v19492_v7 = vmax.f32 %v15976_v30, 0.0  ;;  %v19493_v13 = vmax.f32 %v15979_v44, 0.0  ;;  %v5556_v47 = vrot.slane %v5555_v6, 2  ;;  %v19494_v20 = vmax.f32 %v15983_v49, 0.0 }
 0x302   :  { %v6944_v57 = vsel %vm5091_vm1, %v20369_v54, %v6591_v29  ;;  %v6945_v15 = vsel %vm5091_vm1, %v20371_v37, %v6591_v29  ;;  %v16008_v54 = vadd.f32 %v14990_v40, %v4201_v3  ;;  %v20374_v39 = vmax.f32 %v20373_v48, 0.0  ;;  %6720 = vrot.lane.b32.xlu0 %v6222_v33, %s9180_s10  ;;  %v20375_v3 = vld [vmem:[#allocation14_spill] sm:$0xff] }
 0x303   :  { %7361 = vst.msk [vmem:[%s18979_s4 + $0x2a0] sm:$0xff] %vm7276_vm2, %v6944_v57  ;;  %7362 = vst.msk [vmem:[%s18979_s4 + $0x2a8] sm:$0xff] %vm7276_vm2, %v6945_v15  ;;  %v5591_v57 = vsel %vm5091_vm1, %v19492_v7, -inf  ;;  %v6265_v40 = vsel %vm5091_vm1, %v19493_v13, -inf  ;;  %v20376_v37 = vmax.f32 %v20375_v3, 0.0  ;;  %v3993_v15 = vmul.f32 %v15988_v55, %v15799_v12 }
 0x304   :  { %20372 = vst [vmem:[#allocation134_spill] sm:$0xff] %v16008_v54  ;;  %v6946_v11 = vsel %vm5091_vm1, %v20374_v39, %v6591_v29  ;;  %v6266_v33 = vmax.f32 %v6264_v17, %v6265_v40  ;;  %v5557_v39 = vmax.f32 %v5555_v6, %v5556_v47  ;;  %v5589_v7 = vsel %vm5091_vm1, %v19494_v20, -inf  ;;  %v16048_v12 = vld [vmem:[%s18978_s3] ss:$0 sm:$0xff]  ;;  %v6695_v47 = vpop.permute.xlu1 %6694 }
 0x305   :  { %v6947_v48 = vsel %vm5091_vm1, %v20376_v37, %v6591_v29  ;;  %7363 = vst.msk [vmem:[%s18979_s4 + $0x2b0] sm:$0xff] %vm7276_vm2, %v6946_v11  ;;  %v19496_v13 = vmax.f32 %v16008_v54, 0.0  ;;  %v16043_v29 = vpop.f32.mrf.mxu1  ;;  %v5590_v3 = vmax.f32 %v5588_v1, %v5589_v7  ;;  %v16051_v17 = vadd.f32 %v16048_v12, %v3993_v15  ;;  %v20380_v54 = vld [vmem:[#allocation10_spill] sm:$0xff] }
 0x306   :  { %7364 = vst.msk [vmem:[%s18979_s4 + $0x2b8] sm:$0xff] %vm7276_vm2, %v6947_v48  ;;  %v4200_v11 = vmul.f32 %v15988_v55, %v15820_v25  ;;  %v6230_v6 = vrot.slane %v15575_v35, 4  ;;  %v16056_v40 = vmax.f32 %v6266_v33, %v6267_v60  ;;  %v5558_v37 = vrot.slane %v5557_v39, 1  ;;  %v16063_v48 = vpop.f32.mrf.mxu0 }
 0x307   :  { %20377 = vst [vmem:[#allocation98_spill] sm:$0xff] %v16051_v17  ;;  %v6276_v1 = vsel %vm5091_vm1, %v19496_v13, -inf  ;;  %v3992_v7 = vmul.f32 %v15988_v55, %v15838_v31  ;;  %v16065_v15 = vmax.f32 %v5590_v3, %v5591_v57  ;;  %v19499_v20 = vmax.f32 %v16051_v17, 0.0  ;;  %v16080_v57 = vpop.f32.mrf.mxu1 }
 0x308   :  { %v16069_v25 = vadd.f32 %v16048_v12, %v4200_v11  ;;  %v6231_v60 = vmax.f32 %v15575_v35, %v6230_v6  ;;  %v5559_v33 = vmax.f32 %v5557_v39, %v5558_v37  ;;  %v4203_v13 = vmul.f32 %v15988_v55, %v15866_v27  ;;  %v20382_v11 = vld [vmem:[#allocation15_spill] sm:$0xff]  ;;  %v20387_v35 = vld [vmem:[#allocation16_spill] sm:$0xff] }
 0x309   :  { %v16073_v32 = vadd.f32 %v16048_v12, %v3992_v7  ;;  %v20381_v31 = vmax.f32 %v20380_v54, 0.0  ;;  %v16085_v3 = vsel %vm5091_vm1, %v19499_v20, -inf  ;;  %v20383_v6 = vmax.f32 %v20382_v11, 0.0  ;;  %v20385_v7 = vld [vmem:[#allocation21_spill] sm:$0xff] }
 0x30a   :  { %20378 = vst [vmem:[#allocation95_spill] sm:$0xff] %v16069_v25  ;;  %v6232_v39 = vrot.slane %v6231_v60, 2  ;;  %6618 = vrot.lane.b32.xlu1 %v5559_v33, %s9180_s10  ;;  %v16098_v54 = vadd.f32 %v16048_v12, %v4203_v13  ;;  %v20388_v11 = vmax.f32 %v20387_v35, 0.0  ;;  %v20389_v33 = vmax.f32 %v16069_v25, 0.0 }
 0x30b   :  { %20379 = vst [vmem:[#allocation141_spill] sm:$0xff] %v16073_v32  ;;  %v7152_v44 = vsel %vm5091_vm1, %v20381_v31, %v6695_v47  ;;  %v7153_v37 = vsel %vm5091_vm1, %v20383_v6, %v6695_v47  ;;  %v20386_v31 = vmax.f32 %v20385_v7, 0.0  ;;  %v4202_v35 = vmul.f32 %v15988_v55, %v15905_v34 }
 0x30c   :  { %7569 = vst.msk [vmem:[%s18979_s4 + $0x920] sm:$0xff] %vm7276_vm2, %v7152_v44  ;;  %20384 = vst [vmem:[#allocation138_spill] sm:$0xff] %v16098_v54  ;;  %v7155_v6 = vsel %vm5091_vm1, %v20388_v11, %v6695_v47  ;;  %v16110_v44 = vpop.f32.mrf.mxu0  ;;  %v6275_v13 = vsel %vm5091_vm1, %v20389_v33, -inf  ;;  %v6233_v27 = vmax.f32 %v6231_v60, %v6232_v39  ;;  %v20390_v7 = vmax.f32 %v16073_v32, 0.0  ;;  %v16132_v11 = vpop.f32.mrf.mxu1 }
 0x30d   :  { %v7154_v20 = vsel %vm5091_vm1, %v20386_v31, %v6695_v47  ;;  %7570 = vst.msk [vmem:[%s18979_s4 + $0x928] sm:$0xff] %vm7276_vm2, %v7153_v37  ;;  %7572 = vst.msk [vmem:[%s18979_s4 + $0x938] sm:$0xff] %vm7276_vm2, %v7155_v6  ;;  %v3995_v47 = vmul.f32 %v15988_v55, %v15890_v21  ;;  %v6277_v37 = vmax.f32 %v6275_v13, %v6276_v1  ;;  %v19504_v39 = vmax.f32 %v16098_v54, 0.0  ;;  %v6593_v31 = vpop.permute.xlu0 %6592 }
 0x30e   :  { %7571 = vst.msk [vmem:[%s18979_s4 + $0x930] sm:$0xff] %vm7276_vm2, %v7154_v20  ;;  %v5599_v60 = vsel %vm5091_vm1, %v20390_v7, -inf  ;;  %v5567_v20 = vrot.slane %v15754_v5, 4  ;;  %v6234_v33 = vrot.slane %v6233_v27, 1  ;;  %v16139_v34 = vadd.f32 %v16048_v12, %v4202_v35  ;;  %v16149_v17 = vpop.f32.mrf.mxu0 }
 0x30f   :  { %v5601_v6 = vmax.f32 %v5599_v60, %v16085_v3  ;;  %v16136_v21 = vadd.f32 %v16048_v12, %v3995_v47  ;;  %v6280_v1 = vsel %vm5091_vm1, %v19504_v39, -inf  ;;  %v3994_v7 = vmul.f32 %v15988_v55, %v15921_v38  ;;  %v20393_v60 = vld [vmem:[#allocation18_spill] sm:$0xff] }
 0x310   :  { %20392 = vst [vmem:[#allocation96_spill] sm:$0xff] %v16139_v34  ;;  %v5568_v13 = vmax.f32 %v15754_v5, %v5567_v20  ;;  %v4205_v25 = vmul.f32 %v15988_v55, %v15947_v62  ;;  %v6235_v3 = vmax.f32 %v6233_v27, %v6234_v33  ;;  %v19509_v35 = vmax.f32 %v16139_v34, 0.0  ;;  %v20397_v20 = vld [vmem:[#allocation23_spill] sm:$0xff]  ;;  %v16169_v27 = vpop.f32.mrf.mxu1  ;;  %v20399_v33 = vld [vmem:[#allocation26_spill] sm:$0xff] }
 0x311   :  { %20391 = vst [vmem:[#allocation137_spill] sm:$0xff] %v16136_v21  ;;  %v19507_v47 = vmax.f32 %v16136_v21, 0.0  ;;  %v20394_v32 = vmax.f32 %v20393_v60, 0.0  ;;  %v16157_v5 = vadd.f32 %v16048_v12, %v3994_v7  ;;  %v20398_v62 = vmax.f32 %v20397_v20, 0.0  ;;  %v20401_v20 = vld [vmem:[#allocation22_spill] sm:$0xff] }
 0x312   :  { %v5569_v39 = vrot.slane %v5568_v13, 2  ;;  %v16160_v38 = vadd.f32 %v16048_v12, %v4205_v25  ;;  %6722 = vrot.lane.b32.xlu1 %v6235_v3, %s9180_s10  ;;  %v6278_v25 = vsel %vm5091_vm1, %v19509_v35, -inf  ;;  %v20400_v7 = vmax.f32 %v20399_v33, 0.0 }
 0x313   :  { %v6948_v54 = vsel %vm5091_vm1, %v20394_v32, %v6593_v31  ;;  %20395 = vst [vmem:[#allocation140_spill] sm:$0xff] %v16157_v5  ;;  %v6949_v42 = vsel %vm5091_vm1, %v20398_v62, %v6593_v31  ;;  %v5604_v32 = vsel %vm5091_vm1, %v19507_v47, -inf  ;;  %v20402_v62 = vmax.f32 %v20401_v20, 0.0  ;;  %v16217_v20 = vpop.f32.mrf.mxu1 }
 0x314   :  { %20396 = vst [vmem:[#allocation139_spill] sm:$0xff] %v16160_v38  ;;  %7365 = vst.msk [vmem:[%s18979_s4 + $0x2c0] sm:$0xff] %vm7276_vm2, %v6948_v54  ;;  %v6950_v60 = vsel %vm5091_vm1, %v20400_v7, %v6593_v31  ;;  %v6279_v3 = vmax.f32 %v6277_v37, %v6278_v25  ;;  %v5570_v21 = vmax.f32 %v5568_v13, %v5569_v39  ;;  %v19511_v47 = vmax.f32 %v16157_v5, 0.0  ;;  %v6697_v25 = vpop.permute.xlu0 %6696 }
 0x315   :  { %v6951_v54 = vsel %vm5091_vm1, %v20402_v62, %v6593_v31  ;;  %7366 = vst.msk [vmem:[%s18979_s4 + $0x2c8] sm:$0xff] %vm7276_vm2, %v6949_v42  ;;  %v19510_v34 = vmax.f32 %v16160_v38, 0.0  ;;  %7367 = vst.msk [vmem:[%s18979_s4 + $0x2d0] sm:$0xff] %vm7276_vm2, %v6950_v60  ;;  %v16198_v31 = vpop.f32.mrf.mxu0  ;;  %v3997_v42 = vmul.f32 %v15988_v55, %v15973_v50  ;;  %v4204_v37 = vmul.f32 %v15988_v55, %v15995_v22 }
 0x316   :  { %7368 = vst.msk [vmem:[%s18979_s4 + $0x2d8] sm:$0xff] %vm7276_vm2, %v6951_v54  ;;  %v6243_v39 = vrot.slane %v15745_v36, 4  ;;  %v3996_v13 = vmul.f32 %v15988_v55, %v16017_v53  ;;  %v16207_v33 = vmax.f32 %v6279_v3, %v6280_v1  ;;  %v5571_v7 = vrot.slane %v5570_v21, 1 }
 0x317   :  { %v5602_v60 = vsel %vm5091_vm1, %v19511_v47, -inf  ;;  %v16215_v50 = vsel %vm5091_vm1, %v19510_v34, -inf  ;;  %v16220_v62 = vadd.f32 %v16048_v12, %v3997_v42  ;;  %v16223_v53 = vadd.f32 %v16048_v12, %v4204_v37  ;;  %v20405_v34 = vld [vmem:[#allocation20_spill] sm:$0xff] }
 0x318   :  { %v5603_v22 = vmax.f32 %v5601_v6, %v5602_v60  ;;  %v6244_v1 = vmax.f32 %v15745_v36, %v6243_v39  ;;  %v5572_v54 = vmax.f32 %v5570_v21, %v5571_v7  ;;  %v16227_v3 = vadd.f32 %v16048_v12, %v3996_v13  ;;  %v16234_v6 = vpop.f32.mrf.mxu0  ;;  %v20410_v39 = vld [vmem:[#allocation28_spill] sm:$0xff] }
 0x319   :  { %20403 = vst [vmem:[#allocation104_spill] sm:$0xff] %v16220_v62  ;;  %20404 = vst [vmem:[#allocation142_spill] sm:$0xff] %v16223_v53  ;;  %v4207_v35 = vmul.f32 %v15988_v55, %v16043_v29  ;;  %v20406_v47 = vmax.f32 %v20405_v34, 0.0  ;;  %v19515_v37 = vmax.f32 %v16220_v62, 0.0  ;;  %v19514_v60 = vmax.f32 %v16223_v53, 0.0  ;;  %v20408_v34 = vld [vmem:[#allocation25_spill] sm:$0xff] }
 0x31a   :  { %v16236_v42 = vmax.f32 %v5603_v22, %v5604_v32  ;;  %v6245_v36 = vrot.slane %v6244_v1, 2  ;;  %6620 = vrot.lane.b32.xlu0 %v5572_v54, %s9180_s10  ;;  %v20411_v13 = vmax.f32 %v20410_v39, 0.0  ;;  %v16255_v22 = vpop.f32.mrf.mxu1  ;;  %v20412_v29 = vld [vmem:[#allocation24_spill] sm:$0xff]  ;;  %v20414_v39 = vmax.f32 %v16227_v3, 0.0 }
 0x31b   :  { %v7156_v38 = vsel %vm5091_vm1, %v20406_v47, %v6697_v25  ;;  %v16247_v21 = vadd.f32 %v16048_v12, %v4207_v35  ;;  %v20409_v47 = vmax.f32 %v20408_v34, 0.0  ;;  %v6288_v54 = vsel %vm5091_vm1, %v19514_v60, -inf }
 0x31c   :  { %7573 = vst.msk [vmem:[%s18979_s4 + $0x940] sm:$0xff] %vm7276_vm2, %v7156_v38  ;;  %v7158_v7 = vsel %vm5091_vm1, %v20411_v13, %v6697_v25  ;;  %v5613_v38 = vsel %vm5091_vm1, %v19515_v37, -inf  ;;  %v6246_v35 = vmax.f32 %v6244_v1, %v6245_v36  ;;  %v20413_v5 = vmax.f32 %v20412_v29, 0.0  ;;  %v16285_v29 = vpop.f32.mrf.mxu0  ;;  %v16300_v60 = vpop.f32.mrf.mxu1  ;;  %v20417_v37 = vld [vmem:[#allocation27_spill] sm:$0xff] }
 0x31d   :  { %20407 = vst [vmem:[#allocation147_spill] sm:$0xff] %v16247_v21  ;;  %v7157_v32 = vsel %vm5091_vm1, %v20409_v47, %v6697_v25  ;;  %7575 = vst.msk [vmem:[%s18979_s4 + $0x950] sm:$0xff] %vm7276_vm2, %v7158_v7  ;;  %v6290_v47 = vmax.f32 %v6288_v54, %v16215_v50  ;;  %v5612_v1 = vsel %vm5091_vm1, %v20414_v39, -inf  ;;  %v19517_v36 = vmax.f32 %v16247_v21, 0.0 }
 0x31e   :  { %v7159_v34 = vsel %vm5091_vm1, %v20413_v5, %v6697_v25  ;;  %7574 = vst.msk [vmem:[%s18979_s4 + $0x948] sm:$0xff] %vm7276_vm2, %v7157_v32  ;;  %v3999_v5 = vmul.f32 %v15988_v55, %v16063_v48  ;;  %v6595_v25 = vpop.permute.xlu1 %6594  ;;  %v6247_v32 = vrot.slane %v6246_v35, 1  ;;  %v5614_v13 = vmax.f32 %v5612_v1, %v5613_v38 }
 0x31f   :  { %7576 = vst.msk [vmem:[%s18979_s4 + $0x958] sm:$0xff] %vm7276_vm2, %v7159_v34  ;;  %v4206_v50 = vmul.f32 %v15988_v55, %v16080_v57  ;;  %v5580_v7 = vrot.slane %v15907_v28, 4  ;;  %v6293_v54 = vsel %vm5091_vm1, %v19517_v36, -inf  ;;  %v3998_v48 = vmul.f32 %v15988_v55, %v16110_v44 }
 0x320   :  { %v16294_v39 = vadd.f32 %v16048_v12, %v3999_v5  ;;  %v4209_v34 = vmul.f32 %v15988_v55, %v16132_v11  ;;  %v6248_v38 = vmax.f32 %v6246_v35, %v6247_v32  ;;  %v20418_v21 = vmax.f32 %v20417_v37, 0.0  ;;  %v20421_v11 = vld [vmem:[#allocation30_spill] sm:$0xff] }
 0x321   :  { %v16303_v57 = vadd.f32 %v16048_v12, %v4206_v50  ;;  %v5581_v1 = vmax.f32 %v15907_v28, %v5580_v7  ;;  %v16311_v53 = vadd.f32 %v16048_v12, %v3998_v48  ;;  %v20422_v62 = vmax.f32 %v20421_v11, 0.0  ;;  %v16323_v28 = vpop.f32.mrf.mxu0  ;;  %v20423_v32 = vld [vmem:[#allocation34_spill] sm:$0xff]  ;;  %v20425_v48 = vld [vmem:[#allocation31_spill] sm:$0xff] }
 0x322   :  { %20415 = vst [vmem:[#allocation106_spill] sm:$0xff] %v16294_v39  ;;  %v6952_v36 = vsel %vm5091_vm1, %v20418_v21, %v6595_v25  ;;  %v19520_v5 = vmax.f32 %v16294_v39, 0.0  ;;  %v16314_v44 = vadd.f32 %v16048_v12, %v4209_v34  ;;  %6724 = vrot.lane.b32.xlu0 %v6248_v38, %s9180_s10  ;;  %v20424_v50 = vmax.f32 %v20423_v32, 0.0 }
 0x323   :  { %20416 = vst [vmem:[#allocation144_spill] sm:$0xff] %v16303_v57  ;;  %20419 = vst [vmem:[#allocation143_spill] sm:$0xff] %v16311_v53  ;;  %v6953_v35 = vsel %vm5091_vm1, %v20422_v62, %v6595_v25  ;;  %v19521_v37 = vmax.f32 %v16303_v57, 0.0  ;;  %v5582_v21 = vrot.slane %v5581_v1, 2  ;;  %v20426_v34 = vmax.f32 %v20425_v48, 0.0 }
 0x324   :  { %20420 = vst [vmem:[#allocation145_spill] sm:$0xff] %v16314_v44  ;;  %7369 = vst.msk [vmem:[%s18979_s4 + $0x2e0] sm:$0xff] %vm7276_vm2, %v6952_v36  ;;  %v6954_v7 = vsel %vm5091_vm1, %v20424_v50, %v6595_v25  ;;  %v5617_v36 = vsel %vm5091_vm1, %v19520_v5, -inf  ;;  %v19523_v38 = vmax.f32 %v16311_v53, 0.0  ;;  %v19524_v11 = vmax.f32 %v16314_v44, 0.0 }
 0x325   :  { %v6955_v62 = vsel %vm5091_vm1, %v20426_v34, %v6595_v25  ;;  %7370 = vst.msk [vmem:[%s18979_s4 + $0x2e8] sm:$0xff] %vm7276_vm2, %v6953_v35  ;;  %7371 = vst.msk [vmem:[%s18979_s4 + $0x2f0] sm:$0xff] %vm7276_vm2, %v6954_v7  ;;  %v4001_v25 = vmul.f32 %v15988_v55, %v16149_v17  ;;  %v16352_v35 = vpop.f32.mrf.mxu1  ;;  %v6291_v32 = vsel %vm5091_vm1, %v19521_v37, -inf  ;;  %v5583_v50 = vmax.f32 %v5581_v1, %v5582_v21  ;;  %v16371_v37 = vpop.f32.mrf.mxu0 }
 0x326   :  { %7372 = vst.msk [vmem:[%s18979_s4 + $0x2f8] sm:$0xff] %vm7276_vm2, %v6955_v62  ;;  %v4208_v48 = vmul.f32 %v15988_v55, %v16169_v27  ;;  %v6256_v7 = vrot.slane %v15899_v51, 4  ;;  %v6292_v34 = vmax.f32 %v6290_v47, %v6291_v32  ;;  %v5615_v62 = vsel %vm5091_vm1, %v19523_v38, -inf  ;;  %v6699_v32 = vpop.permute.xlu1 %6698 }
 0x327   :  { %v16366_v17 = vsel %vm5091_vm1, %v19524_v11, -inf  ;;  %v16369_v5 = vadd.f32 %v16048_v12, %v4001_v25  ;;  %v5584_v1 = vrot.slane %v5583_v50, 1  ;;  %v5616_v21 = vmax.f32 %v5614_v13, %v5615_v62  ;;  %v16384_v44 = vpop.f32.mrf.mxu1 }
 0x328   :  { %v16374_v27 = vadd.f32 %v16048_v12, %v4208_v48  ;;  %v6257_v47 = vmax.f32 %v15899_v51, %v6256_v7  ;;  %v16377_v57 = vmax.f32 %v6292_v34, %v6293_v54  ;;  %v4000_v11 = vmul.f32 %v15988_v55, %v16198_v31  ;;  %v20430_v7 = vld [vmem:[#allocation29_spill] sm:$0xff] }
 0x329   :  { %20427 = vst [vmem:[#allocation107_spill] sm:$0xff] %v16369_v5  ;;  %v19527_v38 = vmax.f32 %v16369_v5, 0.0  ;;  %v4211_v25 = vmul.f32 %v15988_v55, %v16217_v20  ;;  %v5585_v39 = vmax.f32 %v5583_v50, %v5584_v1  ;;  %v16386_v13 = vmax.f32 %v5616_v21, %v5617_v36  ;;  %v16401_v50 = vpop.f32.mrf.mxu0  ;;  %v20432_v21 = vld [vmem:[#allocation33_spill] sm:$0xff] }
 0x32a   :  { %20428 = vst [vmem:[#allocation8_spill] sm:$0xff] %v16374_v27  ;;  %v19530_v48 = vmax.f32 %v16374_v27, 0.0  ;;  %v6258_v62 = vrot.slane %v6257_v47, 2  ;;  %v16393_v54 = vadd.f32 %v16048_v12, %v4000_v11  ;;  %v20431_v20 = vmax.f32 %v20430_v7, 0.0  ;;  %v20434_v5 = vld [vmem:[#allocation37_spill] sm:$0xff] }
 0x32b   :  { %v5626_v51 = vsel %vm5091_vm1, %v19527_v38, -inf  ;;  %v16396_v31 = vadd.f32 %v16048_v12, %v4211_v25  ;;  %6622 = vrot.lane.b32.xlu1 %v5585_v39, %s9180_s10  ;;  %v20433_v38 = vmax.f32 %v20432_v21, 0.0  ;;  %v20435_v25 = vmax.f32 %v20434_v5, 0.0  ;;  %v16431_v5 = vpop.f32.mrf.mxu1 }
 0x32c   :  { %v7160_v34 = vsel %vm5091_vm1, %v20431_v20, %v6699_v32  ;;  %v6301_v36 = vsel %vm5091_vm1, %v19530_v48, -inf  ;;  %v6259_v1 = vmax.f32 %v6257_v47, %v6258_v62  ;;  %v19531_v7 = vmax.f32 %v16393_v54, 0.0  ;;  %v20436_v47 = vld [vmem:[#allocation32_spill] sm:$0xff] }
 0x32d   :  { %20429 = vst [vmem:[#allocation4_spill] sm:$0xff] %v16396_v31  ;;  %v7161_v11 = vsel %vm5091_vm1, %v20433_v38, %v6699_v32  ;;  %v7162_v53 = vsel %vm5091_vm1, %v20435_v25, %v6699_v32  ;;  %7577 = vst.msk [vmem:[%s18979_s4 + $0x960] sm:$0xff] %vm7276_vm2, %v7160_v34  ;;  %v6303_v39 = vmax.f32 %v6301_v36, %v16366_v17  ;;  %v19532_v20 = vmax.f32 %v16396_v31, 0.0  ;;  %v6597_v36 = vpop.permute.xlu0 %6596 }
 0x32e   :  { %v20437_v62 = vmax.f32 %v20436_v47, 0.0  ;;  %7578 = vst.msk [vmem:[%s18979_s4 + $0x968] sm:$0xff] %vm7276_vm2, %v7161_v11  ;;  %7579 = vst.msk [vmem:[%s18979_s4 + $0x970] sm:$0xff] %vm7276_vm2, %v7162_v53  ;;  %v6260_v38 = vrot.slane %v6259_v1, 1  ;;  %v4003_v17 = vmul.f32 %v15988_v55, %v16234_v6  ;;  %v5593_v34 = vrot.slane %v16065_v15, 4  ;;  %v16452_v47 = vpop.f32.mrf.mxu0 }
 0x32f   :  { %v5625_v53 = vsel %vm5091_vm1, %v19531_v7, -inf  ;;  %v6306_v11 = vsel %vm5091_vm1, %v19532_v20, -inf  ;;  %v4002_v25 = vmul.f32 %v15988_v55, %v16285_v29  ;;  %v4213_v6 = vmul.f32 %v15988_v55, %v16300_v60 }
 0x330   :  { %v7163_v21 = vsel %vm5091_vm1, %v20437_v62, %v6699_v32  ;;  %v4210_v32 = vmul.f32 %v15988_v55, %v16255_v22  ;;  %v6261_v22 = vmax.f32 %v6259_v1, %v6260_v38  ;;  %v5627_v62 = vmax.f32 %v5625_v53, %v5626_v51  ;;  %v16470_v1 = vpop.f32.mrf.mxu1 }
 0x331   :  { %7580 = vst.msk [vmem:[%s18979_s4 + $0x978] sm:$0xff] %vm7276_vm2, %v7163_v21  ;;  %v16455_v21 = vadd.f32 %v16048_v12, %v4003_v17  ;;  %v5594_v7 = vmax.f32 %v16065_v15, %v5593_v34  ;;  %v16462_v20 = vadd.f32 %v16048_v12, %v4002_v25  ;;  %v16465_v29 = vadd.f32 %v16048_v12, %v4213_v6  ;;  %v20441_v17 = vld [vmem:[#allocation38_spill] sm:$0xff] }
 0x332   :  { %v16458_v48 = vadd.f32 %v16048_v12, %v4210_v32  ;;  %v20440_v60 = vmax.f32 %v13706_v10, 0.0  ;;  %6726 = vrot.lane.b32.xlu1 %v6261_v22, %s9180_s10  ;;  %v20442_v15 = vmax.f32 %v20441_v17, 0.0  ;;  %v20443_v34 = vmax.f32 %v13790_v45, 0.0  ;;  %v20444_v22 = vld [vmem:[#allocation35_spill] sm:$0xff]  ;;  %v16498_v45 = vpop.f32.mrf.mxu0 }
 0x333   :  { %20439 = vst [vmem:[#allocation148_spill] sm:$0xff] %v16465_v29  ;;  %v19535_v51 = vmax.f32 %v16455_v21, 0.0  ;;  %v5595_v10 = vrot.slane %v5594_v7, 2  ;;  %v19537_v25 = vmax.f32 %v16462_v20, 0.0  ;;  %v19536_v6 = vmax.f32 %v16465_v29, 0.0 }
 0x334   :  { %20438 = vst [vmem:[#allocation2_spill] sm:$0xff] %v16458_v48  ;;  %v6956_v31 = vsel %vm5091_vm1, %v20440_v60, %v6597_v36  ;;  %v19534_v38 = vmax.f32 %v16458_v48, 0.0  ;;  %v6957_v32 = vsel %vm5091_vm1, %v20442_v15, %v6597_v36  ;;  %v6958_v53 = vsel %vm5091_vm1, %v20443_v34, %v6597_v36 }
 0x335   :  { %7373 = vst.msk [vmem:[%s18979_s4 + $0x300] sm:$0xff] %vm7276_vm2, %v6956_v31  ;;  %v20445_v60 = vmax.f32 %v20444_v22, 0.0  ;;  %7374 = vst.msk [vmem:[%s18979_s4 + $0x308] sm:$0xff] %vm7276_vm2, %v6957_v32  ;;  %v5630_v31 = vsel %vm5091_vm1, %v19535_v51, -inf  ;;  %v4005_v15 = vmul.f32 %v15988_v55, %v16323_v28  ;;  %v4212_v32 = vmul.f32 %v15988_v55, %v16352_v35 }
 0x336   :  { %7375 = vst.msk [vmem:[%s18979_s4 + $0x310] sm:$0xff] %vm7276_vm2, %v6958_v53  ;;  %v5596_v53 = vmax.f32 %v5594_v7, %v5595_v10  ;;  %v5628_v22 = vsel %vm5091_vm1, %v19537_v25, -inf  ;;  %v6269_v35 = vrot.slane %v16056_v40, 4  ;;  %v16537_v25 = vpop.f32.mrf.mxu0 }
 0x337   :  { %v6959_v17 = vsel %vm5091_vm1, %v20445_v60, %v6597_v36  ;;  %v6304_v36 = vsel %vm5091_vm1, %v19534_v38, -inf  ;;  %v16520_v60 = vsel %vm5091_vm1, %v19536_v6, -inf  ;;  %v16522_v38 = vpop.f32.mrf.mxu1  ;;  %v16525_v51 = vadd.f32 %v16048_v12, %v4005_v15 }
 0x338   :  { %7376 = vst.msk [vmem:[%s18979_s4 + $0x318] sm:$0xff] %vm7276_vm2, %v6959_v17  ;;  %v6305_v34 = vmax.f32 %v6303_v39, %v6304_v36  ;;  %v5629_v17 = vmax.f32 %v5627_v62, %v5628_v22  ;;  %v16528_v28 = vadd.f32 %v16048_v12, %v4212_v32  ;;  %v6701_v39 = vpop.permute.xlu0 %6700  ;;  %v5597_v10 = vrot.slane %v5596_v53, 1 }
 0x339   :  { %20446 = vst [vmem:[#allocation6_spill] sm:$0xff] %v16525_v51  ;;  %v4004_v36 = vmul.f32 %v15988_v55, %v16371_v37  ;;  %v4215_v6 = vmul.f32 %v15988_v55, %v16384_v44  ;;  %v19542_v15 = vmax.f32 %v16525_v51, 0.0  ;;  %v6270_v22 = vmax.f32 %v16056_v40, %v6269_v35  ;;  %v20450_v37 = vld [vmem:[#allocation146_spill] sm:$0xff]  ;;  %v16553_v27 = vpop.f32.mrf.mxu1 }
 0x33a   :  { %20447 = vst [vmem:[#allocation119_spill] sm:$0xff] %v16528_v28  ;;  %v16531_v7 = vmax.f32 %v6305_v34, %v6306_v11  ;;  %v16539_v62 = vmax.f32 %v5629_v17, %v5630_v31  ;;  %v19541_v32 = vmax.f32 %v16528_v28, 0.0  ;;  %v5598_v29 = vmax.f32 %v5596_v53, %v5597_v10  ;;  %v20452_v17 = vld [vmem:[#allocation41_spill] sm:$0xff] }
 0x33b   :  { %v16545_v11 = vadd.f32 %v16048_v12, %v4004_v36  ;;  %v16548_v34 = vadd.f32 %v16048_v12, %v4215_v6  ;;  %v20451_v48 = vmax.f32 %v20450_v37, 0.0  ;;  %v5639_v31 = vsel %vm5091_vm1, %v19542_v15, -inf  ;;  %v20454_v37 = vld [vmem:[#allocation40_spill] sm:$0xff] }
 0x33c   :  { %v6314_v40 = vsel %vm5091_vm1, %v19541_v32, -inf  ;;  %v6271_v53 = vrot.slane %v6270_v22, 2  ;;  %v20453_v35 = vmax.f32 %v20452_v17, 0.0  ;;  %6624 = vrot.lane.b32.xlu0 %v5598_v29, %s9180_s10  ;;  %v20455_v32 = vmax.f32 %v20454_v37, 0.0  ;;  %v16579_v17 = vpop.f32.mrf.mxu0  ;;  %v6599_v37 = vpop.permute.xlu1 %6598 }
 0x33d   :  { %20448 = vst [vmem:[#allocation9_spill] sm:$0xff] %v16545_v11  ;;  %20449 = vst [vmem:[#allocation13_spill] sm:$0xff] %v16548_v34  ;;  %v7164_v44 = vsel %vm5091_vm1, %v20451_v48, %v6701_v39  ;;  %v6316_v48 = vmax.f32 %v6314_v40, %v16520_v60  ;;  %v19544_v10 = vmax.f32 %v16545_v11, 0.0  ;;  %v19543_v36 = vmax.f32 %v16548_v34, 0.0  ;;  %v20460_v34 = vld [vmem:[#allocation49_spill] sm:$0xff] }
 0x33e   :  { %v7165_v6 = vsel %vm5091_vm1, %v20453_v35, %v6701_v39  ;;  %7581 = vst.msk [vmem:[%s18979_s4 + $0x980] sm:$0xff] %vm7276_vm2, %v7164_v44  ;;  %v7166_v15 = vsel %vm5091_vm1, %v20455_v32, %v6701_v39  ;;  %v6272_v44 = vmax.f32 %v6270_v22, %v6271_v53  ;;  %v20456_v35 = vld [vmem:[#allocation36_spill] sm:$0xff]  ;;  %v4007_v32 = vmul.f32 %v15988_v55, %v16401_v50  ;;  %v16622_v51 = vpop.f32.mrf.mxu0 }
 0x33f   :  { %7582 = vst.msk [vmem:[%s18979_s4 + $0x988] sm:$0xff] %vm7276_vm2, %v7165_v6  ;;  %v20457_v29 = vmax.f32 %v20456_v35, 0.0  ;;  %7583 = vst.msk [vmem:[%s18979_s4 + $0x990] sm:$0xff] %vm7276_vm2, %v7166_v15  ;;  %v4214_v40 = vmul.f32 %v15988_v55, %v16431_v5  ;;  %v5638_v22 = vsel %vm5091_vm1, %v19544_v10, -inf  ;;  %v5606_v15 = vrot.slane %v16236_v42, 4  ;;  %v16605_v5 = vpop.f32.mrf.mxu1 }
 0x340   :  { %v4006_v50 = vmul.f32 %v15988_v55, %v16452_v47  ;;  %v6273_v53 = vrot.slane %v6272_v44, 1  ;;  %v5640_v6 = vmax.f32 %v5638_v22, %v5639_v31  ;;  %v16608_v35 = vadd.f32 %v16048_v12, %v4007_v32  ;;  %v20462_v22 = vld [vmem:[#allocation44_spill] sm:$0xff] }
 0x341   :  { %v7167_v60 = vsel %vm5091_vm1, %v20457_v29, %v6701_v39  ;;  %v6319_v39 = vsel %vm5091_vm1, %v19543_v36, -inf  ;;  %v16611_v29 = vadd.f32 %v16048_v12, %v4214_v40  ;;  %v5607_v36 = vmax.f32 %v16236_v42, %v5606_v15 }
 0x342   :  { %7584 = vst.msk [vmem:[%s18979_s4 + $0x998] sm:$0xff] %vm7276_vm2, %v7167_v60  ;;  %20458 = vst [vmem:[#allocation7_spill] sm:$0xff] %v16608_v35  ;;  %v16615_v10 = vadd.f32 %v16048_v12, %v4006_v50  ;;  %v4217_v60 = vmul.f32 %v15988_v55, %v16470_v1  ;;  %v20461_v47 = vmax.f32 %v20460_v34, 0.0  ;;  %v6274_v31 = vmax.f32 %v6272_v44, %v6273_v53  ;;  %v20465_v44 = vld [vmem:[#allocation43_spill] sm:$0xff] }
 0x343   :  { %20459 = vst [vmem:[#allocation3_spill] sm:$0xff] %v16611_v29  ;;  %v19549_v32 = vmax.f32 %v16608_v35, 0.0  ;;  %v19550_v40 = vmax.f32 %v16611_v29, 0.0  ;;  %v20463_v11 = vmax.f32 %v20462_v22, 0.0  ;;  %v5608_v1 = vrot.slane %v5607_v36, 2 }
 0x344   :  { %v6960_v28 = vsel %vm5091_vm1, %v20461_v47, %v6599_v37  ;;  %v19551_v34 = vmax.f32 %v16615_v10, 0.0  ;;  %v16635_v15 = vadd.f32 %v16048_v12, %v4217_v60  ;;  %v20466_v50 = vmax.f32 %v20465_v44, 0.0  ;;  %6728 = vrot.lane.b32.xlu0 %v6274_v31, %s9180_s10  ;;  %v20467_v47 = vld [vmem:[#allocation5_spill] sm:$0xff] }
 0x345   :  { %v6961_v42 = vsel %vm5091_vm1, %v20463_v11, %v6599_v37  ;;  %7377 = vst.msk [vmem:[%s18979_s4 + $0x320] sm:$0xff] %vm7276_vm2, %v6960_v28  ;;  %v16644_v11 = vpop.f32.mrf.mxu1  ;;  %v5643_v28 = vsel %vm5091_vm1, %v19549_v32, -inf  ;;  %v6317_v60 = vsel %vm5091_vm1, %v19550_v40, -inf  ;;  %v20468_v22 = vmax.f32 %v20467_v47, 0.0 }
 0x346   :  { %20464 = vst [vmem:[#allocation11_spill] sm:$0xff] %v16635_v15  ;;  %v6962_v53 = vsel %vm5091_vm1, %v20466_v50, %v6599_v37  ;;  %7378 = vst.msk [vmem:[%s18979_s4 + $0x328] sm:$0xff] %vm7276_vm2, %v6961_v42  ;;  %v4009_v31 = vmul.f32 %v15988_v55, %v16498_v45  ;;  %v6318_v42 = vmax.f32 %v6316_v48, %v6317_v60  ;;  %v5641_v32 = vsel %vm5091_vm1, %v19551_v34, -inf }
 0x347   :  { %v6963_v44 = vsel %vm5091_vm1, %v20468_v22, %v6599_v37  ;;  %7379 = vst.msk [vmem:[%s18979_s4 + $0x330] sm:$0xff] %vm7276_vm2, %v6962_v53  ;;  %v5609_v50 = vmax.f32 %v5607_v36, %v5608_v1  ;;  %v19552_v40 = vmax.f32 %v16635_v15, 0.0  ;;  %v16670_v37 = vpop.f32.mrf.mxu0  ;;  %v5642_v47 = vmax.f32 %v5640_v6, %v5641_v32  ;;  %v6703_v36 = vpop.permute.xlu1 %6702  ;;  %v20472_v15 = vld [vmem:[#allocation42_spill] sm:$0xff] }
 0x348   :  { %7380 = vst.msk [vmem:[%s18979_s4 + $0x338] sm:$0xff] %vm7276_vm2, %v6963_v44  ;;  %v16673_v53 = vadd.f32 %v16048_v12, %v4009_v31  ;;  %v4216_v45 = vmul.f32 %v15988_v55, %v16522_v38  ;;  %v6282_v48 = vrot.slane %v16207_v33, 4  ;;  %v16678_v1 = vmax.f32 %v6318_v42, %v6319_v39  ;;  %v16685_v6 = vpop.f32.mrf.mxu1 }
 0x349   :  { %v5610_v60 = vrot.slane %v5609_v50, 1  ;;  %v6328_v22 = vsel %vm5091_vm1, %v19552_v40, -inf  ;;  %v4008_v44 = vmul.f32 %v15988_v55, %v16537_v25  ;;  %v16687_v32 = vmax.f32 %v5642_v47, %v5643_v28  ;;  %v2630_v28 = vpop.f32.mrf.mxu0 }
 0x34a   :  { %20469 = vst [vmem:[#allocation17_spill] sm:$0xff] %v16673_v53  ;;  %v19555_v31 = vmax.f32 %v16673_v53, 0.0  ;;  %v16691_v38 = vadd.f32 %v16048_v12, %v4216_v45  ;;  %v6283_v39 = vmax.f32 %v16207_v33, %v6282_v48  ;;  %v4219_v40 = vmul.f32 %v15988_v55, %v16553_v27  ;;  %v20479_v45 = vld [vmem:[#allocation46_spill] sm:$0xff] }
 0x34b   :  { %v5611_v42 = vmax.f32 %v5609_v50, %v5610_v60  ;;  %v16695_v34 = vadd.f32 %v16048_v12, %v4008_v44  ;;  %v20473_v25 = vmax.f32 %v20472_v15, 0.0  ;;  %v20474_v50 = vld [vmem:[#allocation39_spill] sm:$0xff]  ;;  %v20477_v44 = vld [vmem:[#allocation45_spill] sm:$0xff] }
 0x34c   :  { %20470 = vst [vmem:[#allocation12_spill] sm:$0xff] %v16691_v38  ;;  %v16705_v47 = vsel %vm5091_vm1, %v19555_v31, -inf  ;;  %v6284_v33 = vrot.slane %v6283_v39, 2  ;;  %v20475_v48 = vmax.f32 %v20474_v50, 0.0  ;;  %v16718_v15 = vadd.f32 %v16048_v12, %v4219_v40 }
 0x34d   :  { %20471 = vst [vmem:[#allocation19_spill] sm:$0xff] %v16695_v34  ;;  %v7168_v29 = vsel %vm5091_vm1, %v20473_v25, %v6703_v36  ;;  %6626 = vrot.lane.b32.xlu1 %v5611_v42, %s9180_s10  ;;  %v20478_v25 = vmax.f32 %v20477_v44, 0.0  ;;  %v20480_v50 = vmax.f32 %v20479_v45, 0.0  ;;  %v20481_v42 = vmax.f32 %v16691_v38, 0.0 }
 0x34e   :  { %v7169_v60 = vsel %vm5091_vm1, %v20475_v48, %v6703_v36  ;;  %7585 = vst.msk [vmem:[%s18979_s4 + $0x9a0] sm:$0xff] %vm7276_vm2, %v7168_v29  ;;  %20476 = vst [vmem:[#allocation14_spill] sm:$0xff] %v16718_v15  ;;  %v9118_v29 = vpop.f32.mrf.mxu1  ;;  %v6285_v40 = vmax.f32 %v6283_v39, %v6284_v33  ;;  %v4218_v45 = vmul.f32 %v15988_v55, %v16605_v5  ;;  %v20482_v44 = vmax.f32 %v16695_v34, 0.0 }
 0x34f   :  { %v7170_v31 = vsel %vm5091_vm1, %v20478_v25, %v6703_v36  ;;  %v7171_v48 = vsel %vm5091_vm1, %v20480_v50, %v6703_v36  ;;  %7586 = vst.msk [vmem:[%s18979_s4 + $0x9a8] sm:$0xff] %vm7276_vm2, %v7169_v60  ;;  %v6327_v27 = vsel %vm5091_vm1, %v20481_v42, -inf  ;;  %v4011_v36 = vmul.f32 %v15988_v55, %v16579_v17  ;;  %v6601_v25 = vpop.permute.xlu0 %6600  ;;  %v16750_v50 = vpop.f32.mrf.mxu0 }
 0x350   :  { %7587 = vst.msk [vmem:[%s18979_s4 + $0x9b0] sm:$0xff] %vm7276_vm2, %v7170_v31  ;;  %7588 = vst.msk [vmem:[%s18979_s4 + $0x9b8] sm:$0xff] %vm7276_vm2, %v7171_v48  ;;  %v6329_v60 = vmax.f32 %v6327_v27, %v6328_v22  ;;  %v5651_v39 = vsel %vm5091_vm1, %v20482_v44, -inf  ;;  %v19560_v33 = vmax.f32 %v16718_v15, 0.0  ;;  %v5619_v31 = vrot.slane %v16386_v13, 4  ;;  %v16767_v53 = vpop.f32.mrf.mxu1 }
 0x351   :  { %v6286_v42 = vrot.slane %v6285_v40, 1  ;;  %v5653_v48 = vmax.f32 %v5651_v39, %v16705_v47  ;;  %v16754_v17 = vadd.f32 %v16048_v12, %v4011_v36  ;;  %v16757_v5 = vadd.f32 %v16048_v12, %v4218_v45  ;;  %v20485_v39 = vld [vmem:[#allocation50_spill] sm:$0xff] }
 0x352   :  { %v6332_v22 = vsel %vm5091_vm1, %v19560_v33, -inf  ;;  %v5620_v27 = vmax.f32 %v16386_v13, %v5619_v31  ;;  %v4010_v44 = vmul.f32 %v15988_v55, %v16622_v51  ;;  %v4221_v38 = vmul.f32 %v15988_v55, %v16644_v11  ;;  %v20488_v31 = vld [vmem:[#allocation47_spill] sm:$0xff] }
 0x353   :  { %20483 = vst [vmem:[#allocation10_spill] sm:$0xff] %v16754_v17  ;;  %20484 = vst [vmem:[#allocation15_spill] sm:$0xff] %v16757_v5  ;;  %v6287_v47 = vmax.f32 %v6285_v40, %v6286_v42  ;;  %v19562_v36 = vmax.f32 %v16754_v17, 0.0  ;;  %v19564_v45 = vmax.f32 %v16757_v5, 0.0  ;;  %v20486_v34 = vmax.f32 %v20485_v39, 0.0  ;;  %v16787_v40 = vpop.f32.mrf.mxu0  ;;  %v20491_v39 = vld [vmem:[#allocation54_spill] sm:$0xff] }
 0x354   :  { %v5621_v33 = vrot.slane %v5620_v27, 2  ;;  %v16775_v13 = vadd.f32 %v16048_v12, %v4010_v44  ;;  %v16778_v51 = vadd.f32 %v16048_v12, %v4221_v38  ;;  %v20489_v11 = vmax.f32 %v20488_v31, 0.0 }
 0x355   :  { %v6964_v15 = vsel %vm5091_vm1, %v20486_v34, %v6601_v25  ;;  %6730 = vrot.lane.b32.xlu1 %v6287_v47, %s9180_s10  ;;  %v5656_v34 = vsel %vm5091_vm1, %v19562_v36, -inf  ;;  %v6330_v38 = vsel %vm5091_vm1, %v19564_v45, -inf  ;;  %v20490_v42 = vmax.f32 %v14107_v63, 0.0  ;;  %v9121_v63 = vpop.f32.mrf.mxu1 }
 0x356   :  { %20487 = vst [vmem:[#allocation21_spill] sm:$0xff] %v16778_v51  ;;  %v6965_v35 = vsel %vm5091_vm1, %v20489_v11, %v6601_v25  ;;  %7381 = vst.msk [vmem:[%s18979_s4 + $0x340] sm:$0xff] %vm7276_vm2, %v6964_v15  ;;  %v20492_v31 = vmax.f32 %v20491_v39, 0.0  ;;  %v6331_v47 = vmax.f32 %v6329_v60, %v6330_v38  ;;  %v5622_v11 = vmax.f32 %v5620_v27, %v5621_v33  ;;  %v6705_v27 = vpop.permute.xlu0 %6704 }
 0x357   :  { %v6966_v44 = vsel %vm5091_vm1, %v20490_v42, %v6601_v25  ;;  %7382 = vst.msk [vmem:[%s18979_s4 + $0x348] sm:$0xff] %vm7276_vm2, %v6965_v35  ;;  %v19565_v36 = vmax.f32 %v16775_v13, 0.0  ;;  %v19566_v5 = vmax.f32 %v16778_v51, 0.0  ;;  %v4013_v35 = vmul.f32 %v15988_v55, %v16670_v37  ;;  %v16832_v37 = vpop.f32.mrf.mxu0  ;;  %v3690_v17 = vpop.f32.mrf.mxu1 }
 0x358   :  { %v6967_v15 = vsel %vm5091_vm1, %v20492_v31, %v6601_v25  ;;  %7383 = vst.msk [vmem:[%s18979_s4 + $0x350] sm:$0xff] %vm7276_vm2, %v6966_v44  ;;  %v4220_v60 = vmul.f32 %v15988_v55, %v16685_v6  ;;  %v6295_v33 = vrot.slane %v16377_v57, 4  ;;  %v4012_v25 = vmul.f32 %v15988_v55, %v2630_v28 }
 0x359   :  { %7384 = vst.msk [vmem:[%s18979_s4 + $0x358] sm:$0xff] %vm7276_vm2, %v6967_v15  ;;  %v16822_v38 = vmax.f32 %v6331_v47, %v6332_v22  ;;  %v5623_v42 = vrot.slane %v5622_v11, 1  ;;  %v5654_v44 = vsel %vm5091_vm1, %v19565_v36, -inf  ;;  %v16830_v39 = vsel %vm5091_vm1, %v19566_v5, -inf  ;;  %v20495_v36 = vld [vmem:[#allocation52_spill] sm:$0xff] }
 0x35a   :  { %v5655_v6 = vmax.f32 %v5653_v48, %v5654_v44  ;;  %v16835_v31 = vadd.f32 %v16048_v12, %v4013_v35  ;;  %v16838_v28 = vadd.f32 %v16048_v12, %v4220_v60  ;;  %v6296_v22 = vmax.f32 %v16377_v57, %v6295_v33 }
 0x35b   :  { %v5624_v15 = vmax.f32 %v5622_v11, %v5623_v42  ;;  %v16842_v47 = vadd.f32 %v16048_v12, %v4012_v25  ;;  %v4223_v45 = vmul.f32 %v15988_v55, %v9118_v29  ;;  %v20496_v5 = vmax.f32 %v20495_v36, 0.0  ;;  %v20500_v11 = vld [vmem:[#allocation53_spill] sm:$0xff]  ;;  %v2650_v42 = vpop.f32.mrf.mxu0 }
 0x35c   :  { %20493 = vst [vmem:[#allocation16_spill] sm:$0xff] %v16835_v31  ;;  %20494 = vst [vmem:[#allocation18_spill] sm:$0xff] %v16838_v28  ;;  %v16848_v48 = vmax.f32 %v5655_v6, %v5656_v34  ;;  %v19570_v35 = vmax.f32 %v16835_v31, 0.0  ;;  %v19569_v60 = vmax.f32 %v16838_v28, 0.0  ;;  %v6297_v44 = vrot.slane %v6296_v22, 2 }
 0x35d   :  { %v7172_v51 = vsel %vm5091_vm1, %v20496_v5, %v6705_v27  ;;  %6628 = vrot.lane.b32.xlu0 %v5624_v15, %s9180_s10  ;;  %v16859_v29 = vadd.f32 %v16048_v12, %v4223_v45  ;;  %v20498_v5 = vld [vmem:[#allocation48_spill] sm:$0xff]  ;;  %v20501_v33 = vmax.f32 %v20500_v11, 0.0  ;;  %v20502_v45 = vld [vmem:[#allocation57_spill] sm:$0xff]  ;;  %v20504_v11 = vmax.f32 %v16842_v47, 0.0 }
 0x35e   :  { %7589 = vst.msk [vmem:[%s18979_s4 + $0x9c0] sm:$0xff] %vm7276_vm2, %v7172_v51  ;;  %v20499_v36 = vmax.f32 %v20498_v5, 0.0  ;;  %v5665_v51 = vsel %vm5091_vm1, %v19570_v35, -inf  ;;  %v6340_v6 = vsel %vm5091_vm1, %v19569_v60, -inf  ;;  %v6298_v15 = vmax.f32 %v6296_v22, %v6297_v44  ;;  %v16907_v60 = vpop.f32.mrf.mxu0  ;;  %v20507_v35 = vld [vmem:[#allocation61_spill] sm:$0xff] }
 0x35f   :  { %20497 = vst [vmem:[#allocation23_spill] sm:$0xff] %v16859_v29  ;;  %v7174_v25 = vsel %vm5091_vm1, %v20501_v33, %v6705_v27  ;;  %v20503_v57 = vmax.f32 %v20502_v45, 0.0  ;;  %v5664_v22 = vsel %vm5091_vm1, %v20504_v11, -inf  ;;  %v19572_v44 = vmax.f32 %v16859_v29, 0.0 }
 0x360   :  { %v7173_v34 = vsel %vm5091_vm1, %v20499_v36, %v6705_v27  ;;  %7591 = vst.msk [vmem:[%s18979_s4 + $0x9d0] sm:$0xff] %vm7276_vm2, %v7174_v25  ;;  %v6342_v36 = vmax.f32 %v6340_v6, %v16830_v39  ;;  %v6299_v33 = vrot.slane %v6298_v15, 1  ;;  %v5666_v25 = vmax.f32 %v5664_v22, %v5665_v51 }
 0x361   :  { %v7175_v5 = vsel %vm5091_vm1, %v20503_v57, %v6705_v27  ;;  %7590 = vst.msk [vmem:[%s18979_s4 + $0x9c8] sm:$0xff] %vm7276_vm2, %v7173_v34  ;;  %v4015_v27 = vmul.f32 %v15988_v55, %v16750_v50  ;;  %v6603_v57 = vpop.permute.xlu1 %6602  ;;  %v9124_v34 = vpop.f32.mrf.mxu1  ;;  %v4222_v39 = vmul.f32 %v15988_v55, %v16767_v53  ;;  %v5632_v6 = vrot.slane %v16539_v62, 4 }
 0x362   :  { %7592 = vst.msk [vmem:[%s18979_s4 + $0x9d8] sm:$0xff] %vm7276_vm2, %v7175_v5  ;;  %v6345_v45 = vsel %vm5091_vm1, %v19572_v44, -inf  ;;  %v4014_v5 = vmul.f32 %v15988_v55, %v16787_v40  ;;  %v4225_v50 = vmul.f32 %v15988_v55, %v9121_v63  ;;  %v6300_v51 = vmax.f32 %v6298_v15, %v6299_v33  ;;  %v20511_v63 = vld [vmem:[#allocation56_spill] sm:$0xff] }
 0x363   :  { %v16902_v11 = vadd.f32 %v16048_v12, %v4015_v27  ;;  %v16910_v22 = vadd.f32 %v16048_v12, %v4222_v39  ;;  %v5633_v53 = vmax.f32 %v16539_v62, %v5632_v6  ;;  %v20508_v29 = vmax.f32 %v20507_v35, 0.0  ;;  %v3700_v62 = vpop.f32.mrf.mxu1  ;;  %v20513_v33 = vld [vmem:[#allocation60_spill] sm:$0xff] }
 0x364   :  { %v16918_v28 = vadd.f32 %v16048_v12, %v4014_v5  ;;  %v16921_v40 = vadd.f32 %v16048_v12, %v4225_v50  ;;  %v20512_v31 = vmax.f32 %v20511_v63, 0.0  ;;  %6732 = vrot.lane.b32.xlu0 %v6300_v51, %s9180_s10  ;;  %v20514_v39 = vmax.f32 %v20513_v33, 0.0  ;;  %v20515_v5 = vld [vmem:[#allocation65_spill] sm:$0xff] }
 0x365   :  { %20505 = vst [vmem:[#allocation26_spill] sm:$0xff] %v16902_v11  ;;  %20506 = vst [vmem:[#allocation22_spill] sm:$0xff] %v16910_v22  ;;  %v6968_v44 = vsel %vm5091_vm1, %v20508_v29, %v6603_v57  ;;  %v19575_v27 = vmax.f32 %v16902_v11, 0.0  ;;  %v19577_v35 = vmax.f32 %v16910_v22, 0.0  ;;  %v5634_v29 = vrot.slane %v5633_v53, 2  ;;  %v9127_v22 = vpop.f32.mrf.mxu1 }
 0x366   :  { %20509 = vst [vmem:[#allocation20_spill] sm:$0xff] %v16918_v28  ;;  %20510 = vst [vmem:[#allocation25_spill] sm:$0xff] %v16921_v40  ;;  %v6969_v15 = vsel %vm5091_vm1, %v20512_v31, %v6603_v57  ;;  %v6970_v6 = vsel %vm5091_vm1, %v20514_v39, %v6603_v57  ;;  %v20516_v50 = vmax.f32 %v20515_v5, 0.0  ;;  %v19580_v51 = vmax.f32 %v16921_v40, 0.0 }
 0x367   :  { %7385 = vst.msk [vmem:[%s18979_s4 + $0x360] sm:$0xff] %vm7276_vm2, %v6968_v44  ;;  %7386 = vst.msk [vmem:[%s18979_s4 + $0x368] sm:$0xff] %vm7276_vm2, %v6969_v15  ;;  %v5669_v31 = vsel %vm5091_vm1, %v19575_v27, -inf  ;;  %v19578_v44 = vmax.f32 %v16918_v28, 0.0  ;;  %v2660_v15 = vpop.f32.mrf.mxu0  ;;  %v6343_v33 = vsel %vm5091_vm1, %v19577_v35, -inf  ;;  %v5635_v39 = vmax.f32 %v5633_v53, %v5634_v29  ;;  %v6707_v29 = vpop.permute.xlu1 %6706 }
 0x368   :  { %v6971_v63 = vsel %vm5091_vm1, %v20516_v50, %v6603_v57  ;;  %7387 = vst.msk [vmem:[%s18979_s4 + $0x370] sm:$0xff] %vm7276_vm2, %v6970_v6  ;;  %v4017_v57 = vmul.f32 %v15988_v55, %v16832_v37  ;;  %v4224_v5 = vmul.f32 %v15988_v55, %v3690_v17  ;;  %v6308_v50 = vrot.slane %v16531_v7, 4 }
 0x369   :  { %7388 = vst.msk [vmem:[%s18979_s4 + $0x378] sm:$0xff] %vm7276_vm2, %v6971_v63  ;;  %v6344_v27 = vmax.f32 %v6342_v36, %v6343_v33  ;;  %v5667_v6 = vsel %vm5091_vm1, %v19578_v44, -inf  ;;  %v16968_v63 = vsel %vm5091_vm1, %v19580_v51, -inf  ;;  %v5636_v35 = vrot.slane %v5635_v39, 1  ;;  %v8815_v11 = vpop.f32.mrf.mxu0 }
 0x36a   :  { %v16971_v37 = vadd.f32 %v16048_v12, %v4017_v57  ;;  %v5668_v53 = vmax.f32 %v5666_v25, %v5667_v6  ;;  %v16974_v17 = vadd.f32 %v16048_v12, %v4224_v5  ;;  %v6309_v36 = vmax.f32 %v16531_v7, %v6308_v50  ;;  %v20521_v5 = vld [vmem:[#allocation51_spill] sm:$0xff] }
 0x36b   :  { %v16977_v33 = vmax.f32 %v6344_v27, %v6345_v45  ;;  %v4016_v40 = vmul.f32 %v15988_v55, %v2650_v42  ;;  %v4227_v51 = vmul.f32 %v15988_v55, %v9124_v34  ;;  %v5637_v57 = vmax.f32 %v5635_v39, %v5636_v35  ;;  %v20519_v42 = vld [vmem:[#allocation55_spill] sm:$0xff]  ;;  %v3710_v35 = vpop.f32.mrf.mxu1 }
 0x36c   :  { %20517 = vst [vmem:[#allocation28_spill] sm:$0xff] %v16974_v17  ;;  %v19583_v44 = vmax.f32 %v16971_v37, 0.0  ;;  %v16982_v28 = vmax.f32 %v5668_v53, %v5669_v31  ;;  %v19584_v25 = vmax.f32 %v16974_v17, 0.0  ;;  %v6310_v6 = vrot.slane %v6309_v36, 2  ;;  %v20523_v53 = vld [vmem:[#allocation62_spill] sm:$0xff] }
 0x36d   :  { %v16991_v45 = vadd.f32 %v16048_v12, %v4016_v40  ;;  %v16994_v27 = vadd.f32 %v16048_v12, %v4227_v51  ;;  %v20520_v55 = vmax.f32 %v20519_v42, 0.0  ;;  %6630 = vrot.lane.b32.xlu1 %v5637_v57, %s9180_s10  ;;  %v20522_v50 = vmax.f32 %v20521_v5, 0.0 }
 0x36e   :  { %v16988_v7 = vsel %vm5091_vm1, %v19583_v44, -inf  ;;  %v6353_v31 = vsel %vm5091_vm1, %v19584_v25, -inf  ;;  %v6311_v39 = vmax.f32 %v6309_v36, %v6310_v6  ;;  %v20524_v44 = vmax.f32 %v20523_v53, 0.0  ;;  %v20525_v36 = vld [vmem:[#allocation58_spill] sm:$0xff] }
 0x36f   :  { %20518 = vst [vmem:[#allocation24_spill] sm:$0xff] %v16994_v27  ;;  %v7176_v34 = vsel %vm5091_vm1, %v20520_v55, %v6707_v29  ;;  %v7177_v40 = vsel %vm5091_vm1, %v20522_v50, %v6707_v29  ;;  %v6355_v51 = vmax.f32 %v6353_v31, %v16968_v63  ;;  %v19585_v57 = vmax.f32 %v16991_v45, 0.0  ;;  %v6605_v50 = vpop.permute.xlu0 %6604 }
 0x370   :  { %v7178_v12 = vsel %vm5091_vm1, %v20524_v44, %v6707_v29  ;;  %7593 = vst.msk [vmem:[%s18979_s4 + $0x9e0] sm:$0xff] %vm7276_vm2, %v7176_v34  ;;  %v19586_v42 = vmax.f32 %v16994_v27, 0.0  ;;  %v20526_v6 = vmax.f32 %v20525_v36, 0.0  ;;  %7594 = vst.msk [vmem:[%s18979_s4 + $0x9e8] sm:$0xff] %vm7276_vm2, %v7177_v40  ;;  %v2670_v44 = vpop.f32.mrf.mxu0  ;;  %v6312_v63 = vrot.slane %v6311_v39, 1 }
 0x371   :  { %7595 = vst.msk [vmem:[%s18979_s4 + $0x9f0] sm:$0xff] %vm7276_vm2, %v7178_v12  ;;  %v5645_v5 = vrot.slane %v16687_v32, 4  ;;  %v5677_v40 = vsel %vm5091_vm1, %v19585_v57, -inf }
 0x372   :  { %v7179_v55 = vsel %vm5091_vm1, %v20526_v6, %v6707_v29  ;;  %v17034_v29 = vld [vmem:[%s18977_s2] ss:$0 sm:$0xff]  ;;  %v6358_v53 = vsel %vm5091_vm1, %v19586_v42, -inf  ;;  %v9130_v6 = vpop.f32.mrf.mxu1 }
 0x373   :  { %7596 = vst.msk [vmem:[%s18979_s4 + $0x9f8] sm:$0xff] %vm7276_vm2, %v7179_v55  ;;  %v4019_v34 = vmul.f32 %v17034_v29, %v16907_v60  ;;  %v4226_v31 = vmul.f32 %v17034_v29, %v3700_v62  ;;  %v4018_v12 = vmul.f32 %v17034_v29, %v2660_v15  ;;  %v4229_v36 = vmul.f32 %v17034_v29, %v9127_v22  ;;  %v17052_v62 = vld [vmem:[%s18978_s3] ss:$0 sm:$0xff] }
 0x374   :  { %v6313_v55 = vmax.f32 %v6311_v39, %v6312_v63  ;;  %v5679_v60 = vmax.f32 %v5677_v40, %v16988_v7  ;;  %v5646_v42 = vmax.f32 %v16687_v32, %v5645_v5  ;;  %v20531_v7 = vmax.f32 %v14341_v24, 0.0  ;;  %v8818_v63 = vpop.f32.mrf.mxu0  ;;  %v20532_v40 = vld [vmem:[#allocation64_spill] sm:$0xff]  ;;  %v20534_v5 = vld [vmem:[#allocation70_spill] sm:$0xff] }
 0x375   :  { %v17055_v25 = vadd.f32 %v17052_v62, %v4019_v34  ;;  %v17058_v57 = vadd.f32 %v17052_v62, %v4226_v31  ;;  %v17062_v15 = vadd.f32 %v17052_v62, %v4018_v12  ;;  %v17065_v22 = vadd.f32 %v17052_v62, %v4229_v36  ;;  %v20536_v34 = vld [vmem:[#allocation66_spill] sm:$0xff] }
 0x376   :  { %v6972_v39 = vsel %vm5091_vm1, %v20531_v7, %v6605_v50  ;;  %6734 = vrot.lane.b32.xlu1 %v6313_v55, %s9180_s10  ;;  %v20533_v27 = vmax.f32 %v20532_v40, 0.0  ;;  %v20535_v12 = vmax.f32 %v20534_v5, 0.0  ;;  %v5647_v24 = vrot.slane %v5646_v42, 2 }
 0x377   :  { %20527 = vst [vmem:[#allocation27_spill] sm:$0xff] %v17055_v25  ;;  %20528 = vst [vmem:[#allocation30_spill] sm:$0xff] %v17058_v57  ;;  %v19591_v55 = vmax.f32 %v17062_v15, 0.0  ;;  %v20537_v31 = vmax.f32 %v20536_v34, 0.0 }
 0x378   :  { %20529 = vst [vmem:[#allocation34_spill] sm:$0xff] %v17062_v15  ;;  %20530 = vst [vmem:[#allocation31_spill] sm:$0xff] %v17065_v22  ;;  %v6973_v32 = vsel %vm5091_vm1, %v20533_v27, %v6605_v50  ;;  %v6974_v36 = vsel %vm5091_vm1, %v20535_v12, %v6605_v50  ;;  %v3720_v27 = vpop.f32.mrf.mxu1  ;;  %v20539_v12 = vmax.f32 %v17058_v57, 0.0 }
 0x379   :  { %7389 = vst.msk [vmem:[%s18979_s4 + $0x380] sm:$0xff] %vm7276_vm2, %v6972_v39  ;;  %v6975_v40 = vsel %vm5091_vm1, %v20537_v31, %v6605_v50  ;;  %7390 = vst.msk [vmem:[%s18979_s4 + $0x388] sm:$0xff] %vm7276_vm2, %v6973_v32  ;;  %v20538_v39 = vmax.f32 %v17055_v25, 0.0  ;;  %v4021_v50 = vmul.f32 %v17034_v29, %v8815_v11  ;;  %v4228_v31 = vmul.f32 %v17034_v29, %v3710_v35 }
 0x37a   :  { %7391 = vst.msk [vmem:[%s18979_s4 + $0x390] sm:$0xff] %vm7276_vm2, %v6974_v36  ;;  %v6356_v34 = vsel %vm5091_vm1, %v20539_v12, -inf  ;;  %7392 = vst.msk [vmem:[%s18979_s4 + $0x398] sm:$0xff] %vm7276_vm2, %v6975_v40  ;;  %v5648_v36 = vmax.f32 %v5646_v42, %v5647_v24  ;;  %v5680_v7 = vsel %vm5091_vm1, %v19591_v55, -inf  ;;  %v2680_v12 = vpop.f32.mrf.mxu0  ;;  %v6321_v35 = vrot.slane %v16678_v1, 4 }
 0x37b   :  { %v5682_v5 = vsel %vm5091_vm1, %v20538_v39, -inf  ;;  %v6357_v32 = vmax.f32 %v6355_v51, %v6356_v34  ;;  %v20540_v39 = vmax.f32 %v17065_v22, 0.0  ;;  %v5681_v17 = vmax.f32 %v5679_v60, %v5680_v7  ;;  %v6709_v51 = vpop.permute.xlu0 %6708 }
 0x37c   :  { %v17117_v25 = vadd.f32 %v17052_v62, %v4021_v50  ;;  %v17120_v11 = vadd.f32 %v17052_v62, %v4228_v31  ;;  %v5649_v24 = vrot.slane %v5648_v36, 1  ;;  %v4020_v40 = vmul.f32 %v17034_v29, %v2670_v44  ;;  %v8821_v15 = vpop.f32.mrf.mxu0 }
 0x37d   :  { %v17114_v57 = vsel %vm5091_vm1, %v20540_v39, -inf  ;;  %v17123_v42 = vmax.f32 %v6357_v32, %v6358_v53  ;;  %v4231_v34 = vmul.f32 %v17034_v29, %v9130_v6  ;;  %v9133_v39 = vpop.f32.mrf.mxu1  ;;  %v17127_v55 = vmax.f32 %v5681_v17, %v5682_v5  ;;  %v20545_v32 = vld [vmem:[#allocation63_spill] sm:$0xff] }
 0x37e   :  { %20541 = vst [vmem:[#allocation29_spill] sm:$0xff] %v17117_v25  ;;  %20542 = vst [vmem:[#allocation33_spill] sm:$0xff] %v17120_v11  ;;  %v19595_v60 = vmax.f32 %v17117_v25, 0.0  ;;  %v19594_v7 = vmax.f32 %v17120_v11, 0.0  ;;  %v6322_v50 = vmax.f32 %v16678_v1, %v6321_v35  ;;  %v5650_v31 = vmax.f32 %v5648_v36, %v5649_v24  ;;  %v20547_v36 = vld [vmem:[#allocation59_spill] sm:$0xff] }
 0x37f   :  { %v17133_v22 = vadd.f32 %v17052_v62, %v4020_v40  ;;  %v17136_v53 = vadd.f32 %v17052_v62, %v4231_v34  ;;  %v20546_v44 = vmax.f32 %v20545_v32, 0.0  ;;  %v20548_v35 = vmax.f32 %v20547_v36, 0.0  ;;  %v3730_v36 = vpop.f32.mrf.mxu1 }
 0x380   :  { %v5691_v17 = vsel %vm5091_vm1, %v19595_v60, -inf  ;;  %v6366_v1 = vsel %vm5091_vm1, %v19594_v7, -inf  ;;  %v6323_v5 = vrot.slane %v6322_v50, 2  ;;  %6632 = vrot.lane.b32.xlu0 %v5650_v31, %s9180_s10 }
 0x381   :  { %20543 = vst [vmem:[#allocation37_spill] sm:$0xff] %v17133_v22  ;;  %20544 = vst [vmem:[#allocation32_spill] sm:$0xff] %v17136_v53  ;;  %v7180_v6 = vsel %vm5091_vm1, %v20546_v44, %v6709_v51  ;;  %v7181_v24 = vsel %vm5091_vm1, %v20548_v35, %v6709_v51  ;;  %v6368_v40 = vmax.f32 %v6366_v1, %v17114_v57  ;;  %v19598_v34 = vmax.f32 %v17133_v22, 0.0  ;;  %v20549_v44 = vld [vmem:[#allocation73_spill] sm:$0xff]  ;;  %v6607_v1 = vpop.permute.xlu1 %6606 }
 0x382   :  { %7597 = vst.msk [vmem:[%s18979_s4 + $0xa00] sm:$0xff] %vm7276_vm2, %v7180_v6  ;;  %v19597_v32 = vmax.f32 %v17136_v53, 0.0  ;;  %v20550_v7 = vmax.f32 %v20549_v44, 0.0  ;;  %7598 = vst.msk [vmem:[%s18979_s4 + $0xa08] sm:$0xff] %vm7276_vm2, %v7181_v24  ;;  %v6324_v35 = vmax.f32 %v6322_v50, %v6323_v5  ;;  %v20551_v6 = vld [vmem:[#allocation69_spill] sm:$0xff]  ;;  %v4023_v57 = vmul.f32 %v17034_v29, %v8818_v63  ;;  %v9136_v53 = vpop.f32.mrf.mxu1 }
 0x383   :  { %v20552_v11 = vmax.f32 %v20551_v6, 0.0  ;;  %v5690_v24 = vsel %vm5091_vm1, %v19598_v34, -inf  ;;  %v4022_v63 = vmul.f32 %v17034_v29, %v2680_v12  ;;  %v20555_v34 = vmax.f32 %v14507_v46, 0.0 }
 0x384   :  { %v7182_v60 = vsel %vm5091_vm1, %v20550_v7, %v6709_v51  ;;  %v4230_v7 = vmul.f32 %v17034_v29, %v3720_v27  ;;  %v6371_v50 = vsel %vm5091_vm1, %v19597_v32, -inf  ;;  %v6325_v27 = vrot.slane %v6324_v35, 1 }
 0x385   :  { %v7183_v31 = vsel %vm5091_vm1, %v20552_v11, %v6709_v51  ;;  %7599 = vst.msk [vmem:[%s18979_s4 + $0xa10] sm:$0xff] %vm7276_vm2, %v7182_v60  ;;  %v5658_v11 = vrot.slane %v16848_v48, 4  ;;  %v2690_v51 = vpop.f32.mrf.mxu0  ;;  %v5692_v60 = vmax.f32 %v5690_v24, %v5691_v17  ;;  %v17187_v5 = vadd.f32 %v17052_v62, %v4023_v57  ;;  %v20556_v24 = vld [vmem:[#allocation67_spill] sm:$0xff] }
 0x386   :  { %7600 = vst.msk [vmem:[%s18979_s4 + $0xa18] sm:$0xff] %vm7276_vm2, %v7183_v31  ;;  %v17190_v44 = vadd.f32 %v17052_v62, %v4230_v7  ;;  %v17194_v32 = vadd.f32 %v17052_v62, %v4022_v63  ;;  %v4233_v31 = vmul.f32 %v17034_v29, %v9133_v39  ;;  %v6976_v12 = vsel %vm5091_vm1, %v20555_v34, %v6607_v1  ;;  %v20559_v34 = vld [vmem:[#allocation82_spill] sm:$0xff] }
 0x387   :  { %20553 = vst [vmem:[#allocation38_spill] sm:$0xff] %v17187_v5  ;;  %v5659_v6 = vmax.f32 %v16848_v48, %v5658_v11  ;;  %v6326_v25 = vmax.f32 %v6324_v35, %v6325_v27  ;;  %v19602_v17 = vmax.f32 %v17187_v5, 0.0  ;;  %v20557_v7 = vmax.f32 %v20556_v24, 0.0  ;;  %7393 = vst.msk [vmem:[%s18979_s4 + $0x3a0] sm:$0xff] %vm7276_vm2, %v6976_v12  ;;  %v8824_v63 = vpop.f32.mrf.mxu0  ;;  %v20561_v12 = vld [vmem:[#allocation77_spill] sm:$0xff] }
 0x388   :  { %20554 = vst [vmem:[#allocation35_spill] sm:$0xff] %v17190_v44  ;;  %v19603_v57 = vmax.f32 %v17190_v44, 0.0  ;;  %v19604_v46 = vmax.f32 %v17194_v32, 0.0  ;;  %v17211_v39 = vadd.f32 %v17052_v62, %v4233_v31  ;;  %v20560_v35 = vmax.f32 %v20559_v34, 0.0 }
 0x389   :  { %v6977_v22 = vsel %vm5091_vm1, %v20557_v7, %v6607_v1  ;;  %v5660_v48 = vrot.slane %v5659_v6, 2  ;;  %6736 = vrot.lane.b32.xlu0 %v6326_v25, %s9180_s10  ;;  %v5695_v27 = vsel %vm5091_vm1, %v19602_v17, -inf  ;;  %v20562_v24 = vmax.f32 %v20561_v12, 0.0 }
 0x38a   :  { %20558 = vst [vmem:[#allocation146_spill] sm:$0xff] %v17211_v39  ;;  %v6978_v11 = vsel %vm5091_vm1, %v20560_v35, %v6607_v1  ;;  %7394 = vst.msk [vmem:[%s18979_s4 + $0x3a8] sm:$0xff] %vm7276_vm2, %v6977_v22  ;;  %v6369_v31 = vsel %vm5091_vm1, %v19603_v57, -inf  ;;  %v4025_v22 = vmul.f32 %v17034_v29, %v8821_v15  ;;  %v5693_v35 = vsel %vm5091_vm1, %v19604_v46, -inf }
 0x38b   :  { %v6979_v7 = vsel %vm5091_vm1, %v20562_v24, %v6607_v1  ;;  %7395 = vst.msk [vmem:[%s18979_s4 + $0x3b0] sm:$0xff] %vm7276_vm2, %v6978_v11  ;;  %v6370_v25 = vmax.f32 %v6368_v40, %v6369_v31  ;;  %v5661_v34 = vmax.f32 %v5659_v6, %v5660_v48  ;;  %v19606_v17 = vmax.f32 %v17211_v39, 0.0  ;;  %v3740_v1 = vpop.f32.mrf.mxu1  ;;  %v6711_v6 = vpop.permute.xlu1 %6710  ;;  %v20566_v39 = vld [vmem:[#allocation72_spill] sm:$0xff] }
 0x38c   :  { %7396 = vst.msk [vmem:[%s18979_s4 + $0x3b8] sm:$0xff] %vm7276_vm2, %v6979_v7  ;;  %v5694_v12 = vmax.f32 %v5692_v60, %v5693_v35  ;;  %v17244_v24 = vadd.f32 %v17052_v62, %v4025_v22  ;;  %v4232_v15 = vmul.f32 %v17034_v29, %v3730_v36  ;;  %v6334_v40 = vrot.slane %v16822_v38, 4  ;;  %v2700_v7 = vpop.f32.mrf.mxu0 }
 0x38d   :  { %v17248_v48 = vmax.f32 %v6370_v25, %v6371_v50  ;;  %v5662_v11 = vrot.slane %v5661_v34, 1  ;;  %v6380_v31 = vsel %vm5091_vm1, %v19606_v17, -inf  ;;  %v4024_v57 = vmul.f32 %v17034_v29, %v2690_v51  ;;  %v9139_v44 = vpop.f32.mrf.mxu1 }
 0x38e   :  { %20563 = vst [vmem:[#allocation41_spill] sm:$0xff] %v17244_v24  ;;  %v17254_v46 = vmax.f32 %v5694_v12, %v5695_v27  ;;  %v19608_v60 = vmax.f32 %v17244_v24, 0.0  ;;  %v17258_v22 = vadd.f32 %v17052_v62, %v4232_v15  ;;  %v6335_v36 = vmax.f32 %v16822_v38, %v6334_v40  ;;  %v20568_v38 = vld [vmem:[#allocation68_spill] sm:$0xff] }
 0x38f   :  { %v5663_v35 = vmax.f32 %v5661_v34, %v5662_v11  ;;  %v17262_v50 = vadd.f32 %v17052_v62, %v4024_v57  ;;  %v4235_v25 = vmul.f32 %v17034_v29, %v9136_v53  ;;  %v20567_v17 = vmax.f32 %v20566_v39, 0.0  ;;  %v20571_v39 = vld [vmem:[#allocation74_spill] sm:$0xff] }
 0x390   :  { %20564 = vst [vmem:[#allocation40_spill] sm:$0xff] %v17258_v22  ;;  %v17271_v27 = vsel %vm5091_vm1, %v19608_v60, -inf  ;;  %v19609_v12 = vmax.f32 %v17258_v22, 0.0  ;;  %v6336_v15 = vrot.slane %v6335_v36, 2  ;;  %v20569_v34 = vmax.f32 %v20568_v38, 0.0  ;;  %v20573_v60 = vld [vmem:[#allocation71_spill] sm:$0xff] }
 0x391   :  { %20565 = vst [vmem:[#allocation36_spill] sm:$0xff] %v17262_v50  ;;  %v7184_v51 = vsel %vm5091_vm1, %v20567_v17, %v6711_v6  ;;  %6634 = vrot.lane.b32.xlu1 %v5663_v35, %s9180_s10  ;;  %v19610_v53 = vmax.f32 %v17262_v50, 0.0  ;;  %v17284_v17 = vadd.f32 %v17052_v62, %v4235_v25  ;;  %v20572_v40 = vmax.f32 %v20571_v39, 0.0 }
 0x392   :  { %v7185_v57 = vsel %vm5091_vm1, %v20569_v34, %v6711_v6  ;;  %7601 = vst.msk [vmem:[%s18979_s4 + $0xa20] sm:$0xff] %vm7276_vm2, %v7184_v51  ;;  %v20574_v38 = vmax.f32 %v20573_v60, 0.0  ;;  %v8827_v51 = vpop.f32.mrf.mxu0  ;;  %v6379_v35 = vsel %vm5091_vm1, %v19609_v12, -inf  ;;  %v6337_v25 = vmax.f32 %v6335_v36, %v6336_v15 }
 0x393   :  { %20570 = vst [vmem:[#allocation49_spill] sm:$0xff] %v17284_v17  ;;  %v7186_v11 = vsel %vm5091_vm1, %v20572_v40, %v6711_v6  ;;  %7602 = vst.msk [vmem:[%s18979_s4 + $0xa28] sm:$0xff] %vm7276_vm2, %v7185_v57  ;;  %v4234_v60 = vmul.f32 %v17034_v29, %v3740_v1  ;;  %v6381_v57 = vmax.f32 %v6379_v35, %v6380_v31  ;;  %v5703_v39 = vsel %vm5091_vm1, %v19610_v53, -inf  ;;  %v6609_v40 = vpop.permute.xlu0 %6608 }
 0x394   :  { %v7187_v34 = vsel %vm5091_vm1, %v20574_v38, %v6711_v6  ;;  %7603 = vst.msk [vmem:[%s18979_s4 + $0xa30] sm:$0xff] %vm7276_vm2, %v7186_v11  ;;  %v4027_v6 = vmul.f32 %v17034_v29, %v8824_v63  ;;  %v19616_v36 = vmax.f32 %v17284_v17, 0.0  ;;  %v5671_v15 = vrot.slane %v16982_v28, 4  ;;  %v3750_v11 = vpop.f32.mrf.mxu1  ;;  %v2710_v22 = vpop.f32.mrf.mxu0 }
 0x395   :  { %7604 = vst.msk [vmem:[%s18979_s4 + $0xa38] sm:$0xff] %vm7276_vm2, %v7187_v34  ;;  %v6338_v38 = vrot.slane %v6337_v25, 1  ;;  %v5705_v12 = vmax.f32 %v5703_v39, %v17271_v27  ;;  %v17319_v63 = vadd.f32 %v17052_v62, %v4234_v60  ;;  %v4026_v35 = vmul.f32 %v17034_v29, %v2700_v7  ;;  %v20576_v39 = vld [vmem:[#allocation81_spill] sm:$0xff]  ;;  %v20579_v7 = vld [vmem:[#allocation76_spill] sm:$0xff] }
 0x396   :  { %v17316_v34 = vadd.f32 %v17052_v62, %v4027_v6  ;;  %v6384_v1 = vsel %vm5091_vm1, %v19616_v36, -inf  ;;  %v5672_v31 = vmax.f32 %v16982_v28, %v5671_v15  ;;  %v4237_v53 = vmul.f32 %v17034_v29, %v9139_v44 }
 0x397   :  { %20575 = vst [vmem:[#allocation44_spill] sm:$0xff] %v17319_v63  ;;  %v6339_v24 = vmax.f32 %v6337_v25, %v6338_v38  ;;  %v19618_v6 = vmax.f32 %v17319_v63, 0.0  ;;  %v20577_v50 = vmax.f32 %v20576_v39, 0.0  ;;  %v17333_v17 = vadd.f32 %v17052_v62, %v4026_v35  ;;  %v9142_v25 = vpop.f32.mrf.mxu1  ;;  %v20582_v39 = vld [vmem:[#allocation88_spill] sm:$0xff] }
 0x398   :  { %v19617_v27 = vmax.f32 %v17316_v34, 0.0  ;;  %v5673_v5 = vrot.slane %v5672_v31, 2  ;;  %v17336_v28 = vadd.f32 %v17052_v62, %v4237_v53  ;;  %v20580_v15 = vmax.f32 %v20579_v7, 0.0 }
 0x399   :  { %v6980_v60 = vsel %vm5091_vm1, %v20577_v50, %v6609_v40  ;;  %6738 = vrot.lane.b32.xlu1 %v6339_v24, %s9180_s10  ;;  %v6382_v53 = vsel %vm5091_vm1, %v19618_v6, -inf  ;;  %v20581_v38 = vmax.f32 %v14729_v18, 0.0  ;;  %v20583_v7 = vmax.f32 %v20582_v39, 0.0  ;;  %v8830_v18 = vpop.f32.mrf.mxu0 }
 0x39a   :  { %20578 = vst [vmem:[#allocation43_spill] sm:$0xff] %v17336_v28  ;;  %v6981_v44 = vsel %vm5091_vm1, %v20580_v15, %v6609_v40  ;;  %7397 = vst.msk [vmem:[%s18979_s4 + $0x3c0] sm:$0xff] %vm7276_vm2, %v6980_v60  ;;  %v5708_v50 = vsel %vm5091_vm1, %v19617_v27, -inf  ;;  %v6383_v24 = vmax.f32 %v6381_v57, %v6382_v53  ;;  %v5674_v60 = vmax.f32 %v5672_v31, %v5673_v5 }
 0x39b   :  { %v6982_v35 = vsel %vm5091_vm1, %v20581_v38, %v6609_v40  ;;  %v6983_v15 = vsel %vm5091_vm1, %v20583_v7, %v6609_v40  ;;  %7398 = vst.msk [vmem:[%s18979_s4 + $0x3c8] sm:$0xff] %vm7276_vm2, %v6981_v44  ;;  %v19619_v36 = vmax.f32 %v17333_v17, 0.0  ;;  %v19621_v27 = vmax.f32 %v17336_v28, 0.0  ;;  %v6713_v44 = vpop.permute.xlu0 %6712  ;;  %v2720_v63 = vpop.f32.mrf.mxu0 }
 0x39c   :  { %7399 = vst.msk [vmem:[%s18979_s4 + $0x3d0] sm:$0xff] %vm7276_vm2, %v6982_v35  ;;  %7400 = vst.msk [vmem:[%s18979_s4 + $0x3d8] sm:$0xff] %vm7276_vm2, %v6983_v15  ;;  %v4029_v40 = vmul.f32 %v17034_v29, %v8827_v51  ;;  %v4236_v57 = vmul.f32 %v17034_v29, %v3750_v11  ;;  %v6347_v5 = vrot.slane %v16977_v33, 4  ;;  %v4028_v31 = vmul.f32 %v17034_v29, %v2710_v22  ;;  %v3760_v51 = vpop.f32.mrf.mxu1 }
 0x39d   :  { %v17376_v53 = vmax.f32 %v6383_v24, %v6384_v1  ;;  %v5675_v38 = vrot.slane %v5674_v60, 1  ;;  %v5706_v35 = vsel %vm5091_vm1, %v19619_v36, -inf  ;;  %v17384_v39 = vsel %vm5091_vm1, %v19621_v27, -inf  ;;  %v20587_v36 = vld [vmem:[#allocation75_spill] sm:$0xff] }
 0x39e   :  { %v5707_v7 = vmax.f32 %v5705_v12, %v5706_v35  ;;  %v17387_v11 = vadd.f32 %v17052_v62, %v4029_v40  ;;  %v17390_v22 = vadd.f32 %v17052_v62, %v4236_v57  ;;  %v6348_v1 = vmax.f32 %v16977_v33, %v6347_v5 }
 0x39f   :  { %v5676_v15 = vmax.f32 %v5674_v60, %v5675_v38  ;;  %v17394_v24 = vadd.f32 %v17052_v62, %v4028_v31  ;;  %v4239_v6 = vmul.f32 %v17034_v29, %v9142_v25  ;;  %v20588_v28 = vmax.f32 %v20587_v36, 0.0  ;;  %v20592_v60 = vld [vmem:[#allocation83_spill] sm:$0xff]  ;;  %v9145_v38 = vpop.f32.mrf.mxu1 }
 0x3a0   :  { %20584 = vst [vmem:[#allocation5_spill] sm:$0xff] %v17387_v11  ;;  %20585 = vst [vmem:[#allocation42_spill] sm:$0xff] %v17390_v22  ;;  %v17400_v12 = vmax.f32 %v5707_v7, %v5708_v50  ;;  %v19624_v40 = vmax.f32 %v17387_v11, 0.0  ;;  %v19623_v57 = vmax.f32 %v17390_v22, 0.0  ;;  %v6349_v35 = vrot.slane %v6348_v1, 2 }
 0x3a1   :  { %20586 = vst [vmem:[#allocation39_spill] sm:$0xff] %v17394_v24  ;;  %v7188_v27 = vsel %vm5091_vm1, %v20588_v28, %v6713_v44  ;;  %6636 = vrot.lane.b32.xlu0 %v5676_v15, %s9180_s10  ;;  %v17411_v36 = vadd.f32 %v17052_v62, %v4239_v6  ;;  %v20590_v28 = vld [vmem:[#allocation78_spill] sm:$0xff]  ;;  %v20593_v5 = vmax.f32 %v20592_v60, 0.0  ;;  %v20594_v6 = vld [vmem:[#allocation79_spill] sm:$0xff]  ;;  %v20596_v60 = vmax.f32 %v17394_v24, 0.0 }
 0x3a2   :  { %7605 = vst.msk [vmem:[%s18979_s4 + $0xa40] sm:$0xff] %vm7276_vm2, %v7188_v27  ;;  %v20591_v25 = vmax.f32 %v20590_v28, 0.0  ;;  %v5717_v27 = vsel %vm5091_vm1, %v19624_v40, -inf  ;;  %v6392_v7 = vsel %vm5091_vm1, %v19623_v57, -inf  ;;  %v6350_v15 = vmax.f32 %v6348_v1, %v6349_v35 }
 0x3a3   :  { %20589 = vst [vmem:[#allocation45_spill] sm:$0xff] %v17411_v36  ;;  %v7190_v31 = vsel %vm5091_vm1, %v20593_v5, %v6713_v44  ;;  %v20595_v33 = vmax.f32 %v20594_v6, 0.0  ;;  %v5716_v1 = vsel %vm5091_vm1, %v20596_v60, -inf  ;;  %v19627_v35 = vmax.f32 %v17411_v36, 0.0 }
 0x3a4   :  { %v7189_v50 = vsel %vm5091_vm1, %v20591_v25, %v6713_v44  ;;  %7607 = vst.msk [vmem:[%s18979_s4 + $0xa50] sm:$0xff] %vm7276_vm2, %v7190_v31  ;;  %v6394_v25 = vmax.f32 %v6392_v7, %v17384_v39  ;;  %v6351_v5 = vrot.slane %v6350_v15, 1  ;;  %v5718_v6 = vmax.f32 %v5716_v1, %v5717_v27  ;;  %v20599_v27 = vld [vmem:[#allocation85_spill] sm:$0xff] }
 0x3a5   :  { %v7191_v28 = vsel %vm5091_vm1, %v20595_v33, %v6713_v44  ;;  %7606 = vst.msk [vmem:[%s18979_s4 + $0xa48] sm:$0xff] %vm7276_vm2, %v7189_v50  ;;  %v4031_v44 = vmul.f32 %v17034_v29, %v8830_v18  ;;  %v6611_v33 = vpop.permute.xlu1 %6610  ;;  %v8833_v50 = vpop.f32.mrf.mxu0  ;;  %v4238_v31 = vmul.f32 %v17034_v29, %v3760_v51  ;;  %v5684_v39 = vrot.slane %v17127_v55, 4 }
 0x3a6   :  { %7608 = vst.msk [vmem:[%s18979_s4 + $0xa58] sm:$0xff] %vm7276_vm2, %v7191_v28  ;;  %v6397_v7 = vsel %vm5091_vm1, %v19627_v35, -inf  ;;  %v4030_v57 = vmul.f32 %v17034_v29, %v2720_v63  ;;  %v4241_v28 = vmul.f32 %v17034_v29, %v9145_v38  ;;  %v3770_v18 = vpop.f32.mrf.mxu1  ;;  %v6352_v40 = vmax.f32 %v6350_v15, %v6351_v5  ;;  %v20603_v38 = vld [vmem:[#allocation89_spill] sm:$0xff] }
 0x3a7   :  { %v17452_v60 = vadd.f32 %v17052_v62, %v4031_v44  ;;  %v17457_v22 = vadd.f32 %v17052_v62, %v4238_v31  ;;  %v5685_v51 = vmax.f32 %v17127_v55, %v5684_v39  ;;  %v20600_v1 = vmax.f32 %v20599_v27, 0.0  ;;  %v2730_v55 = vpop.f32.mrf.mxu0  ;;  %v20607_v27 = vld [vmem:[#allocation91_spill] sm:$0xff] }
 0x3a8   :  { %v17465_v44 = vadd.f32 %v17052_v62, %v4030_v57  ;;  %v17468_v63 = vadd.f32 %v17052_v62, %v4241_v28  ;;  %v20604_v11 = vmax.f32 %v20603_v38, 0.0  ;;  %6740 = vrot.lane.b32.xlu0 %v6352_v40, %s9180_s10  ;;  %v20605_v57 = vld [vmem:[#allocation94_spill] sm:$0xff] }
 0x3a9   :  { %20597 = vst [vmem:[#allocation46_spill] sm:$0xff] %v17452_v60  ;;  %20598 = vst [vmem:[#allocation50_spill] sm:$0xff] %v17457_v22  ;;  %v6984_v36 = vsel %vm5091_vm1, %v20600_v1, %v6611_v33  ;;  %v19629_v35 = vmax.f32 %v17452_v60, 0.0  ;;  %v19631_v5 = vmax.f32 %v17457_v22, 0.0  ;;  %v5686_v31 = vrot.slane %v5685_v51, 2  ;;  %v8836_v22 = vpop.f32.mrf.mxu0 }
 0x3aa   :  { %20601 = vst [vmem:[#allocation47_spill] sm:$0xff] %v17465_v44  ;;  %20602 = vst [vmem:[#allocation54_spill] sm:$0xff] %v17468_v63  ;;  %v6985_v15 = vsel %vm5091_vm1, %v20604_v11, %v6611_v33  ;;  %v20606_v39 = vmax.f32 %v20605_v57, 0.0  ;;  %v20608_v1 = vmax.f32 %v20607_v27, 0.0  ;;  %v19632_v40 = vmax.f32 %v17465_v44, 0.0 }
 0x3ab   :  { %7401 = vst.msk [vmem:[%s18979_s4 + $0x3e0] sm:$0xff] %vm7276_vm2, %v6984_v36  ;;  %7402 = vst.msk [vmem:[%s18979_s4 + $0x3e8] sm:$0xff] %vm7276_vm2, %v6985_v15  ;;  %v5721_v11 = vsel %vm5091_vm1, %v19629_v35, -inf  ;;  %v19634_v36 = vmax.f32 %v17468_v63, 0.0  ;;  %v9148_v15 = vpop.f32.mrf.mxu1  ;;  %v6395_v57 = vsel %vm5091_vm1, %v19631_v5, -inf  ;;  %v4240_v27 = vmul.f32 %v17034_v29, %v3770_v18 }
 0x3ac   :  { %v6986_v28 = vsel %vm5091_vm1, %v20606_v39, %v6611_v33  ;;  %v6987_v38 = vsel %vm5091_vm1, %v20608_v1, %v6611_v33  ;;  %v4033_v33 = vmul.f32 %v17034_v29, %v8833_v50  ;;  %v5687_v39 = vmax.f32 %v5685_v51, %v5686_v31 }
 0x3ad   :  { %7403 = vst.msk [vmem:[%s18979_s4 + $0x3f0] sm:$0xff] %vm7276_vm2, %v6986_v28  ;;  %7404 = vst.msk [vmem:[%s18979_s4 + $0x3f8] sm:$0xff] %vm7276_vm2, %v6987_v38  ;;  %v6360_v1 = vrot.slane %v17123_v42, 4  ;;  %v6396_v35 = vmax.f32 %v6394_v25, %v6395_v57  ;;  %v5719_v28 = vsel %vm5091_vm1, %v19632_v40, -inf  ;;  %v17514_v38 = vsel %vm5091_vm1, %v19634_v36, -inf  ;;  %v6715_v36 = vpop.permute.xlu1 %6714  ;;  %v3780_v60 = vpop.f32.mrf.mxu1 }
 0x3ae   :  { %v17517_v50 = vadd.f32 %v17052_v62, %v4033_v33  ;;  %v5688_v5 = vrot.slane %v5687_v39, 1  ;;  %v5720_v51 = vmax.f32 %v5718_v6, %v5719_v28  ;;  %v17520_v18 = vadd.f32 %v17052_v62, %v4240_v27 }
 0x3af   :  { %v6361_v25 = vmax.f32 %v17123_v42, %v6360_v1  ;;  %v6398_v31 = vmax.f32 %v6396_v35, %v6397_v7  ;;  %v4032_v40 = vmul.f32 %v17034_v29, %v2730_v55  ;;  %v4243_v63 = vmul.f32 %v17034_v29, %v9148_v15  ;;  %v2740_v55 = vpop.f32.mrf.mxu0  ;;  %v20613_v15 = vld [vmem:[#allocation86_spill] sm:$0xff]  ;;  %v20615_v1 = vld [vmem:[#allocation93_spill] sm:$0xff] }
 0x3b0   :  { %20609 = vst [vmem:[#allocation52_spill] sm:$0xff] %v17517_v50  ;;  %20610 = vst [vmem:[#allocation48_spill] sm:$0xff] %v17520_v18  ;;  %v19638_v57 = vmax.f32 %v17517_v50, 0.0  ;;  %v5689_v44 = vmax.f32 %v5687_v39, %v5688_v5  ;;  %v17526_v33 = vmax.f32 %v5720_v51, %v5721_v11  ;;  %v19641_v24 = vmax.f32 %v17520_v18, 0.0 }
 0x3b1   :  { %v6362_v6 = vrot.slane %v6361_v25, 2  ;;  %v6399_v28 = vrot.slane %v6398_v31, 4  ;;  %v17535_v35 = vadd.f32 %v17052_v62, %v4032_v40  ;;  %v17538_v7 = vadd.f32 %v17052_v62, %v4243_v63 }
 0x3b2   :  { %v17532_v42 = vsel %vm5091_vm1, %v19638_v57, -inf  ;;  %6638 = vrot.lane.b32.xlu1 %v5689_v44, %s9180_s10  ;;  %v6405_v5 = vsel %vm5091_vm1, %v19641_v24, -inf  ;;  %v20614_v39 = vmax.f32 %v20613_v15, 0.0  ;;  %v20616_v51 = vmax.f32 %v20615_v1, 0.0 }
 0x3b3   :  { %20611 = vst [vmem:[#allocation53_spill] sm:$0xff] %v17535_v35  ;;  %20612 = vst [vmem:[#allocation57_spill] sm:$0xff] %v17538_v7  ;;  %v6363_v11 = vmax.f32 %v6361_v25, %v6362_v6  ;;  %v17550_v57 = vmax.f32 %v6398_v31, %v6399_v28  ;;  %v6407_v63 = vmax.f32 %v6405_v5, %v17514_v38  ;;  %v19642_v50 = vmax.f32 %v17535_v35, 0.0  ;;  %v9151_v25 = vpop.f32.mrf.mxu1  ;;  %v20617_v31 = vld [vmem:[#allocation100_spill] sm:$0xff] }
 0x3b4   :  { %v7192_v27 = vsel %vm5091_vm1, %v20614_v39, %v6715_v36  ;;  %v7193_v40 = vsel %vm5091_vm1, %v20616_v51, %v6715_v36  ;;  %v19640_v44 = vmax.f32 %v17538_v7, 0.0  ;;  %v20618_v28 = vmax.f32 %v20617_v31, 0.0  ;;  %v20619_v5 = vld [vmem:[#allocation92_spill] sm:$0xff]  ;;  %v6613_v51 = vpop.permute.xlu0 %6612  ;;  %v8839_v31 = vpop.f32.mrf.mxu0 }
 0x3b5   :  { %7609 = vst.msk [vmem:[%s18979_s4 + $0xa60] sm:$0xff] %vm7276_vm2, %v7192_v27  ;;  %7610 = vst.msk [vmem:[%s18979_s4 + $0xa68] sm:$0xff] %vm7276_vm2, %v7193_v40  ;;  %v6364_v6 = vrot.slane %v6363_v11, 1  ;;  %v20620_v15 = vmax.f32 %v20619_v5, 0.0  ;;  %v4035_v1 = vmul.f32 %v17034_v29, %v8836_v22  ;;  %v5729_v27 = vsel %vm5091_vm1, %v19642_v50, -inf  ;;  %v3790_v7 = vpop.f32.mrf.mxu1 }
 0x3b6   :  { %v7194_v38 = vsel %vm5091_vm1, %v20618_v28, %v6715_v36  ;;  %v6410_v40 = vsel %vm5091_vm1, %v19640_v44, -inf  ;;  %v4242_v22 = vmul.f32 %v17034_v29, %v3780_v60  ;;  %v5731_v5 = vmax.f32 %v5729_v27, %v17532_v42  ;;  %v20627_v27 = vld [vmem:[#allocation111_spill] sm:$0xff] }
 0x3b7   :  { %v7195_v39 = vsel %vm5091_vm1, %v20620_v15, %v6715_v36  ;;  %7611 = vst.msk [vmem:[%s18979_s4 + $0xa70] sm:$0xff] %vm7276_vm2, %v7194_v38  ;;  %v5697_v36 = vrot.slane %v17254_v46, 4  ;;  %v6365_v28 = vmax.f32 %v6363_v11, %v6364_v6  ;;  %v17588_v15 = vadd.f32 %v17052_v62, %v4035_v1 }
 0x3b8   :  { %7612 = vst.msk [vmem:[%s18979_s4 + $0xa78] sm:$0xff] %vm7276_vm2, %v7195_v39  ;;  %v4034_v44 = vmul.f32 %v17034_v29, %v2740_v55  ;;  %v17592_v38 = vadd.f32 %v17052_v62, %v4242_v22  ;;  %v4245_v39 = vmul.f32 %v17034_v29, %v9151_v25  ;;  %v20623_v60 = vmax.f32 %v14968_v16, 0.0  ;;  %v20625_v55 = vld [vmem:[#allocation101_spill] sm:$0xff]  ;;  %v6717_v18 = vpop.permute.xlu0 %6716 }
 0x3b9   :  { %20621 = vst [vmem:[#allocation61_spill] sm:$0xff] %v17588_v15  ;;  %v5698_v24 = vmax.f32 %v17254_v46, %v5697_v36  ;;  %6742 = vrot.lane.b32.xlu1 %v6365_v28, %s9180_s10  ;;  %v19644_v42 = vmax.f32 %v17588_v15, 0.0  ;;  %v20626_v6 = vmax.f32 %v20625_v55, 0.0  ;;  %v20628_v46 = vmax.f32 %v20627_v27, 0.0 }
 0x3ba   :  { %20622 = vst [vmem:[#allocation56_spill] sm:$0xff] %v17592_v38  ;;  %v6988_v50 = vsel %vm5091_vm1, %v20623_v60, %v6613_v51  ;;  %v17602_v11 = vadd.f32 %v17052_v62, %v4034_v44  ;;  %v19646_v16 = vmax.f32 %v17592_v38, 0.0  ;;  %v17616_v36 = vadd.f32 %v17052_v62, %v4245_v39  ;;  %v20630_v44 = vld [vmem:[#allocation103_spill] sm:$0xff] }
 0x3bb   :  { %v6989_v1 = vsel %vm5091_vm1, %v20626_v6, %v6613_v51  ;;  %v6990_v25 = vsel %vm5091_vm1, %v20628_v46, %v6613_v51  ;;  %7405 = vst.msk [vmem:[%s18979_s4 + $0x400] sm:$0xff] %vm7276_vm2, %v6988_v50  ;;  %v5699_v22 = vrot.slane %v5698_v24, 2  ;;  %v20631_v28 = vmax.f32 %v20630_v44, 0.0  ;;  %v2750_v50 = vpop.f32.mrf.mxu0  ;;  %v9154_v44 = vpop.f32.mrf.mxu1 }
 0x3bc   :  { %20624 = vst [vmem:[#allocation60_spill] sm:$0xff] %v17602_v11  ;;  %20629 = vst [vmem:[#allocation65_spill] sm:$0xff] %v17616_v36  ;;  %v5734_v39 = vsel %vm5091_vm1, %v19644_v42, -inf  ;;  %v19647_v55 = vmax.f32 %v17602_v11, 0.0  ;;  %v4244_v6 = vmul.f32 %v17034_v29, %v3790_v7  ;;  %v19651_v46 = vmax.f32 %v17616_v36, 0.0 }
 0x3bd   :  { %v6991_v60 = vsel %vm5091_vm1, %v20631_v28, %v6613_v51  ;;  %7406 = vst.msk [vmem:[%s18979_s4 + $0x408] sm:$0xff] %vm7276_vm2, %v6989_v1  ;;  %7407 = vst.msk [vmem:[%s18979_s4 + $0x410] sm:$0xff] %vm7276_vm2, %v6990_v25  ;;  %v4037_v51 = vmul.f32 %v17034_v29, %v8839_v31  ;;  %v6408_v1 = vsel %vm5091_vm1, %v19646_v16, -inf  ;;  %v5700_v27 = vmax.f32 %v5698_v24, %v5699_v22  ;;  %v3800_v36 = vpop.f32.mrf.mxu1 }
 0x3be   :  { %7408 = vst.msk [vmem:[%s18979_s4 + $0x418] sm:$0xff] %vm7276_vm2, %v6991_v60  ;;  %v6373_v25 = vrot.slane %v17248_v48, 4  ;;  %v6409_v28 = vmax.f32 %v6407_v63, %v6408_v1  ;;  %v5732_v42 = vsel %vm5091_vm1, %v19647_v55, -inf  ;;  %v17651_v7 = vadd.f32 %v17052_v62, %v4244_v6  ;;  %v8842_v63 = vpop.f32.mrf.mxu0 }
 0x3bf   :  { %v17648_v60 = vadd.f32 %v17052_v62, %v4037_v51  ;;  %v5701_v31 = vrot.slane %v5700_v27, 1  ;;  %v5733_v38 = vmax.f32 %v5731_v5, %v5732_v42  ;;  %v17656_v24 = vsel %vm5091_vm1, %v19651_v46, -inf }
 0x3c0   :  { %20633 = vst [vmem:[#allocation51_spill] sm:$0xff] %v17651_v7  ;;  %v6374_v22 = vmax.f32 %v17248_v48, %v6373_v25  ;;  %v6411_v1 = vmax.f32 %v6409_v28, %v6410_v40  ;;  %v19653_v55 = vmax.f32 %v17651_v7, 0.0  ;;  %v4036_v51 = vmul.f32 %v17034_v29, %v2750_v50  ;;  %v20636_v25 = vld [vmem:[#allocation99_spill] sm:$0xff]  ;;  %v20638_v7 = vld [vmem:[#allocation105_spill] sm:$0xff] }
 0x3c1   :  { %20632 = vst [vmem:[#allocation55_spill] sm:$0xff] %v17648_v60  ;;  %v19652_v16 = vmax.f32 %v17648_v60, 0.0  ;;  %v5702_v6 = vmax.f32 %v5700_v27, %v5701_v31  ;;  %v17662_v15 = vmax.f32 %v5733_v38, %v5734_v39  ;;  %v4247_v42 = vmul.f32 %v17034_v29, %v9154_v44  ;;  %v2760_v31 = vpop.f32.mrf.mxu0 }
 0x3c2   :  { %v6375_v5 = vrot.slane %v6374_v22, 2  ;;  %v6412_v46 = vrot.slane %v6411_v1, 4  ;;  %v6418_v40 = vsel %vm5091_vm1, %v19653_v55, -inf  ;;  %v17674_v50 = vadd.f32 %v17052_v62, %v4036_v51 }
 0x3c3   :  { %v17668_v48 = vsel %vm5091_vm1, %v19652_v16, -inf  ;;  %6640 = vrot.lane.b32.xlu0 %v5702_v6, %s9180_s10  ;;  %v6420_v38 = vmax.f32 %v6418_v40, %v17656_v24  ;;  %v17679_v27 = vadd.f32 %v17052_v62, %v4247_v42  ;;  %v20637_v44 = vmax.f32 %v20636_v25, 0.0  ;;  %v20640_v6 = vld [vmem:[#allocation102_spill] sm:$0xff] }
 0x3c4   :  { %20634 = vst [vmem:[#allocation62_spill] sm:$0xff] %v17674_v50  ;;  %v6376_v39 = vmax.f32 %v6374_v22, %v6375_v5  ;;  %v17684_v16 = vmax.f32 %v6411_v1, %v6412_v46  ;;  %v19658_v55 = vmax.f32 %v17674_v50, 0.0  ;;  %v20639_v51 = vmax.f32 %v20638_v7, 0.0  ;;  %v6615_v22 = vpop.permute.xlu1 %6614  ;;  %v20642_v1 = vld [vmem:[#allocation97_spill] sm:$0xff]  ;;  %v9157_v7 = vpop.f32.mrf.mxu1 }
 0x3c5   :  { %20635 = vst [vmem:[#allocation58_spill] sm:$0xff] %v17679_v27  ;;  %v7196_v28 = vsel %vm5091_vm1, %v20637_v44, %v6717_v18  ;;  %v20641_v11 = vmax.f32 %v20640_v6, 0.0  ;;  %v19657_v46 = vmax.f32 %v17679_v27, 0.0  ;;  %v20643_v42 = vmax.f32 %v20642_v1, 0.0 }
 0x3c6   :  { %v7197_v60 = vsel %vm5091_vm1, %v20639_v51, %v6717_v18  ;;  %7613 = vst.msk [vmem:[%s18979_s4 + $0xa80] sm:$0xff] %vm7276_vm2, %v7196_v28  ;;  %v6377_v5 = vrot.slane %v6376_v39, 1  ;;  %v5742_v25 = vsel %vm5091_vm1, %v19658_v55, -inf  ;;  %v4038_v44 = vmul.f32 %v17034_v29, %v2760_v31 }
 0x3c7   :  { %v7198_v24 = vsel %vm5091_vm1, %v20641_v11, %v6717_v18  ;;  %v7199_v40 = vsel %vm5091_vm1, %v20643_v42, %v6717_v18  ;;  %7614 = vst.msk [vmem:[%s18979_s4 + $0xa88] sm:$0xff] %vm7276_vm2, %v7197_v60  ;;  %v4039_v11 = vmul.f32 %v17034_v29, %v8842_v63  ;;  %v4246_v18 = vmul.f32 %v17034_v29, %v3800_v36 }
 0x3c8   :  { %7615 = vst.msk [vmem:[%s18979_s4 + $0xa90] sm:$0xff] %vm7276_vm2, %v7198_v24  ;;  %7616 = vst.msk [vmem:[%s18979_s4 + $0xa98] sm:$0xff] %vm7276_vm2, %v7199_v40  ;;  %v5710_v60 = vrot.slane %v17400_v12, 4  ;;  %v6378_v28 = vmax.f32 %v6376_v39, %v6377_v5  ;;  %v5744_v51 = vmax.f32 %v5742_v25, %v17668_v48  ;;  %v6423_v63 = vsel %vm5091_vm1, %v19657_v46, -inf  ;;  %v8845_v24 = vpop.f32.mrf.mxu0  ;;  %v20648_v40 = vld [vmem:[#allocation115_spill] sm:$0xff] }
 0x3c9   :  { %v17725_v6 = vadd.f32 %v17052_v62, %v4039_v11  ;;  %v17728_v1 = vadd.f32 %v17052_v62, %v4246_v18  ;;  %v17732_v42 = vadd.f32 %v17052_v62, %v4038_v44  ;;  %v4249_v39 = vmul.f32 %v17034_v29, %v9157_v7  ;;  %v20650_v18 = vld [vmem:[#allocation113_spill] sm:$0xff] }
 0x3ca   :  { %v5711_v36 = vmax.f32 %v17400_v12, %v5710_v60  ;;  %6744 = vrot.lane.b32.xlu0 %v6378_v28, %s9180_s10  ;;  %v20647_v31 = vmax.f32 %v15139_v41, 0.0  ;;  %v20649_v11 = vmax.f32 %v20648_v40, 0.0  ;;  %v20651_v46 = vmax.f32 %v20650_v18, 0.0  ;;  %v3810_v60 = vpop.f32.mrf.mxu1  ;;  %v6719_v41 = vpop.permute.xlu1 %6718 }
 0x3cb   :  { %20644 = vst [vmem:[#allocation64_spill] sm:$0xff] %v17725_v6  ;;  %20645 = vst [vmem:[#allocation70_spill] sm:$0xff] %v17728_v1  ;;  %v19661_v48 = vmax.f32 %v17725_v6, 0.0  ;;  %v19662_v44 = vmax.f32 %v17728_v1, 0.0  ;;  %v17749_v55 = vadd.f32 %v17052_v62, %v4249_v39  ;;  %v2770_v18 = vpop.f32.mrf.mxu0  ;;  %v20655_v27 = vmax.f32 %v17732_v42, 0.0 }
 0x3cc   :  { %20646 = vst [vmem:[#allocation66_spill] sm:$0xff] %v17732_v42  ;;  %v6992_v5 = vsel %vm5091_vm1, %v20647_v31, %v6615_v22  ;;  %v6993_v25 = vsel %vm5091_vm1, %v20649_v11, %v6615_v22  ;;  %v6994_v12 = vsel %vm5091_vm1, %v20651_v46, %v6615_v22  ;;  %v5712_v7 = vrot.slane %v5711_v36, 2  ;;  %v17763_v46 = vpop.permute.xlu0 %6616  ;;  %v20653_v31 = vld [vmem:[#allocation109_spill] sm:$0xff] }
 0x3cd   :  { %20652 = vst [vmem:[#allocation63_spill] sm:$0xff] %v17749_v55  ;;  %7409 = vst.msk [vmem:[%s18979_s4 + $0x420] sm:$0xff] %vm7276_vm2, %v6992_v5  ;;  %v5747_v39 = vsel %vm5091_vm1, %v19661_v48, -inf  ;;  %v20654_v40 = vmax.f32 %v20653_v31, 0.0  ;;  %v4041_v11 = vmul.f32 %v17034_v29, %v8845_v24  ;;  %v5745_v6 = vsel %vm5091_vm1, %v20655_v27, -inf }
 0x3ce   :  { %7410 = vst.msk [vmem:[%s18979_s4 + $0x428] sm:$0xff] %vm7276_vm2, %v6993_v25  ;;  %7411 = vst.msk [vmem:[%s18979_s4 + $0x430] sm:$0xff] %vm7276_vm2, %v6994_v12  ;;  %v4248_v25 = vmul.f32 %v17034_v29, %v3810_v60  ;;  %v6421_v12 = vsel %vm5091_vm1, %v19662_v44, -inf  ;;  %v5713_v28 = vmax.f32 %v5711_v36, %v5712_v7  ;;  %v19664_v48 = vmax.f32 %v17749_v55, 0.0  ;;  %v9160_v44 = vpop.f32.mrf.mxu1 }
 0x3cf   :  { %v6995_v5 = vsel %vm5091_vm1, %v20654_v40, %v6615_v22  ;;  %v6422_v22 = vmax.f32 %v6420_v38, %v6421_v12  ;;  %v5746_v24 = vmax.f32 %v5744_v51, %v5745_v6  ;;  %v17785_v60 = vadd.f32 %v17052_v62, %v4041_v11 }
 0x3d0   :  { %7412 = vst.msk [vmem:[%s18979_s4 + $0x438] sm:$0xff] %vm7276_vm2, %v6995_v5  ;;  %v17788_v31 = vadd.f32 %v17052_v62, %v4248_v25  ;;  %v5714_v36 = vrot.slane %v5713_v28, 1  ;;  %v17793_v27 = vsel %vm5091_vm1, %v19664_v48, -inf  ;;  %v6386_v7 = vrot.slane %v17376_v53, 4  ;;  %v17797_v5 = vpop.permute.xlu1 %6618  ;;  %v8848_v25 = vpop.f32.mrf.mxu0 }
 0x3d1   :  { %20656 = vst [vmem:[#allocation59_spill] sm:$0xff] %v17785_v60  ;;  %v4040_v40 = vmul.f32 %v17034_v29, %v2770_v18  ;;  %v6424_v38 = vmax.f32 %v6422_v22, %v6423_v63  ;;  %v5748_v51 = vmax.f32 %v5746_v24, %v5747_v39  ;;  %v19668_v6 = vmax.f32 %v17785_v60, 0.0  ;;  %v17806_v42 = vpop.permute.xlu0 %6720  ;;  %v3820_v24 = vpop.f32.mrf.mxu1 }
 0x3d2   :  { %20657 = vst [vmem:[#allocation73_spill] sm:$0xff] %v17788_v31  ;;  %v19670_v11 = vmax.f32 %v17788_v31, 0.0  ;;  %v5715_v12 = vmax.f32 %v5713_v28, %v5714_v36  ;;  %v6387_v55 = vmax.f32 %v17376_v53, %v6386_v7  ;;  %v4251_v1 = vmul.f32 %v17034_v29, %v9160_v44 }
 0x3d3   :  { %v17803_v48 = vadd.f32 %v17052_v62, %v4040_v40  ;;  %v6425_v18 = vrot.slane %v6424_v38, 4  ;;  %v5749_v50 = vrot.slane %v5748_v51, 4  ;;  %v17811_v63 = vsel %vm5091_vm1, %v19668_v6, -inf  ;;  %v20658_v40 = vld [vmem:[#allocation112_spill] sm:$0xff] }
 0x3d4   :  { %v6431_v28 = vsel %vm5091_vm1, %v19670_v11, -inf  ;;  %6642 = vrot.lane.b32.xlu1 %v5715_v12, %s9180_s10  ;;  %v6388_v39 = vrot.slane %v6387_v55, 2  ;;  %v17820_v22 = vadd.f32 %v17052_v62, %v4251_v1  ;;  %v20659_v6 = vmax.f32 %v20658_v40, 0.0  ;;  %v20660_v11 = vld [vmem:[#allocation108_spill] sm:$0xff] }
 0x3d5   :  { %v6433_v53 = vmax.f32 %v6431_v28, %v17793_v27  ;;  %v19674_v44 = vmax.f32 %v17803_v48, 0.0  ;;  %v17822_v36 = vmax.f32 %v6424_v38, %v6425_v18  ;;  %v17824_v7 = vmax.f32 %v5748_v51, %v5749_v50  ;;  %v2780_v27 = vpop.f32.mrf.mxu0  ;;  %v20662_v38 = vld [vmem:[#allocation114_spill] sm:$0xff] }
 0x3d6   :  { %v7200_v31 = vsel %vm5091_vm1, %v20659_v6, %v6719_v41  ;;  %v20661_v60 = vmax.f32 %v20660_v11, 0.0  ;;  %v6389_v28 = vmax.f32 %v6387_v55, %v6388_v39  ;;  %v19673_v35 = vmax.f32 %v17820_v22, 0.0  ;;  %v17847_v55 = vpop.permute.xlu1 %6722  ;;  %v20664_v6 = vld [vmem:[#allocation110_spill] sm:$0xff] }
 0x3d7   :  { %v5755_v1 = vsel %vm5091_vm1, %v19674_v44, -inf  ;;  %v20663_v18 = vmax.f32 %v20662_v38, 0.0  ;;  %7617 = vst.msk [vmem:[%s18979_s4 + $0xaa0] sm:$0xff] %vm7276_vm2, %v7200_v31  ;;  %v20665_v11 = vmax.f32 %v20664_v6, 0.0  ;;  %v4043_v31 = vmul.f32 %v17034_v29, %v8848_v25  ;;  %v20668_v6 = vld [vmem:[#allocation116_spill] sm:$0xff] }
 0x3d8   :  { %v7201_v12 = vsel %vm5091_vm1, %v20661_v60, %v6719_v41  ;;  %v17849_v60 = vpop.permute.xlu0 %6620  ;;  %v5757_v51 = vmax.f32 %v5755_v1, %v17811_v63  ;;  %v4250_v40 = vmul.f32 %v17034_v29, %v3820_v24  ;;  %v6436_v38 = vsel %vm5091_vm1, %v19673_v35, -inf  ;;  %v20666_v24 = vld [vmem:[#allocation121_spill] sm:$0xff] }
 0x3d9   :  { %v7202_v50 = vsel %vm5091_vm1, %v20663_v18, %v6719_v41  ;;  %7618 = vst.msk [vmem:[%s18979_s4 + $0xaa8] sm:$0xff] %vm7276_vm2, %v7201_v12  ;;  %v7203_v39 = vsel %vm5091_vm1, %v20665_v11, %v6719_v41  ;;  %v6390_v12 = vrot.slane %v6389_v28, 1  ;;  %v5723_v41 = vrot.slane %v17526_v33, 4 }
 0x3da   :  { %7619 = vst.msk [vmem:[%s18979_s4 + $0xab0] sm:$0xff] %vm7276_vm2, %v7202_v50  ;;  %7620 = vst.msk [vmem:[%s18979_s4 + $0xab8] sm:$0xff] %vm7276_vm2, %v7203_v39  ;;  %v4042_v63 = vmul.f32 %v17034_v29, %v2780_v27  ;;  %v17871_v1 = vadd.f32 %v17052_v62, %v4043_v31  ;;  %v17874_v25 = vadd.f32 %v17052_v62, %v4250_v40  ;;  %v20667_v18 = vmax.f32 %v20666_v24, 0.0 }
 0x3db   :  { %v20669_v11 = vmax.f32 %v20668_v6, 0.0  ;;  %v6391_v35 = vmax.f32 %v6389_v28, %v6390_v12  ;;  %v5724_v44 = vmax.f32 %v17526_v33, %v5723_v41  ;;  %v20670_v27 = vmax.f32 %v15361_v14, 0.0  ;;  %v17900_v28 = vpop.permute.xlu1 %6622  ;;  %v20671_v14 = vld [vmem:[#allocation117_spill] sm:$0xff]  ;;  %v20675_v6 = vld [vmem:[#allocation120_spill] sm:$0xff] }
 0x3dc   :  { %v6996_v50 = vsel %vm5091_vm1, %v20667_v18, %v17763_v46  ;;  %v17886_v29 = vadd.f32 %v17052_v62, %v4042_v63  ;;  %v4882_v62 = vmax.f32 %v17871_v1, 0.0  ;;  %v5089_v33 = vmax.f32 %v17874_v25, 0.0  ;;  %v20673_v18 = vld [vmem:[#allocation124_spill] sm:$0xff]  ;;  %v20912_v1 = vld [vmem:[#allocation73_spill] sm:$0xff] }
 0x3dd   :  { %v6997_v39 = vsel %vm5091_vm1, %v20669_v11, %v17763_v46  ;;  %v6998_v31 = vsel %vm5091_vm1, %v20670_v27, %v17763_v46  ;;  %7413 = vst.msk [vmem:[%s18979_s4 + $0x440] sm:$0xff] %vm7276_vm2, %v6996_v50  ;;  %v20672_v40 = vmax.f32 %v20671_v14, 0.0  ;;  %v6401_v41 = vrot.slane %v17550_v57, 2  ;;  %6746 = vrot.lane.b32.xlu1 %v6391_v35, %s9180_s10  ;;  %v17927_v27 = vpop.permute.xlu0 %6724 }
 0x3de   :  { %7414 = vst.msk [vmem:[%s18979_s4 + $0x448] sm:$0xff] %vm7276_vm2, %v6997_v39  ;;  %7415 = vst.msk [vmem:[%s18979_s4 + $0x450] sm:$0xff] %vm7276_vm2, %v6998_v31  ;;  %v5725_v63 = vrot.slane %v5724_v44, 2  ;;  %v4881_v24 = vmax.f32 %v17886_v29, 0.0  ;;  %v20676_v11 = vmax.f32 %v20675_v6, 0.0  ;;  %v5760_v35 = vsel %vm5091_vm1, %v4882_v62, -inf }
 0x3df   :  { %v6999_v12 = vsel %vm5091_vm1, %v20672_v40, %v17763_v46  ;;  %v20674_v46 = vmax.f32 %v20673_v18, 0.0  ;;  %v6434_v31 = vsel %vm5091_vm1, %v5089_v33, -inf  ;;  %v6402_v14 = vmax.f32 %v17550_v57, %v6401_v41  ;;  %v20677_v40 = vld [vmem:[#allocation123_spill] sm:$0xff]  ;;  %v20679_v41 = vld [vmem:[#allocation118_spill] sm:$0xff] }
 0x3e0   :  { %7416 = vst.msk [vmem:[%s18979_s4 + $0x458] sm:$0xff] %vm7276_vm2, %v6999_v12  ;;  %v7205_v39 = vsel %vm5091_vm1, %v20676_v11, %v17806_v42  ;;  %v20678_v12 = vmax.f32 %v20677_v40, 0.0  ;;  %v5726_v6 = vmax.f32 %v5724_v44, %v5725_v63  ;;  %v5758_v57 = vsel %vm5091_vm1, %v4881_v24, -inf  ;;  %v20681_v44 = vld [vmem:[#allocation130_spill] sm:$0xff] }
 0x3e1   :  { %v7204_v50 = vsel %vm5091_vm1, %v20674_v46, %v17806_v42  ;;  %7622 = vst.msk [vmem:[%s18979_s4 + $0xac8] sm:$0xff] %vm7276_vm2, %v7205_v39  ;;  %v6435_v46 = vmax.f32 %v6433_v53, %v6434_v31  ;;  %v20680_v11 = vmax.f32 %v20679_v41, 0.0  ;;  %v5736_v53 = vrot.slane %v17662_v15, 4  ;;  %v20683_v41 = vld [vmem:[#allocation127_spill] sm:$0xff] }
 0x3e2   :  { %v7206_v18 = vsel %vm5091_vm1, %v20678_v12, %v17806_v42  ;;  %7621 = vst.msk [vmem:[%s18979_s4 + $0xac0] sm:$0xff] %vm7276_vm2, %v7204_v50  ;;  %v5759_v50 = vmax.f32 %v5757_v51, %v5758_v57  ;;  %v6403_v12 = vrot.slane %v6402_v14, 1  ;;  %v20682_v63 = vmax.f32 %v20681_v44, 0.0  ;;  %v17982_v44 = vpop.permute.xlu0 %6624 }
 0x3e3   :  { %v7207_v40 = vsel %vm5091_vm1, %v20680_v11, %v17806_v42  ;;  %7623 = vst.msk [vmem:[%s18979_s4 + $0xad0] sm:$0xff] %vm7276_vm2, %v7206_v18  ;;  %v6437_v42 = vmax.f32 %v6435_v46, %v6436_v38  ;;  %v5727_v31 = vrot.slane %v5726_v6, 1  ;;  %v20684_v11 = vmax.f32 %v20683_v41, 0.0 }
 0x3e4   :  { %7624 = vst.msk [vmem:[%s18979_s4 + $0xad8] sm:$0xff] %vm7276_vm2, %v7207_v40  ;;  %v7000_v39 = vsel %vm5091_vm1, %v20682_v63, %v17797_v5  ;;  %v20685_v18 = vmax.f32 %v15525_v58, 0.0  ;;  %v17980_v40 = vpop.permute.xlu1 %6726  ;;  %v5761_v38 = vmax.f32 %v5759_v50, %v5760_v35  ;;  %v6404_v46 = vmax.f32 %v6402_v14, %v6403_v12 }
 0x3e5   :  { %v7001_v51 = vsel %vm5091_vm1, %v20684_v11, %v17797_v5  ;;  %7417 = vst.msk [vmem:[%s18979_s4 + $0x460] sm:$0xff] %vm7276_vm2, %v7000_v39  ;;  %v5737_v63 = vmax.f32 %v17662_v15, %v5736_v53  ;;  %v20686_v41 = vmax.f32 %v15504_v43, 0.0  ;;  %v6438_v39 = vrot.slane %v6437_v42, 4  ;;  %v20687_v15 = vld [vmem:[#allocation125_spill] sm:$0xff]  ;;  %v20689_v53 = vld [vmem:[#allocation122_spill] sm:$0xff] }
 0x3e6   :  { %v7002_v57 = vsel %vm5091_vm1, %v20685_v18, %v17797_v5  ;;  %7418 = vst.msk [vmem:[%s18979_s4 + $0x468] sm:$0xff] %vm7276_vm2, %v7001_v51  ;;  %v5728_v35 = vmax.f32 %v5726_v6, %v5727_v31  ;;  %v6414_v43 = vrot.slane %v17684_v16, 2  ;;  %v5762_v50 = vrot.slane %v5761_v38, 4 }
 0x3e7   :  { %v7003_v58 = vsel %vm5091_vm1, %v20686_v41, %v17797_v5  ;;  %7419 = vst.msk [vmem:[%s18979_s4 + $0x470] sm:$0xff] %vm7276_vm2, %v7002_v57  ;;  %v20688_v5 = vmax.f32 %v20687_v15, 0.0  ;;  %v5738_v12 = vrot.slane %v5737_v63, 2  ;;  %v20690_v11 = vmax.f32 %v20689_v53, 0.0  ;;  %v20692_v41 = vld [vmem:[#allocation84_spill] sm:$0xff] }
 0x3e8   :  { %7420 = vst.msk [vmem:[%s18979_s4 + $0x478] sm:$0xff] %vm7276_vm2, %v7003_v58  ;;  %v20691_v6 = vmax.f32 %v15507_v19, 0.0  ;;  %v6439_v18 = vmax.f32 %v6437_v42, %v6438_v39  ;;  %6644 = vrot.lane.b32.xlu0 %v5728_v35, %s9180_s10  ;;  %v6415_v57 = vmax.f32 %v17684_v16, %v6414_v43  ;;  %v20693_v58 = vmax.f32 %v20692_v41, 0.0  ;;  %v18033_v42 = vpop.permute.xlu1 %6626  ;;  %v20695_v43 = vld [vmem:[#allocation80_spill] sm:$0xff] }
 0x3e9   :  { %v7208_v14 = vsel %vm5091_vm1, %v20688_v5, %v17847_v55  ;;  %v7209_v51 = vsel %vm5091_vm1, %v20690_v11, %v17847_v55  ;;  %v5751_v19 = vrot.slane %v17824_v7, 2  ;;  %v5763_v16 = vmax.f32 %v5761_v38, %v5762_v50 }
 0x3ea   :  { %v7210_v31 = vsel %vm5091_vm1, %v20691_v6, %v17847_v55  ;;  %7625 = vst.msk [vmem:[%s18979_s4 + $0xae0] sm:$0xff] %vm7276_vm2, %v7208_v14  ;;  %v7211_v15 = vsel %vm5091_vm1, %v20693_v58, %v17847_v55  ;;  %7626 = vst.msk [vmem:[%s18979_s4 + $0xae8] sm:$0xff] %vm7276_vm2, %v7209_v51  ;;  %v5739_v39 = vmax.f32 %v5737_v63, %v5738_v12  ;;  %v20694_v55 = vmax.f32 %v15595_v52, 0.0  ;;  %v20701_v6 = vld [vmem:[#allocation126_spill] sm:$0xff] }
 0x3eb   :  { %7627 = vst.msk [vmem:[%s18979_s4 + $0xaf0] sm:$0xff] %vm7276_vm2, %v7210_v31  ;;  %7628 = vst.msk [vmem:[%s18979_s4 + $0xaf8] sm:$0xff] %vm7276_vm2, %v7211_v15  ;;  %v20696_v5 = vmax.f32 %v20695_v43, 0.0  ;;  %v6416_v53 = vrot.slane %v6415_v57, 1  ;;  %v5752_v11 = vmax.f32 %v17824_v7, %v5751_v19  ;;  %v20697_v38 = vmax.f32 %v15679_v59, 0.0  ;;  %v6729_v7 = vpop.permute.xlu0 %6728  ;;  %v20703_v19 = vld [vmem:[#allocation133_spill] sm:$0xff] }
 0x3ec   :  { %v7004_v35 = vsel %vm5091_vm1, %v20694_v55, %v17849_v60  ;;  %v20698_v50 = vmax.f32 %v15662_v9, 0.0  ;;  %v5740_v12 = vrot.slane %v5739_v39, 1  ;;  %v6427_v59 = vrot.slane %v17822_v36, 2  ;;  %v20699_v9 = vld [vmem:[#allocation129_spill] sm:$0xff]  ;;  %6748 = vrot.lane.b32.xlu0 %v6404_v46, %s9180_s10  ;;  %v20705_v43 = vld [vmem:[#allocation128_spill] sm:$0xff] }
 0x3ed   :  { %v7005_v14 = vsel %vm5091_vm1, %v20696_v5, %v17849_v60  ;;  %v7006_v63 = vsel %vm5091_vm1, %v20697_v38, %v17849_v60  ;;  %7421 = vst.msk [vmem:[%s18979_s4 + $0x480] sm:$0xff] %vm7276_vm2, %v7004_v35  ;;  %v20702_v31 = vmax.f32 %v20701_v6, 0.0  ;;  %v6417_v58 = vmax.f32 %v6415_v57, %v6416_v53 }
 0x3ee   :  { %v7007_v52 = vsel %vm5091_vm1, %v20698_v50, %v17849_v60  ;;  %7422 = vst.msk [vmem:[%s18979_s4 + $0x488] sm:$0xff] %vm7276_vm2, %v7005_v14  ;;  %7423 = vst.msk [vmem:[%s18979_s4 + $0x490] sm:$0xff] %vm7276_vm2, %v7006_v63  ;;  %v20700_v60 = vmax.f32 %v20699_v9, 0.0  ;;  %v5753_v15 = vrot.slane %v5752_v11, 1  ;;  %v20704_v55 = vmax.f32 %v20703_v19, 0.0  ;;  %v20716_v19 = vld [vmem:[#allocation90_spill] sm:$0xff] }
 0x3ef   :  { %7424 = vst.msk [vmem:[%s18979_s4 + $0x498] sm:$0xff] %vm7276_vm2, %v7007_v52  ;;  %v7213_v41 = vsel %vm5091_vm1, %v20702_v31, %v17927_v27  ;;  %v20706_v5 = vmax.f32 %v20705_v43, 0.0  ;;  %v5741_v46 = vmax.f32 %v5739_v39, %v5740_v12  ;;  %v6428_v57 = vmax.f32 %v17822_v36, %v6427_v59  ;;  %v20708_v39 = vld [vmem:[#allocation136_spill] sm:$0xff] }
 0x3f0   :  { %v7212_v51 = vsel %vm5091_vm1, %v20700_v60, %v17927_v27  ;;  %v7214_v35 = vsel %vm5091_vm1, %v20704_v55, %v17927_v27  ;;  %7630 = vst.msk [vmem:[%s18979_s4 + $0xb08] sm:$0xff] %vm7276_vm2, %v7213_v41  ;;  %v20707_v53 = vmax.f32 %v15761_v56, 0.0  ;;  %v5754_v63 = vmax.f32 %v5752_v11, %v5753_v15  ;;  %v6731_v56 = vpop.permute.xlu1 %6730  ;;  %v18127_v11 = vpop.permute.xlu0 %6628 }
 0x3f1   :  { %v7215_v14 = vsel %vm5091_vm1, %v20706_v5, %v17927_v27  ;;  %7629 = vst.msk [vmem:[%s18979_s4 + $0xb00] sm:$0xff] %vm7276_vm2, %v7212_v51  ;;  %7631 = vst.msk [vmem:[%s18979_s4 + $0xb10] sm:$0xff] %vm7276_vm2, %v7214_v35  ;;  %v5764_v27 = vrot.slane %v5763_v16, 2  ;;  %v20709_v36 = vmax.f32 %v20708_v39, 0.0  ;;  %v20710_v52 = vmax.f32 %v15830_v2, 0.0  ;;  %6646 = vrot.lane.b32.xlu1 %v5741_v46, %s9180_s10 }
 0x3f2   :  { %7632 = vst.msk [vmem:[%s18979_s4 + $0xb18] sm:$0xff] %vm7276_vm2, %v7215_v14  ;;  %v7008_v38 = vsel %vm5091_vm1, %v20707_v53, %v17900_v28  ;;  %v20711_v59 = vmax.f32 %v15823_v23, 0.0  ;;  %v6429_v60 = vrot.slane %v6428_v57, 1  ;;  %v6440_v2 = vrot.slane %v6439_v18, 2  ;;  %6648 = vrot.lane.b32.xlu0 %v5754_v63, %s9180_s10 }
 0x3f3   :  { %v7009_v50 = vsel %vm5091_vm1, %v20709_v36, %v17900_v28  ;;  %v7010_v12 = vsel %vm5091_vm1, %v20710_v52, %v17900_v28  ;;  %7425 = vst.msk [vmem:[%s18979_s4 + $0x4a0] sm:$0xff] %vm7276_vm2, %v7008_v38  ;;  %v5765_v51 = vmax.f32 %v5763_v16, %v5764_v27  ;;  %v20712_v23 = vmax.f32 %v15742_v26, 0.0  ;;  %v20713_v16 = vld [vmem:[#allocation87_spill] sm:$0xff]  ;;  %v20723_v38 = vld [vmem:[#allocation132_spill] sm:$0xff] }
 0x3f4   :  { %v7011_v9 = vsel %vm5091_vm1, %v20711_v59, %v17900_v28  ;;  %7426 = vst.msk [vmem:[%s18979_s4 + $0x4a8] sm:$0xff] %vm7276_vm2, %v7009_v50  ;;  %7427 = vst.msk [vmem:[%s18979_s4 + $0x4b0] sm:$0xff] %vm7276_vm2, %v7010_v12  ;;  %v20714_v6 = vmax.f32 %v20713_v16, 0.0  ;;  %v20715_v41 = vmax.f32 %v15826_v8, 0.0  ;;  %v20717_v55 = vmax.f32 %v20716_v19, 0.0  ;;  %v6631_v39 = vpop.permute.xlu1 %6630  ;;  %v20727_v52 = vld [vmem:[#allocation131_spill] sm:$0xff] }
 0x3f5   :  { %7428 = vst.msk [vmem:[%s18979_s4 + $0x4b8] sm:$0xff] %vm7276_vm2, %v7011_v9  ;;  %v7216_v28 = vsel %vm5091_vm1, %v20712_v23, %v17980_v40  ;;  %v20718_v26 = vmax.f32 %v15913_v4, 0.0  ;;  %v6430_v5 = vmax.f32 %v6428_v57, %v6429_v60  ;;  %v5766_v14 = vrot.slane %v5765_v51, 1  ;;  %6750 = vrot.lane.b32.xlu1 %v6417_v58, %s9180_s10  ;;  %v20731_v60 = vld [vmem:[#allocation98_spill] sm:$0xff]  ;;  %v20733_v23 = vld [vmem:[#allocation140_spill] sm:$0xff] }
 0x3f6   :  { %v7217_v31 = vsel %vm5091_vm1, %v20714_v6, %v17980_v40  ;;  %v7218_v15 = vsel %vm5091_vm1, %v20715_v41, %v17980_v40  ;;  %v7219_v35 = vsel %vm5091_vm1, %v20717_v55, %v17980_v40  ;;  %7633 = vst.msk [vmem:[%s18979_s4 + $0xb20] sm:$0xff] %vm7276_vm2, %v7216_v28  ;;  %v6441_v8 = vmax.f32 %v6439_v18, %v6440_v2  ;;  %v20735_v6 = vld [vmem:[#allocation137_spill] sm:$0xff] }
 0x3f7   :  { %v7012_v43 = vsel %vm5091_vm1, %v20718_v26, %v17982_v44  ;;  %7634 = vst.msk [vmem:[%s18979_s4 + $0xb28] sm:$0xff] %vm7276_vm2, %v7217_v31  ;;  %7635 = vst.msk [vmem:[%s18979_s4 + $0xb30] sm:$0xff] %vm7276_vm2, %v7218_v15  ;;  %v20719_v4 = vmax.f32 %v15893_v0, 0.0  ;;  %v20720_v18 = vmax.f32 %v15983_v49, 0.0  ;;  %v20721_v57 = vmax.f32 %v15976_v30, 0.0  ;;  %6752 = vrot.lane.b32.xlu0 %v6430_v5, %s9180_s10  ;;  %v6733_v15 = vpop.permute.xlu0 %6732  ;;  %v20739_v26 = vld [vmem:[#allocation134_spill] sm:$0xff] }
 0x3f8   :  { %7636 = vst.msk [vmem:[%s18979_s4 + $0xb38] sm:$0xff] %vm7276_vm2, %v7219_v35  ;;  %7429 = vst.msk [vmem:[%s18979_s4 + $0x4c0] sm:$0xff] %vm7276_vm2, %v7012_v43  ;;  %v20722_v0 = vmax.f32 %v15896_v61, 0.0  ;;  %v20724_v63 = vmax.f32 %v20723_v38, 0.0  ;;  %v5767_v36 = vmax.f32 %v5765_v51, %v5766_v14  ;;  %v6442_v30 = vrot.slane %v6441_v8, 1  ;;  %v20725_v61 = vld [vmem:[#allocation135_spill] sm:$0xff] }
 0x3f9   :  { %v7013_v40 = vsel %vm5091_vm1, %v20719_v4, %v17982_v44  ;;  %v7014_v46 = vsel %vm5091_vm1, %v20720_v18, %v17982_v44  ;;  %v7015_v27 = vsel %vm5091_vm1, %v20721_v57, %v17982_v44  ;;  %v20726_v44 = vmax.f32 %v20725_v61, 0.0  ;;  %v20741_v14 = vld [vmem:[#allocation96_spill] sm:$0xff]  ;;  %v20748_v38 = vld [vmem:[#allocation143_spill] sm:$0xff] }
 0x3fa   :  { %7430 = vst.msk [vmem:[%s18979_s4 + $0x4c8] sm:$0xff] %vm7276_vm2, %v7013_v40  ;;  %v7220_v53 = vsel %vm5091_vm1, %v20722_v0, %v6729_v7  ;;  %v7221_v49 = vsel %vm5091_vm1, %v20724_v63, %v6729_v7  ;;  %7431 = vst.msk [vmem:[%s18979_s4 + $0x4d0] sm:$0xff] %vm7276_vm2, %v7014_v46  ;;  %v20728_v12 = vmax.f32 %v20727_v52, 0.0  ;;  %v20732_v51 = vmax.f32 %v20731_v60, 0.0  ;;  %v20743_v40 = vld [vmem:[#allocation138_spill] sm:$0xff]  ;;  %6650 = vrot.lane.b32.xlu1 %v5767_v36, %s9180_s10 }
 0x3fb   :  { %7432 = vst.msk [vmem:[%s18979_s4 + $0x4d8] sm:$0xff] %vm7276_vm2, %v7015_v27  ;;  %v7222_v50 = vsel %vm5091_vm1, %v20726_v44, %v6729_v7  ;;  %7637 = vst.msk [vmem:[%s18979_s4 + $0xb40] sm:$0xff] %vm7276_vm2, %v7220_v53  ;;  %v20734_v28 = vmax.f32 %v20733_v23, 0.0  ;;  %v20736_v31 = vmax.f32 %v20735_v6, 0.0  ;;  %v6443_v19 = vmax.f32 %v6441_v8, %v6442_v30  ;;  %v20746_v27 = vld [vmem:[#allocation104_spill] sm:$0xff]  ;;  %v20752_v36 = vld [vmem:[#allocation142_spill] sm:$0xff] }
 0x3fc   :  { %v7223_v58 = vsel %vm5091_vm1, %v20728_v12, %v6729_v7  ;;  %7638 = vst.msk [vmem:[%s18979_s4 + $0xb48] sm:$0xff] %vm7276_vm2, %v7221_v49  ;;  %7639 = vst.msk [vmem:[%s18979_s4 + $0xb50] sm:$0xff] %vm7276_vm2, %v7222_v50  ;;  %v20729_v7 = vld [vmem:[#allocation141_spill] sm:$0xff]  ;;  %v7017_v2 = vsel %vm5091_vm1, %v20732_v51, %v18033_v42  ;;  %v20740_v43 = vmax.f32 %v20739_v26, 0.0  ;;  %v20742_v8 = vmax.f32 %v20741_v14, 0.0 }
 0x3fd   :  { %7640 = vst.msk [vmem:[%s18979_s4 + $0xb58] sm:$0xff] %vm7276_vm2, %v7223_v58  ;;  %v20730_v59 = vmax.f32 %v20729_v7, 0.0  ;;  %v7018_v16 = vsel %vm5091_vm1, %v20734_v28, %v18033_v42  ;;  %v7019_v41 = vsel %vm5091_vm1, %v20736_v31, %v18033_v42  ;;  %7434 = vst.msk [vmem:[%s18979_s4 + $0x4e8] sm:$0xff] %vm7276_vm2, %v7017_v2  ;;  %v20744_v18 = vmax.f32 %v20743_v40, 0.0  ;;  %v20756_v58 = vld [vmem:[#allocation144_spill] sm:$0xff]  ;;  %v20761_v28 = vld [vmem:[#allocation107_spill] sm:$0xff] }
 0x3fe   :  { %7435 = vst.msk [vmem:[%s18979_s4 + $0x4f0] sm:$0xff] %vm7276_vm2, %v7018_v16  ;;  %7436 = vst.msk [vmem:[%s18979_s4 + $0x4f8] sm:$0xff] %vm7276_vm2, %v7019_v41  ;;  %v7225_v5 = vsel %vm5091_vm1, %v20740_v43, %v6731_v56  ;;  %v7226_v4 = vsel %vm5091_vm1, %v20742_v8, %v6731_v56  ;;  %v20745_v57 = vmax.f32 %v16227_v3, 0.0  ;;  %v20747_v0 = vmax.f32 %v20746_v27, 0.0  ;;  %v20750_v3 = vld [vmem:[#allocation106_spill] sm:$0xff]  ;;  %v20771_v8 = vld [vmem:[#allocation4_spill] sm:$0xff]  ;;  %6754 = vrot.lane.b32.xlu1 %v6443_v19, %s9180_s10 }
 0x3ff   :  { %v7016_v9 = vsel %vm5091_vm1, %v20730_v59, %v18033_v42  ;;  %v20737_v42 = vld [vmem:[#allocation95_spill] sm:$0xff]  ;;  %v7227_v46 = vsel %vm5091_vm1, %v20744_v18, %v6731_v56  ;;  %7642 = vst.msk [vmem:[%s18979_s4 + $0xb68] sm:$0xff] %vm7276_vm2, %v7225_v5  ;;  %7643 = vst.msk [vmem:[%s18979_s4 + $0xb70] sm:$0xff] %vm7276_vm2, %v7226_v4  ;;  %v20749_v63 = vmax.f32 %v20748_v38, 0.0  ;;  %v20751_v30 = vmax.f32 %v20750_v3, 0.0  ;;  %v20769_v43 = vld [vmem:[#allocation2_spill] sm:$0xff]  ;;  %v6633_v18 = vpop.permute.xlu0 %6632 }
 0x400   :  { %7433 = vst.msk [vmem:[%s18979_s4 + $0x4e0] sm:$0xff] %vm7276_vm2, %v7016_v9  ;;  %v20738_v55 = vmax.f32 %v20737_v42, 0.0  ;;  %v7021_v53 = vsel %vm5091_vm1, %v20747_v0, %v18127_v11  ;;  %7644 = vst.msk [vmem:[%s18979_s4 + $0xb78] sm:$0xff] %vm7276_vm2, %v7227_v46  ;;  %v20753_v44 = vmax.f32 %v20752_v36, 0.0  ;;  %v20757_v7 = vmax.f32 %v20756_v58, 0.0  ;;  %v20758_v9 = vld [vmem:[#allocation147_spill] sm:$0xff] }
 0x401   :  { %v7022_v49 = vsel %vm5091_vm1, %v20749_v63, %v18127_v11  ;;  %v7023_v61 = vsel %vm5091_vm1, %v20751_v30, %v18127_v11  ;;  %7438 = vst.msk [vmem:[%s18979_s4 + $0x508] sm:$0xff] %vm7276_vm2, %v7021_v53  ;;  %v20759_v60 = vmax.f32 %v20758_v9, 0.0  ;;  %v20760_v2 = vmax.f32 %v16393_v54, 0.0  ;;  %v20773_v46 = vld [vmem:[#allocation9_spill] sm:$0xff]  ;;  %v20775_v27 = vld [vmem:[#allocation6_spill] sm:$0xff]  ;;  %v20780_v30 = vld [vmem:[#allocation119_spill] sm:$0xff] }
 0x402   :  { %v7224_v35 = vsel %vm5091_vm1, %v20738_v55, %v6731_v56  ;;  %v7020_v56 = vsel %vm5091_vm1, %v20745_v57, %v18127_v11  ;;  %7439 = vst.msk [vmem:[%s18979_s4 + $0x510] sm:$0xff] %vm7276_vm2, %v7022_v49  ;;  %v7228_v50 = vsel %vm5091_vm1, %v20753_v44, %v6733_v15  ;;  %v20754_v11 = vld [vmem:[#allocation139_spill] sm:$0xff]  ;;  %v7230_v59 = vsel %vm5091_vm1, %v20757_v7, %v6733_v15  ;;  %v20782_v44 = vld [vmem:[#allocation148_spill] sm:$0xff]  ;;  %v20786_v7 = vld [vmem:[#allocation13_spill] sm:$0xff] }
 0x403   :  { %7641 = vst.msk [vmem:[%s18979_s4 + $0xb60] sm:$0xff] %vm7276_vm2, %v7224_v35  ;;  %7437 = vst.msk [vmem:[%s18979_s4 + $0x500] sm:$0xff] %vm7276_vm2, %v7020_v56  ;;  %v20755_v52 = vmax.f32 %v20754_v11, 0.0  ;;  %v7231_v51 = vsel %vm5091_vm1, %v20759_v60, %v6733_v15  ;;  %v7024_v23 = vsel %vm5091_vm1, %v20760_v2, %v6631_v39  ;;  %v20762_v16 = vmax.f32 %v20761_v28, 0.0  ;;  %v20778_v49 = vld [vmem:[#allocation7_spill] sm:$0xff]  ;;  %v20790_v28 = vld [vmem:[#allocation17_spill] sm:$0xff] }
 0x404   :  { %7440 = vst.msk [vmem:[%s18979_s4 + $0x518] sm:$0xff] %vm7276_vm2, %v7023_v61  ;;  %7645 = vst.msk [vmem:[%s18979_s4 + $0xb80] sm:$0xff] %vm7276_vm2, %v7228_v50  ;;  %v20763_v31 = vmax.f32 %v16462_v20, 0.0  ;;  %v20764_v42 = vmax.f32 %v16455_v21, 0.0  ;;  %v20765_v20 = vld [vmem:[#allocation8_spill] sm:$0xff]  ;;  %v20770_v5 = vmax.f32 %v20769_v43, 0.0 }
 0x405   :  { %v7229_v12 = vsel %vm5091_vm1, %v20755_v52, %v6733_v15  ;;  %7647 = vst.msk [vmem:[%s18979_s4 + $0xb90] sm:$0xff] %vm7276_vm2, %v7230_v59  ;;  %v7025_v6 = vsel %vm5091_vm1, %v20762_v16, %v6631_v39  ;;  %v6735_v15 = vpop.permute.xlu1 %6734  ;;  %7648 = vst.msk [vmem:[%s18979_s4 + $0xb98] sm:$0xff] %vm7276_vm2, %v7231_v51  ;;  %v20766_v55 = vmax.f32 %v20765_v20, 0.0  ;;  %v20772_v4 = vmax.f32 %v20771_v8, 0.0  ;;  %v20784_v52 = vld [vmem:[#allocation3_spill] sm:$0xff]  ;;  %v20795_v20 = vld [vmem:[#allocation12_spill] sm:$0xff] }
 0x406   :  { %7646 = vst.msk [vmem:[%s18979_s4 + $0xb88] sm:$0xff] %vm7276_vm2, %v7229_v12  ;;  %v7026_v41 = vsel %vm5091_vm1, %v20763_v31, %v6631_v39  ;;  %v7027_v54 = vsel %vm5091_vm1, %v20764_v42, %v6631_v39  ;;  %7441 = vst.msk [vmem:[%s18979_s4 + $0x520] sm:$0xff] %vm7276_vm2, %v7024_v23  ;;  %v20767_v39 = vld [vmem:[#allocation145_spill] sm:$0xff]  ;;  %v7234_v14 = vsel %vm5091_vm1, %v20770_v5, %v6735_v15  ;;  %v20774_v57 = vmax.f32 %v20773_v46, 0.0  ;;  %v20788_v51 = vld [vmem:[#allocation19_spill] sm:$0xff] }
 0x407   :  { %7442 = vst.msk [vmem:[%s18979_s4 + $0x528] sm:$0xff] %vm7276_vm2, %v7025_v6  ;;  %7443 = vst.msk [vmem:[%s18979_s4 + $0x530] sm:$0xff] %vm7276_vm2, %v7026_v41  ;;  %v7232_v21 = vsel %vm5091_vm1, %v20766_v55, %v6735_v15  ;;  %v20768_v35 = vmax.f32 %v20767_v39, 0.0  ;;  %v7235_v40 = vsel %vm5091_vm1, %v20772_v4, %v6735_v15  ;;  %v20776_v0 = vmax.f32 %v20775_v27, 0.0  ;;  %v20797_v39 = vld [vmem:[#allocation11_spill] sm:$0xff]  ;;  %v20801_v8 = vld [vmem:[#allocation14_spill] sm:$0xff] }
 0x408   :  { %7444 = vst.msk [vmem:[%s18979_s4 + $0x538] sm:$0xff] %vm7276_vm2, %v7027_v54  ;;  %7649 = vst.msk [vmem:[%s18979_s4 + $0xba0] sm:$0xff] %vm7276_vm2, %v7232_v21  ;;  %v7028_v56 = vsel %vm5091_vm1, %v20774_v57, %v6633_v18  ;;  %v20777_v38 = vmax.f32 %v16615_v10, 0.0  ;;  %v20779_v19 = vmax.f32 %v20778_v49, 0.0  ;;  %v6737_v10 = vpop.permute.xlu0 %6736  ;;  %v20781_v61 = vmax.f32 %v20780_v30, 0.0  ;;  %v20799_v43 = vld [vmem:[#allocation15_spill] sm:$0xff] }
 0x409   :  { %v7233_v26 = vsel %vm5091_vm1, %v20768_v35, %v6735_v15  ;;  %7651 = vst.msk [vmem:[%s18979_s4 + $0xbb0] sm:$0xff] %vm7276_vm2, %v7234_v14  ;;  %7652 = vst.msk [vmem:[%s18979_s4 + $0xbb8] sm:$0xff] %vm7276_vm2, %v7235_v40  ;;  %v7029_v53 = vsel %vm5091_vm1, %v20776_v0, %v6633_v18  ;;  %v20783_v50 = vmax.f32 %v20782_v44, 0.0  ;;  %v20785_v12 = vmax.f32 %v20784_v52, 0.0  ;;  %v6635_v60 = vpop.permute.xlu1 %6634  ;;  %v20793_v15 = vld [vmem:[#allocation10_spill] sm:$0xff] }
 0x40a   :  { %7650 = vst.msk [vmem:[%s18979_s4 + $0xba8] sm:$0xff] %vm7276_vm2, %v7233_v26  ;;  %v7030_v63 = vsel %vm5091_vm1, %v20777_v38, %v6633_v18  ;;  %v7031_v3 = vsel %vm5091_vm1, %v20779_v19, %v6633_v18  ;;  %7445 = vst.msk [vmem:[%s18979_s4 + $0x540] sm:$0xff] %vm7276_vm2, %v7028_v56  ;;  %v7236_v36 = vsel %vm5091_vm1, %v20781_v61, %v6737_v10  ;;  %v20787_v59 = vmax.f32 %v20786_v7, 0.0  ;;  %v20804_v56 = vld [vmem:[#allocation16_spill] sm:$0xff]  ;;  %v20808_v49 = vld [vmem:[#allocation26_spill] sm:$0xff] }
 0x40b   :  { %7446 = vst.msk [vmem:[%s18979_s4 + $0x548] sm:$0xff] %vm7276_vm2, %v7029_v53  ;;  %7447 = vst.msk [vmem:[%s18979_s4 + $0x550] sm:$0xff] %vm7276_vm2, %v7030_v63  ;;  %v7237_v11 = vsel %vm5091_vm1, %v20783_v50, %v6737_v10  ;;  %v7238_v58 = vsel %vm5091_vm1, %v20785_v12, %v6737_v10  ;;  %v20789_v2 = vmax.f32 %v20788_v51, 0.0  ;;  %v20791_v16 = vmax.f32 %v20790_v28, 0.0  ;;  %v20806_v53 = vld [vmem:[#allocation20_spill] sm:$0xff]  ;;  %v20820_v28 = vld [vmem:[#allocation34_spill] sm:$0xff] }
 0x40c   :  { %7448 = vst.msk [vmem:[%s18979_s4 + $0x558] sm:$0xff] %vm7276_vm2, %v7031_v3  ;;  %v7239_v9 = vsel %vm5091_vm1, %v20787_v59, %v6737_v10  ;;  %7653 = vst.msk [vmem:[%s18979_s4 + $0xbc0] sm:$0xff] %vm7276_vm2, %v7236_v36  ;;  %v20792_v31 = vmax.f32 %v16775_v13, 0.0  ;;  %v20794_v42 = vmax.f32 %v20793_v15, 0.0  ;;  %v20796_v55 = vmax.f32 %v20795_v20, 0.0  ;;  %v20810_v10 = vld [vmem:[#allocation18_spill] sm:$0xff] }
 0x40d   :  { %7654 = vst.msk [vmem:[%s18979_s4 + $0xbc8] sm:$0xff] %vm7276_vm2, %v7237_v11  ;;  %7655 = vst.msk [vmem:[%s18979_s4 + $0xbd0] sm:$0xff] %vm7276_vm2, %v7238_v58  ;;  %v7032_v23 = vsel %vm5091_vm1, %v20789_v2, %v6635_v60  ;;  %v7033_v6 = vsel %vm5091_vm1, %v20791_v16, %v6635_v60  ;;  %v6739_v13 = vpop.permute.xlu1 %6738  ;;  %v20798_v35 = vmax.f32 %v20797_v39, 0.0  ;;  %v20800_v5 = vmax.f32 %v20799_v43, 0.0  ;;  %v20812_v36 = vld [vmem:[#allocation21_spill] sm:$0xff]  ;;  %v20814_v11 = vld [vmem:[#allocation22_spill] sm:$0xff] }
 0x40e   :  { %7656 = vst.msk [vmem:[%s18979_s4 + $0xbd8] sm:$0xff] %vm7276_vm2, %v7239_v9  ;;  %v7034_v41 = vsel %vm5091_vm1, %v20792_v31, %v6635_v60  ;;  %v7035_v54 = vsel %vm5091_vm1, %v20794_v42, %v6635_v60  ;;  %7449 = vst.msk [vmem:[%s18979_s4 + $0x560] sm:$0xff] %vm7276_vm2, %v7032_v23  ;;  %v7240_v21 = vsel %vm5091_vm1, %v20796_v55, %v6739_v13  ;;  %v20802_v4 = vmax.f32 %v20801_v8, 0.0  ;;  %v20816_v58 = vld [vmem:[#allocation23_spill] sm:$0xff]  ;;  %v20832_v8 = vld [vmem:[#allocation37_spill] sm:$0xff] }
 0x40f   :  { %7450 = vst.msk [vmem:[%s18979_s4 + $0x568] sm:$0xff] %vm7276_vm2, %v7033_v6  ;;  %7451 = vst.msk [vmem:[%s18979_s4 + $0x570] sm:$0xff] %vm7276_vm2, %v7034_v41  ;;  %v7241_v26 = vsel %vm5091_vm1, %v20798_v35, %v6739_v13  ;;  %v7242_v14 = vsel %vm5091_vm1, %v20800_v5, %v6739_v13  ;;  %v20803_v46 = vmax.f32 %v16842_v47, 0.0  ;;  %v20805_v27 = vmax.f32 %v20804_v56, 0.0  ;;  %v20822_v31 = vld [vmem:[#allocation27_spill] sm:$0xff] }
 0x410   :  { %7452 = vst.msk [vmem:[%s18979_s4 + $0x578] sm:$0xff] %vm7276_vm2, %v7035_v54  ;;  %v7243_v40 = vsel %vm5091_vm1, %v20802_v4, %v6739_v13  ;;  %7657 = vst.msk [vmem:[%s18979_s4 + $0xbe0] sm:$0xff] %vm7276_vm2, %v7240_v21  ;;  %v20807_v38 = vmax.f32 %v20806_v53, 0.0  ;;  %v20809_v19 = vmax.f32 %v20808_v49, 0.0  ;;  %v20811_v30 = vmax.f32 %v20810_v10, 0.0  ;;  %v20826_v13 = vld [vmem:[#allocation25_spill] sm:$0xff] }
 0x411   :  { %7658 = vst.msk [vmem:[%s18979_s4 + $0xbe8] sm:$0xff] %vm7276_vm2, %v7241_v26  ;;  %7659 = vst.msk [vmem:[%s18979_s4 + $0xbf0] sm:$0xff] %vm7276_vm2, %v7242_v14  ;;  %v20813_v44 = vmax.f32 %v20812_v36, 0.0  ;;  %v20815_v52 = vmax.f32 %v20814_v11, 0.0  ;;  %v20817_v7 = vmax.f32 %v20816_v58, 0.0  ;;  %v20818_v60 = vmax.f32 %v16991_v45, 0.0 }
 0x412   :  { %7660 = vst.msk [vmem:[%s18979_s4 + $0xbf8] sm:$0xff] %vm7276_vm2, %v7243_v40  ;;  %v20819_v2 = vmax.f32 %v16971_v37, 0.0  ;;  %v20821_v16 = vmax.f32 %v20820_v28, 0.0  ;;  %v20823_v41 = vmax.f32 %v20822_v31, 0.0  ;;  %v20824_v45 = vld [vmem:[#allocation28_spill] sm:$0xff]  ;;  %v20827_v20 = vmax.f32 %v20826_v13, 0.0 }
 0x413   :  { %v6637_v18 = vpop.permute.xlu0 %6636  ;;  %v20825_v42 = vmax.f32 %v20824_v45, 0.0  ;;  %v20828_v21 = vld [vmem:[#allocation30_spill] sm:$0xff]  ;;  %v20830_v26 = vld [vmem:[#allocation24_spill] sm:$0xff]  ;;  %v20833_v4 = vmax.f32 %v20832_v8, 0.0  ;;  %v20836_v56 = vmax.f32 %v17194_v32, 0.0  ;;  %v20913_v29 = vmax.f32 %v20912_v1, 0.0 }
 0x414   :  { %v7036_v57 = vsel %vm5091_vm1, %v20803_v46, %v6637_v18  ;;  %v7037_v0 = vsel %vm5091_vm1, %v20805_v27, %v6637_v18  ;;  %v7038_v63 = vsel %vm5091_vm1, %v20807_v38, %v6637_v18  ;;  %v7039_v3 = vsel %vm5091_vm1, %v20809_v19, %v6637_v18  ;;  %v20834_v18 = vld [vmem:[#allocation29_spill] sm:$0xff]  ;;  %v20855_v31 = vld [vmem:[#allocation146_spill] sm:$0xff] }
 0x415   :  { %7453 = vst.msk [vmem:[%s18979_s4 + $0x580] sm:$0xff] %vm7276_vm2, %v7036_v57  ;;  %7454 = vst.msk [vmem:[%s18979_s4 + $0x588] sm:$0xff] %vm7276_vm2, %v7037_v0  ;;  %v20829_v39 = vmax.f32 %v20828_v21, 0.0  ;;  %v20831_v43 = vmax.f32 %v20830_v26, 0.0  ;;  %v20835_v46 = vmax.f32 %v20834_v18, 0.0  ;;  %v20837_v0 = vld [vmem:[#allocation38_spill] sm:$0xff] }
 0x416   :  { %7455 = vst.msk [vmem:[%s18979_s4 + $0x590] sm:$0xff] %vm7276_vm2, %v7038_v63  ;;  %7456 = vst.msk [vmem:[%s18979_s4 + $0x598] sm:$0xff] %vm7276_vm2, %v7039_v3  ;;  %v20838_v53 = vmax.f32 %v20837_v0, 0.0  ;;  %v20839_v63 = vld [vmem:[#allocation33_spill] sm:$0xff]  ;;  %v20841_v3 = vld [vmem:[#allocation31_spill] sm:$0xff] }
 0x417   :  { %v20840_v49 = vmax.f32 %v20839_v63, 0.0  ;;  %v20861_v21 = vld [vmem:[#allocation39_spill] sm:$0xff]  ;;  %v20863_v26 = vld [vmem:[#allocation5_spill] sm:$0xff]  ;;  %v20873_v63 = vld [vmem:[#allocation50_spill] sm:$0xff] }
 0x41a   :  { %v6741_v47 = vpop.permute.xlu0 %6740 }
 0x41b   :  { %v7244_v61 = vsel %vm5091_vm1, %v20811_v30, %v6741_v47  ;;  %v7245_v50 = vsel %vm5091_vm1, %v20813_v44, %v6741_v47  ;;  %v7246_v12 = vsel %vm5091_vm1, %v20815_v52, %v6741_v47  ;;  %v7247_v59 = vsel %vm5091_vm1, %v20817_v7, %v6741_v47  ;;  %v20843_v30 = vld [vmem:[#allocation35_spill] sm:$0xff]  ;;  %v20845_v44 = vld [vmem:[#allocation32_spill] sm:$0xff] }
 0x41c   :  { %7661 = vst.msk [vmem:[%s18979_s4 + $0xc00] sm:$0xff] %vm7276_vm2, %v7244_v61  ;;  %7662 = vst.msk [vmem:[%s18979_s4 + $0xc08] sm:$0xff] %vm7276_vm2, %v7245_v50  ;;  %v20842_v47 = vmax.f32 %v20841_v3, 0.0  ;;  %v20844_v61 = vmax.f32 %v20843_v30, 0.0  ;;  %v20846_v50 = vmax.f32 %v20845_v44, 0.0  ;;  %v20875_v3 = vld [vmem:[#allocation45_spill] sm:$0xff] }
 0x41d   :  { %7663 = vst.msk [vmem:[%s18979_s4 + $0xc10] sm:$0xff] %vm7276_vm2, %v7246_v12  ;;  %7664 = vst.msk [vmem:[%s18979_s4 + $0xc18] sm:$0xff] %vm7276_vm2, %v7247_v59  ;;  %v20847_v12 = vld [vmem:[#allocation36_spill] sm:$0xff]  ;;  %v20849_v59 = vld [vmem:[#allocation41_spill] sm:$0xff] }
 0x41e   :  { %v20848_v58 = vmax.f32 %v20847_v12, 0.0  ;;  %v20881_v12 = vld [vmem:[#allocation60_spill] sm:$0xff] }
 0x424   :  { %v6639_v9 = vpop.permute.xlu1 %6638 }
 0x425   :  { %v7040_v51 = vsel %vm5091_vm1, %v20818_v60, %v6639_v9  ;;  %v7041_v23 = vsel %vm5091_vm1, %v20819_v2, %v6639_v9  ;;  %v7042_v6 = vsel %vm5091_vm1, %v20821_v16, %v6639_v9  ;;  %v7043_v15 = vsel %vm5091_vm1, %v20823_v41, %v6639_v9 }
 0x426   :  { %7457 = vst.msk [vmem:[%s18979_s4 + $0x5a0] sm:$0xff] %vm7276_vm2, %v7040_v51  ;;  %7458 = vst.msk [vmem:[%s18979_s4 + $0x5a8] sm:$0xff] %vm7276_vm2, %v7041_v23  ;;  %v20850_v9 = vmax.f32 %v20849_v59, 0.0  ;;  %v20851_v51 = vmax.f32 %v17333_v17, 0.0  ;;  %v20852_v23 = vmax.f32 %v17316_v34, 0.0  ;;  %v20853_v34 = vld [vmem:[#allocation40_spill] sm:$0xff] }
 0x427   :  { %7459 = vst.msk [vmem:[%s18979_s4 + $0x5b0] sm:$0xff] %vm7276_vm2, %v7042_v6  ;;  %7460 = vst.msk [vmem:[%s18979_s4 + $0x5b8] sm:$0xff] %vm7276_vm2, %v7043_v15  ;;  %v20854_v16 = vmax.f32 %v20853_v34, 0.0  ;;  %v20856_v41 = vmax.f32 %v20855_v31, 0.0  ;;  %v20883_v59 = vld [vmem:[#allocation61_spill] sm:$0xff] }
 0x42b   :  { %v6743_v37 = vpop.permute.xlu1 %6742 }
 0x42c   :  { %v7248_v54 = vsel %vm5091_vm1, %v20825_v42, %v6743_v37  ;;  %v7249_v55 = vsel %vm5091_vm1, %v20827_v20, %v6743_v37  ;;  %v7250_v35 = vsel %vm5091_vm1, %v20829_v39, %v6743_v37  ;;  %v7251_v5 = vsel %vm5091_vm1, %v20831_v43, %v6743_v37  ;;  %v20857_v37 = vld [vmem:[#allocation44_spill] sm:$0xff] }
 0x42d   :  { %7665 = vst.msk [vmem:[%s18979_s4 + $0xc20] sm:$0xff] %vm7276_vm2, %v7248_v54  ;;  %7666 = vst.msk [vmem:[%s18979_s4 + $0xc28] sm:$0xff] %vm7276_vm2, %v7249_v55  ;;  %v20858_v45 = vmax.f32 %v20857_v37, 0.0  ;;  %v20859_v54 = vld [vmem:[#allocation49_spill] sm:$0xff]  ;;  %v20862_v39 = vmax.f32 %v20861_v21, 0.0  ;;  %v20864_v43 = vmax.f32 %v20863_v26, 0.0 }
 0x42e   :  { %7667 = vst.msk [vmem:[%s18979_s4 + $0xc30] sm:$0xff] %vm7276_vm2, %v7250_v35  ;;  %7668 = vst.msk [vmem:[%s18979_s4 + $0xc38] sm:$0xff] %vm7276_vm2, %v7251_v5  ;;  %v20860_v13 = vmax.f32 %v20859_v54, 0.0  ;;  %v20893_v54 = vld [vmem:[#allocation48_spill] sm:$0xff] }
 0x435   :  { %v6641_v14 = vpop.permute.xlu0 %6640 }
 0x436   :  { %v7044_v40 = vsel %vm5091_vm1, %v20833_v4, %v6641_v14  ;;  %v7045_v57 = vsel %vm5091_vm1, %v20835_v46, %v6641_v14  ;;  %v7046_v27 = vsel %vm5091_vm1, %v20836_v56, %v6641_v14  ;;  %v7047_v38 = vsel %vm5091_vm1, %v20838_v53, %v6641_v14  ;;  %v20865_v14 = vld [vmem:[#allocation47_spill] sm:$0xff]  ;;  %v20869_v56 = vld [vmem:[#allocation42_spill] sm:$0xff] }
 0x437   :  { %7461 = vst.msk [vmem:[%s18979_s4 + $0x5c0] sm:$0xff] %vm7276_vm2, %v7044_v40  ;;  %7462 = vst.msk [vmem:[%s18979_s4 + $0x5c8] sm:$0xff] %vm7276_vm2, %v7045_v57  ;;  %v20866_v8 = vmax.f32 %v20865_v14, 0.0  ;;  %v20867_v40 = vld [vmem:[#allocation46_spill] sm:$0xff]  ;;  %v20871_v53 = vld [vmem:[#allocation43_spill] sm:$0xff] }
 0x438   :  { %7463 = vst.msk [vmem:[%s18979_s4 + $0x5d0] sm:$0xff] %vm7276_vm2, %v7046_v27  ;;  %7464 = vst.msk [vmem:[%s18979_s4 + $0x5d8] sm:$0xff] %vm7276_vm2, %v7047_v38  ;;  %v20868_v18 = vmax.f32 %v20867_v40, 0.0  ;;  %v20870_v27 = vmax.f32 %v20869_v56, 0.0  ;;  %v20872_v38 = vmax.f32 %v20871_v53, 0.0  ;;  %v20901_v40 = vld [vmem:[#allocation51_spill] sm:$0xff] }
 0x43c   :  { %v6745_v32 = vpop.permute.xlu0 %6744 }
 0x43d   :  { %v7252_v19 = vsel %vm5091_vm1, %v20840_v49, %v6745_v32  ;;  %v7253_v10 = vsel %vm5091_vm1, %v20842_v47, %v6745_v32  ;;  %v7254_v36 = vsel %vm5091_vm1, %v20844_v61, %v6745_v32  ;;  %v7255_v11 = vsel %vm5091_vm1, %v20846_v50, %v6745_v32  ;;  %v20877_v61 = vld [vmem:[#allocation53_spill] sm:$0xff]  ;;  %v20879_v50 = vld [vmem:[#allocation52_spill] sm:$0xff] }
 0x43e   :  { %7669 = vst.msk [vmem:[%s18979_s4 + $0xc40] sm:$0xff] %vm7276_vm2, %v7252_v19  ;;  %7670 = vst.msk [vmem:[%s18979_s4 + $0xc48] sm:$0xff] %vm7276_vm2, %v7253_v10  ;;  %v20874_v49 = vmax.f32 %v20873_v63, 0.0  ;;  %v20876_v47 = vmax.f32 %v20875_v3, 0.0  ;;  %v20909_v3 = vmax.f32 %v17803_v48, 0.0 }
 0x43f   :  { %7671 = vst.msk [vmem:[%s18979_s4 + $0xc50] sm:$0xff] %vm7276_vm2, %v7254_v36  ;;  %7672 = vst.msk [vmem:[%s18979_s4 + $0xc58] sm:$0xff] %vm7276_vm2, %v7255_v11  ;;  %v20878_v36 = vmax.f32 %v20877_v61, 0.0  ;;  %v20880_v11 = vmax.f32 %v20879_v50, 0.0 }
 0x446   :  { %v6643_v52 = vpop.permute.xlu1 %6642 }
 0x447   :  { %v7048_v7 = vsel %vm5091_vm1, %v20848_v58, %v6643_v52  ;;  %v7049_v60 = vsel %vm5091_vm1, %v20850_v9, %v6643_v52  ;;  %v7050_v2 = vsel %vm5091_vm1, %v20851_v51, %v6643_v52  ;;  %v7051_v28 = vsel %vm5091_vm1, %v20852_v23, %v6643_v52 }
 0x448   :  { %7465 = vst.msk [vmem:[%s18979_s4 + $0x5e0] sm:$0xff] %vm7276_vm2, %v7048_v7  ;;  %7466 = vst.msk [vmem:[%s18979_s4 + $0x5e8] sm:$0xff] %vm7276_vm2, %v7049_v60  ;;  %v20882_v58 = vmax.f32 %v20881_v12, 0.0  ;;  %v20884_v9 = vmax.f32 %v20883_v59, 0.0  ;;  %v20916_v12 = vmax.f32 %v17820_v22, 0.0 }
 0x449   :  { %7467 = vst.msk [vmem:[%s18979_s4 + $0x5f0] sm:$0xff] %vm7276_vm2, %v7050_v2  ;;  %7468 = vst.msk [vmem:[%s18979_s4 + $0x5f8] sm:$0xff] %vm7276_vm2, %v7051_v28  ;;  %v20885_v2 = vld [vmem:[#allocation62_spill] sm:$0xff] }
 0x44a   :  { %v20886_v23 = vmax.f32 %v20885_v2, 0.0 }
 0x44f   :  { %v6747_v17 = vpop.permute.xlu1 %6746 }
 0x450   :  { %v7256_v6 = vsel %vm5091_vm1, %v20854_v16, %v6747_v17  ;;  %v7257_v15 = vsel %vm5091_vm1, %v20856_v41, %v6747_v17  ;;  %v7258_v42 = vsel %vm5091_vm1, %v20858_v45, %v6747_v17  ;;  %v7259_v20 = vsel %vm5091_vm1, %v20860_v13, %v6747_v17  ;;  %v20887_v17 = vld [vmem:[#allocation55_spill] sm:$0xff] }
 0x451   :  { %7673 = vst.msk [vmem:[%s18979_s4 + $0xc60] sm:$0xff] %vm7276_vm2, %v7256_v6  ;;  %7674 = vst.msk [vmem:[%s18979_s4 + $0xc68] sm:$0xff] %vm7276_vm2, %v7257_v15  ;;  %v20888_v34 = vmax.f32 %v20887_v17, 0.0  ;;  %v20889_v6 = vld [vmem:[#allocation66_spill] sm:$0xff]  ;;  %v20891_v15 = vld [vmem:[#allocation64_spill] sm:$0xff]  ;;  %v20894_v13 = vmax.f32 %v20893_v54, 0.0 }
 0x452   :  { %7675 = vst.msk [vmem:[%s18979_s4 + $0xc70] sm:$0xff] %vm7276_vm2, %v7258_v42  ;;  %7676 = vst.msk [vmem:[%s18979_s4 + $0xc78] sm:$0xff] %vm7276_vm2, %v7259_v20  ;;  %v20890_v31 = vmax.f32 %v20889_v6, 0.0  ;;  %v20892_v37 = vmax.f32 %v20891_v15, 0.0 }
 0x45a   :  { %v6645_v55 = vpop.permute.xlu0 %6644 }
 0x45b   :  { %v7052_v35 = vsel %vm5091_vm1, %v20862_v39, %v6645_v55  ;;  %v7053_v5 = vsel %vm5091_vm1, %v20864_v43, %v6645_v55  ;;  %v7054_v4 = vsel %vm5091_vm1, %v20866_v8, %v6645_v55  ;;  %v7055_v46 = vsel %vm5091_vm1, %v20868_v18, %v6645_v55  ;;  %v20895_v55 = vld [vmem:[#allocation54_spill] sm:$0xff] }
 0x45c   :  { %7469 = vst.msk [vmem:[%s18979_s4 + $0x600] sm:$0xff] %vm7276_vm2, %v7052_v35  ;;  %7470 = vst.msk [vmem:[%s18979_s4 + $0x608] sm:$0xff] %vm7276_vm2, %v7053_v5  ;;  %v20896_v21 = vmax.f32 %v20895_v55, 0.0  ;;  %v20897_v35 = vld [vmem:[#allocation56_spill] sm:$0xff]  ;;  %v20899_v5 = vld [vmem:[#allocation57_spill] sm:$0xff]  ;;  %v20902_v18 = vmax.f32 %v20901_v40, 0.0 }
 0x45d   :  { %7471 = vst.msk [vmem:[%s18979_s4 + $0x610] sm:$0xff] %vm7276_vm2, %v7054_v4  ;;  %7472 = vst.msk [vmem:[%s18979_s4 + $0x618] sm:$0xff] %vm7276_vm2, %v7055_v46  ;;  %v20898_v26 = vmax.f32 %v20897_v35, 0.0  ;;  %v20900_v14 = vmax.f32 %v20899_v5, 0.0 }
 0x45e   :  { %v6749_v57 = vpop.permute.xlu0 %6748 }
 0x45f   :  { %v7260_v0 = vsel %vm5091_vm1, %v20870_v27, %v6749_v57  ;;  %v7261_v32 = vsel %vm5091_vm1, %v20872_v38, %v6749_v57  ;;  %v7262_v19 = vsel %vm5091_vm1, %v20874_v49, %v6749_v57  ;;  %v7263_v10 = vsel %vm5091_vm1, %v20876_v47, %v6749_v57  ;;  %v20903_v57 = vld [vmem:[#allocation65_spill] sm:$0xff] }
 0x460   :  { %7677 = vst.msk [vmem:[%s18979_s4 + $0xc80] sm:$0xff] %vm7276_vm2, %v7260_v0  ;;  %7678 = vst.msk [vmem:[%s18979_s4 + $0xc88] sm:$0xff] %vm7276_vm2, %v7261_v32  ;;  %v20904_v56 = vmax.f32 %v20903_v57, 0.0  ;;  %v20905_v0 = vld [vmem:[#allocation70_spill] sm:$0xff] }
 0x461   :  { %7679 = vst.msk [vmem:[%s18979_s4 + $0xc90] sm:$0xff] %vm7276_vm2, %v7262_v19  ;;  %7680 = vst.msk [vmem:[%s18979_s4 + $0xc98] sm:$0xff] %vm7276_vm2, %v7263_v10  ;;  %v20906_v53 = vmax.f32 %v20905_v0, 0.0  ;;  %v20907_v32 = vld [vmem:[#allocation58_spill] sm:$0xff]  ;;  %v20910_v10 = vld [vmem:[#allocation59_spill] sm:$0xff] }
 0x462   :  { %v20908_v63 = vmax.f32 %v20907_v32, 0.0 }
 0x463   :  { %v6647_v30 = vpop.permute.xlu1 %6646 }
 0x464   :  { %v7056_v44 = vsel %vm5091_vm1, %v20878_v36, %v6647_v30  ;;  %v7057_v52 = vsel %vm5091_vm1, %v20880_v11, %v6647_v30  ;;  %v7058_v7 = vsel %vm5091_vm1, %v20882_v58, %v6647_v30  ;;  %v7059_v60 = vsel %vm5091_vm1, %v20884_v9, %v6647_v30  ;;  %v6649_v51 = vpop.permute.xlu0 %6648 }
 0x465   :  { %7473 = vst.msk [vmem:[%s18979_s4 + $0x620] sm:$0xff] %vm7276_vm2, %v7056_v44  ;;  %7474 = vst.msk [vmem:[%s18979_s4 + $0x628] sm:$0xff] %vm7276_vm2, %v7057_v52  ;;  %v7060_v28 = vsel %vm5091_vm1, %v20886_v23, %v6649_v51  ;;  %v7061_v16 = vsel %vm5091_vm1, %v20888_v34, %v6649_v51  ;;  %v7062_v41 = vsel %vm5091_vm1, %v20890_v31, %v6649_v51  ;;  %v20911_v30 = vmax.f32 %v20910_v10, 0.0 }
 0x466   :  { %7475 = vst.msk [vmem:[%s18979_s4 + $0x630] sm:$0xff] %vm7276_vm2, %v7058_v7  ;;  %7476 = vst.msk [vmem:[%s18979_s4 + $0x638] sm:$0xff] %vm7276_vm2, %v7059_v60  ;;  %v7063_v45 = vsel %vm5091_vm1, %v20892_v37, %v6649_v51 }
 0x467   :  { %7477 = vst.msk [vmem:[%s18979_s4 + $0x640] sm:$0xff] %vm7276_vm2, %v7060_v28  ;;  %7478 = vst.msk [vmem:[%s18979_s4 + $0x648] sm:$0xff] %vm7276_vm2, %v7061_v16  ;;  %v6751_v42 = vpop.permute.xlu1 %6750 }
 0x468   :  { %7479 = vst.msk [vmem:[%s18979_s4 + $0x650] sm:$0xff] %vm7276_vm2, %v7062_v41  ;;  %7480 = vst.msk [vmem:[%s18979_s4 + $0x658] sm:$0xff] %vm7276_vm2, %v7063_v45  ;;  %v7264_v20 = vsel %vm5091_vm1, %v20894_v13, %v6751_v42  ;;  %v7265_v39 = vsel %vm5091_vm1, %v20896_v21, %v6751_v42  ;;  %v7266_v43 = vsel %vm5091_vm1, %v20898_v26, %v6751_v42 }
 0x469   :  { %v7267_v8 = vsel %vm5091_vm1, %v20900_v14, %v6751_v42  ;;  %v6753_v4 = vpop.permute.xlu0 %6752  ;;  %7681 = vst.msk [vmem:[%s18979_s4 + $0xca0] sm:$0xff] %vm7276_vm2, %v7264_v20  ;;  %7682 = vst.msk [vmem:[%s18979_s4 + $0xca8] sm:$0xff] %vm7276_vm2, %v7265_v39 }
 0x46a   :  { %7683 = vst.msk [vmem:[%s18979_s4 + $0xcb0] sm:$0xff] %vm7276_vm2, %v7266_v43  ;;  %7684 = vst.msk [vmem:[%s18979_s4 + $0xcb8] sm:$0xff] %vm7276_vm2, %v7267_v8  ;;  %v7268_v46 = vsel %vm5091_vm1, %v20902_v18, %v6753_v4  ;;  %v7269_v27 = vsel %vm5091_vm1, %v20904_v56, %v6753_v4  ;;  %v7270_v38 = vsel %vm5091_vm1, %v20906_v53, %v6753_v4 }
 0x46b   :  { %v7271_v49 = vsel %vm5091_vm1, %v20908_v63, %v6753_v4  ;;  %7685 = vst.msk [vmem:[%s18979_s4 + $0xcc0] sm:$0xff] %vm7276_vm2, %v7268_v46  ;;  %7686 = vst.msk [vmem:[%s18979_s4 + $0xcc8] sm:$0xff] %vm7276_vm2, %v7269_v27 }
 0x46c   :  { %7687 = vst.msk [vmem:[%s18979_s4 + $0xcd0] sm:$0xff] %vm7276_vm2, %v7270_v38  ;;  %7688 = vst.msk [vmem:[%s18979_s4 + $0xcd8] sm:$0xff] %vm7276_vm2, %v7271_v49  ;;  %v6651_v19 = vpop.permute.xlu1 %6650 }
 0x46d   :  { %v7064_v47 = vsel %vm5091_vm1, %v20909_v3, %v6651_v19  ;;  %v7065_v61 = vsel %vm5091_vm1, %v20911_v30, %v6651_v19  ;;  %v7066_v36 = vsel %vm5091_vm1, %v4881_v24, %v6651_v19  ;;  %v7067_v44 = vsel %vm5091_vm1, %v4882_v62, %v6651_v19  ;;  %v20914_v24 = vld [vmem:[#allocation63_spill] sm:$0xff] }
 0x46e   :  { %7481 = vst.msk [vmem:[%s18979_s4 + $0x660] sm:$0xff] %vm7276_vm2, %v7064_v47  ;;  %7482 = vst.msk [vmem:[%s18979_s4 + $0x668] sm:$0xff] %vm7276_vm2, %v7065_v61  ;;  %v20915_v50 = vmax.f32 %v20914_v24, 0.0 }
 0x46f   :  { %7483 = vst.msk [vmem:[%s18979_s4 + $0x670] sm:$0xff] %vm7276_vm2, %v7066_v36  ;;  %7484 = vst.msk [vmem:[%s18979_s4 + $0x678] sm:$0xff] %vm7276_vm2, %v7067_v44 }
 0x470   :  { %v6755_v48 = vpop.permute.xlu1 %6754 }
 0x471   :  { %v7272_v62 = vsel %vm5091_vm1, %v20913_v29, %v6755_v48  ;;  %v7273_v11 = vsel %vm5091_vm1, %v20915_v50, %v6755_v48  ;;  %v7274_v52 = vsel %vm5091_vm1, %v5089_v33, %v6755_v48  ;;  %v7275_v58 = vsel %vm5091_vm1, %v20916_v12, %v6755_v48 }
 0x472   :  { %7689 = vst.msk [vmem:[%s18979_s4 + $0xce0] sm:$0xff] %vm7276_vm2, %v7272_v62  ;;  %7690 = vst.msk [vmem:[%s18979_s4 + $0xce8] sm:$0xff] %vm7276_vm2, %v7273_v11 }
 0x473   :  { %7691 = vst.msk [vmem:[%s18979_s4 + $0xcf0] sm:$0xff] %vm7276_vm2, %v7274_v52  ;;  %7692 = vst.msk [vmem:[%s18979_s4 + $0xcf8] sm:$0xff] %vm7276_vm2, %v7275_v58 }

</bundles_post_ra>
